<compile_context>
chip_gen: v5e
topology: v5e:2x2
jax: 0.10.0
libtpu: 0.0.40
codegen_flags: <defaults>
</compile_context>

<pallas_src>
import numpy as np
import jax
import jax.numpy as jnp
from jax.experimental import pallas as pl
from jax.experimental.pallas import tpu as pltpu


# ----------------------------------------------------------------------------
# Fused Pallas kernel (one graph-group per grid step):
#   NNConv -> ReLU -> GAT1 -> ReLU -> GAT2 -> ReLU -> wire/action heads
# ----------------------------------------------------------------------------
def fused_twohead_gat_kernel(
    # per-group graph tensors
    x_ref, ea_ref, gsrc_ref, sdst_ref, invc_ref, neg_ref, pool_ref,
    # NNConv / edge-encoder params + host constants
    ee_w1_ref, ee_b1_ref, ee_w2_ref, ee_b2_ref, rep_ref, sum_ref,
    nn_root_ref, nn_bias_ref,
    # GAT layer 1 params (head-stacked)
    g1_w_ref, g1_as_ref, g1_ad_ref, g1_b_ref,
    # GAT layer 2 params (head-stacked)
    g2_w_ref, g2_as_ref, g2_ad_ref, g2_b_ref,
    # heads (lane-padded weights)
    ww_ref, wb_ref, aw_ref, ab_ref,
    # outputs (lane-dense bf16 slabs)
    wire_ref, act_ref):
    f32 = jnp.float32
    bf16 = jnp.bfloat16

    x = x_ref[...]                                    # (n, D)  bf16
    # Additive attention mask (0 on edges/self-loops, -1e30 elsewhere), hoisted once and
    # shared by both GAT layers (bf16 in HBM/VMEM, upcast here).
    neg3 = neg_ref[...].astype(f32)[None]             # (1, n, n)

    # ---- NNConv(in, in, edge_encoder, aggr='mean') + ReLU -------------------
    # Reassociated contraction: every E-/n-sized matmul keeps a 64-lane (D*D) output.
    ea = ea_ref[...]                                  # (E, Fe) bf16
    h1 = jnp.maximum(
        jnp.dot(ea, ee_w1_ref[...], preferred_element_type=f32) + ee_b1_ref[...], 0.0)
    wflat = (jnp.dot(h1.astype(bf16), ee_w2_ref[...], preferred_element_type=f32)
             + ee_b2_ref[...])                        # (E, D*D): row e = W_e flat (d, f)
    x_rep = jnp.dot(x, rep_ref[...], preferred_element_type=f32)          # (n, D*D), exact replicate
    x_src_exp = jnp.dot(gsrc_ref[...], x_rep.astype(bf16),
                        preferred_element_type=f32)                       # (E, D*D) gather
    scat = jnp.dot(sdst_ref[...], (x_src_exp * wflat).astype(bf16),
                   preferred_element_type=f32)                            # (n, D*D) scatter-sum
    agg = jnp.dot(scat, sum_ref[...], preferred_element_type=f32) * invc_ref[...]   # (n, D) mean
    x0 = jnp.maximum(
        agg + jnp.dot(x, nn_root_ref[...], preferred_element_type=f32) + nn_bias_ref[...],
        0.0)

    # ---- packed multi-head GATConv (concat=False, eval mode) + ReLU ---------
    def gat(x_in, w3, a_s3, a_d3, b):
        H, d_in, C = w3.shape
        n = x_in.shape[0]
        inv_h = 1.0 / H
        xb = jnp.broadcast_to(x_in.astype(bf16)[None], (H, n, d_in))
        h = jnp.einsum('hnd,hdc->hnc', xb, w3,
                       preferred_element_type=f32)                        # (H, n, C)
        hb = h.astype(bf16)
        s_d = jnp.einsum('hnc,hkc->hnk', h, a_d3,
                         preferred_element_type=f32)                      # (H, n, 1)
        s_s = jnp.einsum('hkc,hnc->hkn', a_s3, h,
                         preferred_element_type=f32)                      # (H, 1, n)
        score = s_d + s_s                                                 # a_d.h_i + a_s.h_j
        score = jnp.maximum(score, 0.2 * score) + neg3                    # LeakyReLU(0.2) + mask
        m = jnp.max(score, axis=2, keepdims=True)
        p = jnp.exp(score - m)                                            # masked entries -> 0
        # fold the 1/H head-mean into the (approx) softmax reciprocal
        alpha = p * (pl.reciprocal(jnp.sum(p, axis=2, keepdims=True), approx=True) * inv_h)
        out = jnp.sum(jnp.einsum('hij,hjc->hic', alpha.astype(bf16), hb,
                                 preferred_element_type=f32), axis=0)     # (n, C)
        return jnp.maximum(out + b, 0.0)

    x1 = gat(x0, g1_w_ref[...], g1_as_ref[...], g1_ad_ref[...], g1_b_ref[...])
    x2 = gat(x1, g2_w_ref[...], g2_as_ref[...], g2_ad_ref[...], g2_b_ref[...])

    # ---- wire head (per node) + global mean pool + action head --------------
    x2b = x2.astype(bf16)
    wire_ref[...] = (jnp.dot(x2b, ww_ref[...], preferred_element_type=f32)
                     + wb_ref[...]).astype(bf16)                          # (n, 128) lane-dense slab
    pooled = jnp.dot(pool_ref[...], x2b, preferred_element_type=f32)      # (Bg, C)
    act_ref[...] = (jnp.dot(pooled.astype(bf16), aw_ref[...], preferred_element_type=f32)
                    + ab_ref[...]).astype(bf16)                           # (Bg, 128) lane-dense slab


# ----------------------------------------------------------------------------
# Wrapper: host-side layout prep + gridded pallas_call (one program per graph group)
# ----------------------------------------------------------------------------
def two_head_gat_forward(params, x, edge_attr, gsrc_g, sdst_g, inv_cnt, neg_bias, pool_g,
                         *, heads, hidden_dim, num_actions, n_groups):
    f32, bf16 = jnp.float32, jnp.bfloat16
    N, D = x.shape
    E, Fe = edge_attr.shape
    npg, epg = N // n_groups, E // n_groups          # nodes / edges per group
    B = pool_g.shape[0]
    bpg = B // n_groups                              # graphs per group
    PAD = 128

    # Host constants for the reassociated NNConv contraction (lane-aligned).
    rep_mat = jnp.asarray(np.kron(np.eye(D, dtype=np.float32),
                                  np.ones((1, D), np.float32))).astype(bf16)   # (D, D*D)
    sum_mat = jnp.asarray(np.kron(np.ones((D, 1), np.float32),
                                  np.eye(D, dtype=np.float32)))                # (D*D, D)

    def stack_heads(w, d_in):   # (d_in, H*C) -> (H, d_in, C), bf16 MXU operand
        return jnp.transpose(w.reshape(d_in, heads, hidden_dim), (1, 0, 2)).astype(bf16)

    g1_w3 = stack_heads(params["g1_w"], D)
    g2_w3 = stack_heads(params["g2_w"], hidden_dim)
    g1_as3 = params["g1_as"][:, None, :]     # (H, 1, C) f32
    g1_ad3 = params["g1_ad"][:, None, :]
    g2_as3 = params["g2_as"][:, None, :]
    g2_ad3 = params["g2_ad"][:, None, :]

    # Lane-dense (128-wide) head weights: unmasked stores, sliced back after the kernel.
    ww_pad = jnp.zeros((hidden_dim, PAD), f32).at[:, :1].set(params["wire_w"]).astype(bf16)
    wb_pad = jnp.zeros((1, PAD), f32).at[:, :1].set(params["wire_b"])
    aw_pad = jnp.zeros((hidden_dim, PAD), f32).at[:, :num_actions].set(params["act_w"]).astype(bf16)
    ab_pad = jnp.zeros((1, PAD), f32).at[:, :num_actions].set(params["act_b"])

    grouped = (                                       # (array, per-group block shape)
        (x.astype(bf16),         (npg, D)),
        (edge_attr.astype(bf16), (epg, Fe)),
        (gsrc_g.astype(bf16),    (epg, npg)),
        (sdst_g.astype(bf16),    (npg, epg)),
        (inv_cnt.astype(f32),    (npg, 1)),
        (neg_bias.astype(bf16),  (npg, npg)),
        (pool_g.astype(bf16),    (bpg, npg)),
    )
    replicated = (
        params["ee_w1"].astype(bf16), params["ee_b1"],
        params["ee_w2"].astype(bf16), params["ee_b2"],
        rep_mat, sum_mat,
        params["nn_root"].astype(bf16), params["nn_bias"],
        g1_w3, g1_as3, g1_ad3, params["g1_b"],
        g2_w3, g2_as3, g2_ad3, params["g2_b"],
        ww_pad, wb_pad, aw_pad, ab_pad,
    )

    def blk(shape):             # per-group blocks, indexed along the leading (group) axis
        nd = len(shape)
        return pl.BlockSpec(shape, lambda g, _n=nd: (g,) + (0,) * (_n - 1))

    def rep_spec(arr):          # replicated params: full-shape block, constant index
        nd = arr.ndim
        return pl.BlockSpec(arr.shape, lambda g, _n=nd: (0,) * _n)

    inputs = tuple(a for a, _ in grouped) + replicated
    in_specs = [blk(s) for _, s in grouped] + [rep_spec(a) for a in replicated]

    wire_pad, act_pad = pl.pallas_call(
        fused_twohead_gat_kernel,
        grid=(n_groups,),
        out_shape=(jax.ShapeDtypeStruct((N, PAD), bf16),
                   jax.ShapeDtypeStruct((B, PAD), bf16)),
        in_specs=in_specs,
        out_specs=(blk((npg, PAD)), blk((bpg, PAD))),
        compiler_params=pltpu.CompilerParams(dimension_semantics=("parallel",)),
    )(*inputs)

    return (wire_pad[:, :1].astype(f32), act_pad[:, :num_actions].astype(f32))


# ----------------------------------------------------------------------------
# Pure-JAX reference (global dense formulation, f32 highest precision)
# ----------------------------------------------------------------------------
def reference_forward(params, x, edge_attr, g_src, s_dst, inv_cnt, adj, pool,
                      *, heads, hidden_dim, in_dim):
    with jax.default_matmul_precision("highest"):
        h1 = jax.nn.relu(edge_attr @ params["ee_w1"] + params["ee_b1"])
        wflat = h1 @ params["ee_w2"] + params["ee_b2"]
        w_e = wflat.reshape(-1, in_dim, in_dim)
        x_src = g_src @ x
        msg = jnp.einsum("ed,edf->ef", x_src, w_e)
        agg = (s_dst @ msg) * inv_cnt
        x0 = jax.nn.relu(agg + x @ params["nn_root"] + params["nn_bias"])

        def gat(xin, w, a_s, a_d, b):
            N = xin.shape[0]
            h = (xin @ w).reshape(N, heads, hidden_dim)
            s_src = (h * a_s[None]).sum(-1)          # (N, H)
            s_dst_ = (h * a_d[None]).sum(-1)         # (N, H)
            score = s_dst_[:, None, :] + s_src[None, :, :]   # (i, j, H)
            score = jnp.where(score > 0, score, 0.2 * score)
            score = jnp.where(adj[:, :, None] > 0, score, -1e30)
            score = score - score.max(axis=1, keepdims=True)
            p = jnp.exp(score) * adj[:, :, None]
            alpha = p / p.sum(axis=1, keepdims=True)
            out = jnp.einsum("ijh,jhc->ihc", alpha, h)
            return jax.nn.relu(out.mean(axis=1) + b)

        x1 = gat(x0, params["g1_w"], params["g1_as"], params["g1_ad"], params["g1_b"])
        x2 = gat(x1, params["g2_w"], params["g2_as"], params["g2_ad"], params["g2_b"])
        wire_all = x2 @ params["wire_w"] + params["wire_b"]
        p_action = (pool @ x2) @ params["act_w"] + params["act_b"]
    return wire_all, p_action


# ----------------------------------------------------------------------------
# Deterministic parameter init (shapes follow TwoHeadGATSmall.__init__)
# ----------------------------------------------------------------------------
def init_params(key, in_dim, edge_feat_dim, hidden_dim, num_actions, heads):
    ks = jax.random.split(key, 16)
    n = lambda k, s: 0.1 * jax.random.normal(k, s, jnp.float32)
    return {
        "ee_w1": n(ks[0], (edge_feat_dim, 32)), "ee_b1": n(ks[1], (1, 32)),
        "ee_w2": n(ks[2], (32, in_dim * in_dim)), "ee_b2": n(ks[3], (1, in_dim * in_dim)),
        "nn_root": n(ks[4], (in_dim, in_dim)), "nn_bias": n(ks[5], (1, in_dim)),
        "g1_w": n(ks[6], (in_dim, heads * hidden_dim)),
        "g1_as": n(ks[7], (heads, hidden_dim)), "g1_ad": n(ks[8], (heads, hidden_dim)),
        "g1_b": n(ks[9], (1, hidden_dim)),
        "g2_w": n(ks[10], (hidden_dim, heads * hidden_dim)),
        "g2_as": n(ks[11], (heads, hidden_dim)), "g2_ad": n(ks[12], (heads, hidden_dim)),
        "g2_b": n(ks[13], (1, hidden_dim)),
        "wire_w": n(ks[14], (hidden_dim, 1)), "wire_b": jnp.zeros((1, 1), jnp.float32),
        "act_w": n(ks[15], (hidden_dim, num_actions)),
        "act_b": jnp.zeros((1, num_actions), jnp.float32),
    }


# ----------------------------------------------------------------------------
if __name__ == "__main__":
    in_dim, edge_feat_dim, hidden_dim, num_actions, heads = 8, 4, 32, 5, 4
    n_per_graph = 16
    graphs_per_group = 8            # 8 graphs x 16 nodes = 128 nodes per group (lane-aligned)
    n_groups = 2                    # grid=(2,), "parallel" -> both TCs on v7x
    n_graphs = graphs_per_group * n_groups
    npg = n_per_graph * graphs_per_group            # 128 nodes / group
    N = npg * n_groups                              # 256 nodes total

    # Deterministic graph: bidirectional ring within each graph (edges never cross graphs).
    src, dst = [], []
    for gph in range(n_graphs):
        for i in range(n_per_graph):
            a = gph * n_per_graph + i
            b = gph * n_per_graph + (i + 1) % n_per_graph
            src += [a, b]
            dst += [b, a]
    src = np.asarray(src, np.int32)
    dst = np.asarray(dst, np.int32)
    E = src.shape[0]
    epg = E // n_groups
    batch = np.repeat(np.arange(n_graphs), n_per_graph).astype(np.int32)
    wire_mask = (np.arange(N) % 3 == 0)

    # Global dense operators (for the reference).
    eyeN = np.eye(N, dtype=np.float32)
    gsrc_glob = eyeN[src]                 # (E, N) gather
    sdst_glob = eyeN[dst].T               # (N, E) scatter
    indeg = sdst_glob.sum(axis=1)
    inv_cnt = (1.0 / np.maximum(indeg, 1.0)).reshape(N, 1).astype(np.float32)
    adj = np.zeros((N, N), np.float32)
    adj[dst, src] = 1.0
    adj += np.eye(N, dtype=np.float32)    # GAT self loops
    # Guard: every row must have >=1 unmasked entry (self loops) for the additive-mask softmax.
    assert np.all(adj.sum(axis=1) > 0)
    pool_glob = np.zeros((n_graphs, N), np.float32)
    for b in range(n_graphs):
        idx = batch == b
        pool_glob[b, idx] = 1.0 / idx.sum()

    # Per-group (block-diagonal) operators for the gridded kernel.
    assert np.all((src // npg) == (dst // npg)), "edges must not cross graph groups"

    def take_blocks(a, rpb, cpb):
        return np.concatenate(
            [a[g * rpb:(g + 1) * rpb, g * cpb:(g + 1) * cpb] for g in range(n_groups)], axis=0)

    gsrc_g = take_blocks(gsrc_glob, epg, npg)                      # (NG*epg, npg)
    sdst_g = take_blocks(sdst_glob, npg, epg)                      # (NG*npg, epg)
    adj_g = take_blocks(adj, npg, npg)                             # (NG*npg, npg)
    pool_g = take_blocks(pool_glob, graphs_per_group, npg)         # (NG*bpg, npg)
    neg_bias = np.where(adj_g > 0, 0.0, -1e30).astype(np.float32)  # additive mask (bf16 on device)

    key = jax.random.PRNGKey(0)
    kx, ke, kp = jax.random.split(key, 3)
    x = jax.random.normal(kx, (N, in_dim), jnp.float32)
    edge_attr = jax.random.normal(ke, (E, edge_feat_dim), jnp.float32)
    params = init_params(kp, in_dim, edge_feat_dim, hidden_dim, num_actions, heads)

    wire_all, p_action = two_head_gat_forward(
        params, x, edge_attr,
        jnp.asarray(gsrc_g), jnp.asarray(sdst_g), jnp.asarray(inv_cnt),
        jnp.asarray(neg_bias), jnp.asarray(pool_g),
        heads=heads, hidden_dim=hidden_dim, num_actions=num_actions, n_groups=n_groups)
    jax.block_until_ready((wire_all, p_action))

    ref_wire, ref_action = reference_forward(
        params, x, edge_attr, jnp.asarray(gsrc_glob), jnp.asarray(sdst_glob),
        jnp.asarray(inv_cnt), jnp.asarray(adj), jnp.asarray(pool_glob),
        heads=heads, hidden_dim=hidden_dim, in_dim=in_dim)

    assert bool(jnp.allclose(wire_all, ref_wire, rtol=2e-2, atol=2e-2)), "wire mismatch"
    assert bool(jnp.allclose(p_action, ref_action, rtol=2e-2, atol=2e-2)), "action mismatch"

    # x2[wire_mask] boolean indexing -> dynamic shape; done in host glue.
    p_wire = np.asarray(wire_all)[:, 0][wire_mask]                 # squeeze(-1) + mask
    p_action_np = np.asarray(p_action)                             # (B, num_actions)
    assert p_wire.shape == (int(wire_mask.sum()),)
    assert p_action_np.shape == (n_graphs, num_actions)
    assert np.all(np.isfinite(p_wire)) and np.all(np.isfinite(p_action_np))

    print("KERNEL_OK")
</pallas_src>

<mosaic_0001>
module attributes {stable_mosaic.version = 11 : i64} {
  func.func @fused_twohead_gat_kernel(%arg0: i32, %arg1: memref<128x8xbf16, #tpu.memory_space<vmem>>, %arg2: memref<256x4xbf16, #tpu.memory_space<vmem>>, %arg3: memref<256x128xbf16, #tpu.memory_space<vmem>>, %arg4: memref<128x256xbf16, #tpu.memory_space<vmem>>, %arg5: memref<128x1xf32, #tpu.memory_space<vmem>>, %arg6: memref<128x128xbf16, #tpu.memory_space<vmem>>, %arg7: memref<8x128xbf16, #tpu.memory_space<vmem>>, %arg8: memref<4x32xbf16, #tpu.memory_space<vmem>>, %arg9: memref<1x32xf32, #tpu.memory_space<vmem>>, %arg10: memref<32x64xbf16, #tpu.memory_space<vmem>>, %arg11: memref<1x64xf32, #tpu.memory_space<vmem>>, %arg12: memref<8x64xbf16, #tpu.memory_space<vmem>>, %arg13: memref<64x8xf32, #tpu.memory_space<vmem>>, %arg14: memref<8x8xbf16, #tpu.memory_space<vmem>>, %arg15: memref<1x8xf32, #tpu.memory_space<vmem>>, %arg16: memref<4x8x32xbf16, #tpu.memory_space<vmem>>, %arg17: memref<4x1x32xf32, #tpu.memory_space<vmem>>, %arg18: memref<4x1x32xf32, #tpu.memory_space<vmem>>, %arg19: memref<1x32xf32, #tpu.memory_space<vmem>>, %arg20: memref<4x32x32xbf16, #tpu.memory_space<vmem>>, %arg21: memref<4x1x32xf32, #tpu.memory_space<vmem>>, %arg22: memref<4x1x32xf32, #tpu.memory_space<vmem>>, %arg23: memref<1x32xf32, #tpu.memory_space<vmem>>, %arg24: memref<32x128xbf16, #tpu.memory_space<vmem>>, %arg25: memref<1x128xf32, #tpu.memory_space<vmem>>, %arg26: memref<32x128xbf16, #tpu.memory_space<vmem>>, %arg27: memref<1x128xf32, #tpu.memory_space<vmem>>, %arg28: memref<128x128xbf16, #tpu.memory_space<vmem>>, %arg29: memref<8x128xbf16, #tpu.memory_space<vmem>>) attributes {dimension_semantics = [#tpu.dimension_semantics<parallel>], iteration_bounds = array<i64: 2>, scalar_prefetch = 0 : i64, scratch_operands = 0 : i64, tpu.core_type = #tpu.core_type<tc>, window_params = [{transform_indices = @transform_0, window_bounds = array<i64: 128, 8>}, {transform_indices = @transform_1, window_bounds = array<i64: 256, 4>}, {transform_indices = @transform_2, window_bounds = array<i64: 256, 128>}, {transform_indices = @transform_3, window_bounds = array<i64: 128, 256>}, {transform_indices = @transform_4, window_bounds = array<i64: 128, 1>}, {transform_indices = @transform_5, window_bounds = array<i64: 128, 128>}, {transform_indices = @transform_6, window_bounds = array<i64: 8, 128>}, {pipeline_mode = #tpu.pipeline_mode<synchronous>, transform_indices = @transform_7, window_bounds = array<i64: 4, 32>}, {pipeline_mode = #tpu.pipeline_mode<synchronous>, transform_indices = @transform_8, window_bounds = array<i64: 1, 32>}, {pipeline_mode = #tpu.pipeline_mode<synchronous>, transform_indices = @transform_9, window_bounds = array<i64: 32, 64>}, {pipeline_mode = #tpu.pipeline_mode<synchronous>, transform_indices = @transform_10, window_bounds = array<i64: 1, 64>}, {pipeline_mode = #tpu.pipeline_mode<synchronous>, transform_indices = @transform_11, window_bounds = array<i64: 8, 64>}, {pipeline_mode = #tpu.pipeline_mode<synchronous>, transform_indices = @transform_12, window_bounds = array<i64: 64, 8>}, {pipeline_mode = #tpu.pipeline_mode<synchronous>, transform_indices = @transform_13, window_bounds = array<i64: 8, 8>}, {pipeline_mode = #tpu.pipeline_mode<synchronous>, transform_indices = @transform_14, window_bounds = array<i64: 1, 8>}, {pipeline_mode = #tpu.pipeline_mode<synchronous>, transform_indices = @transform_15, window_bounds = array<i64: 4, 8, 32>}, {pipeline_mode = #tpu.pipeline_mode<synchronous>, transform_indices = @transform_16, window_bounds = array<i64: 4, 1, 32>}, {pipeline_mode = #tpu.pipeline_mode<synchronous>, transform_indices = @transform_17, window_bounds = array<i64: 4, 1, 32>}, {pipeline_mode = #tpu.pipeline_mode<synchronous>, transform_indices = @transform_18, window_bounds = array<i64: 1, 32>}, {pipeline_mode = #tpu.pipeline_mode<synchronous>, transform_indices = @transform_19, window_bounds = array<i64: 4, 32, 32>}, {pipeline_mode = #tpu.pipeline_mode<synchronous>, transform_indices = @transform_20, window_bounds = array<i64: 4, 1, 32>}, {pipeline_mode = #tpu.pipeline_mode<synchronous>, transform_indices = @transform_21, window_bounds = array<i64: 4, 1, 32>}, {pipeline_mode = #tpu.pipeline_mode<synchronous>, transform_indices = @transform_22, window_bounds = array<i64: 1, 32>}, {pipeline_mode = #tpu.pipeline_mode<synchronous>, transform_indices = @transform_23, window_bounds = array<i64: 32, 128>}, {pipeline_mode = #tpu.pipeline_mode<synchronous>, transform_indices = @transform_24, window_bounds = array<i64: 1, 128>}, {pipeline_mode = #tpu.pipeline_mode<synchronous>, transform_indices = @transform_25, window_bounds = array<i64: 32, 128>}, {pipeline_mode = #tpu.pipeline_mode<synchronous>, transform_indices = @transform_26, window_bounds = array<i64: 1, 128>}, {transform_indices = @transform_27, window_bounds = array<i64: 128, 128>}, {transform_indices = @transform_28, window_bounds = array<i64: 8, 128>}]} {
    %c0 = arith.constant 0 : index
    %c0_0 = arith.constant 0 : index
    %0 = vector.load %arg1[%c0, %c0_0] : memref<128x8xbf16, #tpu.memory_space<vmem>>, vector<128x8xbf16>
    %c0_1 = arith.constant 0 : index
    %c0_2 = arith.constant 0 : index
    %1 = vector.load %arg6[%c0_1, %c0_2] : memref<128x128xbf16, #tpu.memory_space<vmem>>, vector<128x128xbf16>
    %2 = arith.extf %1 : vector<128x128xbf16> to vector<128x128xf32>
    %3 = vector.shape_cast %2 : vector<128x128xf32> to vector<1x128x128xf32>
    %c0_3 = arith.constant 0 : index
    %c0_4 = arith.constant 0 : index
    %4 = vector.load %arg2[%c0_3, %c0_4] : memref<256x4xbf16, #tpu.memory_space<vmem>>, vector<256x4xbf16>
    %c0_5 = arith.constant 0 : index
    %c0_6 = arith.constant 0 : index
    %5 = vector.load %arg8[%c0_5, %c0_6] : memref<4x32xbf16, #tpu.memory_space<vmem>>, vector<4x32xbf16>
    %cst = arith.constant dense<0.000000e+00> : vector<256x32xf32>
    %6 = tpu.matmul %4, %5, %cst {dimension_numbers = #tpu.dot_dimension_numbers<[1], [0], [0], [1], [0, 0, 1, 1], [], []>} : vector<256x4xbf16>, vector<4x32xbf16>, vector<256x32xf32> -> vector<256x32xf32>
    %c0_7 = arith.constant 0 : index
    %c0_8 = arith.constant 0 : index
    %7 = vector.load %arg9[%c0_7, %c0_8] : memref<1x32xf32, #tpu.memory_space<vmem>>, vector<1x32xf32>
    %8 = vector.broadcast %7 : vector<1x32xf32> to vector<256x32xf32>
    %9 = arith.addf %6, %8 : vector<256x32xf32>
    %cst_9 = arith.constant 0.000000e+00 : f32
    %10 = vector.broadcast %cst_9 : f32 to vector<256x32xf32>
    %11 = arith.maximumf %9, %10 : vector<256x32xf32>
    %12 = arith.truncf %11 : vector<256x32xf32> to vector<256x32xbf16>
    %c0_10 = arith.constant 0 : index
    %c0_11 = arith.constant 0 : index
    %13 = vector.load %arg10[%c0_10, %c0_11] : memref<32x64xbf16, #tpu.memory_space<vmem>>, vector<32x64xbf16>
    %cst_12 = arith.constant dense<0.000000e+00> : vector<256x64xf32>
    %14 = tpu.matmul %12, %13, %cst_12 {dimension_numbers = #tpu.dot_dimension_numbers<[1], [0], [0], [1], [0, 0, 1, 1], [], []>} : vector<256x32xbf16>, vector<32x64xbf16>, vector<256x64xf32> -> vector<256x64xf32>
    %c0_13 = arith.constant 0 : index
    %c0_14 = arith.constant 0 : index
    %15 = vector.load %arg11[%c0_13, %c0_14] : memref<1x64xf32, #tpu.memory_space<vmem>>, vector<1x64xf32>
    %16 = vector.broadcast %15 : vector<1x64xf32> to vector<256x64xf32>
    %17 = arith.addf %14, %16 : vector<256x64xf32>
    %c0_15 = arith.constant 0 : index
    %c0_16 = arith.constant 0 : index
    %18 = vector.load %arg12[%c0_15, %c0_16] : memref<8x64xbf16, #tpu.memory_space<vmem>>, vector<8x64xbf16>
    %cst_17 = arith.constant dense<0.000000e+00> : vector<128x64xf32>
    %19 = tpu.matmul %0, %18, %cst_17 {dimension_numbers = #tpu.dot_dimension_numbers<[1], [0], [0], [1], [0, 0, 1, 1], [], []>} : vector<128x8xbf16>, vector<8x64xbf16>, vector<128x64xf32> -> vector<128x64xf32>
    %c0_18 = arith.constant 0 : index
    %c0_19 = arith.constant 0 : index
    %20 = vector.load %arg3[%c0_18, %c0_19] : memref<256x128xbf16, #tpu.memory_space<vmem>>, vector<256x128xbf16>
    %21 = arith.truncf %19 : vector<128x64xf32> to vector<128x64xbf16>
    %cst_20 = arith.constant dense<0.000000e+00> : vector<256x64xf32>
    %22 = tpu.matmul %20, %21, %cst_20 {dimension_numbers = #tpu.dot_dimension_numbers<[1], [0], [0], [1], [0, 0, 1, 1], [], []>} : vector<256x128xbf16>, vector<128x64xbf16>, vector<256x64xf32> -> vector<256x64xf32>
    %c0_21 = arith.constant 0 : index
    %c0_22 = arith.constant 0 : index
    %23 = vector.load %arg4[%c0_21, %c0_22] : memref<128x256xbf16, #tpu.memory_space<vmem>>, vector<128x256xbf16>
    %24 = arith.mulf %22, %17 : vector<256x64xf32>
    %25 = arith.truncf %24 : vector<256x64xf32> to vector<256x64xbf16>
    %cst_23 = arith.constant dense<0.000000e+00> : vector<128x64xf32>
    %26 = tpu.matmul %23, %25, %cst_23 {dimension_numbers = #tpu.dot_dimension_numbers<[1], [0], [0], [1], [0, 0, 1, 1], [], []>} : vector<128x256xbf16>, vector<256x64xbf16>, vector<128x64xf32> -> vector<128x64xf32>
    %c0_24 = arith.constant 0 : index
    %c0_25 = arith.constant 0 : index
    %27 = vector.load %arg13[%c0_24, %c0_25] : memref<64x8xf32, #tpu.memory_space<vmem>>, vector<64x8xf32>
    %cst_26 = arith.constant dense<0.000000e+00> : vector<128x8xf32>
    %28 = tpu.matmul %26, %27, %cst_26 {dimension_numbers = #tpu.dot_dimension_numbers<[1], [0], [0], [1], [0, 0, 1, 1], [], []>} : vector<128x64xf32>, vector<64x8xf32>, vector<128x8xf32> -> vector<128x8xf32>
    %c0_27 = arith.constant 0 : index
    %c0_28 = arith.constant 0 : index
    %29 = vector.load %arg5[%c0_27, %c0_28] : memref<128x1xf32, #tpu.memory_space<vmem>>, vector<128x1xf32>
    %30 = vector.broadcast %29 : vector<128x1xf32> to vector<128x8xf32>
    %31 = arith.mulf %28, %30 : vector<128x8xf32>
    %c0_29 = arith.constant 0 : index
    %c0_30 = arith.constant 0 : index
    %32 = vector.load %arg14[%c0_29, %c0_30] : memref<8x8xbf16, #tpu.memory_space<vmem>>, vector<8x8xbf16>
    %cst_31 = arith.constant dense<0.000000e+00> : vector<128x8xf32>
    %33 = tpu.matmul %0, %32, %cst_31 {dimension_numbers = #tpu.dot_dimension_numbers<[1], [0], [0], [1], [0, 0, 1, 1], [], []>} : vector<128x8xbf16>, vector<8x8xbf16>, vector<128x8xf32> -> vector<128x8xf32>
    %34 = arith.addf %31, %33 : vector<128x8xf32>
    %c0_32 = arith.constant 0 : index
    %c0_33 = arith.constant 0 : index
    %35 = vector.load %arg15[%c0_32, %c0_33] : memref<1x8xf32, #tpu.memory_space<vmem>>, vector<1x8xf32>
    %36 = vector.broadcast %35 : vector<1x8xf32> to vector<128x8xf32>
    %37 = arith.addf %34, %36 : vector<128x8xf32>
    %cst_34 = arith.constant 0.000000e+00 : f32
    %38 = vector.broadcast %cst_34 : f32 to vector<128x8xf32>
    %39 = arith.maximumf %37, %38 : vector<128x8xf32>
    %c0_35 = arith.constant 0 : index
    %c0_36 = arith.constant 0 : index
    %c0_37 = arith.constant 0 : index
    %40 = vector.load %arg16[%c0_35, %c0_36, %c0_37] : memref<4x8x32xbf16, #tpu.memory_space<vmem>>, vector<4x8x32xbf16>
    %c0_38 = arith.constant 0 : index
    %c0_39 = arith.constant 0 : index
    %c0_40 = arith.constant 0 : index
    %41 = vector.load %arg17[%c0_38, %c0_39, %c0_40] : memref<4x1x32xf32, #tpu.memory_space<vmem>>, vector<4x1x32xf32>
    %c0_41 = arith.constant 0 : index
    %c0_42 = arith.constant 0 : index
    %c0_43 = arith.constant 0 : index
    %42 = vector.load %arg18[%c0_41, %c0_42, %c0_43] : memref<4x1x32xf32, #tpu.memory_space<vmem>>, vector<4x1x32xf32>
    %c0_44 = arith.constant 0 : index
    %c0_45 = arith.constant 0 : index
    %43 = vector.load %arg19[%c0_44, %c0_45] : memref<1x32xf32, #tpu.memory_space<vmem>>, vector<1x32xf32>
    %44 = arith.truncf %39 : vector<128x8xf32> to vector<128x8xbf16>
    %45 = vector.shape_cast %44 : vector<128x8xbf16> to vector<1x128x8xbf16>
    %46 = vector.shape_cast %45 : vector<1x128x8xbf16> to vector<1x128x8xbf16>
    %47 = vector.broadcast %46 : vector<1x128x8xbf16> to vector<4x128x8xbf16>
    "tpu.trace_start"() <{level = 10 : i32, message = "hnd,hdc->hnc"}> : () -> ()
    %cst_46 = arith.constant dense<0.000000e+00> : vector<4x128x32xf32>
    %48 = tpu.matmul %47, %40, %cst_46 {dimension_numbers = #tpu.dot_dimension_numbers<[2], [1], [1], [2], [0, 0, 0, 1, 1, 2], [0], [0]>} : vector<4x128x8xbf16>, vector<4x8x32xbf16>, vector<4x128x32xf32> -> vector<4x128x32xf32>
    "tpu.trace_stop"() : () -> ()
    %49 = arith.truncf %48 : vector<4x128x32xf32> to vector<4x128x32xbf16>
    "tpu.trace_start"() <{level = 10 : i32, message = "hnc,hkc->hnk"}> : () -> ()
    %cst_47 = arith.constant dense<0.000000e+00> : vector<4x128x1xf32>
    %50 = tpu.matmul %48, %42, %cst_47 {dimension_numbers = #tpu.dot_dimension_numbers<[2], [2], [1], [1], [0, 0, 0, 1, 1, 1], [0], [0]>} : vector<4x128x32xf32>, vector<4x1x32xf32>, vector<4x128x1xf32> -> vector<4x128x1xf32>
    "tpu.trace_stop"() : () -> ()
    "tpu.trace_start"() <{level = 10 : i32, message = "hkc,hnc->hkn"}> : () -> ()
    %cst_48 = arith.constant dense<0.000000e+00> : vector<4x1x128xf32>
    %51 = tpu.matmul %41, %48, %cst_48 {dimension_numbers = #tpu.dot_dimension_numbers<[2], [2], [1], [1], [0, 0, 0, 1, 1, 1], [0], [0]>} : vector<4x1x32xf32>, vector<4x128x32xf32>, vector<4x1x128xf32> -> vector<4x1x128xf32>
    "tpu.trace_stop"() : () -> ()
    %52 = vector.broadcast %50 : vector<4x128x1xf32> to vector<4x128x128xf32>
    %53 = vector.broadcast %51 : vector<4x1x128xf32> to vector<4x128x128xf32>
    %54 = arith.addf %52, %53 : vector<4x128x128xf32>
    %cst_49 = arith.constant 2.000000e-01 : f32
    %55 = vector.broadcast %cst_49 : f32 to vector<4x128x128xf32>
    %56 = arith.mulf %55, %54 : vector<4x128x128xf32>
    %57 = arith.maximumf %54, %56 : vector<4x128x128xf32>
    %58 = vector.broadcast %3 : vector<1x128x128xf32> to vector<4x128x128xf32>
    %59 = arith.addf %57, %58 : vector<4x128x128xf32>
    %cst_50 = arith.constant dense<0xFF800000> : vector<4x128xf32>
    %60 = vector.multi_reduction <maximumf>, %59, %cst_50 [2] : vector<4x128x128xf32> to vector<4x128xf32>
    %61 = vector.shape_cast %60 : vector<4x128xf32> to vector<4x128x1xf32>
    %62 = vector.broadcast %61 : vector<4x128x1xf32> to vector<4x128x128xf32>
    %63 = arith.subf %59, %62 : vector<4x128x128xf32>
    %64 = math.exp %63 : vector<4x128x128xf32>
    %cst_51 = arith.constant dense<0.000000e+00> : vector<4x128xf32>
    %65 = vector.multi_reduction <add>, %64, %cst_51 [2] : vector<4x128x128xf32> to vector<4x128xf32>
    %66 = vector.shape_cast %65 : vector<4x128xf32> to vector<4x128x1xf32>
    %67 = tpu.reciprocal %66 {approx = true} : vector<4x128x1xf32> -> vector<4x128x1xf32>
    %cst_52 = arith.constant 2.500000e-01 : f32
    %68 = vector.broadcast %cst_52 : f32 to vector<4x128x1xf32>
    %69 = arith.mulf %67, %68 : vector<4x128x1xf32>
    %70 = vector.broadcast %69 : vector<4x128x1xf32> to vector<4x128x128xf32>
    %71 = arith.mulf %64, %70 : vector<4x128x128xf32>
    %72 = arith.truncf %71 : vector<4x128x128xf32> to vector<4x128x128xbf16>
    "tpu.trace_start"() <{level = 10 : i32, message = "hij,hjc->hic"}> : () -> ()
    %cst_53 = arith.constant dense<0.000000e+00> : vector<4x128x32xf32>
    %73 = tpu.matmul %72, %49, %cst_53 {dimension_numbers = #tpu.dot_dimension_numbers<[2], [1], [1], [2], [0, 0, 0, 1, 1, 2], [0], [0]>} : vector<4x128x128xbf16>, vector<4x128x32xbf16>, vector<4x128x32xf32> -> vector<4x128x32xf32>
    "tpu.trace_stop"() : () -> ()
    %cst_54 = arith.constant dense<0.000000e+00> : vector<128x32xf32>
    %74 = vector.multi_reduction <add>, %73, %cst_54 [0] : vector<4x128x32xf32> to vector<128x32xf32>
    %75 = vector.broadcast %43 : vector<1x32xf32> to vector<128x32xf32>
    %76 = arith.addf %74, %75 : vector<128x32xf32>
    %cst_55 = arith.constant 0.000000e+00 : f32
    %77 = vector.broadcast %cst_55 : f32 to vector<128x32xf32>
    %78 = arith.maximumf %76, %77 : vector<128x32xf32>
    %c0_56 = arith.constant 0 : index
    %c0_57 = arith.constant 0 : index
    %c0_58 = arith.constant 0 : index
    %79 = vector.load %arg20[%c0_56, %c0_57, %c0_58] : memref<4x32x32xbf16, #tpu.memory_space<vmem>>, vector<4x32x32xbf16>
    %c0_59 = arith.constant 0 : index
    %c0_60 = arith.constant 0 : index
    %c0_61 = arith.constant 0 : index
    %80 = vector.load %arg21[%c0_59, %c0_60, %c0_61] : memref<4x1x32xf32, #tpu.memory_space<vmem>>, vector<4x1x32xf32>
    %c0_62 = arith.constant 0 : index
    %c0_63 = arith.constant 0 : index
    %c0_64 = arith.constant 0 : index
    %81 = vector.load %arg22[%c0_62, %c0_63, %c0_64] : memref<4x1x32xf32, #tpu.memory_space<vmem>>, vector<4x1x32xf32>
    %c0_65 = arith.constant 0 : index
    %c0_66 = arith.constant 0 : index
    %82 = vector.load %arg23[%c0_65, %c0_66] : memref<1x32xf32, #tpu.memory_space<vmem>>, vector<1x32xf32>
    %83 = arith.truncf %78 : vector<128x32xf32> to vector<128x32xbf16>
    %84 = vector.shape_cast %83 : vector<128x32xbf16> to vector<1x128x32xbf16>
    %85 = vector.shape_cast %84 : vector<1x128x32xbf16> to vector<1x128x32xbf16>
    %86 = vector.broadcast %85 : vector<1x128x32xbf16> to vector<4x128x32xbf16>
    "tpu.trace_start"() <{level = 10 : i32, message = "hnd,hdc->hnc"}> : () -> ()
    %cst_67 = arith.constant dense<0.000000e+00> : vector<4x128x32xf32>
    %87 = tpu.matmul %86, %79, %cst_67 {dimension_numbers = #tpu.dot_dimension_numbers<[2], [1], [1], [2], [0, 0, 0, 1, 1, 2], [0], [0]>} : vector<4x128x32xbf16>, vector<4x32x32xbf16>, vector<4x128x32xf32> -> vector<4x128x32xf32>
    "tpu.trace_stop"() : () -> ()
    %88 = arith.truncf %87 : vector<4x128x32xf32> to vector<4x128x32xbf16>
    "tpu.trace_start"() <{level = 10 : i32, message = "hnc,hkc->hnk"}> : () -> ()
    %cst_68 = arith.constant dense<0.000000e+00> : vector<4x128x1xf32>
    %89 = tpu.matmul %87, %81, %cst_68 {dimension_numbers = #tpu.dot_dimension_numbers<[2], [2], [1], [1], [0, 0, 0, 1, 1, 1], [0], [0]>} : vector<4x128x32xf32>, vector<4x1x32xf32>, vector<4x128x1xf32> -> vector<4x128x1xf32>
    "tpu.trace_stop"() : () -> ()
    "tpu.trace_start"() <{level = 10 : i32, message = "hkc,hnc->hkn"}> : () -> ()
    %cst_69 = arith.constant dense<0.000000e+00> : vector<4x1x128xf32>
    %90 = tpu.matmul %80, %87, %cst_69 {dimension_numbers = #tpu.dot_dimension_numbers<[2], [2], [1], [1], [0, 0, 0, 1, 1, 1], [0], [0]>} : vector<4x1x32xf32>, vector<4x128x32xf32>, vector<4x1x128xf32> -> vector<4x1x128xf32>
    "tpu.trace_stop"() : () -> ()
    %91 = vector.broadcast %89 : vector<4x128x1xf32> to vector<4x128x128xf32>
    %92 = vector.broadcast %90 : vector<4x1x128xf32> to vector<4x128x128xf32>
    %93 = arith.addf %91, %92 : vector<4x128x128xf32>
    %cst_70 = arith.constant 2.000000e-01 : f32
    %94 = vector.broadcast %cst_70 : f32 to vector<4x128x128xf32>
    %95 = arith.mulf %94, %93 : vector<4x128x128xf32>
    %96 = arith.maximumf %93, %95 : vector<4x128x128xf32>
    %97 = vector.broadcast %3 : vector<1x128x128xf32> to vector<4x128x128xf32>
    %98 = arith.addf %96, %97 : vector<4x128x128xf32>
    %cst_71 = arith.constant dense<0xFF800000> : vector<4x128xf32>
    %99 = vector.multi_reduction <maximumf>, %98, %cst_71 [2] : vector<4x128x128xf32> to vector<4x128xf32>
    %100 = vector.shape_cast %99 : vector<4x128xf32> to vector<4x128x1xf32>
    %101 = vector.broadcast %100 : vector<4x128x1xf32> to vector<4x128x128xf32>
    %102 = arith.subf %98, %101 : vector<4x128x128xf32>
    %103 = math.exp %102 : vector<4x128x128xf32>
    %cst_72 = arith.constant dense<0.000000e+00> : vector<4x128xf32>
    %104 = vector.multi_reduction <add>, %103, %cst_72 [2] : vector<4x128x128xf32> to vector<4x128xf32>
    %105 = vector.shape_cast %104 : vector<4x128xf32> to vector<4x128x1xf32>
    %106 = tpu.reciprocal %105 {approx = true} : vector<4x128x1xf32> -> vector<4x128x1xf32>
    %cst_73 = arith.constant 2.500000e-01 : f32
    %107 = vector.broadcast %cst_73 : f32 to vector<4x128x1xf32>
    %108 = arith.mulf %106, %107 : vector<4x128x1xf32>
    %109 = vector.broadcast %108 : vector<4x128x1xf32> to vector<4x128x128xf32>
    %110 = arith.mulf %103, %109 : vector<4x128x128xf32>
    %111 = arith.truncf %110 : vector<4x128x128xf32> to vector<4x128x128xbf16>
    "tpu.trace_start"() <{level = 10 : i32, message = "hij,hjc->hic"}> : () -> ()
    %cst_74 = arith.constant dense<0.000000e+00> : vector<4x128x32xf32>
    %112 = tpu.matmul %111, %88, %cst_74 {dimension_numbers = #tpu.dot_dimension_numbers<[2], [1], [1], [2], [0, 0, 0, 1, 1, 2], [0], [0]>} : vector<4x128x128xbf16>, vector<4x128x32xbf16>, vector<4x128x32xf32> -> vector<4x128x32xf32>
    "tpu.trace_stop"() : () -> ()
    %cst_75 = arith.constant dense<0.000000e+00> : vector<128x32xf32>
    %113 = vector.multi_reduction <add>, %112, %cst_75 [0] : vector<4x128x32xf32> to vector<128x32xf32>
    %114 = vector.broadcast %82 : vector<1x32xf32> to vector<128x32xf32>
    %115 = arith.addf %113, %114 : vector<128x32xf32>
    %cst_76 = arith.constant 0.000000e+00 : f32
    %116 = vector.broadcast %cst_76 : f32 to vector<128x32xf32>
    %117 = arith.maximumf %115, %116 : vector<128x32xf32>
    %118 = arith.truncf %117 : vector<128x32xf32> to vector<128x32xbf16>
    %c0_77 = arith.constant 0 : index
    %c0_78 = arith.constant 0 : index
    %119 = vector.load %arg24[%c0_77, %c0_78] : memref<32x128xbf16, #tpu.memory_space<vmem>>, vector<32x128xbf16>
    %cst_79 = arith.constant dense<0.000000e+00> : vector<128x128xf32>
    %120 = tpu.matmul %118, %119, %cst_79 {dimension_numbers = #tpu.dot_dimension_numbers<[1], [0], [0], [1], [0, 0, 1, 1], [], []>} : vector<128x32xbf16>, vector<32x128xbf16>, vector<128x128xf32> -> vector<128x128xf32>
    %c0_80 = arith.constant 0 : index
    %c0_81 = arith.constant 0 : index
    %121 = vector.load %arg25[%c0_80, %c0_81] : memref<1x128xf32, #tpu.memory_space<vmem>>, vector<1x128xf32>
    %122 = vector.broadcast %121 : vector<1x128xf32> to vector<128x128xf32>
    %123 = arith.addf %120, %122 : vector<128x128xf32>
    %124 = arith.truncf %123 : vector<128x128xf32> to vector<128x128xbf16>
    %c0_82 = arith.constant 0 : index
    %c0_83 = arith.constant 0 : index
    %125 = vector.load %arg28[%c0_82, %c0_83] : memref<128x128xbf16, #tpu.memory_space<vmem>>, vector<128x128xbf16>
    tpu.vector_store %arg28[%c0_82, %c0_83], %124 {strides = array<i32>} : memref<128x128xbf16, #tpu.memory_space<vmem>>, vector<128x128xbf16>,
    %c0_84 = arith.constant 0 : index
    %c0_85 = arith.constant 0 : index
    %126 = vector.load %arg7[%c0_84, %c0_85] : memref<8x128xbf16, #tpu.memory_space<vmem>>, vector<8x128xbf16>
    %cst_86 = arith.constant dense<0.000000e+00> : vector<8x32xf32>
    %127 = tpu.matmul %126, %118, %cst_86 {dimension_numbers = #tpu.dot_dimension_numbers<[1], [0], [0], [1], [0, 0, 1, 1], [], []>} : vector<8x128xbf16>, vector<128x32xbf16>, vector<8x32xf32> -> vector<8x32xf32>
    %128 = arith.truncf %127 : vector<8x32xf32> to vector<8x32xbf16>
    %c0_87 = arith.constant 0 : index
    %c0_88 = arith.constant 0 : index
    %129 = vector.load %arg26[%c0_87, %c0_88] : memref<32x128xbf16, #tpu.memory_space<vmem>>, vector<32x128xbf16>
    %cst_89 = arith.constant dense<0.000000e+00> : vector<8x128xf32>
    %130 = tpu.matmul %128, %129, %cst_89 {dimension_numbers = #tpu.dot_dimension_numbers<[1], [0], [0], [1], [0, 0, 1, 1], [], []>} : vector<8x32xbf16>, vector<32x128xbf16>, vector<8x128xf32> -> vector<8x128xf32>
    %c0_90 = arith.constant 0 : index
    %c0_91 = arith.constant 0 : index
    %131 = vector.load %arg27[%c0_90, %c0_91] : memref<1x128xf32, #tpu.memory_space<vmem>>, vector<1x128xf32>
    %132 = vector.broadcast %131 : vector<1x128xf32> to vector<8x128xf32>
    %133 = arith.addf %130, %132 : vector<8x128xf32>
    %134 = arith.truncf %133 : vector<8x128xf32> to vector<8x128xbf16>
    %c0_92 = arith.constant 0 : index
    %c0_93 = arith.constant 0 : index
    %135 = vector.load %arg29[%c0_92, %c0_93] : memref<8x128xbf16, #tpu.memory_space<vmem>>, vector<8x128xbf16>
    tpu.vector_store %arg29[%c0_92, %c0_93], %134 {strides = array<i32>} : memref<8x128xbf16, #tpu.memory_space<vmem>>, vector<8x128xbf16>,
    return
  }
  func.func @transform_0(%arg0: i32) -> (i32, i32) {
    %c0_i32 = arith.constant 0 : i32
    %c0_i32_0 = arith.constant 0 : i32
    return %arg0, %c0_i32 : i32, i32
  }
  func.func @transform_1(%arg0: i32) -> (i32, i32) {
    %c0_i32 = arith.constant 0 : i32
    %c0_i32_0 = arith.constant 0 : i32
    return %arg0, %c0_i32 : i32, i32
  }
  func.func @transform_2(%arg0: i32) -> (i32, i32) {
    %c0_i32 = arith.constant 0 : i32
    %c0_i32_0 = arith.constant 0 : i32
    return %arg0, %c0_i32 : i32, i32
  }
  func.func @transform_3(%arg0: i32) -> (i32, i32) {
    %c0_i32 = arith.constant 0 : i32
    %c0_i32_0 = arith.constant 0 : i32
    return %arg0, %c0_i32 : i32, i32
  }
  func.func @transform_4(%arg0: i32) -> (i32, i32) {
    %c0_i32 = arith.constant 0 : i32
    %c0_i32_0 = arith.constant 0 : i32
    return %arg0, %c0_i32 : i32, i32
  }
  func.func @transform_5(%arg0: i32) -> (i32, i32) {
    %c0_i32 = arith.constant 0 : i32
    %c0_i32_0 = arith.constant 0 : i32
    return %arg0, %c0_i32 : i32, i32
  }
  func.func @transform_6(%arg0: i32) -> (i32, i32) {
    %c0_i32 = arith.constant 0 : i32
    %c0_i32_0 = arith.constant 0 : i32
    return %arg0, %c0_i32 : i32, i32
  }
  func.func @transform_7(%arg0: i32) -> (i32, i32) {
    %c0_i32 = arith.constant 0 : i32
    %c0_i32_0 = arith.constant 0 : i32
    %c0_i32_1 = arith.constant 0 : i32
    return %c0_i32, %c0_i32_0 : i32, i32
  }
  func.func @transform_8(%arg0: i32) -> (i32, i32) {
    %c0_i32 = arith.constant 0 : i32
    %c0_i32_0 = arith.constant 0 : i32
    %c0_i32_1 = arith.constant 0 : i32
    return %c0_i32, %c0_i32_0 : i32, i32
  }
  func.func @transform_9(%arg0: i32) -> (i32, i32) {
    %c0_i32 = arith.constant 0 : i32
    %c0_i32_0 = arith.constant 0 : i32
    %c0_i32_1 = arith.constant 0 : i32
    return %c0_i32, %c0_i32_0 : i32, i32
  }
  func.func @transform_10(%arg0: i32) -> (i32, i32) {
    %c0_i32 = arith.constant 0 : i32
    %c0_i32_0 = arith.constant 0 : i32
    %c0_i32_1 = arith.constant 0 : i32
    return %c0_i32, %c0_i32_0 : i32, i32
  }
  func.func @transform_11(%arg0: i32) -> (i32, i32) {
    %c0_i32 = arith.constant 0 : i32
    %c0_i32_0 = arith.constant 0 : i32
    %c0_i32_1 = arith.constant 0 : i32
    return %c0_i32, %c0_i32_0 : i32, i32
  }
  func.func @transform_12(%arg0: i32) -> (i32, i32) {
    %c0_i32 = arith.constant 0 : i32
    %c0_i32_0 = arith.constant 0 : i32
    %c0_i32_1 = arith.constant 0 : i32
    return %c0_i32, %c0_i32_0 : i32, i32
  }
  func.func @transform_13(%arg0: i32) -> (i32, i32) {
    %c0_i32 = arith.constant 0 : i32
    %c0_i32_0 = arith.constant 0 : i32
    %c0_i32_1 = arith.constant 0 : i32
    return %c0_i32, %c0_i32_0 : i32, i32
  }
  func.func @transform_14(%arg0: i32) -> (i32, i32) {
    %c0_i32 = arith.constant 0 : i32
    %c0_i32_0 = arith.constant 0 : i32
    %c0_i32_1 = arith.constant 0 : i32
    return %c0_i32, %c0_i32_0 : i32, i32
  }
  func.func @transform_15(%arg0: i32) -> (i32, i32, i32) {
    %c0_i32 = arith.constant 0 : i32
    %c0_i32_0 = arith.constant 0 : i32
    %c0_i32_1 = arith.constant 0 : i32
    %c0_i32_2 = arith.constant 0 : i32
    return %c0_i32, %c0_i32_0, %c0_i32_1 : i32, i32, i32
  }
  func.func @transform_16(%arg0: i32) -> (i32, i32, i32) {
    %c0_i32 = arith.constant 0 : i32
    %c0_i32_0 = arith.constant 0 : i32
    %c0_i32_1 = arith.constant 0 : i32
    %c0_i32_2 = arith.constant 0 : i32
    return %c0_i32, %c0_i32_0, %c0_i32_1 : i32, i32, i32
  }
  func.func @transform_17(%arg0: i32) -> (i32, i32, i32) {
    %c0_i32 = arith.constant 0 : i32
    %c0_i32_0 = arith.constant 0 : i32
    %c0_i32_1 = arith.constant 0 : i32
    %c0_i32_2 = arith.constant 0 : i32
    return %c0_i32, %c0_i32_0, %c0_i32_1 : i32, i32, i32
  }
  func.func @transform_18(%arg0: i32) -> (i32, i32) {
    %c0_i32 = arith.constant 0 : i32
    %c0_i32_0 = arith.constant 0 : i32
    %c0_i32_1 = arith.constant 0 : i32
    return %c0_i32, %c0_i32_0 : i32, i32
  }
  func.func @transform_19(%arg0: i32) -> (i32, i32, i32) {
    %c0_i32 = arith.constant 0 : i32
    %c0_i32_0 = arith.constant 0 : i32
    %c0_i32_1 = arith.constant 0 : i32
    %c0_i32_2 = arith.constant 0 : i32
    return %c0_i32, %c0_i32_0, %c0_i32_1 : i32, i32, i32
  }
  func.func @transform_20(%arg0: i32) -> (i32, i32, i32) {
    %c0_i32 = arith.constant 0 : i32
    %c0_i32_0 = arith.constant 0 : i32
    %c0_i32_1 = arith.constant 0 : i32
    %c0_i32_2 = arith.constant 0 : i32
    return %c0_i32, %c0_i32_0, %c0_i32_1 : i32, i32, i32
  }
  func.func @transform_21(%arg0: i32) -> (i32, i32, i32) {
    %c0_i32 = arith.constant 0 : i32
    %c0_i32_0 = arith.constant 0 : i32
    %c0_i32_1 = arith.constant 0 : i32
    %c0_i32_2 = arith.constant 0 : i32
    return %c0_i32, %c0_i32_0, %c0_i32_1 : i32, i32, i32
  }
  func.func @transform_22(%arg0: i32) -> (i32, i32) {
    %c0_i32 = arith.constant 0 : i32
    %c0_i32_0 = arith.constant 0 : i32
    %c0_i32_1 = arith.constant 0 : i32
    return %c0_i32, %c0_i32_0 : i32, i32
  }
  func.func @transform_23(%arg0: i32) -> (i32, i32) {
    %c0_i32 = arith.constant 0 : i32
    %c0_i32_0 = arith.constant 0 : i32
    %c0_i32_1 = arith.constant 0 : i32
    return %c0_i32, %c0_i32_0 : i32, i32
  }
  func.func @transform_24(%arg0: i32) -> (i32, i32) {
    %c0_i32 = arith.constant 0 : i32
    %c0_i32_0 = arith.constant 0 : i32
    %c0_i32_1 = arith.constant 0 : i32
    return %c0_i32, %c0_i32_0 : i32, i32
  }
  func.func @transform_25(%arg0: i32) -> (i32, i32) {
    %c0_i32 = arith.constant 0 : i32
    %c0_i32_0 = arith.constant 0 : i32
    %c0_i32_1 = arith.constant 0 : i32
    return %c0_i32, %c0_i32_0 : i32, i32
  }
  func.func @transform_26(%arg0: i32) -> (i32, i32) {
    %c0_i32 = arith.constant 0 : i32
    %c0_i32_0 = arith.constant 0 : i32
    %c0_i32_1 = arith.constant 0 : i32
    return %c0_i32, %c0_i32_0 : i32, i32
  }
  func.func @transform_27(%arg0: i32) -> (i32, i32) {
    %c0_i32 = arith.constant 0 : i32
    %c0_i32_0 = arith.constant 0 : i32
    return %arg0, %c0_i32 : i32, i32
  }
  func.func @transform_28(%arg0: i32) -> (i32, i32) {
    %c0_i32 = arith.constant 0 : i32
    %c0_i32_0 = arith.constant 0 : i32
    return %arg0, %c0_i32 : i32, i32
  }
}

</mosaic_0001>

<bundles_post_ra>
// kernel: tpu_custom_call.1
= control target key start
LH: loop header
LB: loop body
LE: loop exit
PB: predicated region body
PF: predicated region fallthrough
CT: control target
= control target key end

     0   :  { %s15577_s0 = inlined_call_operand.vmem [shape: bf16[256,8], index: 0, kind: input, shape index: {}]   ;;  %s15578_s1 = inlined_call_operand.vmem [shape: bf16[512,4], index: 1, kind: input, shape index: {}]   ;;  %s15579_s2 = inlined_call_operand.vmem [shape: bf16[512,128], index: 2, kind: input, shape index: {}]   ;;  %s15580_s3 = inlined_call_operand.vmem [shape: bf16[256,256], index: 3, kind: input, shape index: {}]   ;;  %s15581_s4 = inlined_call_operand.vmem [shape: f32[256,1], index: 4, kind: input, shape index: {}]   ;;  %s15582_s5 = inlined_call_operand.vmem [shape: bf16[256,128], index: 5, kind: input, shape index: {}]   ;;  %s15583_s6 = inlined_call_operand.vmem [shape: bf16[16,128], index: 6, kind: input, shape index: {}]   ;;  %s15584_s7 = inlined_call_operand.hbm [shape: bf16[4,32], index: 7, kind: input, shape index: {}]   ;;  %s15585_s8 = inlined_call_operand.vmem [shape: f32[1,32], index: 8, kind: input, shape index: {}]   ;;  %s15586_s9 = inlined_call_operand.hbm [shape: bf16[32,64], index: 9, kind: input, shape index: {}]   ;;  %s15587_s10 = inlined_call_operand.vmem [shape: f32[1,64], index: 10, kind: input, shape index: {}]   ;;  %s15588_s11 = inlined_call_operand.hbm [shape: bf16[8,64], index: 11, kind: input, shape index: {}]   ;;  %s15589_s12 = inlined_call_operand.vmem [shape: f32[64,8], index: 12, kind: input, shape index: {}]   ;;  %s15590_s13 = inlined_call_operand.hbm [shape: bf16[8,8], index: 13, kind: input, shape index: {}]   ;;  %s15591_s14 = inlined_call_operand.vmem [shape: f32[1,8], index: 14, kind: input, shape index: {}]   ;;  %s15592_s15 = inlined_call_operand.hbm [shape: bf16[4,8,32], index: 15, kind: input, shape index: {}]   ;;  %s15593_s16 = inlined_call_operand.vmem [shape: f32[4,1,32], index: 16, kind: input, shape index: {}]   ;;  %s15594_s17 = inlined_call_operand.hbm [shape: f32[4,1,32], index: 17, kind: input, shape index: {}]   ;;  %s15595_s18 = inlined_call_operand.hbm [shape: f32[1,32], index: 18, kind: input, shape index: {}]   ;;  %s15596_s19 = inlined_call_operand.vmem [shape: bf16[4,32,32], index: 19, kind: input, shape index: {}]   ;;  %s15597_s20 = inlined_call_operand.hbm [shape: f32[4,1,32], index: 20, kind: input, shape index: {}]   ;;  %s15598_s21 = inlined_call_operand.hbm [shape: f32[4,1,32], index: 21, kind: input, shape index: {}]   ;;  %s15599_s22 = inlined_call_operand.hbm [shape: f32[1,32], index: 22, kind: input, shape index: {}]   ;;  %s15600_s23 = inlined_call_operand.hbm [shape: bf16[32,128], index: 23, kind: input, shape index: {}]   ;;  %s15601_s24 = inlined_call_operand.vmem [shape: f32[1,128], index: 24, kind: input, shape index: {}]   ;;  %s15602_s25 = inlined_call_operand.hbm [shape: bf16[32,128], index: 25, kind: input, shape index: {}]   ;;  %s15603_s26 = inlined_call_operand.vmem [shape: f32[1,128], index: 26, kind: input, shape index: {}]   ;;  %s15604_s27 = inlined_call_operand.hbm [shape: bf16[256,128], index: 27, kind: output, shape index: {0}]   ;;  %s15605_s28 = inlined_call_operand.hbm [shape: bf16[16,128], index: 28, kind: output, shape index: {1}]  }
   0x1   :  { %15834 = sst [smem:[#allocation96_spill]] %s15577_s0 }
   0x2   :  { %15835 = sst [smem:[#allocation97_spill]] %s15578_s1 }
   0x3   :  { %15836 = sst [smem:[#allocation98_spill]] %s15579_s2 }
   0x4   :  { %15837 = sst [smem:[#allocation99_spill]] %s15580_s3 }
   0x5   :  { %15838 = sst [smem:[#allocation100_spill]] %s15581_s4 }
   0x6   :  { %15839 = sst [smem:[#allocation101_spill]] %s15582_s5 }
   0x7   :  { %15840 = sst [smem:[#allocation102_spill]] %s15583_s6 }
   0x8   :  { %15841 = sst [smem:[#allocation103_spill]] %s15584_s7 }
   0x9   :  { %15842 = sst [smem:[#allocation104_spill]] %s15585_s8 }
   0xa   :  { %15843 = sst [smem:[#allocation105_spill]] %s15586_s9 }
   0xb   :  { %15844 = sst [smem:[#allocation106_spill]] %s15587_s10 }
   0xc   :  { %15845 = sst [smem:[#allocation107_spill]] %s15588_s11 }
   0xd   :  { %15846 = sst [smem:[#allocation108_spill]] %s15589_s12 }
   0xe   :  { %15847 = sst [smem:[#allocation109_spill]] %s15590_s13 }
   0xf   :  { %15848 = sst [smem:[#allocation110_spill]] %s15591_s14 }
  0x10   :  { %15849 = sst [smem:[#allocation111_spill]] %s15592_s15 }
  0x11   :  { %15850 = sst [smem:[#allocation112_spill]] %s15594_s17 }
  0x12   :  { %15851 = sst [smem:[#allocation113_spill]] %s15597_s20 }
  0x13   :  { %15852 = sst [smem:[#allocation114_spill]] %s15603_s26 }
  0x14   :  { %15853 = sst [smem:[#allocation115_spill]] %s15604_s27 }
  0x15   :  { %15854 = sst [smem:[#allocation116_spill]] %s15605_s28 }
  0x16   :  { %34 = vsyncpa [#allocation3], 0 }
  0x17   :  { %35 = vsyncpa [#allocation6], 0 }
  0x18   :  { %36 = vsyncpa [#allocation9], 0 }
  0x19   :  { %37 = vsyncpa [#allocation12], 0 }
  0x1a   :  { %38 = vsyncpa [#allocation15], 0 }
  0x1b   :  { %39 = vsyncpa [#allocation18], 0 }
  0x1c   :  { %40 = vsyncpa [#allocation21], 0 }
  0x1d   :  { %41 = vsyncpa [#allocation4], 0 }
  0x1e   :  { %43 = vsyncpa [#allocation4 + $0x1], 0 }
  0x1f   :  { %44 = vsyncpa [#allocation24], 0 }
  0x20   :  { %46 = vsyncpa [#allocation24 + $0x1], 0  ;;  %s11147_s8 = smov 0   ;;  %s11149_s5 = smov 0  }
  0x21   :  { %s11151_s9 = smov 0   ;;  %s11153_s30 = smov 0  }
  0x22 LB: > { %15855 = sst [smem:[#allocation34_spill]] %s10969_s8  ;;  %s11168_s3 = sadd.s32 4294967295, %s10981_s30   ;;  %s10981_s30 = sphi %s11153_s30, %s16308_s30   ;;  %s10977_s9 = sphi %s11151_s9, %s16310_s9   ;;  %s10973_s5 = sphi %s11149_s5, %s16312_s5   ;;  %s10969_s8 = sphi %s11147_s8, %s16311_s8  }
  0x23   : > { %15856 = sst [smem:[#allocation35_spill]] %s10977_s9  ;;  %s9025_s6 = sadd.s32 4294967294, %s10981_s30  }
  0x24   : > { %15857 = sst [smem:[#allocation36_spill]] %s10981_s30  ;;  %s11172_s10 = sadd.s32 1, %s10981_s30  }
  0x25   : > { %15858 = sst [smem:[#allocation37_spill]] %s11172_s10  ;;  %s661_s0 = sadd.s32 1, %s10977_s9 }
  0x26   : > { %s658_s11 = ssub.s32 %s10981_s30, %s11172_s10  ;;  %p671_p0 = scmp.ne.s32.totalorder %s10977_s9, %s10973_s5 }
  0x27   : > { %p659_p1 = scmp.eq.s32.totalorder %s658_s11, 0  ;;  %p672_p2 = scmp.eq.s32.totalorder %s11168_s3, 1 }
  0x28   : > { %p677_p3 = scmp.ne.s32.totalorder %s10973_s5, %s10969_s8  ;;  %p678_p4 = scmp.eq.s32.totalorder %s9025_s6, 1 }
  0x29   : > { %s11183_s29 = scalar_select %p659_p1, %s10977_s9, %s661_s0  }
  0x2a   : > { %p11185_p5 = por %p672_p2, %p671_p0  ;;  %p11189_p6 = por %p678_p4, %p677_p3 }
  0x2b   : > { %15859 = sst [smem:[#allocation38_spill]] %s11183_s29  ;;  %p9026_p7 = scmp.ge.s32.totalorder %s10981_s30, 1 }
  0x2c   : > { %s15860_s2 = scalar_select %p11185_p5, 1, 0 }
  0x2d   : > { %s15862_s7 = scalar_select %p11189_p6, 1, 0 }
  0x2e   : > { %15861 = sst [smem:[#allocation39_spill]] %s15860_s2  ;;  %p711_p8 = scmp.lt.s32.totalorder %s10981_s30, 3 }
  0x2f   : > { %15863 = sst [smem:[#allocation40_spill]] %s15862_s7  ;;  %p9892_p9 = scmp.eq.s32.totalorder %s11168_s3, 0 }
  0x30   : > { %p11196_p10 = pnand %p9026_p7, %p711_p8  ;;  %s15865_s6 = sld [smem:[#allocation105_spill]] }
  0x31   : > { %s10983_s11 = smov [#allocation5]   ;;  %s15867_s13 = sld [smem:[#allocation109_spill]] }
  0x32   : > { %p9848_p11 = pneg %p11196_p10  ;;  %s739_s29 = sshll.u32 %s10983_s11, 4  ;;  %s740_s29 = int_to_ptr.vmem [resolvable:$true] %s739_s29 }
  0x33   : > { %s15617_s1 = smov 64   ;;  %s15619_s4 = smov 4  }
  0x34   : > { %p11207_p12 = pnand %p9892_p9, %p9848_p11  ;;  %s15868_s17 = sld [smem:[#allocation112_spill]] }
  0x35   : > { %s10987_s10 = smov [#allocation11]   ;;  %s15869_s20 = sld [smem:[#allocation113_spill]] }
  0x36   : > { %s737_s0 = sshll.u32 %s15865_s6, 4  ;;  %s10986_s6 = smov [#allocation8]   ;;  %s738_s0 = int_to_ptr.hbm [resolvable:$true] %s737_s0 }
  0x37   : > { %s770_s8 = sshll.u32 %s15867_s13, 4  ;;  %s772_s11 = sshll.u32 %s10986_s6, 4  ;;  %s771_s8 = int_to_ptr.hbm [resolvable:$true] %s770_s8  ;;  %s773_s11 = int_to_ptr.vmem [resolvable:$true] %s772_s11 }
  0x38   : > { %9854 = dma.hbm_to_vmem [thread:$0]  (!%p11207_p12), %s738_s0, 256, %s740_s29, [#allocation6], %s15617_s1, %s15617_s1, %s15619_s4  }
  0x39   : > { %9860 = dma.hbm_to_vmem [thread:$0]  (!%p11207_p12), %s771_s8, 64, %s773_s11, [#allocation9]  }
  0x3a   : > { %s801_s26 = sshll.u32 %s15868_s17, 4  ;;  %s803_s7 = sshll.u32 %s10987_s10, 4  ;;  %s802_s26 = int_to_ptr.hbm [resolvable:$true] %s801_s26  ;;  %s804_s7 = int_to_ptr.vmem [resolvable:$true] %s803_s7 }
  0x3b   : > { %s830_s2 = sshll.u32 %s15869_s20, 4  ;;  %s10988_s29 = smov 16   ;;  %s831_s2 = int_to_ptr.hbm [resolvable:$true] %s830_s2 }
  0x3c   : > { %s10989_s0 = smov 1   ;;  %s10990_s28 = smov [#allocation14]  }
  0x3d   : > { %9866 = dma.hbm_to_vmem [thread:$0]  (!%p11207_p12), %s802_s26, 64, %s804_s7, [#allocation12], %s10988_s29, %s10988_s29, %s10989_s0  }
  0x3e   : > { %s832_s30 = sshll.u32 %s10990_s28, 4  ;;  %s859_s11 = sshll.u32 %s15599_s22, 4  ;;  %s833_s30 = int_to_ptr.vmem [resolvable:$true] %s832_s30  ;;  %s860_s11 = int_to_ptr.hbm [resolvable:$true] %s859_s11 }
  0x3f   : > { %9872 = dma.hbm_to_vmem [thread:$0]  (!%p11207_p12), %s831_s2, 64, %s833_s30, [#allocation15], %s10988_s29, %s10988_s29, %s10989_s0  }
  0x40   : > { %s15870_s10 = sld [smem:[#allocation103_spill]]  ;;  %s10991_s26 = smov [#allocation17]  }
  0x41   : > { %s861_s7 = sshll.u32 %s10991_s26, 4  ;;  %s10992_s28 = smov [#allocation2]   ;;  %s862_s7 = int_to_ptr.vmem [resolvable:$true] %s861_s7 }
  0x42   : > { %9878 = dma.hbm_to_vmem [thread:$0]  (!%p11207_p12), %s860_s11, 16, %s862_s7, [#allocation18]  }
  0x43   : > { %s725_s6 = sshll.u32 %s10992_s28, 4  ;;  %s15871_s17 = sld [smem:[#allocation107_spill]]  ;;  %s726_s6 = int_to_ptr.vmem [resolvable:$true] %s725_s6 }
  0x44   : > { %s15872_s15 = sld [smem:[#allocation111_spill]]  ;;  %s10993_s27 = smov [#allocation7]  }
  0x45   : > { %s10994_s11 = smov [#allocation10]   ;;  %s15874_s28 = smov 64  }
  0x46   : > { %s723_s1 = sshll.u32 %s15870_s10, 4  ;;  %s757_s10 = sshll.u32 %s10993_s27, 4  ;;  %s724_s1 = int_to_ptr.hbm [resolvable:$true] %s723_s1  ;;  %s758_s10 = int_to_ptr.vmem [resolvable:$true] %s757_s10 }
  0x47   : > { %9851 = dma.hbm_to_vmem [thread:$0]  (!%p11207_p12), %s724_s1, 32, %s726_s6, [#allocation3]  }
  0x48   : > { %s786_s26 = sshll.u32 %s10994_s11, 4  ;;  %s15873_s1 = smov 4   ;;  %s787_s26 = int_to_ptr.vmem [resolvable:$true] %s786_s26 }
  0x49   : > { %s755_s20 = sshll.u32 %s15871_s17, 4  ;;  %s816_s17 = sshll.u32 %s15595_s18, 4  ;;  %s756_s20 = int_to_ptr.hbm [resolvable:$true] %s755_s20  ;;  %s817_s17 = int_to_ptr.hbm [resolvable:$true] %s816_s17 }
  0x4a   : > { %s784_s13 = sshll.u32 %s15872_s15, 4  ;;  %s844_s2 = sshll.u32 %s15598_s21, 4  ;;  %s785_s13 = int_to_ptr.hbm [resolvable:$true] %s784_s13  ;;  %s845_s2 = int_to_ptr.hbm [resolvable:$true] %s844_s2 }
  0x4b   : > { %9857 = dma.hbm_to_vmem [thread:$0]  (!%p11207_p12), %s756_s20, 64, %s758_s10, [#allocation6]  }
  0x4c   : > { %9863 = dma.hbm_to_vmem [thread:$0]  (!%p11207_p12), %s785_s13, 256, %s787_s26, [#allocation9], %s15874_s28, %s15874_s28, %s15873_s1  }
  0x4d   : > { %s10995_s30 = smov [#allocation13]   ;;  %s10996_s27 = smov [#allocation16]  }
  0x4e   : > { %s818_s20 = sshll.u32 %s10995_s30, 4  ;;  %s846_s10 = sshll.u32 %s10996_s27, 4  ;;  %s819_s20 = int_to_ptr.vmem [resolvable:$true] %s818_s20  ;;  %s847_s10 = int_to_ptr.vmem [resolvable:$true] %s846_s10 }
  0x4f   : > { %9869 = dma.hbm_to_vmem [thread:$0]  (!%p11207_p12), %s817_s17, 16, %s819_s20, [#allocation12]  }
  0x50   : > { %s870_s7 = sshll.u32 %s15600_s23, 4  ;;  %s887_s6 = sshll.u32 %s15602_s25, 4  ;;  %s871_s7 = int_to_ptr.hbm [resolvable:$true] %s870_s7  ;;  %s888_s6 = int_to_ptr.hbm [resolvable:$true] %s887_s6 }
  0x51   : > { %9875 = dma.hbm_to_vmem [thread:$0]  (!%p11207_p12), %s845_s2, 64, %s847_s10, [#allocation15], %s10988_s29, %s10988_s29, %s10989_s0  }
  0x52   : > { %s10997_s8 = smov [#allocation19]   ;;  %s10998_s30 = smov [#allocation20]  }
  0x53   : > { %s872_s17 = sshll.u32 %s10997_s8, 4  ;;  %s889_s20 = sshll.u32 %s10998_s30, 4  ;;  %s873_s17 = int_to_ptr.vmem [resolvable:$true] %s872_s17  ;;  %s890_s20 = int_to_ptr.vmem [resolvable:$true] %s889_s20 }
  0x54   : > { %9881 = dma.hbm_to_vmem [thread:$0]  (!%p11207_p12), %s871_s7, 256, %s873_s17, [#allocation18], %s15874_s28, %s15874_s28, %s15873_s1  }
  0x55   : > { %9884 = dma.hbm_to_vmem [thread:$0]  (!%p11207_p12), %s888_s6, 256, %s890_s20, [#allocation21], %s15874_s28, %s15874_s28, %s15873_s1  }
  0x56   : > { %970 = sbr.rel (%p11196_p10) target bundleno = 3722 (0xe8a), region = 128 }
  0x5b   : > { %10932 = dma.done.wait (%p9892_p9), [#allocation3], 32  }
  0x5c   : > { %10934 = vsyncadd (%p9892_p9), [#allocation3], 4294967264 }
  0x5d   : > { %10936 = dma.done.wait (%p9892_p9), [#allocation6], 320  }
  0x5e   : > { %10938 = vsyncadd (%p9892_p9), [#allocation6], 4294966976 }
  0x5f   : > { %10940 = dma.done.wait (%p9892_p9), [#allocation9], 320  }
  0x60   : > { %10942 = vsyncadd (%p9892_p9), [#allocation9], 4294966976 }
  0x61   : > { %10944 = dma.done.wait (%p9892_p9), [#allocation12], 80  }
  0x62   : > { %10946 = vsyncadd (%p9892_p9), [#allocation12], 4294967216 }
  0x63   : > { %10948 = dma.done.wait (%p9892_p9), [#allocation15], 128  }
  0x64   : > { %10950 = vsyncadd (%p9892_p9), [#allocation15], 4294967168 }
  0x65   : > { %10952 = dma.done.wait (%p9892_p9), [#allocation18], 272  }
  0x66   : > { %10954 = vsyncadd (%p9892_p9), [#allocation18], 4294967024 }
  0x67   : > { %10956 = dma.done.wait (%p9892_p9), [#allocation21], 256  }
  0x68   : > { %10958 = vsyncadd (%p9892_p9), [#allocation21], 4294967040  ;;  %s9057_s9 = sshll.u32 %s11168_s3, 5  ;;  %vm1392_vm0 = vcmask 1041408   ;;  %s15875_s1 = sld [smem:[#allocation97_spill]]  ;;  %vm1757_vm1 = vcmask 1043456  }
  0x69   : > { %p1142_p13 = scmp.lt.s32.totalorder %s9057_s9, 63  ;;  %v1258_v0 = vld [vmem:[#allocation2] sm:$0x3]  ;;  %v1691_v4 = vld [vmem:[#allocation7] sm:$0xf]  ;;  %vm1343_vm2 = vcmask 31744  }
  0x6a   : > { %v1394_v1 = vsel %vm1392_vm0, %v1258_v0, 0  ;;  %v1759_v5 = vsel %vm1757_vm1, %v1691_v4, 0  ;;  %s9055_s2 = sshll.u32 %s11168_s3, 4  ;;  %s15876_s4 = sld [smem:[#allocation96_spill]]  ;;  %vm1732_vm3 = vcmask 64512   ;;  %v9655_v18 = vld [vmem:[#allocation5 + $0x8] sm:$0xff] }
  0x6b   : > { %s16314_s9 = smov (!%p1142_p13, %s9057_s9), 63  ;;  %1403 = vmatpush.bf16.msra.mxu0 %v1394_v1  ;;  %9787 = vmatpush.bf16.msra.mxu2 %v1394_v1  ;;  %p1136_p0 = scmp.lt.s32.totalorder %s9055_s2, 31  ;;  %v9654_v19 = vld [vmem:[#allocation5] sm:$0xff]  ;;  %vm1553_vm4 = vcmask 261120   ;;  %vm2285_vm5 = vcmask 523264  }
  0x6c   : > { %s9058_s12 = sshll.u32 %s16314_s9, 2  ;;  %1608 = vmatpush.bf16.msra.mxu1 %v9655_v18  ;;  %s15877_s6 = sld [smem:[#allocation104_spill]] }
  0x6d   : > { %s16316_s2 = smov (!%p1136_p0, %s9055_s2), 31  ;;  %s15878_s30 = sld [smem:[#allocation98_spill]] }
  0x6e   : > { %s11328_s28 = scalar_lea.vmem %s15875_s1, %s9058_s12  ;;  %s9056_s27 = sshll.u32 %s16316_s2, 2 }
  0x6f   : > { %v9638_v2 = vld [vmem:[%s11328_s28] sm:$0xff]  ;;  %v9652_v3 = vld [vmem:[%s11328_s28 + $0x70] sm:$0xff]  ;;  %1768 = vmatpush.bf16.msrb.mxu2 %v1759_v5  ;;  %v9639_v6 = vld [vmem:[%s11328_s28 + $0x8] sm:$0xff]  ;;  %s15879_s29 = sld [smem:[#allocation106_spill]]  ;;  %s9629_s0 = sshll.u32 %s16316_s2, 3 }
  0x70   : > { %9133 = vmatmul.msk.bf16.vlgmr.msra.gmra.mxu0 %vm1343_vm2, %v9638_v2  ;;  %9147 = vmatmul.msk.bf16.vlgmr.msra.gmra.mxu2 %vm1343_vm2, %v9652_v3  ;;  %v9653_v7 = vld [vmem:[%s11328_s28 + $0x78] sm:$0xff]  ;;  %s11348_s7 = scalar_lea.vmem %s15876_s4, %s9056_s27  ;;  %v9640_v8 = vld [vmem:[%s11328_s28 + $0x10] sm:$0xff]  ;;  %v9642_v12 = vld [vmem:[%s11328_s28 + $0x20] sm:$0xff]  ;;  %s15880_s10 = sld [smem:[#allocation99_spill]] }
  0x71   : > { %v11352_v9 = vld [vmem:[%s11348_s7] sm:$0xff]  ;;  %v9641_v10 = vld [vmem:[%s11328_s28 + $0x18] sm:$0xff]  ;;  %v11359_v11 = vld [vmem:[%s11348_s7 + $0x8] sm:$0xff]  ;;  %1609 = vmatpush.bf16.msra.mxu1 %v9654_v19  ;;  %s15881_s13 = sld [smem:[#allocation100_spill]]  ;;  %p1172_p1 = scmp.lt.s32.totalorder %s11168_s3, 1 }
  0x72   : > { %v11366_v13 = vld [vmem:[%s11348_s7 + $0x10] sm:$0xff]  ;;  %v9643_v14 = vld [vmem:[%s11328_s28 + $0x28] sm:$0xff]  ;;  %v11373_v15 = vld [vmem:[%s11348_s7 + $0x18] sm:$0xff]  ;;  %s15882_s17 = sld [smem:[#allocation108_spill]] }
  0x73   : > { %v9644_v16 = vld [vmem:[%s11328_s28 + $0x30] sm:$0xff]  ;;  %v11380_v17 = vld [vmem:[%s11348_s7 + $0x20] sm:$0xff]  ;;  %v9645_v20 = vld [vmem:[%s11328_s28 + $0x38] sm:$0xff]  ;;  %s11485_s20 = scalar_lea.vmem %s15878_s30, %s9058_s12  ;;  %s15883_s14 = sld [smem:[#allocation110_spill]] }
  0x74   : > { %v11387_v21 = vld [vmem:[%s11348_s7 + $0x28] sm:$0xff]  ;;  %v9646_v22 = vld [vmem:[%s11328_s28 + $0x40] sm:$0xff]  ;;  %v11394_v23 = vld [vmem:[%s11348_s7 + $0x30] sm:$0xff]  ;;  %s1173_s8 = scalar_select %p1172_p1, %s11168_s3, 1 }
  0x75   : > { %v11399_v25 = vld [vmem:[%s15877_s6] ss:$0 sm:$0xff]  ;;  %v9647_v34 = vld [vmem:[%s11328_s28 + $0x48] sm:$0xff]  ;;  %v11413_v35 = vld [vmem:[%s11348_s7 + $0x38] sm:$0xff]  ;;  %s15954_s7 = sld [smem:[#allocation101_spill]] }
  0x76   : > { %v9648_v45 = vld [vmem:[%s11328_s28 + $0x50] sm:$0xff]  ;;  %v9649_v55 = vld [vmem:[%s11328_s28 + $0x58] sm:$0xff]  ;;  %v9650_v1 = vld [vmem:[%s11328_s28 + $0x60] sm:$0xff]  ;;  %s11620_s11 = scalar_lea.vmem %s15880_s10, %s9629_s0  ;;  %s16301_s10 = sld [smem:[#allocation115_spill]] }
  0x77   : > { %s11687_s26 = scalar_lea.vmem %s15881_s13, %s9629_s0  ;;  %s9700_s0 = sshll.u32 %s11168_s3, 6 }
  0x7b   : > { %s12580_s13 = scalar_lea.vmem %s15954_s7, %s9056_s27  ;;  %s15475_s7 = sand.u32 1, %s10973_s5  }
  0x7c   : > { %s9053_s27 = sshll.u32 %s15475_s7, 6  ;;  %s8723_s4 = scalar_lea.hbm %s16301_s10, %s9700_s0 }
  0x7d   : > { %s15488_s6 = scalar_lea.vmem [#allocation22], %s9053_s27  ;;  %s8707_s2 = scalar_lea.sflag [#allocation4], %s15475_s7 }
  0x80   : > { %9134 = vmatmul.msk.bf16.gmra.mxu0 %vm1343_vm2, %v9639_v6  ;;  %9148 = vmatmul.msk.bf16.gmra.mxu2 %vm1343_vm2, %v9653_v7 }
  0x90   : > { %9135 = vmatmul.msk.bf16.gmra.mxu0 %vm1343_vm2, %v9640_v8  ;;  %9205 = vmatmul.msk.bf16.vlgmr.msrb.gmra.mxu2 %vm1732_vm3, %v11352_v9 }
  0xa0   : > { %9136 = vmatmul.msk.bf16.gmra.mxu0 %vm1343_vm2, %v9641_v10  ;;  %9206 = vmatmul.msk.bf16.gmra.mxu2 %vm1732_vm3, %v11359_v11 }
  0xb0   : > { %9137 = vmatmul.msk.bf16.gmra.mxu0 %vm1343_vm2, %v9642_v12  ;;  %9207 = vmatmul.msk.bf16.gmra.mxu2 %vm1732_vm3, %v11366_v13 }
  0xc0   : > { %9138 = vmatmul.msk.bf16.gmra.mxu0 %vm1343_vm2, %v9643_v14  ;;  %9208 = vmatmul.msk.bf16.gmra.mxu2 %vm1732_vm3, %v11373_v15  ;;  %v9651_v14 = vld [vmem:[%s11328_s28 + $0x68] sm:$0xff] }
  0xd0   : > { %9139 = vmatmul.msk.bf16.gmra.mxu0 %vm1343_vm2, %v9644_v16  ;;  %9209 = vmatmul.msk.bf16.gmra.mxu2 %vm1732_vm3, %v11380_v17 }
  0xe0   : > { %9140 = vmatmul.msk.bf16.gmra.mxu0 %vm1343_vm2, %v9645_v20  ;;  %9210 = vmatmul.msk.bf16.gmra.mxu2 %vm1732_vm3, %v11387_v21 }
  0xed   : > { %v1405_v24 = vpop.f32.mrf.mxu0 }
  0xee   : > { %v1406_v26 = vadd.f32 %v11399_v25, %v1405_v24 }
  0xf0   : > { %9141 = vmatmul.msk.bf16.gmra.mxu0 %vm1343_vm2, %v9646_v22  ;;  %9211 = vmatmul.msk.bf16.gmra.mxu2 %vm1732_vm3, %v11394_v23  ;;  %v1485_v29 = vmax.f32 %v1406_v26, 0.0 }
  0xf3   : > { %v11405_v27 = vpop.f32.mrf.mxu2 }
  0xf5   : > { %v1407_v28 = vpop.f32.mrf.mxu0 }
  0xf6   : > { %v1408_v30 = vadd.f32 %v11399_v25, %v1407_v28 }
  0xf8   : > { %v1486_v31 = vmax.f32 %v1408_v30, 0.0 }
  0xfa   : > { %v1517_v32 = vpack.c.bf16 %v1486_v31, %v1485_v29 }
  0xfb   : > { %v11408_v33 = vpop.f32.mrf.mxu2 }
  0xfc   : > { %9157 = vmatmul.msk.bf16.vlgmr.msra.gmra.mxu1 %vm1553_vm4, %v1517_v32 }
  0xfd   : > { %v1410_v36 = vpop.f32.mrf.mxu0 }
  0xfe   : > { %v1411_v37 = vadd.f32 %v11399_v25, %v1410_v36 }
 0x100   : > { %9142 = vmatmul.msk.bf16.gmra.mxu0 %vm1343_vm2, %v9647_v34  ;;  %9212 = vmatmul.msk.bf16.gmra.mxu2 %vm1732_vm3, %v11413_v35  ;;  %v1487_v40 = vmax.f32 %v1411_v37, 0.0 }
 0x103   : > { %v11419_v38 = vpop.f32.mrf.mxu2 }
 0x105   : > { %v1412_v39 = vpop.f32.mrf.mxu0 }
 0x106   : > { %v1413_v41 = vadd.f32 %v11399_v25, %v1412_v39 }
 0x108   : > { %v1488_v42 = vmax.f32 %v1413_v41, 0.0 }
 0x10a   : > { %v1518_v43 = vpack.c.bf16 %v1488_v42, %v1487_v40 }
 0x10b   : > { %v11422_v44 = vpop.f32.mrf.mxu2 }
 0x10c   : > { %9158 = vmatmul.msk.bf16.gmra.mxu1 %vm1553_vm4, %v1518_v43 }
 0x10d   : > { %v1415_v46 = vpop.f32.mrf.mxu0 }
 0x10e   : > { %v1416_v47 = vadd.f32 %v11399_v25, %v1415_v46 }
 0x110   : > { %9143 = vmatmul.msk.bf16.gmra.mxu0 %vm1343_vm2, %v9648_v45  ;;  %v1489_v50 = vmax.f32 %v1416_v47, 0.0 }
 0x113   : > { %v11428_v48 = vpop.f32.mrf.mxu2 }
 0x115   : > { %v1417_v49 = vpop.f32.mrf.mxu0 }
 0x116   : > { %v1418_v51 = vadd.f32 %v11399_v25, %v1417_v49 }
 0x118   : > { %v1490_v52 = vmax.f32 %v1418_v51, 0.0 }
 0x11a   : > { %v1519_v53 = vpack.c.bf16 %v1490_v52, %v1489_v50 }
 0x11b   : > { %v11431_v54 = vpop.f32.mrf.mxu2 }
 0x11c   : > { %9159 = vmatmul.msk.bf16.gmra.mxu1 %vm1553_vm4, %v1519_v53 }
 0x11d   : > { %v1420_v56 = vpop.f32.mrf.mxu0 }
 0x11e   : > { %v1421_v57 = vadd.f32 %v11399_v25, %v1420_v56 }
 0x120   : > { %9144 = vmatmul.msk.bf16.gmra.mxu0 %vm1343_vm2, %v9649_v55  ;;  %v1491_v60 = vmax.f32 %v1421_v57, 0.0 }
 0x123   : > { %v11437_v58 = vpop.f32.mrf.mxu2 }
 0x125   : > { %v1422_v59 = vpop.f32.mrf.mxu0 }
 0x126   : > { %v1423_v61 = vadd.f32 %v11399_v25, %v1422_v59 }
 0x128   : > { %v1492_v62 = vmax.f32 %v1423_v61, 0.0 }
 0x12a   : > { %v1520_v63 = vpack.c.bf16 %v1492_v62, %v1491_v60 }
 0x12b   : > { %v11440_v0 = vpop.f32.mrf.mxu2 }
 0x12c   : > { %9160 = vmatmul.msk.bf16.gmra.mxu1 %vm1553_vm4, %v1520_v63 }
 0x12d   : > { %v1425_v2 = vpop.f32.mrf.mxu0 }
 0x12e   : > { %v1426_v3 = vadd.f32 %v11399_v25, %v1425_v2 }
 0x130   : > { %9145 = vmatmul.msk.bf16.gmra.mxu0 %vm1343_vm2, %v9650_v1  ;;  %v1493_v6 = vmax.f32 %v1426_v3, 0.0 }
 0x133   : > { %v11446_v4 = vpop.f32.mrf.mxu2 }
 0x135   : > { %v1427_v5 = vpop.f32.mrf.mxu0 }
 0x136   : > { %v1428_v7 = vadd.f32 %v11399_v25, %v1427_v5 }
 0x138   : > { %v1494_v8 = vmax.f32 %v1428_v7, 0.0 }
 0x13a   : > { %v1521_v10 = vpack.c.bf16 %v1494_v8, %v1493_v6 }
 0x13b   : > { %v11449_v12 = vpop.f32.mrf.mxu2 }
 0x13c   : > { %9161 = vmatmul.msk.bf16.gmra.mxu1 %vm1553_vm4, %v1521_v10 }
 0x13d   : > { %v1430_v16 = vpop.f32.mrf.mxu0 }
 0x13e   : > { %v1431_v18 = vadd.f32 %v11399_v25, %v1430_v16 }
 0x140   : > { %9146 = vmatmul.msk.bf16.gmra.mxu0 %vm1343_vm2, %v9651_v14  ;;  %v1495_v22 = vmax.f32 %v1431_v18, 0.0 }
 0x143   : > { %v11455_v19 = vpop.f32.mrf.mxu2 }
 0x145   : > { %v1432_v20 = vpop.f32.mrf.mxu0 }
 0x146   : > { %v1433_v24 = vadd.f32 %v11399_v25, %v1432_v20 }
 0x148   : > { %v1496_v26 = vmax.f32 %v1433_v24, 0.0 }
 0x14a   : > { %v1522_v28 = vpack.c.bf16 %v1496_v26, %v1495_v22 }
 0x14b   : > { %v1787_v29 = vpop.f32.mrf.mxu2 }
 0x14c   : > { %9162 = vmatmul.msk.bf16.gmra.mxu1 %vm1553_vm4, %v1522_v28 }
 0x14d   : > { %v1435_v30 = vpop.f32.mrf.mxu0 }
 0x14e   : > { %v1436_v31 = vadd.f32 %v11399_v25, %v1435_v30 }
 0x150   : > { %v1497_v36 = vmax.f32 %v1436_v31, 0.0 }
 0x153   : > { %v1790_v32 = vpop.f32.mrf.mxu2 }
 0x155   : > { %v1437_v34 = vpop.f32.mrf.mxu0 }
 0x156   : > { %v1438_v37 = vadd.f32 %v11399_v25, %v1437_v34 }
 0x158   : > { %v1498_v39 = vmax.f32 %v1438_v37, 0.0  ;;  %v1845_v37 = vpack.c.bf16 %v1787_v29, %v11455_v19 }
 0x15a   : > { %v1523_v40 = vpack.c.bf16 %v1498_v39, %v1497_v36 }
 0x15b   : > { %v1792_v41 = vpop.f32.mrf.mxu2 }
 0x15c   : > { %9163 = vmatmul.msk.bf16.gmra.mxu1 %vm1553_vm4, %v1523_v40  ;;  %v1846_v34 = vpack.c.bf16 %v1792_v41, %v1790_v32  ;;  %v1844_v40 = vpack.c.bf16 %v11449_v12, %v11446_v4  ;;  %v1843_v32 = vpack.c.bf16 %v11440_v0, %v11437_v58  ;;  %v1842_v58 = vpack.c.bf16 %v11431_v54, %v11428_v48  ;;  %v9656_v0 = vld [vmem:[%s11485_s20] sm:$0xff] }
 0x15d   : > { %v1440_v42 = vpop.f32.mrf.mxu0 }
 0x15e   : > { %v1441_v43 = vadd.f32 %v11399_v25, %v1440_v42 }
 0x160   : > { %v1499_v47 = vmax.f32 %v1441_v43, 0.0  ;;  %v9660_v43 = vld [vmem:[%s11485_s20 + $0x20] sm:$0xff] }
 0x163   : > { %v1795_v45 = vpop.f32.mrf.mxu2 }
 0x165   : > { %v1442_v46 = vpop.f32.mrf.mxu0 }
 0x166   : > { %v1443_v49 = vadd.f32 %v11399_v25, %v1442_v46 }
 0x168   : > { %v1500_v50 = vmax.f32 %v1443_v49, 0.0 }
 0x16a   : > { %v1524_v51 = vpack.c.bf16 %v1500_v50, %v1499_v47 }
 0x16b   : > { %v1797_v52 = vpop.f32.mrf.mxu2 }
 0x16c   : > { %9164 = vmatmul.msk.bf16.gmra.mxu1 %vm1553_vm4, %v1524_v51  ;;  %v1847_v24 = vpack.c.bf16 %v1797_v52, %v1795_v45  ;;  %v9657_v52 = vld [vmem:[%s11485_s20 + $0x8] sm:$0xff] }
 0x16d   : > { %v1445_v53 = vpop.f32.mrf.mxu0 }
 0x16e   : > { %v1446_v55 = vadd.f32 %v11399_v25, %v1445_v53  ;;  %v9661_v53 = vld [vmem:[%s11485_s20 + $0x28] sm:$0xff] }
 0x170   : > { %v1501_v59 = vmax.f32 %v1446_v55, 0.0 }
 0x173   : > { %v1800_v56 = vpop.f32.mrf.mxu2 }
 0x175   : > { %v1447_v57 = vpop.f32.mrf.mxu0 }
 0x176   : > { %v1448_v60 = vadd.f32 %v11399_v25, %v1447_v57 }
 0x178   : > { %v1502_v61 = vmax.f32 %v1448_v60, 0.0 }
 0x179   : > { %v11487_v19 = vpop.f32.mrf.mxu1 }
 0x17a   : > { %v1525_v62 = vpack.c.bf16 %v1502_v61, %v1501_v59 }
 0x17b   : > { %v1802_v63 = vpop.f32.mrf.mxu2 }
 0x17c   : > { %9165 = vmatmul.msk.bf16.gmra.mxu1 %vm1553_vm4, %v1525_v62  ;;  %v1848_v20 = vpack.c.bf16 %v1802_v63, %v1800_v56 }
 0x17d   : > { %v1450_v1 = vpop.f32.mrf.mxu0 }
 0x17e   : > { %v1451_v2 = vadd.f32 %v11399_v25, %v1450_v1 }
 0x180   : > { %v1503_v6 = vmax.f32 %v1451_v2, 0.0  ;;  %v9658_v2 = vld [vmem:[%s11485_s20 + $0x10] sm:$0xff] }
 0x181   : > { %v11495_v47 = vpop.f32.mrf.mxu1 }
 0x183   : > { %v1805_v3 = vpop.f32.mrf.mxu2 }
 0x185   : > { %v1452_v5 = vpop.f32.mrf.mxu0 }
 0x186   : > { %v1453_v7 = vadd.f32 %v11399_v25, %v1452_v5 }
 0x188   : > { %v1504_v8 = vmax.f32 %v1453_v7, 0.0  ;;  %v1478_v7 = vadd.f32 %v11399_v25, %v11408_v33 }
 0x189   : > { %v11501_v55 = vpop.f32.mrf.mxu1 }
 0x18a   : > { %v1526_v10 = vpack.c.bf16 %v1504_v8, %v1503_v6  ;;  %v1476_v8 = vadd.f32 %v11399_v25, %v11405_v27  ;;  %v1481_v27 = vadd.f32 %v11399_v25, %v11419_v38  ;;  %v11540_v38 = vld [vmem:[%s15879_s29] ss:$0 sm:$0xff]  ;;  %s8724_s29 = sshll.u32 %s15488_s6, 4  ;;  %s8725_s29 = int_to_ptr.vmem [resolvable:$true] %s8724_s29 }
 0x18b   : > { %v1807_v14 = vpop.f32.mrf.mxu2 }
 0x18c   : > { %9166 = vmatmul.msk.bf16.gmra.mxu1 %vm1553_vm4, %v1526_v10  ;;  %v1849_v16 = vpack.c.bf16 %v1807_v14, %v1805_v3  ;;  %v9662_v3 = vld [vmem:[%s11485_s20 + $0x30] sm:$0xff]  ;;  %v1514_v10 = vmax.f32 %v1478_v7, 0.0  ;;  %v1513_v14 = vmax.f32 %v1476_v8, 0.0 }
 0x18d   : > { %v1455_v18 = vpop.f32.mrf.mxu0 }
 0x18e   : > { %1946 = vmatpush.bf16.msrb.mxu0 %v1849_v16  ;;  %9788 = vmatpush.bf16.msra.mxu3 %v1849_v16  ;;  %v1456_v22 = vadd.f32 %v11399_v25, %v1455_v18  ;;  %v9659_v18 = vld [vmem:[%s11485_s20 + $0x18] sm:$0xff] }
 0x190   : > { %v1505_v28 = vmax.f32 %v1456_v22, 0.0  ;;  %v1531_v22 = vpack.c.bf16 %v1514_v10, %v1513_v14 }
 0x191   : > { %v11505_v60 = vpop.f32.mrf.mxu1 }
 0x192   : > { %1947 = vmatpush.bf16.msrb.mxu0 %v1848_v20  ;;  %9789 = vmatpush.bf16.msra.mxu3 %v1848_v20  ;;  %v9663_v20 = vld [vmem:[%s11485_s20 + $0x38] sm:$0xff] }
 0x195   : > { %v1457_v26 = vpop.f32.mrf.mxu0 }
 0x196   : > { %v1458_v30 = vadd.f32 %v11399_v25, %v1457_v26  ;;  %1948 = vmatpush.bf16.msrb.mxu0 %v1847_v24  ;;  %9790 = vmatpush.bf16.msra.mxu3 %v1847_v24  ;;  %v1483_v24 = vadd.f32 %v11399_v25, %v11422_v44  ;;  %v9666_v44 = vld [vmem:[%s11485_s20 + $0x50] sm:$0xff] }
 0x198   : > { %v1506_v31 = vmax.f32 %v1458_v30, 0.0  ;;  %v1516_v26 = vmax.f32 %v1483_v24, 0.0  ;;  %v9664_v30 = vld [vmem:[%s11485_s20 + $0x40] sm:$0xff]  ;;  %v9671_v24 = vld [vmem:[%s11485_s20 + $0x78] sm:$0xff] }
 0x199   : > { %v11511_v6 = vpop.f32.mrf.mxu1 }
 0x19a   : > { %1949 = vmatpush.bf16.msrb.mxu0 %v1846_v34  ;;  %9791 = vmatpush.bf16.msra.mxu3 %v1846_v34  ;;  %v1527_v36 = vpack.c.bf16 %v1506_v31, %v1505_v28  ;;  %v1515_v28 = vmax.f32 %v1481_v27, 0.0 }
 0x19c   : > { %9167 = vmatmul.msk.bf16.gmra.mxu1 %vm1553_vm4, %v1527_v36  ;;  %v1532_v31 = vpack.c.bf16 %v1516_v26, %v1515_v28  ;;  %v9665_v36 = vld [vmem:[%s11485_s20 + $0x48] sm:$0xff] }
 0x19d   : > { %v1460_v39 = vpop.f32.mrf.mxu0 }
 0x19e   : > { %1950 = vmatpush.bf16.msrb.mxu0 %v1845_v37  ;;  %9792 = vmatpush.bf16.msra.mxu3 %v1845_v37  ;;  %v1461_v42 = vadd.f32 %v11399_v25, %v1460_v39 }
 0x1a0   : > { %v1507_v29 = vmax.f32 %v1461_v42, 0.0  ;;  %v9667_v42 = vld [vmem:[%s11485_s20 + $0x58] sm:$0xff] }
 0x1a1   : > { %v1623_v16 = vpop.f32.mrf.mxu1 }
 0x1a2   : > { %1951 = vmatpush.bf16.msrb.mxu0 %v1844_v40  ;;  %9793 = vmatpush.bf16.msra.mxu3 %v1844_v40 }
 0x1a5   : > { %v1462_v41 = vpop.f32.mrf.mxu0 }
 0x1a6   : > { %v1463_v4 = vadd.f32 %v11399_v25, %v1462_v41  ;;  %1952 = vmatpush.bf16.msrb.mxu0 %v1843_v32  ;;  %9794 = vmatpush.bf16.msra.mxu3 %v1843_v32  ;;  %v1612_v41 = vadd.f32 %v11540_v38, %v11487_v19 }
 0x1a8   : > { %v1508_v12 = vmax.f32 %v1463_v4, 0.0 }
 0x1a9   : > { %v11522_v33 = vpop.f32.mrf.mxu1 }
 0x1aa   : > { %1953 = vmatpush.bf16.msrb.mxu0 %v1842_v58  ;;  %9795 = vmatpush.bf16.msra.mxu3 %v1842_v58  ;;  %v1528_v45 = vpack.c.bf16 %v1508_v12, %v1507_v29  ;;  %v9668_v29 = vld [vmem:[%s11485_s20 + $0x60] sm:$0xff]  ;;  %v1627_v28 = vadd.f32 %v11540_v38, %v11522_v33 }
 0x1ac   : > { %9168 = vmatmul.msk.bf16.gmra.mxu1 %vm1553_vm4, %v1528_v45  ;;  %v1614_v45 = vadd.f32 %v11540_v38, %v11495_v47  ;;  %v1619_v47 = vadd.f32 %v11540_v38, %v11505_v60  ;;  %v1624_v60 = vadd.f32 %v11540_v38, %v1623_v16 }
 0x1ad   : > { %v1465_v46 = vpop.f32.mrf.mxu0  ;;  %1954 = vmatmul.bf16.vlgmr.msrb.gmra.mxu0 %v9656_v0  ;;  %1974 = vmatmul.bf16.vlgmr.msra.gmra.mxu3 %v9660_v43 }
 0x1ae   : > { %v1466_v49 = vadd.f32 %v11399_v25, %v1465_v46 }
 0x1b0   : > { %v1509_v51 = vmax.f32 %v1466_v49, 0.0 }
 0x1b1   : > { %v1628_v34 = vpop.f32.mrf.mxu1 }
 0x1b5   : > { %v1467_v50 = vpop.f32.mrf.mxu0 }
 0x1b6   : > { %v1468_v48 = vadd.f32 %v11399_v25, %v1467_v50 }
 0x1b8   : > { %v1510_v54 = vmax.f32 %v1468_v48, 0.0  ;;  %v9669_v48 = vld [vmem:[%s11485_s20 + $0x68] sm:$0xff] }
 0x1b9   : > { %v1631_v37 = vpop.f32.mrf.mxu1 }
 0x1ba   : > { %v1529_v56 = vpack.c.bf16 %v1510_v54, %v1509_v51  ;;  %v1632_v58 = vadd.f32 %v11540_v38, %v1631_v37 }
 0x1bc   : > { %9169 = vmatmul.msk.bf16.gmra.mxu1 %vm1553_vm4, %v1529_v56  ;;  %v1617_v56 = vadd.f32 %v11540_v38, %v11501_v55  ;;  %v1622_v55 = vadd.f32 %v11540_v38, %v11511_v6 }
 0x1bd   : > { %v1470_v57 = vpop.f32.mrf.mxu0  ;;  %1959 = vmatmul.bf16.gmra.mxu0 %v9657_v52  ;;  %1979 = vmatmul.bf16.gmra.mxu3 %v9661_v53 }
 0x1be   : > { %v1471_v59 = vadd.f32 %v11399_v25, %v1470_v57 }
 0x1c0   : > { %v1511_v62 = vmax.f32 %v1471_v59, 0.0 }
 0x1c1   : > { %v11529_v39 = vpop.f32.mrf.mxu1 }
 0x1c5   : > { %v1472_v61 = vpop.f32.mrf.mxu0 }
 0x1c6   : > { %v1473_v63 = vadd.f32 %v11399_v25, %v1472_v61 }
 0x1c8   : > { %v1512_v1 = vmax.f32 %v1473_v63, 0.0 }
 0x1c9   : > { %v11532_v40 = vpop.f32.mrf.mxu1 }
 0x1ca   : > { %v1530_v5 = vpack.c.bf16 %v1512_v1, %v1511_v62 }
 0x1cc   : > { %9170 = vmatmul.msk.bf16.gmra.mxu1 %vm1553_vm4, %v1530_v5 }
 0x1cd   : > { %1964 = vmatmul.bf16.gmra.mxu0 %v9658_v2  ;;  %1984 = vmatmul.bf16.gmra.mxu3 %v9662_v3  ;;  %v9670_v2 = vld [vmem:[%s11485_s20 + $0x70] sm:$0xff]  ;;  %s16299_s20 = sld [smem:[#allocation102_spill]] }
 0x1d1   : > { %v11535_v25 = vpop.f32.mrf.mxu1 }
 0x1d9   : > { %v1641_v32 = vpop.f32.mrf.mxu1 }
 0x1dc   : > { %9171 = vmatmul.msk.bf16.gmra.mxu1 %vm1553_vm4, %v1531_v22 }
 0x1dd   : > { %1969 = vmatmul.bf16.gmra.mxu0 %v9659_v18  ;;  %1989 = vmatmul.bf16.gmra.mxu3 %v9663_v20 }
 0x1e1   : > { %v1643_v0 = vpop.f32.mrf.mxu1 }
 0x1e9   : > { %v1646_v54 = vpop.f32.mrf.mxu1 }
 0x1ec   : > { %9172 = vmatmul.msk.bf16.gmra.mxu1 %vm1553_vm4, %v1532_v31 }
 0x1ed   : > { %1994 = vmatmul.bf16.gmra.mxu3 %v9664_v30  ;;  %v1629_v30 = vadd.f32 %v11540_v38, %v1628_v34  ;;  %v1639_v34 = vadd.f32 %v11540_v38, %v11535_v25 }
 0x1f1   : > { %v1648_v62 = vpop.f32.mrf.mxu1 }
 0x1f9   : > { %v1651_v5 = vpop.f32.mrf.mxu1 }
 0x1fd   : > { %1999 = vmatmul.bf16.gmra.mxu3 %v9665_v36 }
 0x201   : > { %v11571_v20 = vpop.f32.mrf.mxu1 }
 0x209   : > { %v1656_v31 = vpop.f32.mrf.mxu1 }
 0x20d   : > { %2004 = vmatmul.bf16.gmra.mxu3 %v9666_v44  ;;  %v1647_v44 = vadd.f32 %v11540_v38, %v1646_v54  ;;  %v1637_v54 = vadd.f32 %v11540_v38, %v11532_v40  ;;  %v1657_v40 = vadd.f32 %v11540_v38, %v1656_v31 }
 0x21d   : > { %2009 = vmatmul.bf16.gmra.mxu3 %v9667_v42  ;;  %v1649_v42 = vadd.f32 %v11540_v38, %v1648_v62 }
 0x22a   : > { %v1955_v4 = vpop.f32.mrf.mxu0 }
 0x22b   : > { %v11545_v12 = vmul.f32 %v1955_v4, %v1612_v41 }
 0x22d   : > { %2014 = vmatmul.bf16.gmra.mxu3 %v9668_v29  ;;  %v1644_v29 = vadd.f32 %v11540_v38, %v1643_v0 }
 0x230   : > { %v1975_v43 = vpop.f32.mrf.mxu3 }
 0x231   : > { %v11550_v46 = vmul.f32 %v1975_v43, %v1632_v58  ;;  %v1642_v43 = vadd.f32 %v11540_v38, %v1641_v32  ;;  %v1634_v32 = vadd.f32 %v11540_v38, %v11529_v39 }
 0x232   : > { %v1957_v49 = vpop.f32.mrf.mxu0 }
 0x233   : > { %v11552_v50 = vmul.f32 %v1957_v49, %v1614_v45  ;;  %v11581_v49 = vpop.f32.mrf.mxu1 }
 0x235   : > { %v2083_v19 = vpack.c.bf16 %v11552_v50, %v11545_v12 }
 0x238   : > { %v1977_v51 = vpop.f32.mrf.mxu3 }
 0x23a   : > { %v1960_v52 = vpop.f32.mrf.mxu0 }
 0x23b   : > { %v11561_v59 = vmul.f32 %v1960_v52, %v1617_v56  ;;  %v1652_v52 = vadd.f32 %v11540_v38, %v1651_v5  ;;  %v1661_v25 = vpop.f32.mrf.mxu1 }
 0x23d   : > { %2019 = vmatmul.bf16.gmra.mxu3 %v9669_v48 }
 0x240   : > { %v1980_v53 = vpop.f32.mrf.mxu3 }
 0x242   : > { %v1962_v57 = vpop.f32.mrf.mxu0 }
 0x243   : > { %v11563_v61 = vmul.f32 %v1962_v57, %v1619_v47  ;;  %v2061_v57 = vmul.f32 %v1980_v53, %v1637_v54 }
 0x245   : > { %v2084_v63 = vpack.c.bf16 %v11563_v61, %v11561_v59  ;;  %v2060_v61 = vmul.f32 %v1977_v51, %v1634_v32  ;;  %v1662_v51 = vadd.f32 %v11540_v38, %v1661_v25 }
 0x248   : > { %v1982_v1 = vpop.f32.mrf.mxu3 }
 0x249   : > { %v2062_v56 = vmul.f32 %v1982_v1, %v1639_v34  ;;  %v11596_v1 = vpop.f32.mrf.mxu1 }
 0x24a   : > { %v1965_v3 = vpop.f32.mrf.mxu0 }
 0x24b   : > { %v2055_v10 = vmul.f32 %v1965_v3, %v1622_v55  ;;  %v2088_v62 = vpack.c.bf16 %v2062_v56, %v2061_v57 }
 0x24d   : > { %2024 = vmatmul.bf16.gmra.mxu3 %v9670_v2  ;;  %v2087_v2 = vpack.c.bf16 %v2060_v61, %v11550_v46 }
 0x250   : > { %v1985_v7 = vpop.f32.mrf.mxu3 }
 0x251   : > { %v2063_v48 = vmul.f32 %v1985_v7, %v1642_v43  ;;  %v1666_v46 = vpop.f32.mrf.mxu1 }
 0x252   : > { %v1967_v8 = vpop.f32.mrf.mxu0 }
 0x253   : > { %v2056_v14 = vmul.f32 %v1967_v8, %v1624_v60 }
 0x255   : > { %v2085_v18 = vpack.c.bf16 %v2056_v14, %v2055_v10  ;;  %v1667_v14 = vadd.f32 %v11540_v38, %v1666_v46 }
 0x258   : > { %v1987_v22 = vpop.f32.mrf.mxu3 }
 0x259   : > { %v2064_v45 = vmul.f32 %v1987_v22, %v1644_v29  ;;  %v1668_v60 = vpop.f32.mrf.mxu1 }
 0x25a   : > { %v1970_v27 = vpop.f32.mrf.mxu0 }
 0x25b   : > { %v2057_v36 = vmul.f32 %v1970_v27, %v1627_v28  ;;  %v2089_v0 = vpack.c.bf16 %v2064_v45, %v2063_v48 }
 0x25d   : > { %2029 = vmatmul.bf16.gmra.mxu3 %v9671_v24 }
 0x260   : > { %v1990_v26 = vpop.f32.mrf.mxu3 }
 0x261   : > { %v2065_v4 = vmul.f32 %v1990_v26, %v1647_v44  ;;  %v1671_v10 = vpop.f32.mrf.mxu1 }
 0x262   : > { %v1972_v6 = vpop.f32.mrf.mxu0 }
 0x263   : > { %v2058_v16 = vmul.f32 %v1972_v6, %v1629_v30 }
 0x265   : > { %v2086_v37 = vpack.c.bf16 %v2058_v16, %v2057_v36  ;;  %v2511_v36 = vld [vmem:[#allocation8] sm:$0xf] }
 0x266   : > { %v2513_v16 = vsel %vm1757_vm1, %v2511_v36, 0  ;;  %v9676_v36 = vld [vmem:[%s11620_s11 + $0x24] sm:$0xf] }
 0x267   : > { %2522 = vmatpush.bf16.msrb.mxu1 %v2513_v16  ;;  %v9297_v16 = vld [vmem:[%s11620_s11 + $0x28] sm:$0xf0] }
 0x268   : > { %v1992_v41 = vpop.f32.mrf.mxu3 }
 0x269   : > { %v2066_v58 = vmul.f32 %v1992_v41, %v1649_v42  ;;  %v1673_v22 = vpop.f32.mrf.mxu1  ;;  %v9279_v42 = vld [vmem:[%s11620_s11] sm:$0xf]  ;;  %v9673_v41 = vld [vmem:[%s11620_s11 + $0x4] sm:$0xf0] }
 0x26a   : > { %9357 = vmatmul.msk.bf16.vlgmr.msrb.gmra.mxu1 %vm1732_vm3, %v11352_v9  ;;  %v9280_v29 = vor.u32 %v9673_v41, %v9279_v42  ;;  %v9678_v41 = vld [vmem:[%s11620_s11 + $0x34] sm:$0xf] }
 0x26b   : > { %v2090_v33 = vpack.c.bf16 %v2066_v58, %v2065_v4 }
 0x26d   : > { %2179 = vmatpush.bf16.msra.mxu2 %v2090_v33 }
 0x270   : > { %v1995_v47 = vpop.f32.mrf.mxu3 }
 0x271   : > { %v11590_v59 = vmul.f32 %v1995_v47, %v1652_v52  ;;  %2180 = vmatpush.bf16.msra.mxu2 %v2089_v0  ;;  %v9287_v0 = vld [vmem:[%s11620_s11 + $0x10] sm:$0xf]  ;;  %v9675_v47 = vld [vmem:[%s11620_s11 + $0x14] sm:$0xf0] }
 0x272   : > { %v9288_v61 = vor.u32 %v9675_v47, %v9287_v0  ;;  %v9682_v0 = vld [vmem:[%s11620_s11 + $0x54] sm:$0xf] }
 0x275   : > { %2181 = vmatpush.bf16.msra.mxu2 %v2088_v62 }
 0x278   : > { %v11593_v3 = vpop.f32.mrf.mxu3 }
 0x279   : > { %2182 = vmatpush.bf16.msra.mxu2 %v2087_v2 }
 0x27a   : > { %9358 = vmatmul.msk.bf16.gmra.mxu1 %vm1732_vm3, %v11359_v11 }
 0x27d   : > { %2183 = vmatpush.bf16.msra.mxu2 %v2086_v37 }
 0x280   : > { %v2000_v5 = vpop.f32.mrf.mxu3 }
 0x281   : > { %v11598_v39 = vmul.f32 %v2000_v5, %v1657_v40  ;;  %2184 = vmatpush.bf16.msra.mxu2 %v2085_v18  ;;  %v1674_v40 = vadd.f32 %v11540_v38, %v1673_v22  ;;  %v1672_v5 = vadd.f32 %v11540_v38, %v1671_v10 }
 0x285   : > { %2185 = vmatpush.bf16.msra.mxu2 %v2084_v63 }
 0x288   : > { %v11600_v53 = vpop.f32.mrf.mxu3 }
 0x289   : > { %2186 = vmatpush.bf16.msra.mxu2 %v2083_v19  ;;  %v1676_v19 = vpop.f32.mrf.mxu1 }
 0x28a   : > { %v1677_v62 = vadd.f32 %v11540_v38, %v1676_v19  ;;  %v1664_v19 = vadd.f32 %v11540_v38, %v11596_v1  ;;  %9359 = vmatmul.msk.bf16.gmra.mxu1 %vm1732_vm3, %v11366_v13  ;;  %v1654_v13 = vadd.f32 %v11540_v38, %v11571_v20  ;;  %v9679_v20 = vld [vmem:[%s11620_s11 + $0x34] sm:$0xf0] }
 0x28c   : > { %2187 = vmatmul.bf16.vlgmr.msra.gmra.mxu2 %v9280_v29  ;;  %v9305_v29 = vld [vmem:[%s11620_s11 + $0x38] sm:$0xf0] }
 0x290   : > { %v2005_v7 = vpop.f32.mrf.mxu3 }
 0x291   : > { %v11606_v55 = vmul.f32 %v2005_v7, %v1662_v51  ;;  %v1678_v27 = vpop.f32.mrf.mxu1  ;;  %v1669_v7 = vadd.f32 %v11540_v38, %v1668_v60  ;;  %v1659_v60 = vadd.f32 %v11540_v38, %v11581_v49  ;;  %v9672_v49 = vld [vmem:[%s11620_s11 + $0x4] sm:$0xf] }
 0x292   : > { %v1679_v32 = vadd.f32 %v11540_v38, %v1678_v27 }
 0x293   : > { %v2070_v1 = vmul.f32 %v11600_v53, %v1659_v60  ;;  %v2402_v60 = vld [vmem:[%s11687_s26 + $0x18] sm:$0xff] }
 0x298   : > { %v11608_v8 = vpop.f32.mrf.mxu3 }
 0x299   : > { %v1681_v28 = vpop.f32.mrf.mxu1  ;;  %v2072_v22 = vmul.f32 %v11608_v8, %v1664_v19  ;;  %v2068_v8 = vmul.f32 %v11593_v3, %v1654_v13  ;;  %v2411_v19 = vld [vmem:[%s11687_s26 + $0x60] sm:$0xff] }
 0x29a   : > { %v1682_v9 = vadd.f32 %v11540_v38, %v1681_v28  ;;  %v9281_v28 = vld [vmem:[%s11620_s11 + $0x8] sm:$0xf0]  ;;  %9360 = vmatmul.msk.bf16.gmra.mxu1 %vm1732_vm3, %v11373_v15 }
 0x29b   : > { %v2091_v53 = vpack.c.bf16 %v2068_v8, %v11590_v59  ;;  %v9311_v59 = vld [vmem:[%s11620_s11 + $0x40] sm:$0xf] }
 0x29c   : > { %2192 = vmatmul.bf16.gmra.mxu2 %v9288_v61  ;;  %v2282_v61 = vld [vmem:[%s15882_s17 + $0x28] sm:$0xff] }
 0x2a0   : > { %v2010_v63 = vpop.f32.mrf.mxu3 }
 0x2a1   : > { %v11611_v18 = vmul.f32 %v2010_v63, %v1667_v14  ;;  %v1683_v31 = vpop.f32.mrf.mxu1 }
 0x2a2   : > { %v1684_v34 = vadd.f32 %v11540_v38, %v1683_v31 }
 0x2a8   : > { %v2012_v12 = vpop.f32.mrf.mxu3 }
 0x2a9   : > { %v1686_v44 = vpop.f32.mrf.mxu1  ;;  %v2074_v63 = vmul.f32 %v2012_v12, %v1669_v7  ;;  %v2277_v7 = vld [vmem:[%s15882_s17] sm:$0xff] }
 0x2aa   : > { %v1687_v43 = vadd.f32 %v11540_v38, %v1686_v44  ;;  %9361 = vmatmul.msk.bf16.gmra.mxu1 %vm1732_vm3, %v11380_v17  ;;  %v9319_v44 = vld [vmem:[%s11620_s11 + $0x50] sm:$0xf]  ;;  %v9683_v17 = vld [vmem:[%s11620_s11 + $0x54] sm:$0xf0] }
 0x2ab   : > { %v2094_v10 = vpack.c.bf16 %v2074_v63, %v11611_v18  ;;  %v2092_v18 = vpack.c.bf16 %v2070_v1, %v11598_v39  ;;  %v9674_v39 = vld [vmem:[%s11620_s11 + $0x14] sm:$0xf]  ;;  %v9320_v42 = vor.u32 %v9683_v17, %v9319_v44  ;;  %v2616_v44 = vld [vmem:[#allocation10] sm:$0xf] }
 0x2ac   : > { %v2710_v17 = vsel %vm1757_vm1, %v2616_v44, 0 }
 0x2ad   : > { %2719 = vmatpush.bf16.msrb.mxu3 %v2710_v17 }
 0x2b0   : > { %v2015_v50 = vpop.f32.mrf.mxu3 }
 0x2b1   : > { %v1688_v58 = vpop.f32.mrf.mxu1  ;;  %v2075_v14 = vmul.f32 %v2015_v50, %v1672_v5  ;;  %v2093_v50 = vpack.c.bf16 %v2072_v22, %v11606_v55  ;;  %v9289_v55 = vld [vmem:[%s11620_s11 + $0x18] sm:$0xf0]  ;;  %v9329_v5 = vld [vmem:[%s11620_s11 + $0x68] sm:$0xf0]  ;;  %v9686_v22 = vld [vmem:[%s11620_s11 + $0x74] sm:$0xf] }
 0x2b2   : > { %v1689_v45 = vadd.f32 %v11540_v38, %v1688_v58  ;;  %v9303_v38 = vld [vmem:[%s11620_s11 + $0x30] sm:$0xf]  ;;  %v9292_v31 = vor.u32 %v9674_v39, %v9289_v55  ;;  %v9327_v58 = vld [vmem:[%s11620_s11 + $0x60] sm:$0xf] }
 0x2b3   : > { %v9304_v3 = vor.u32 %v9679_v20, %v9303_v38  ;;  %v2403_v39 = vld [vmem:[%s11687_s26 + $0x20] sm:$0xff] }
 0x2b8   : > { %v2017_v24 = vpop.f32.mrf.mxu3 }
 0x2b9   : > { %v2076_v46 = vmul.f32 %v2017_v24, %v1674_v40  ;;  %v9295_v24 = vld [vmem:[%s11620_s11 + $0x20] sm:$0xf]  ;;  %v2279_v40 = vld [vmem:[%s15882_s17 + $0x10] sm:$0xff] }
 0x2ba   : > { %9362 = vmatmul.msk.bf16.gmra.mxu1 %vm1732_vm3, %v11387_v21  ;;  %v9680_v21 = vld [vmem:[%s11620_s11 + $0x44] sm:$0xf] }
 0x2bb   : > { %v2095_v27 = vpack.c.bf16 %v2076_v46, %v2075_v14  ;;  %v2408_v14 = vld [vmem:[%s11687_s26 + $0x48] sm:$0xff] }
 0x2c0   : > { %v2020_v26 = vpop.f32.mrf.mxu3 }
 0x2c1   : > { %v2077_v11 = vmul.f32 %v2020_v26, %v1677_v62  ;;  %v9677_v26 = vld [vmem:[%s11620_s11 + $0x24] sm:$0xf0]  ;;  %v2281_v62 = vld [vmem:[%s15882_s17 + $0x20] sm:$0xff] }
 0x2c2   : > { %v9296_v12 = vor.u32 %v9677_v26, %v9295_v24 }
 0x2c4   : > { %2197 = vmatmul.bf16.gmra.mxu2 %v9296_v12  ;;  %v2414_v12 = vld [vmem:[%s11687_s26 + $0x78] sm:$0xff] }
 0x2c8   : > { %v2022_v30 = vpop.f32.mrf.mxu3 }
 0x2c9   : > { %v2078_v25 = vmul.f32 %v2022_v30, %v1679_v32  ;;  %v9284_v30 = vor.u32 %v9672_v49, %v9281_v28  ;;  %v2400_v32 = vld [vmem:[%s11687_s26 + $0x8] sm:$0xff]  ;;  %v2409_v49 = vld [vmem:[%s11687_s26 + $0x50] sm:$0xff] }
 0x2ca   : > { %9363 = vmatmul.msk.bf16.gmra.mxu1 %vm1732_vm3, %v11394_v23  ;;  %v2284_v23 = vld [vmem:[%s15882_s17 + $0x38] sm:$0xff] }
 0x2cb   : > { %v2096_v51 = vpack.c.bf16 %v2078_v25, %v2077_v11  ;;  %2342 = vmatpush.msrb.mxu2 %v2284_v23  ;;  %v2280_v25 = vld [vmem:[%s15882_s17 + $0x18] sm:$0xff]  ;;  %v9684_v11 = vld [vmem:[%s11620_s11 + $0x64] sm:$0xf] }
 0x2cc   : > { %v9332_v46 = vor.u32 %v9684_v11, %v9329_v5 }
 0x2d0   : > { %v2025_v6 = vpop.f32.mrf.mxu3 }
 0x2d1   : > { %v2079_v57 = vmul.f32 %v2025_v6, %v1682_v9  ;;  %v9681_v6 = vld [vmem:[%s11620_s11 + $0x44] sm:$0xf0]  ;;  %v10999_v9 = vmov 0  }
 0x2d2   : > { %v9312_v15 = vor.u32 %v9681_v6, %v9311_v59  ;;  %9968 = vset.pattern.permute.xlu0 %v10999_v9  ;;  %9969 = vset.pattern.permute.xlu1 %v10999_v9  ;;  %v2404_v6 = vld [vmem:[%s11687_s26 + $0x28] sm:$0xff] }
 0x2d3   : > { %9970 = vset.pattern.permute.xlu2 %v10999_v9 }
 0x2d4   : > { %2202 = vmatmul.bf16.gmra.mxu2 %v9304_v3  ;;  %2437 = vperm.xlu2 %9970, %v2403_v39  }
 0x2d8   : > { %v2027_v37 = vpop.f32.mrf.mxu3 }
 0x2d9   : > { %v2080_v52 = vmul.f32 %v2027_v37, %v1684_v34  ;;  %v9300_v37 = vor.u32 %v9676_v36, %v9297_v16 }
 0x2da   : > { %9364 = vmatmul.msk.bf16.gmra.mxu1 %vm1732_vm3, %v11413_v35  ;;  %v9321_v35 = vld [vmem:[%s11620_s11 + $0x58] sm:$0xf0] }
 0x2db   : > { %v2097_v2 = vpack.c.bf16 %v2080_v52, %v2079_v57  ;;  %v9324_v47 = vor.u32 %v9682_v0, %v9321_v35  ;;  %v2283_v57 = vld [vmem:[%s15882_s17 + $0x30] sm:$0xff] }
 0x2dc   : > { %2343 = vmatpush.msrb.mxu2 %v2283_v57  ;;  %2442 = vperm.xlu2 %9970, %v2404_v6  }
 0x2de   : > { %2344 = vmatpush.msrb.mxu2 %v2282_v61 }
 0x2e0   : > { %v2030_v4 = vpop.f32.mrf.mxu3  ;;  %2345 = vmatpush.msrb.mxu2 %v2281_v62  ;;  %v2618_v62 = vld [vmem:[#allocation10 + $0x8] sm:$0xf] }
 0x2e1   : > { %v2081_v48 = vmul.f32 %v2030_v4, %v1687_v43  ;;  %v9308_v4 = vor.u32 %v9678_v41, %v9305_v29  ;;  %v9685_v43 = vld [vmem:[%s11620_s11 + $0x64] sm:$0xf0] }
 0x2e2   : > { %2346 = vmatpush.msrb.mxu2 %v2280_v25  ;;  %v2617_v25 = vld [vmem:[#allocation10 + $0x4] sm:$0xf] }
 0x2e3   : > { %v2762_v11 = vsel %vm1757_vm1, %v2617_v25, 0 }
 0x2e4   : > { %2207 = vmatmul.bf16.gmra.mxu2 %v9312_v15 }
 0x2e5   : > { %2347 = vmatpush.msrb.mxu2 %v2279_v40  ;;  %v2814_v40 = vsel %vm1757_vm1, %v2618_v62, 0 }
 0x2e8   : > { %v2032_v33 = vpop.f32.mrf.mxu3 }
 0x2e9   : > { %v2082_v54 = vmul.f32 %v2032_v33, %v1689_v45  ;;  %v9328_v45 = vor.u32 %v9685_v43, %v9327_v58  ;;  %v9313_v33 = vld [vmem:[%s11620_s11 + $0x48] sm:$0xf0] }
 0x2ea   : > { %v9316_v34 = vor.u32 %v9680_v21, %v9313_v33  ;;  %v2413_v21 = vld [vmem:[%s11687_s26 + $0x70] sm:$0xff] }
 0x2eb   : > { %v2098_v56 = vpack.c.bf16 %v2082_v54, %v2081_v48  ;;  %v9335_v48 = vld [vmem:[%s11620_s11 + $0x70] sm:$0xf]  ;;  %v9687_v54 = vld [vmem:[%s11620_s11 + $0x74] sm:$0xf0] }
 0x2ec   : > { %v9336_v52 = vor.u32 %v9687_v54, %v9335_v48 }
 0x2ed   : > { %2228 = vmatpush.bf16.msra.mxu0 %v2098_v56  ;;  %v2399_v56 = vld [vmem:[%s11687_s26] sm:$0xff] }
 0x2ee   : > { %2417 = vperm.xlu0 %9968, %v2399_v56  }
 0x2f1   : > { %2229 = vmatpush.bf16.msra.mxu0 %v2097_v2  ;;  %v2405_v2 = vld [vmem:[%s11687_s26 + $0x30] sm:$0xff] }
 0x2f4   : > { %2212 = vmatmul.bf16.gmra.mxu2 %v9320_v42 }
 0x2f5   : > { %2230 = vmatpush.bf16.msra.mxu0 %v2096_v51  ;;  %v2278_v51 = vld [vmem:[%s15882_s17 + $0x8] sm:$0xff] }
 0x2f6   : > { %2422 = vperm.xlu0 %9968, %v2400_v32   ;;  %2348 = vmatpush.msrb.mxu2 %v2278_v51 }
 0x2f8   : > { %2349 = vmatpush.msrb.mxu2 %v2277_v7 }
 0x2f9   : > { %2231 = vmatpush.bf16.msra.mxu0 %v2095_v27  ;;  %v2401_v27 = vld [vmem:[%s11687_s26 + $0x10] sm:$0xff] }
 0x2fa   : > { %2427 = vperm.xlu1 %9969, %v2401_v27   ;;  %2823 = vmatpush.bf16.msra.mxu2 %v2814_v40  ;;  %v2524_v27 = vpop.f32.mrf.mxu1 }
 0x2fd   : > { %2232 = vmatpush.bf16.msra.mxu0 %v2094_v10  ;;  %v9337_v10 = vld [vmem:[%s11620_s11 + $0x78] sm:$0xf0]  ;;  %s9068_s11 = sshll.u32 %s1173_s8, 2 }
 0x2fe   : > { %2447 = vperm.xlu0 %9968, %v2405_v2   ;;  %v9340_v26 = vor.u32 %v9686_v22, %v9337_v10  ;;  %v2619_v2 = vld [vmem:[#allocation10 + $0xc] sm:$0xf]  ;;  %s1175_s9 = scalar_lea.vmem %s16299_s20, %s9068_s11 }
 0x2ff   : > { %v2866_v5 = vsel %vm1757_vm1, %v2619_v2, 0 }
 0x300   : > { %2875 = vmatpush.bf16.msra.mxu1 %v2866_v5 }
 0x301   : > { %2233 = vmatpush.bf16.msra.mxu0 %v2093_v50  ;;  %v2406_v50 = vld [vmem:[%s11687_s26 + $0x38] sm:$0xff] }
 0x302   : > { %2432 = vperm.xlu1 %9969, %v2402_v60  }
 0x304   : > { %2217 = vmatmul.bf16.gmra.mxu2 %v9328_v45 }
 0x305   : > { %2234 = vmatpush.bf16.msra.mxu0 %v2092_v18 }
 0x306   : > { %2462 = vperm.xlu0 %9968, %v2408_v14  }
 0x309   : > { %2235 = vmatpush.bf16.msra.mxu0 %v2091_v53 }
 0x30a   : > { %2452 = vperm.xlu1 %9969, %v2406_v50  }
 0x30c   : > { %2236 = vmatmul.bf16.vlgmr.msra.gmra.mxu0 %v9284_v30  ;;  %v2412_v30 = vld [vmem:[%s11687_s26 + $0x68] sm:$0xff] }
 0x30d   : > { %2771 = vmatpush.bf16.msrb.mxu0 %v2762_v11 }
 0x30e   : > { %2477 = vperm.xlu0 %9968, %v2411_v19  }
 0x30f   : > { %v2188_v63 = vpop.f32.mrf.mxu2 }
 0x312   : > { %2467 = vperm.xlu1 %9969, %v2409_v49  }
 0x314   : > { %2222 = vmatmul.bf16.gmra.mxu2 %v9336_v52 }
 0x316   : > { %2492 = vperm.xlu0 %9968, %v2414_v12  }
 0x317   : > { %v2190_v24 = vpop.f32.mrf.mxu2 }
 0x31a   : > { %2482 = vperm.xlu1 %9969, %v2412_v30  }
 0x31c   : > { %2241 = vmatmul.bf16.gmra.mxu0 %v9292_v31 }
 0x31f   : > { %v2193_v1 = vpop.f32.mrf.mxu2 }
 0x327   : > { %v2195_v8 = vpop.f32.mrf.mxu2 }
 0x32c   : > { %2246 = vmatmul.bf16.gmra.mxu0 %v9300_v37  ;;  %v2407_v37 = vld [vmem:[%s11687_s26 + $0x40] sm:$0xff] }
 0x32d   : > { %2457 = vperm.xlu2 %9970, %v2407_v37  }
 0x33c   : > { %2251 = vmatmul.bf16.gmra.mxu0 %v9308_v4  ;;  %v2410_v4 = vld [vmem:[%s11687_s26 + $0x58] sm:$0xff] }
 0x33d   : > { %2472 = vperm.xlu2 %9970, %v2410_v4  }
 0x345   : > { %2487 = vperm.xlu2 %9970, %v2413_v21  }
 0x347   : > { %v2198_v38 = vpop.f32.mrf.mxu2 }
 0x34c   : > { %2256 = vmatmul.bf16.gmra.mxu0 %v9316_v34 }
 0x34f   : > { %v2200_v55 = vpop.f32.mrf.mxu2 }
 0x357   : > { %v2203_v15 = vpop.f32.mrf.mxu2 }
 0x35c   : > { %2261 = vmatmul.bf16.gmra.mxu0 %v9324_v47 }
 0x35f   : > { %v2205_v41 = vpop.f32.mrf.mxu2 }
 0x360   : > { %v2418_v50 = vpop.permute.xlu0 %2417 }
 0x367   : > { %v2208_v45 = vpop.f32.mrf.mxu2 }
 0x368   : > { %v2423_v30 = vpop.permute.xlu0 %2422 }
 0x36c   : > { %2266 = vmatmul.bf16.gmra.mxu0 %v9332_v46 }
 0x36f   : > { %v2210_v23 = vpop.f32.mrf.mxu2 }
 0x377   : > { %v2213_v9 = vpop.f32.mrf.mxu2 }
 0x37c   : > { %2271 = vmatmul.bf16.gmra.mxu0 %v9340_v26 }
 0x37f   : > { %v2215_v35 = vpop.f32.mrf.mxu2 }
 0x387   : > { %v2218_v61 = vpop.f32.mrf.mxu2 }
 0x389   : > { %v2237_v13 = vpop.f32.mrf.mxu0 }
 0x38a   : > { %v2238_v18 = vadd.f32 %v2237_v13, %v2188_v63 }
 0x38c   : > { %9341 = vmatmul.msk.f32.vlgmr.msrb.gmra.mxu2 %vm2285_vm5, %v2238_v18 }
 0x38f   : > { %v2220_v7 = vpop.f32.mrf.mxu2 }
 0x391   : > { %v2239_v28 = vpop.f32.mrf.mxu0 }
 0x392   : > { %v2240_v53 = vadd.f32 %v2239_v28, %v2190_v24  ;;  %v2526_v24 = vpop.f32.mrf.mxu1  ;;  %v11762_v28 = vld [vmem:[%s15883_s14] ss:$0 sm:$0xff] }
 0x394   : > { %9342 = vmatmul.msk.f32.gmra.mxu2 %vm2285_vm5, %v2240_v53 }
 0x397   : > { %v2223_v19 = vpop.f32.mrf.mxu2 }
 0x399   : > { %v2242_v20 = vpop.f32.mrf.mxu0 }
 0x39a   : > { %v2243_v3 = vadd.f32 %v2242_v20, %v2193_v1  ;;  %v2529_v1 = vpop.f32.mrf.mxu1 }
 0x39c   : > { %9343 = vmatmul.msk.f32.gmra.mxu2 %vm2285_vm5, %v2243_v3 }
 0x39f   : > { %v2225_v26 = vpop.f32.mrf.mxu2 }
 0x3a1   : > { %v2244_v31 = vpop.f32.mrf.mxu0 }
 0x3a2   : > { %v2245_v59 = vadd.f32 %v2244_v31, %v2195_v8  ;;  %v2531_v18 = vpop.f32.mrf.mxu1 }
 0x3a4   : > { %9344 = vmatmul.msk.f32.gmra.mxu2 %vm2285_vm5, %v2245_v59  ;;  %v2428_v59 = vpop.permute.xlu1 %2427 }
 0x3a9   : > { %v2247_v36 = vpop.f32.mrf.mxu0 }
 0x3aa   : > { %v2248_v16 = vadd.f32 %v2247_v36, %v2198_v38  ;;  %v2534_v3 = vpop.f32.mrf.mxu1 }
 0x3ac   : > { %9345 = vmatmul.msk.f32.gmra.mxu2 %vm2285_vm5, %v2248_v16 }
 0x3b1   : > { %v2249_v42 = vpop.f32.mrf.mxu0 }
 0x3b2   : > { %v2250_v29 = vadd.f32 %v2249_v42, %v2200_v55 }
 0x3b4   : > { %9346 = vmatmul.msk.f32.gmra.mxu2 %vm2285_vm5, %v2250_v29 }
 0x3b9   : > { %v2252_v58 = vpop.f32.mrf.mxu0 }
 0x3ba   : > { %v2253_v43 = vadd.f32 %v2252_v58, %v2203_v15  ;;  %v2433_v58 = vpop.permute.xlu1 %2432 }
 0x3bc   : > { %9347 = vmatmul.msk.f32.gmra.mxu2 %vm2285_vm5, %v2253_v43 }
 0x3c1   : > { %v2254_v33 = vpop.f32.mrf.mxu0 }
 0x3c2   : > { %v2255_v34 = vadd.f32 %v2254_v33, %v2205_v41  ;;  %v2536_v41 = vpop.f32.mrf.mxu1 }
 0x3c4   : > { %9348 = vmatmul.msk.f32.gmra.mxu2 %vm2285_vm5, %v2255_v34  ;;  %v2438_v34 = vpop.permute.xlu2 %2437 }
 0x3c9   : > { %v2257_v48 = vpop.f32.mrf.mxu0 }
 0x3ca   : > { %v2258_v54 = vadd.f32 %v2257_v48, %v2208_v45  ;;  %v2539_v48 = vpop.f32.mrf.mxu1 }
 0x3cc   : > { %9349 = vmatmul.msk.f32.gmra.mxu2 %vm2285_vm5, %v2258_v54 }
 0x3d1   : > { %v2259_v52 = vpop.f32.mrf.mxu0 }
 0x3d2   : > { %v2260_v56 = vadd.f32 %v2259_v52, %v2210_v23  ;;  %v2541_v2 = vpop.f32.mrf.mxu1 }
 0x3d4   : > { %9350 = vmatmul.msk.f32.gmra.mxu2 %vm2285_vm5, %v2260_v56 }
 0x3d9   : > { %v2262_v0 = vpop.f32.mrf.mxu0 }
 0x3da   : > { %v2263_v47 = vadd.f32 %v2262_v0, %v2213_v9 }
 0x3dc   : > { %9351 = vmatmul.msk.f32.gmra.mxu2 %vm2285_vm5, %v2263_v47 }
 0x3e1   : > { %v2264_v32 = vpop.f32.mrf.mxu0 }
 0x3e2   : > { %v2265_v57 = vadd.f32 %v2264_v32, %v2215_v35 }
 0x3e4   : > { %9352 = vmatmul.msk.f32.gmra.mxu2 %vm2285_vm5, %v2265_v57 }
 0x3e9   : > { %v2267_v46 = vpop.f32.mrf.mxu0 }
 0x3ea   : > { %v2268_v51 = vadd.f32 %v2267_v46, %v2218_v61  ;;  %v2443_v61 = vpop.permute.xlu2 %2442 }
 0x3ec   : > { %9353 = vmatmul.msk.f32.gmra.mxu2 %vm2285_vm5, %v2268_v51 }
 0x3f1   : > { %v2269_v14 = vpop.f32.mrf.mxu0 }
 0x3f2   : > { %v2270_v63 = vadd.f32 %v2269_v14, %v2220_v7  ;;  %v2448_v14 = vpop.permute.xlu0 %2447 }
 0x3f4   : > { %9354 = vmatmul.msk.f32.gmra.mxu2 %vm2285_vm5, %v2270_v63 }
 0x3f9   : > { %v2272_v22 = vpop.f32.mrf.mxu0 }
 0x3fa   : > { %v2273_v10 = vadd.f32 %v2272_v22, %v2223_v19  ;;  %v2544_v22 = vpop.f32.mrf.mxu1 }
 0x3fc   : > { %9355 = vmatmul.msk.f32.gmra.mxu2 %vm2285_vm5, %v2273_v10 }
 0x401   : > { %v2274_v60 = vpop.f32.mrf.mxu0 }
 0x402   : > { %v2275_v12 = vadd.f32 %v2274_v60, %v2225_v26 }
 0x404   : > { %9356 = vmatmul.msk.f32.gmra.mxu2 %vm2285_vm5, %v2275_v12 }
 0x40f   : > { %v2351_v13 = vpop.f32.mrf.mxu2 }
 0x410   : > { %v2495_v8 = vmul.f32 %v2418_v50, %v2351_v13 }
 0x412   : > { %v2564_v49 = vadd.f32 %v2524_v27, %v2495_v8 }
 0x414   : > { %v2584_v53 = vadd.f32 %v11762_v28, %v2564_v49  ;;  %v2546_v49 = vpop.f32.mrf.mxu1 }
 0x416   : > { %v2600_v39 = vmax.f32 %v2584_v53, 0.0 }
 0x417   : > { %v2354_v38 = vpop.f32.mrf.mxu2 }
 0x418   : > { %v2496_v20 = vmul.f32 %v2423_v30, %v2354_v38  ;;  %v2629_v6 = vpack.c.bf16 %v2600_v39, %v2600_v39 }
 0x41a   : > { %v2565_v55 = vadd.f32 %v2526_v24, %v2496_v20  ;;  %v2661_v44 = vunpack.c.l.b16 %v2629_v6  ;;  %v2458_v20 = vpop.permute.xlu2 %2457 }
 0x41c   : > { %v2585_v31 = vadd.f32 %v11762_v28, %v2565_v55 }
 0x41e   : > { %v2601_v15 = vmax.f32 %v2585_v31, 0.0 }
 0x41f   : > { %v2357_v36 = vpop.f32.mrf.mxu2 }
 0x420   : > { %v2630_v16 = vpack.c.bf16 %v2601_v15, %v2601_v15  ;;  %v2497_v37 = vmul.f32 %v2428_v59, %v2357_v36  ;;  %v2549_v36 = vpop.f32.mrf.mxu1 }
 0x422   : > { %v2662_v17 = vunpack.c.l.b16 %v2630_v16  ;;  %v2566_v42 = vadd.f32 %v2529_v1, %v2497_v37  ;;  %v2453_v1 = vpop.permute.xlu1 %2452  ;;  %v2463_v37 = vpop.permute.xlu0 %2462 }
 0x424   : > { %v2677_v29 = vpack.c.b16 %v2662_v17, %v2661_v44  ;;  %v2586_v4 = vadd.f32 %v11762_v28, %v2566_v42 }
 0x426   : > { %9365 = vmatmul.msk.bf16.vlgmr.msrb.gmra.mxu3 %vm1732_vm3, %v2677_v29  ;;  %9373 = vmatmul.msk.bf16.vlgmr.msrb.gmra.mxu0 %vm1732_vm3, %v2677_v29  ;;  %v2602_v21 = vmax.f32 %v2586_v4, 0.0 }
 0x427   : > { %9381 = vmatmul.msk.bf16.vlgmr.msra.gmra.mxu2 %vm1732_vm3, %v2677_v29  ;;  %9389 = vmatmul.msk.bf16.vlgmr.msra.gmra.mxu1 %vm1732_vm3, %v2677_v29  ;;  %v2360_v43 = vpop.f32.mrf.mxu2 }
 0x428   : > { %v2498_v45 = vmul.f32 %v2433_v58, %v2360_v43  ;;  %v2631_v54 = vpack.c.bf16 %v2602_v21, %v2602_v21  ;;  %v2551_v21 = vpop.f32.mrf.mxu1 }
 0x42a   : > { %v2567_v33 = vadd.f32 %v2531_v18, %v2498_v45  ;;  %v2663_v35 = vunpack.c.l.b16 %v2631_v54  ;;  %v2468_v4 = vpop.permute.xlu1 %2467 }
 0x42c   : > { %v2587_v23 = vadd.f32 %v11762_v28, %v2567_v33 }
 0x42e   : > { %v2603_v9 = vmax.f32 %v2587_v23, 0.0 }
 0x42f   : > { %v2363_v52 = vpop.f32.mrf.mxu2 }
 0x430   : > { %v2632_v56 = vpack.c.bf16 %v2603_v9, %v2603_v9  ;;  %v2499_v0 = vmul.f32 %v2438_v34, %v2363_v52 }
 0x432   : > { %v2664_v47 = vunpack.c.l.b16 %v2632_v56  ;;  %v2568_v32 = vadd.f32 %v2534_v3, %v2499_v0  ;;  %v2473_v56 = vpop.permute.xlu2 %2472 }
 0x434   : > { %v2678_v57 = vpack.c.b16 %v2664_v47, %v2663_v35  ;;  %v2588_v62 = vadd.f32 %v11762_v28, %v2568_v32  ;;  %v2554_v47 = vpop.f32.mrf.mxu1 }
 0x436   : > { %9366 = vmatmul.msk.bf16.gmra.mxu3 %vm1732_vm3, %v2678_v57  ;;  %9374 = vmatmul.msk.bf16.gmra.mxu0 %vm1732_vm3, %v2678_v57  ;;  %v2604_v11 = vmax.f32 %v2588_v62, 0.0 }
 0x437   : > { %9382 = vmatmul.msk.bf16.gmra.mxu2 %vm1732_vm3, %v2678_v57  ;;  %9390 = vmatmul.msk.bf16.gmra.mxu1 %vm1732_vm3, %v2678_v57  ;;  %v2366_v25 = vpop.f32.mrf.mxu2 }
 0x438   : > { %v2500_v40 = vmul.f32 %v2443_v61, %v2366_v25  ;;  %v2633_v51 = vpack.c.bf16 %v2604_v11, %v2604_v11 }
 0x43a   : > { %v2569_v5 = vadd.f32 %v2536_v41, %v2500_v40  ;;  %v2665_v10 = vunpack.c.l.b16 %v2633_v51 }
 0x43c   : > { %v2589_v46 = vadd.f32 %v11762_v28, %v2569_v5 }
 0x43e   : > { %v2605_v7 = vmax.f32 %v2589_v46, 0.0 }
 0x43f   : > { %v2369_v63 = vpop.f32.mrf.mxu2 }
 0x440   : > { %v2634_v27 = vpack.c.bf16 %v2605_v7, %v2605_v7  ;;  %v2501_v19 = vmul.f32 %v2448_v14, %v2369_v63  ;;  %v2556_v14 = vpop.f32.mrf.mxu1 }
 0x442   : > { %v2666_v24 = vunpack.c.l.b16 %v2634_v27  ;;  %v2570_v26 = vadd.f32 %v2539_v48, %v2501_v19  ;;  %v2483_v19 = vpop.permute.xlu1 %2482 }
 0x444   : > { %v2679_v60 = vpack.c.b16 %v2666_v24, %v2665_v10  ;;  %v2590_v12 = vadd.f32 %v11762_v28, %v2570_v26 }
 0x446   : > { %9367 = vmatmul.msk.bf16.gmra.mxu3 %vm1732_vm3, %v2679_v60  ;;  %9375 = vmatmul.msk.bf16.gmra.mxu0 %vm1732_vm3, %v2679_v60  ;;  %v2606_v8 = vmax.f32 %v2590_v12, 0.0 }
 0x447   : > { %9383 = vmatmul.msk.bf16.gmra.mxu2 %vm1732_vm3, %v2679_v60  ;;  %9391 = vmatmul.msk.bf16.gmra.mxu1 %vm1732_vm3, %v2679_v60  ;;  %v2372_v50 = vpop.f32.mrf.mxu2 }
 0x448   : > { %v2502_v13 = vmul.f32 %v2453_v1, %v2372_v50  ;;  %v2635_v30 = vpack.c.bf16 %v2606_v8, %v2606_v8  ;;  %v2559_v12 = vpop.f32.mrf.mxu1 }
 0x44a   : > { %v2571_v18 = vadd.f32 %v2541_v2, %v2502_v13  ;;  %v2667_v31 = vunpack.c.l.b16 %v2635_v30  ;;  %v2478_v2 = vpop.permute.xlu0 %2477  ;;  %v2488_v13 = vpop.permute.xlu2 %2487 }
 0x44c   : > { %v2591_v53 = vadd.f32 %v11762_v28, %v2571_v18 }
 0x44e   : > { %v2607_v38 = vmax.f32 %v2591_v53, 0.0 }
 0x44f   : > { %v2375_v3 = vpop.f32.mrf.mxu2 }
 0x450   : > { %v2636_v39 = vpack.c.bf16 %v2607_v38, %v2607_v38  ;;  %v2503_v55 = vmul.f32 %v2458_v20, %v2375_v3 }
 0x452   : > { %v2668_v59 = vunpack.c.l.b16 %v2636_v39  ;;  %v2572_v6 = vadd.f32 %v2544_v22, %v2503_v55  ;;  %v2493_v3 = vpop.permute.xlu0 %2492 }
 0x454   : > { %v2680_v15 = vpack.c.b16 %v2668_v59, %v2667_v31  ;;  %v2592_v16 = vadd.f32 %v11762_v28, %v2572_v6  ;;  %v2561_v31 = vpop.f32.mrf.mxu1 }
 0x456   : > { %9368 = vmatmul.msk.bf16.gmra.mxu3 %vm1732_vm3, %v2680_v15  ;;  %9376 = vmatmul.msk.bf16.gmra.mxu0 %vm1732_vm3, %v2680_v15  ;;  %v2608_v42 = vmax.f32 %v2592_v16, 0.0 }
 0x457   : > { %9384 = vmatmul.msk.bf16.gmra.mxu2 %vm1732_vm3, %v2680_v15  ;;  %9392 = vmatmul.msk.bf16.gmra.mxu1 %vm1732_vm3, %v2680_v15  ;;  %v2378_v44 = vpop.f32.mrf.mxu2 }
 0x458   : > { %v2504_v17 = vmul.f32 %v2463_v37, %v2378_v44  ;;  %v2637_v58 = vpack.c.bf16 %v2608_v42, %v2608_v42 }
 0x45a   : > { %v2573_v41 = vadd.f32 %v2546_v49, %v2504_v17  ;;  %v2669_v23 = vunpack.c.l.b16 %v2637_v58 }
 0x45c   : > { %v2593_v29 = vadd.f32 %v11762_v28, %v2573_v41 }
 0x45e   : > { %v2609_v43 = vmax.f32 %v2593_v29, 0.0  ;;  %v11812_v29 = vld [vmem:[#allocation11 + $0x1] ss:$0 sm:$0xff] }
 0x45f   : > { %v2381_v45 = vpop.f32.mrf.mxu2 }
 0x460   : > { %v2638_v33 = vpack.c.bf16 %v2609_v43, %v2609_v43  ;;  %v2505_v34 = vmul.f32 %v2468_v4, %v2381_v45  ;;  %v11814_v4 = vld [vmem:[#allocation11 + $0x3] ss:$0 sm:$0xff] }
 0x462   : > { %v2670_v48 = vunpack.c.l.b16 %v2638_v33  ;;  %v2574_v54 = vadd.f32 %v2549_v36, %v2505_v34  ;;  %v11825_v33 = vld [vmem:[#allocation11] ss:$0 sm:$0xff] }
 0x464   : > { %v2681_v9 = vpack.c.b16 %v2670_v48, %v2669_v23  ;;  %v2594_v52 = vadd.f32 %v11762_v28, %v2574_v54  ;;  %v11828_v23 = vld [vmem:[#allocation11 + $0x2] ss:$0 sm:$0xff] }
 0x466   : > { %9369 = vmatmul.msk.bf16.gmra.mxu3 %vm1732_vm3, %v2681_v9  ;;  %9377 = vmatmul.msk.bf16.gmra.mxu0 %vm1732_vm3, %v2681_v9  ;;  %v2610_v32 = vmax.f32 %v2594_v52, 0.0 }
 0x467   : > { %9385 = vmatmul.msk.bf16.gmra.mxu2 %vm1732_vm3, %v2681_v9  ;;  %9393 = vmatmul.msk.bf16.gmra.mxu1 %vm1732_vm3, %v2681_v9  ;;  %v2384_v0 = vpop.f32.mrf.mxu2 }
 0x468   : > { %v2506_v35 = vmul.f32 %v2473_v56, %v2384_v0  ;;  %v2639_v62 = vpack.c.bf16 %v2610_v32, %v2610_v32 }
 0x46a   : > { %v2575_v57 = vadd.f32 %v2551_v21, %v2506_v35  ;;  %v2671_v46 = vunpack.c.l.b16 %v2639_v62 }
 0x46c   : > { %v2595_v61 = vadd.f32 %v11762_v28, %v2575_v57 }
 0x46e   : > { %v2611_v25 = vmax.f32 %v2595_v61, 0.0 }
 0x46f   : > { %v2387_v40 = vpop.f32.mrf.mxu2 }
 0x470   : > { %v2640_v11 = vpack.c.bf16 %v2611_v25, %v2611_v25  ;;  %v2507_v5 = vmul.f32 %v2478_v2, %v2387_v40 }
 0x472   : > { %v2672_v51 = vunpack.c.l.b16 %v2640_v11  ;;  %v2576_v7 = vadd.f32 %v2554_v47, %v2507_v5 }
 0x474   : > { %v2682_v63 = vpack.c.b16 %v2672_v51, %v2671_v46  ;;  %v2596_v27 = vadd.f32 %v11762_v28, %v2576_v7 }
 0x476   : > { %9370 = vmatmul.msk.bf16.gmra.mxu3 %vm1732_vm3, %v2682_v63  ;;  %9378 = vmatmul.msk.bf16.gmra.mxu0 %vm1732_vm3, %v2682_v63  ;;  %v2612_v24 = vmax.f32 %v2596_v27, 0.0 }
 0x477   : > { %9386 = vmatmul.msk.bf16.gmra.mxu2 %vm1732_vm3, %v2682_v63  ;;  %9394 = vmatmul.msk.bf16.gmra.mxu1 %vm1732_vm3, %v2682_v63  ;;  %v2390_v22 = vpop.f32.mrf.mxu2 }
 0x478   : > { %v2508_v10 = vmul.f32 %v2483_v19, %v2390_v22  ;;  %v2641_v1 = vpack.c.bf16 %v2612_v24, %v2612_v24 }
 0x47a   : > { %v2577_v26 = vadd.f32 %v2556_v14, %v2508_v10  ;;  %v2673_v53 = vunpack.c.l.b16 %v2641_v1 }
 0x47c   : > { %v2597_v60 = vadd.f32 %v11762_v28, %v2577_v26 }
 0x47e   : > { %v2613_v50 = vmax.f32 %v2597_v60, 0.0 }
 0x47f   : > { %v2393_v8 = vpop.f32.mrf.mxu2 }
 0x480   : > { %v2642_v18 = vpack.c.bf16 %v2613_v50, %v2613_v50  ;;  %v2509_v49 = vmul.f32 %v2488_v13, %v2393_v8 }
 0x482   : > { %v2674_v30 = vunpack.c.l.b16 %v2642_v18  ;;  %v2578_v38 = vadd.f32 %v2559_v12, %v2509_v49 }
 0x484   : > { %v2683_v20 = vpack.c.b16 %v2674_v30, %v2673_v53  ;;  %v2598_v39 = vadd.f32 %v11762_v28, %v2578_v38 }
 0x486   : > { %9371 = vmatmul.msk.bf16.gmra.mxu3 %vm1732_vm3, %v2683_v20  ;;  %9379 = vmatmul.msk.bf16.gmra.mxu0 %vm1732_vm3, %v2683_v20  ;;  %v2614_v6 = vmax.f32 %v2598_v39, 0.0 }
 0x487   : > { %9387 = vmatmul.msk.bf16.gmra.mxu2 %vm1732_vm3, %v2683_v20  ;;  %9395 = vmatmul.msk.bf16.gmra.mxu1 %vm1732_vm3, %v2683_v20  ;;  %v2396_v55 = vpop.f32.mrf.mxu2 }
 0x488   : > { %v2510_v59 = vmul.f32 %v2493_v3, %v2396_v55  ;;  %v2643_v16 = vpack.c.bf16 %v2614_v6, %v2614_v6 }
 0x48a   : > { %v2579_v15 = vadd.f32 %v2561_v31, %v2510_v59  ;;  %v2675_v17 = vunpack.c.l.b16 %v2643_v16 }
 0x48c   : > { %v2599_v36 = vadd.f32 %v11762_v28, %v2579_v15 }
 0x48e   : > { %v2615_v37 = vmax.f32 %v2599_v36, 0.0 }
 0x490   : > { %v2644_v44 = vpack.c.bf16 %v2615_v37, %v2615_v37 }
 0x492   : > { %v2676_v42 = vunpack.c.l.b16 %v2644_v44 }
 0x494   : > { %v2684_v41 = vpack.c.b16 %v2676_v42, %v2675_v17 }
 0x496   : > { %9372 = vmatmul.msk.bf16.gmra.mxu3 %vm1732_vm3, %v2684_v41  ;;  %9380 = vmatmul.msk.bf16.gmra.mxu0 %vm1732_vm3, %v2684_v41 }
 0x497   : > { %9388 = vmatmul.msk.bf16.gmra.mxu2 %vm1732_vm3, %v2684_v41  ;;  %9396 = vmatmul.msk.bf16.gmra.mxu1 %vm1732_vm3, %v2684_v41 }
 0x4a3   : > { %v11816_v58 = vpop.f32.mrf.mxu0 }
 0x4a4   : > { %15884 = vst [vmem:[#allocation41_spill] sm:$0xff] %v11816_v58  ;;  %v11818_v28 = vpop.f32.mrf.mxu1  ;;  %v3051_v43 = vmul.f32 %v11812_v29, %v11816_v58 }
 0x4a5   : > { %15885 = vst [vmem:[#allocation42_spill] sm:$0xff] %v11818_v28  ;;  %v3185_v45 = vmul.f32 %v11814_v4, %v11818_v28 }
 0x4a6   : > { %v3067_v21 = vsel %vm1553_vm4, %v3051_v43, 0.0 }
 0x4a7   : > { %v3201_v34 = vsel %vm1553_vm4, %v3185_v45, 0.0  ;;  %3068 = vadd.xlane.f32.xlu1 %v3067_v21 }
 0x4a8   : > { %3202 = vadd.xlane.f32.xlu0 %v3201_v34 }
 0x4a9   : > { %v11830_v48 = vpop.f32.mrf.mxu3 }
 0x4aa   : > { %15886 = vst [vmem:[#allocation43_spill] sm:$0xff] %v11830_v48  ;;  %v11832_v54 = vpop.f32.mrf.mxu2  ;;  %v2984_v9 = vmul.f32 %v11825_v33, %v11830_v48 }
 0x4ab   : > { %15887 = vst [vmem:[#allocation44_spill] sm:$0xff] %v11832_v54  ;;  %v11836_v52 = vpop.f32.mrf.mxu0  ;;  %v3118_v56 = vmul.f32 %v11828_v23, %v11832_v54 }
 0x4ac   : > { %v11840_v0 = vpop.f32.mrf.mxu1  ;;  %v3000_v47 = vsel %vm1553_vm4, %v2984_v9, 0.0  ;;  %v3052_v57 = vmul.f32 %v11812_v29, %v11836_v52 }
 0x4ad   : > { %15888 = vst [vmem:[#allocation45_spill] sm:$0xff] %v11840_v0  ;;  %v3134_v35 = vsel %vm1553_vm4, %v3118_v56, 0.0  ;;  %v3186_v62 = vmul.f32 %v11814_v4, %v11840_v0 }
 0x4ae   : > { %3135 = vadd.xlane.f32.xlu2 %v3134_v35  ;;  %v3070_v11 = vsel %vm1553_vm4, %v3052_v57, 0.0 }
 0x4af   : > { %3001 = vadd.xlane.f32.xlu1 %v3000_v47  ;;  %v3204_v46 = vsel %vm1553_vm4, %v3186_v62, 0.0 }
 0x4b1   : > { %v11844_v32 = vpop.f32.mrf.mxu3 }
 0x4b2   : > { %15889 = vst [vmem:[#allocation46_spill] sm:$0xff] %v11844_v32  ;;  %v11848_v61 = vpop.f32.mrf.mxu2  ;;  %v2985_v7 = vmul.f32 %v11825_v33, %v11844_v32 }
 0x4b3   : > { %15890 = vst [vmem:[#allocation47_spill] sm:$0xff] %v11848_v61  ;;  %v11852_v25 = vpop.f32.mrf.mxu0  ;;  %v3119_v2 = vmul.f32 %v11828_v23, %v11848_v61 }
 0x4b4   : > { %v11856_v40 = vpop.f32.mrf.mxu1  ;;  %v3053_v14 = vmul.f32 %v11812_v29, %v11852_v25  ;;  %v3003_v10 = vsel %vm1553_vm4, %v2985_v7, 0.0 }
 0x4b5   : > { %15891 = vst [vmem:[#allocation48_spill] sm:$0xff] %v11856_v40  ;;  %v3137_v5 = vsel %vm1553_vm4, %v3119_v2, 0.0  ;;  %v3187_v12 = vmul.f32 %v11814_v4, %v11856_v40 }
 0x4b6   : > { %3071 = vadd.xlane.f32.xlu2 %v3070_v11  ;;  %3138 = vadd.xlane.f32.xlu0 %v3137_v5  ;;  %v3073_v24 = vsel %vm1553_vm4, %v3053_v14, 0.0 }
 0x4b7   : > { %3205 = vadd.xlane.f32.xlu1 %v3204_v46  ;;  %v3207_v49 = vsel %vm1553_vm4, %v3187_v12, 0.0 }
 0x4b9   : > { %v11861_v51 = vpop.f32.mrf.mxu3 }
 0x4ba   : > { %15892 = vst [vmem:[#allocation49_spill] sm:$0xff] %v11861_v51  ;;  %v11867_v63 = vpop.f32.mrf.mxu2  ;;  %v2986_v1 = vmul.f32 %v11825_v33, %v11861_v51 }
 0x4bb   : > { %15893 = vst [vmem:[#allocation50_spill] sm:$0xff] %v11867_v63  ;;  %v11869_v27 = vpop.f32.mrf.mxu0  ;;  %v3120_v19 = vmul.f32 %v11828_v23, %v11867_v63 }
 0x4bc   : > { %v11873_v22 = vpop.f32.mrf.mxu1  ;;  %v3054_v13 = vmul.f32 %v11812_v29, %v11869_v27  ;;  %v3006_v53 = vsel %vm1553_vm4, %v2986_v1, 0.0 }
 0x4bd   : > { %15894 = vst [vmem:[#allocation51_spill] sm:$0xff] %v11873_v22  ;;  %v3140_v26 = vsel %vm1553_vm4, %v3120_v19, 0.0  ;;  %v3188_v3 = vmul.f32 %v11814_v4, %v11873_v22 }
 0x4be   : > { %3004 = vadd.xlane.f32.xlu2 %v3003_v10  ;;  %3074 = vadd.xlane.f32.xlu0 %v3073_v24  ;;  %v3076_v30 = vsel %vm1553_vm4, %v3054_v13, 0.0 }
 0x4bf   : > { %3141 = vadd.xlane.f32.xlu1 %v3140_v26  ;;  %v3210_v15 = vsel %vm1553_vm4, %v3188_v3, 0.0 }
 0x4c1   : > { %v11878_v60 = vpop.f32.mrf.mxu3 }
 0x4c2   : > { %15895 = vst [vmem:[#allocation52_spill] sm:$0xff] %v11878_v60  ;;  %v11884_v50 = vpop.f32.mrf.mxu2  ;;  %v2987_v20 = vmul.f32 %v11825_v33, %v11878_v60 }
 0x4c3   : > { %15896 = vst [vmem:[#allocation53_spill] sm:$0xff] %v11884_v50  ;;  %v11888_v8 = vpop.f32.mrf.mxu0  ;;  %v3121_v37 = vmul.f32 %v11828_v23, %v11884_v50 }
 0x4c4   : > { %v11890_v18 = vpop.f32.mrf.mxu1  ;;  %v3009_v6 = vsel %vm1553_vm4, %v2987_v20, 0.0  ;;  %v3055_v56 = vmul.f32 %v11812_v29, %v11888_v8 }
 0x4c5   : > { %v3189_v55 = vmul.f32 %v11814_v4, %v11890_v18  ;;  %v3143_v45 = vsel %vm1553_vm4, %v3121_v37, 0.0 }
 0x4c6   : > { %3208 = vadd.xlane.f32.xlu2 %v3207_v49  ;;  %3007 = vadd.xlane.f32.xlu0 %v3006_v53  ;;  %v3079_v11 = vsel %vm1553_vm4, %v3055_v56, 0.0 }
 0x4c7   : > { %3077 = vadd.xlane.f32.xlu1 %v3076_v30  ;;  %v3213_v36 = vsel %vm1553_vm4, %v3189_v55, 0.0 }
 0x4c9   : > { %v11895_v38 = vpop.f32.mrf.mxu3 }
 0x4ca   : > { %15897 = vst [vmem:[#allocation54_spill] sm:$0xff] %v11895_v38  ;;  %v11901_v39 = vpop.f32.mrf.mxu2  ;;  %v2988_v42 = vmul.f32 %v11825_v33, %v11895_v38 }
 0x4cb   : > { %15898 = vst [vmem:[#allocation55_spill] sm:$0xff] %v11901_v39  ;;  %v11905_v31 = vpop.f32.mrf.mxu0  ;;  %v3122_v44 = vmul.f32 %v11828_v23, %v11901_v39 }
 0x4cc   : > { %v11907_v59 = vpop.f32.mrf.mxu1  ;;  %v3012_v34 = vsel %vm1553_vm4, %v2988_v42, 0.0  ;;  %v3056_v35 = vmul.f32 %v11812_v29, %v11905_v31 }
 0x4cd   : > { %v3146_v21 = vsel %vm1553_vm4, %v3122_v44, 0.0  ;;  %v3190_v14 = vmul.f32 %v11814_v4, %v11907_v59 }
 0x4ce   : > { %3010 = vadd.xlane.f32.xlu2 %v3009_v6  ;;  %3211 = vadd.xlane.f32.xlu0 %v3210_v15  ;;  %v3082_v5 = vsel %vm1553_vm4, %v3056_v35, 0.0 }
 0x4cf   : > { %3214 = vadd.xlane.f32.xlu1 %v3213_v36  ;;  %v3216_v1 = vsel %vm1553_vm4, %v3190_v14, 0.0 }
 0x4d1   : > { %v11912_v16 = vpop.f32.mrf.mxu3 }
 0x4d2   : > { %15899 = vst [vmem:[#allocation56_spill] sm:$0xff] %v11912_v16  ;;  %v11918_v17 = vpop.f32.mrf.mxu2  ;;  %v2989_v30 = vmul.f32 %v11825_v33, %v11912_v16 }
 0x4d3   : > { %v11922_v41 = vpop.f32.mrf.mxu0  ;;  %v3123_v57 = vmul.f32 %v11828_v23, %v11918_v17 }
 0x4d4   : > { %v11924_v43 = vpop.f32.mrf.mxu1  ;;  %v3057_v24 = vmul.f32 %v11812_v29, %v11922_v41  ;;  %v3015_v36 = vsel %vm1553_vm4, %v2989_v30, 0.0 }
 0x4d5   : > { %v3149_v46 = vsel %vm1553_vm4, %v3123_v57, 0.0  ;;  %v3191_v19 = vmul.f32 %v11814_v4, %v11924_v43 }
 0x4d6   : > { %3144 = vadd.xlane.f32.xlu2 %v3143_v45  ;;  %3147 = vadd.xlane.f32.xlu0 %v3146_v21  ;;  %v3085_v49 = vsel %vm1553_vm4, %v3057_v24, 0.0 }
 0x4d7   : > { %3013 = vadd.xlane.f32.xlu1 %v3012_v34  ;;  %v3219_v13 = vsel %vm1553_vm4, %v3191_v19, 0.0 }
 0x4d9   : > { %v11929_v9 = vpop.f32.mrf.mxu3 }
 0x4da   : > { %15900 = vst [vmem:[#allocation57_spill] sm:$0xff] %v11929_v9  ;;  %v11935_v47 = vpop.f32.mrf.mxu2  ;;  %v2990_v20 = vmul.f32 %v11825_v33, %v11929_v9 }
 0x4db   : > { %v11939_v62 = vpop.f32.mrf.mxu0  ;;  %v3124_v45 = vmul.f32 %v11828_v23, %v11935_v47 }
 0x4dc   : > { %15901 = vst [vmem:[#allocation58_spill] sm:$0xff] %v11939_v62  ;;  %v11941_v2 = vpop.f32.mrf.mxu1  ;;  %v3018_v37 = vsel %vm1553_vm4, %v2990_v20, 0.0  ;;  %v3058_v19 = vmul.f32 %v11812_v29, %v11939_v62 }
 0x4dd   : > { %v3192_v55 = vmul.f32 %v11814_v4, %v11941_v2 }
 0x4de   : > { %3080 = vadd.xlane.f32.xlu2 %v3079_v11  ;;  %3083 = vadd.xlane.f32.xlu0 %v3082_v5  ;;  %v3152_v11 = vsel %vm1553_vm4, %v3124_v45, 0.0  ;;  %v3088_v20 = vsel %vm1553_vm4, %v3058_v19, 0.0 }
 0x4df   : > { %3150 = vadd.xlane.f32.xlu1 %v3149_v46  ;;  %v3222_v44 = vsel %vm1553_vm4, %v3192_v55, 0.0 }
 0x4e1   : > { %v11946_v7 = vpop.f32.mrf.mxu3 }
 0x4e2   : > { %15902 = vst [vmem:[#allocation59_spill] sm:$0xff] %v11946_v7  ;;  %v11952_v10 = vpop.f32.mrf.mxu2  ;;  %v2991_v56 = vmul.f32 %v11825_v33, %v11946_v7 }
 0x4e3   : > { %v11956_v26 = vpop.f32.mrf.mxu0  ;;  %v3125_v21 = vmul.f32 %v11828_v23, %v11952_v10 }
 0x4e4   : > { %v11958_v12 = vpop.f32.mrf.mxu1  ;;  %v3021_v46 = vsel %vm1553_vm4, %v2991_v56, 0.0  ;;  %v3059_v24 = vmul.f32 %v11812_v29, %v11956_v26 }
 0x4e5   : > { %v3155_v5 = vsel %vm1553_vm4, %v3125_v21, 0.0 }
 0x4e6   : > { %3217 = vadd.xlane.f32.xlu2 %v3216_v1  ;;  %3220 = vadd.xlane.f32.xlu0 %v3219_v13  ;;  %v3091_v55 = vsel %vm1553_vm4, %v3059_v24, 0.0 }
 0x4e7   : > { %3086 = vadd.xlane.f32.xlu1 %v3085_v49 }
 0x4e9   : > { %v11963_v53 = vpop.f32.mrf.mxu3 }
 0x4ea   : > { %15903 = vst [vmem:[#allocation60_spill] sm:$0xff] %v11963_v53  ;;  %v11969_v3 = vpop.f32.mrf.mxu2 }
 0x4eb   : > { %v11973_v6 = vpop.f32.mrf.mxu0  ;;  %v3126_v13 = vmul.f32 %v11828_v23, %v11969_v3 }
 0x4ec   : > { %v11975_v15 = vpop.f32.mrf.mxu1  ;;  %v3060_v56 = vmul.f32 %v11812_v29, %v11973_v6 }
 0x4ed   : > { %v3194_v45 = vmul.f32 %v11814_v4, %v11975_v15 }
 0x4ee   : > { %3016 = vadd.xlane.f32.xlu2 %v3015_v36  ;;  %3019 = vadd.xlane.f32.xlu0 %v3018_v37  ;;  %v3158_v36 = vsel %vm1553_vm4, %v3126_v13, 0.0  ;;  %v3094_v24 = vsel %vm1553_vm4, %v3060_v56, 0.0 }
 0x4ef   : > { %3223 = vadd.xlane.f32.xlu1 %v3222_v44  ;;  %v3193_v44 = vmul.f32 %v11814_v4, %v11958_v12  ;;  %v3228_v19 = vsel %vm1553_vm4, %v3194_v45, 0.0 }
 0x4f1   : > { %v11980_v42 = vpop.f32.mrf.mxu3 }
 0x4f2   : > { %15904 = vst [vmem:[#allocation61_spill] sm:$0xff] %v11980_v42  ;;  %v11986_v34 = vpop.f32.mrf.mxu2 }
 0x4f3   : > { %v11990_v35 = vpop.f32.mrf.mxu0  ;;  %v3127_v48 = vmul.f32 %v11828_v23, %v11986_v34 }
 0x4f4   : > { %v11992_v57 = vpop.f32.mrf.mxu1  ;;  %v3061_v63 = vmul.f32 %v11812_v29, %v11990_v35 }
 0x4f6   : > { %3153 = vadd.xlane.f32.xlu2 %v3152_v11  ;;  %3156 = vadd.xlane.f32.xlu0 %v3155_v5 }
 0x4f7   : > { %3022 = vadd.xlane.f32.xlu1 %v3021_v46  ;;  %v3225_v46 = vsel %vm1553_vm4, %v3193_v44, 0.0  ;;  %v3195_v44 = vmul.f32 %v11814_v4, %v11992_v57 }
 0x4f9   : > { %v11997_v14 = vpop.f32.mrf.mxu3 }
 0x4fa   : > { %15905 = vst [vmem:[#allocation62_spill] sm:$0xff] %v11997_v14  ;;  %v12003_v1 = vpop.f32.mrf.mxu2 }
 0x4fb   : > { %v12007_v49 = vpop.f32.mrf.mxu0  ;;  %v3128_v61 = vmul.f32 %v11828_v23, %v12003_v1 }
 0x4fc   : > { %15906 = vst [vmem:[#allocation63_spill] sm:$0xff] %v12007_v49  ;;  %v12009_v30 = vpop.f32.mrf.mxu1  ;;  %v3062_v51 = vmul.f32 %v11812_v29, %v12007_v49 }
 0x4fe   : > { %3089 = vadd.xlane.f32.xlu2 %v3088_v20  ;;  %3092 = vadd.xlane.f32.xlu0 %v3091_v55  ;;  %v2992_v20 = vmul.f32 %v11825_v33, %v11963_v53  ;;  %v2993_v55 = vmul.f32 %v11825_v33, %v11980_v42 }
 0x4ff   : > { %3159 = vadd.xlane.f32.xlu1 %v3158_v36 }
 0x500   : > { %v3024_v56 = vsel %vm1553_vm4, %v2992_v20, 0.0  ;;  %v2994_v20 = vmul.f32 %v11825_v33, %v11997_v14 }
 0x501   : > { %v12014_v37 = vpop.f32.mrf.mxu3 }
 0x502   : > { %15907 = vst [vmem:[#allocation64_spill] sm:$0xff] %v12014_v37  ;;  %v12020_v21 = vpop.f32.mrf.mxu2 }
 0x503   : > { %v12024_v11 = vpop.f32.mrf.mxu0 }
 0x504   : > { %15908 = vst [vmem:[#allocation65_spill] sm:$0xff] %v12024_v11  ;;  %v12026_v5 = vpop.f32.mrf.mxu1 }
 0x506   : > { %3226 = vadd.xlane.f32.xlu2 %v3225_v46  ;;  %3229 = vadd.xlane.f32.xlu0 %v3228_v19  ;;  %v3027_v46 = vsel %vm1553_vm4, %v2993_v55, 0.0  ;;  %v3231_v19 = vsel %vm1553_vm4, %v3195_v44, 0.0  ;;  %v3161_v44 = vsel %vm1553_vm4, %v3127_v48, 0.0  ;;  %v3129_v48 = vmul.f32 %v11828_v23, %v12020_v21 }
 0x507   : > { %3095 = vadd.xlane.f32.xlu1 %v3094_v24 }
 0x508   : > { %v3167_v38 = vsel %vm1553_vm4, %v3129_v48, 0.0 }
 0x509   : > { %v12031_v13 = vpop.f32.mrf.mxu3 }
 0x50a   : > { %v12037_v36 = vpop.f32.mrf.mxu2 }
 0x50b   : > { %v12041_v54 = vpop.f32.mrf.mxu0 }
 0x50c   : > { %v12043_v45 = vpop.f32.mrf.mxu1  ;;  %v2946_v60 = vpack.c.bf16 %v12041_v54, %v12041_v54 }
 0x50e   : > { %3025 = vadd.xlane.f32.xlu2 %v3024_v56  ;;  %3028 = vadd.xlane.f32.xlu0 %v3027_v46  ;;  %v3164_v56 = vsel %vm1553_vm4, %v3128_v61, 0.0  ;;  %v3030_v46 = vsel %vm1553_vm4, %v2994_v20, 0.0  ;;  %v5039_v48 = vunpack.c.l.b16 %v2946_v60 }
 0x50f   : > { %3232 = vadd.xlane.f32.xlu1 %v3231_v19 }
 0x511   : > { %v12048_v24 = vpop.f32.mrf.mxu3 }
 0x512   : > { %v12054_v32 = vpop.f32.mrf.mxu2 }
 0x513   : > { %v12058_v28 = vpop.f32.mrf.mxu0 }
 0x514   : > { %v12060_v55 = vpop.f32.mrf.mxu1  ;;  %v2947_v0 = vpack.c.bf16 %v12058_v28, %v12058_v28 }
 0x516   : > { %3162 = vadd.xlane.f32.xlu2 %v3161_v44  ;;  %3165 = vadd.xlane.f32.xlu0 %v3164_v56  ;;  %v3097_v56 = vsel %vm1553_vm4, %v3061_v63, 0.0  ;;  %v5040_v40 = vunpack.c.l.b16 %v2947_v0  ;;  %v3197_v0 = vmul.f32 %v11814_v4, %v12026_v5 }
 0x517   : > { %3031 = vadd.xlane.f32.xlu1 %v3030_v46  ;;  %v3100_v46 = vsel %vm1553_vm4, %v3062_v51, 0.0  ;;  %v3196_v51 = vmul.f32 %v11814_v4, %v12009_v30 }
 0x519   : > { %v12065_v19 = vpop.f32.mrf.mxu3  ;;  %v3234_v60 = vsel %vm1553_vm4, %v3196_v51, 0.0  ;;  %v2941_v51 = vpack.c.bf16 %v11956_v26, %v11956_v26 }
 0x51a   : > { %v12073_v50 = vpop.f32.mrf.mxu2 }
 0x51b   : > { %v12077_v61 = vpop.f32.mrf.mxu0 }
 0x51c   : > { %15909 = vst [vmem:[#allocation66_spill] sm:$0xff] %v12077_v61  ;;  %v2948_v20 = vpack.c.bf16 %v12077_v61, %v12077_v61  ;;  %v12081_v44 = vpop.f32.mrf.mxu1  ;;  %v2945_v61 = vpack.c.bf16 %v12024_v11, %v12024_v11 }
 0x51d   : > { %9448 = vmatpush.xpose.msk.msrb.mxu2 %vm1553_vm4, %v12081_v44 }
 0x51e   : > { %v5041_v39 = vunpack.c.l.b16 %v2948_v20  ;;  %3098 = vadd.xlane.f32.xlu2 %v3097_v56  ;;  %3101 = vadd.xlane.f32.xlu0 %v3100_v46  ;;  %v2944_v20 = vpack.c.bf16 %v12007_v49, %v12007_v49  ;;  %v5038_v56 = vunpack.c.l.b16 %v2945_v61  ;;  %v3237_v46 = vsel %vm1553_vm4, %v3197_v0, 0.0 }
 0x51f   : > { %3168 = vadd.xlane.f32.xlu1 %v3167_v38 }
 0x520   : > { %v5049_v22 = vpack.c.b16 %v5041_v39, %v5040_v40  ;;  %v3063_v40 = vmul.f32 %v11812_v29, %v12024_v11  ;;  %v2943_v39 = vpack.c.bf16 %v11990_v35, %v11990_v35  ;;  %v5048_v11 = vpack.c.b16 %v5039_v48, %v5038_v56 }
 0x521   : > { %9449 = vmatpush.xpose.msk.msrb.mxu2 %vm1553_vm4, %v12060_v55  ;;  %v12094_v63 = vpop.f32.mrf.mxu3  ;;  %v12118_v49 = vpop.xlane.xlu2 %3135  ;;  %v2996_v48 = vmul.f32 %v11825_v33, %v12031_v13  ;;  %v2940_v56 = vpack.c.bf16 %v11939_v62, %v11939_v62 }
 0x522   : > { %15910 = vst [vmem:[#allocation67_spill] sm:$0xff] %v12094_v63  ;;  %v12102_v38 = vpop.f32.mrf.mxu2  ;;  %9397 = vmatpush.xpose.msk.msra.mxu3 %vm1553_vm4, %v12094_v63  ;;  %5058 = vmatpush.bf16.msrb.mxu1 %v5049_v22  ;;  %v2942_v22 = vpack.c.bf16 %v11973_v6, %v11973_v6  ;;  %v5037_v63 = vunpack.c.l.b16 %v2944_v20  ;;  %v3103_v61 = vsel %vm1553_vm4, %v3063_v40, 0.0  ;;  %v5036_v0 = vunpack.c.l.b16 %v2943_v39 }
 0x523   : > { %9431 = vmatpush.xpose.msk.msra.mxu0 %vm1553_vm4, %v12102_v38  ;;  %v2995_v20 = vmul.f32 %v11825_v33, %v12014_v37  ;;  %v2939_v39 = vpack.c.bf16 %v11922_v41, %v11922_v41 }
 0x524   : > { %v5047_v40 = vpack.c.b16 %v5037_v63, %v5036_v0  ;;  %v3036_v63 = vsel %vm1553_vm4, %v2996_v48, 0.0  ;;  %v5033_v0 = vunpack.c.l.b16 %v2940_v56  ;;  %v3130_v56 = vmul.f32 %v11828_v23, %v12037_v36 }
 0x525   : > { %9450 = vmatpush.xpose.msk.msrb.mxu2 %vm1553_vm4, %v12043_v45  ;;  %v5032_v48 = vunpack.c.l.b16 %v2939_v39  ;;  %v2935_v39 = vpack.c.bf16 %v11852_v25, %v11852_v25 }
 0x526   : > { %3235 = vadd.xlane.f32.xlu2 %v3234_v60  ;;  %3238 = vadd.xlane.f32.xlu0 %v3237_v46  ;;  %v5035_v60 = vunpack.c.l.b16 %v2942_v22  ;;  %v5034_v46 = vunpack.c.l.b16 %v2941_v51  ;;  %v3033_v22 = vsel %vm1553_vm4, %v2995_v20, 0.0  ;;  %v2937_v20 = vpack.c.bf16 %v11888_v8, %v11888_v8 }
 0x527   : > { %9398 = vmatpush.xpose.msk.msra.mxu3 %vm1553_vm4, %v12065_v19  ;;  %9432 = vmatpush.xpose.msk.msra.mxu0 %vm1553_vm4, %v12073_v50 }
 0x528   : > { %5059 = vmatpush.bf16.msrb.mxu1 %v5048_v11  ;;  %3104 = vadd.xlane.f32.xlu1 %v3103_v61  ;;  %v3198_v11 = vmul.f32 %v11814_v4, %v12043_v45  ;;  %v2938_v61 = vpack.c.bf16 %v11905_v31, %v11905_v31  ;;  %v5046_v62 = vpack.c.b16 %v5035_v60, %v5034_v46 }
 0x529   : > { %9451 = vmatpush.xpose.msk.msrb.mxu2 %vm1553_vm4, %v12026_v5  ;;  %v3131_v60 = vmul.f32 %v11828_v23, %v12054_v32 }
 0x52a   : > { %v3240_v51 = vsel %vm1553_vm4, %v3198_v11, 0.0  ;;  %v2936_v11 = vpack.c.bf16 %v11869_v27, %v11869_v27  ;;  %v5031_v46 = vunpack.c.l.b16 %v2938_v61  ;;  %v3170_v61 = vsel %vm1553_vm4, %v3130_v56, 0.0 }
 0x52b   : > { %9399 = vmatpush.xpose.msk.msra.mxu3 %vm1553_vm4, %v12048_v24  ;;  %9433 = vmatpush.xpose.msk.msra.mxu0 %vm1553_vm4, %v12054_v32  ;;  %v2933_v56 = vpack.c.bf16 %v11816_v58, %v11816_v58  ;;  %v2972_v58 = vpack.c.bf16 %v11941_v2, %v11941_v2 }
 0x52c   : > { %5060 = vmatpush.bf16.msrb.mxu1 %v5047_v40  ;;  %v12156_v40 = vpop.xlane.xlu2 %3071 }
 0x52d   : > { %9452 = vmatpush.xpose.msk.msrb.mxu2 %vm1553_vm4, %v12009_v30 }
 0x52e   : > { %3034 = vadd.xlane.f32.xlu2 %v3033_v22  ;;  %3037 = vadd.xlane.f32.xlu0 %v3036_v63  ;;  %v5045_v22 = vpack.c.b16 %v5033_v0, %v5032_v48  ;;  %v5030_v63 = vunpack.c.l.b16 %v2937_v20  ;;  %v3173_v0 = vsel %vm1553_vm4, %v3131_v60, 0.0  ;;  %v5029_v48 = vunpack.c.l.b16 %v2936_v11 }
 0x52f   : > { %9400 = vmatpush.xpose.msk.msra.mxu3 %vm1553_vm4, %v12031_v13  ;;  %9434 = vmatpush.xpose.msk.msra.mxu0 %vm1553_vm4, %v12037_v36  ;;  %v5028_v60 = vunpack.c.l.b16 %v2935_v39  ;;  %v3064_v11 = vmul.f32 %v11812_v29, %v12041_v54 }
 0x530   : > { %5061 = vmatpush.bf16.msrb.mxu1 %v5046_v62  ;;  %3241 = vadd.xlane.f32.xlu1 %v3240_v51  ;;  %v2997_v62 = vmul.f32 %v11825_v33, %v12048_v24  ;;  %v2934_v51 = vpack.c.bf16 %v11836_v52, %v11836_v52 }
 0x531   : > { %9453 = vmatpush.xpose.msk.msrb.mxu2 %vm1553_vm4, %v11992_v57  ;;  %v3106_v39 = vsel %vm1553_vm4, %v3064_v11, 0.0  ;;  %v2998_v11 = vmul.f32 %v11825_v33, %v12065_v19  ;;  %v15917_v33 = vld [vmem:[#allocation55_spill] sm:$0xff] }
 0x532   : > { %v3039_v20 = vsel %vm1553_vm4, %v2997_v62, 0.0  ;;  %v5043_v62 = vpack.c.b16 %v5029_v48, %v5028_v60  ;;  %v3199_v48 = vmul.f32 %v11814_v4, %v12060_v55 }
 0x533   : > { %9401 = vmatpush.xpose.msk.msra.mxu3 %vm1553_vm4, %v12014_v37  ;;  %9435 = vmatpush.xpose.msk.msra.mxu0 %vm1553_vm4, %v12020_v21  ;;  %v5044_v37 = vpack.c.b16 %v5031_v46, %v5030_v63  ;;  %v3065_v46 = vmul.f32 %v11812_v29, %v12058_v28  ;;  %v5027_v63 = vunpack.c.l.b16 %v2934_v51 }
 0x534   : > { %5062 = vmatpush.bf16.msrb.mxu1 %v5045_v22  ;;  %v3069_v22 = vpop.xlane.xlu1 %3068  ;;  %v3243_v60 = vsel %vm1553_vm4, %v3199_v48, 0.0  ;;  %v15918_v48 = vld [vmem:[#allocation48_spill] sm:$0xff] }
 0x535   : > { %9454 = vmatpush.xpose.msk.msrb.mxu2 %vm1553_vm4, %v11975_v15 }
 0x536   : > { %3171 = vadd.xlane.f32.xlu2 %v3170_v61  ;;  %3174 = vadd.xlane.f32.xlu0 %v3173_v0  ;;  %v12193_v61 = vpop.xlane.xlu2 %3004  ;;  %v3109_v0 = vsel %vm1553_vm4, %v3065_v46, 0.0 }
 0x537   : > { %9402 = vmatpush.xpose.msk.msra.mxu3 %vm1553_vm4, %v11997_v14  ;;  %9436 = vmatpush.xpose.msk.msra.mxu0 %vm1553_vm4, %v12003_v1  ;;  %15911 = vst [vmem:[#allocation68_spill] sm:$0xff] %v12193_v61  ;;  %v15921_v61 = vld [vmem:[#allocation45_spill] sm:$0xff] }
 0x538   : > { %5063 = vmatpush.bf16.msrb.mxu1 %v5044_v37  ;;  %3040 = vadd.xlane.f32.xlu1 %v3039_v20  ;;  %v5026_v37 = vunpack.c.l.b16 %v2933_v56 }
 0x539   : > { %9455 = vmatpush.xpose.msk.msrb.mxu2 %vm1553_vm4, %v11958_v12 }
 0x53a   : > { %v5042_v51 = vpack.c.b16 %v5027_v63, %v5026_v37  ;;  %v15914_v63 = vld [vmem:[#allocation51_spill] sm:$0xff] }
 0x53b   : > { %9403 = vmatpush.xpose.msk.msra.mxu3 %vm1553_vm4, %v11980_v42  ;;  %9437 = vmatpush.xpose.msk.msra.mxu0 %vm1553_vm4, %v11986_v34 }
 0x53c   : > { %5064 = vmatpush.bf16.msrb.mxu1 %v5043_v62  ;;  %v12211_v20 = vpop.xlane.xlu1 %3001  ;;  %v3042_v62 = vsel %vm1553_vm4, %v2998_v11, 0.0  ;;  %v15919_v11 = vld [vmem:[#allocation52_spill] sm:$0xff] }
 0x53d   : > { %9456 = vmatpush.xpose.msk.msrb.mxu2 %vm1553_vm4, %v11941_v2  ;;  %15912 = vst [vmem:[#allocation69_spill] sm:$0xff] %v12211_v20  ;;  %v15929_v20 = vld [vmem:[#allocation43_spill] sm:$0xff] }
 0x53e   : > { %3107 = vadd.xlane.f32.xlu2 %v3106_v39  ;;  %3110 = vadd.xlane.f32.xlu0 %v3109_v0  ;;  %v12217_v56 = vpop.xlane.xlu2 %3208  ;;  %v15916_v39 = vld [vmem:[#allocation54_spill] sm:$0xff]  ;;  %v3203_v0 = vpop.xlane.xlu0 %3202 }
 0x53f   : > { %9404 = vmatpush.xpose.msk.msra.mxu3 %vm1553_vm4, %v11963_v53  ;;  %9438 = vmatpush.xpose.msk.msra.mxu0 %vm1553_vm4, %v11969_v3  ;;  %15913 = vst [vmem:[#allocation70_spill] sm:$0xff] %v12217_v56 }
 0x540   : > { %5065 = vmatpush.bf16.msrb.mxu1 %v5042_v51  ;;  %v2980_v51 = vpack.c.bf16 %v12081_v44, %v12081_v44 }
 0x541   : > { %9457 = vmatpush.xpose.msk.msrb.mxu2 %vm1553_vm4, %v11924_v43 }
 0x542   : > { %v5331_v56 = vunpack.c.l.b16 %v2980_v51  ;;  %v2963_v51 = vpack.c.bf16 %v12073_v50, %v12073_v50 }
 0x543   : > { %9405 = vmatpush.xpose.msk.msra.mxu3 %vm1553_vm4, %v11946_v7  ;;  %9439 = vmatpush.xpose.msk.msra.mxu0 %vm1553_vm4, %v11952_v10  ;;  %v15926_v7 = vld [vmem:[#allocation42_spill] sm:$0xff] }
 0x544   : > { %v12234_v46 = vpop.xlane.xlu1 %3205  ;;  %v5185_v14 = vunpack.c.l.b16 %v2963_v51  ;;  %v2958_v51 = vpack.c.bf16 %v11986_v34, %v11986_v34  ;;  %v5323_v34 = vunpack.c.l.b16 %v2972_v58 }
 0x545   : > { %9458 = vmatpush.xpose.msk.msrb.mxu2 %vm1553_vm4, %v11907_v59 }
 0x546   : > { %3244 = vadd.xlane.f32.xlu2 %v3243_v60  ;;  %v12239_v37 = vpop.xlane.xlu2 %3010  ;;  %v2979_v60 = vpack.c.bf16 %v12060_v55, %v12060_v55  ;;  %v2964_v55 = vpack.c.bf16 %v12102_v38, %v12102_v38 }
 0x547   : > { %9406 = vmatpush.xpose.msk.msra.mxu3 %vm1553_vm4, %v11929_v9  ;;  %9440 = vmatpush.xpose.msk.msra.mxu0 %vm1553_vm4, %v11935_v47  ;;  %15915 = vst [vmem:[#allocation51_spill] sm:$0xff] %v12239_v37  ;;  %v2978_v37 = vpack.c.bf16 %v12043_v45, %v12043_v45  ;;  %v2976_v45 = vpack.c.bf16 %v12009_v30, %v12009_v30 }
 0x548   : > { %v2962_v30 = vpack.c.bf16 %v12054_v32, %v12054_v32  ;;  %v5186_v42 = vunpack.c.l.b16 %v2964_v55  ;;  %v2973_v32 = vpack.c.bf16 %v11958_v12, %v11958_v12  ;;  %v2622_v12 = vld [vmem:[%s15593_s16 + $0x2] sm:$0x1] }
 0x549   : > { %9459 = vmatpush.xpose.msk.msrb.mxu2 %vm1553_vm4, %v11890_v18 }
 0x54b   : > { %9407 = vmatpush.xpose.msk.msra.mxu3 %vm1553_vm4, %v11912_v16  ;;  %9441 = vmatpush.xpose.msk.msra.mxu0 %vm1553_vm4, %v11918_v17  ;;  %v15924_v16 = vld [vmem:[#allocation50_spill] sm:$0xff] }
 0x54d   : > { %9460 = vmatpush.xpose.msk.msrb.mxu2 %vm1553_vm4, %v15914_v63 }
 0x54e   : > { %3043 = vadd.xlane.f32.xlu2 %v3042_v62  ;;  %v15920_v62 = vld [vmem:[#allocation53_spill] sm:$0xff]  ;;  %v12273_v9 = vpop.xlane.xlu2 %3144 }
 0x54f   : > { %9408 = vmatpush.xpose.msk.msra.mxu3 %vm1553_vm4, %v15916_v39  ;;  %9442 = vmatpush.xpose.msk.msra.mxu0 %vm1553_vm4, %v15917_v33  ;;  %v5330_v39 = vunpack.c.l.b16 %v2979_v60  ;;  %15925 = vst [vmem:[#allocation48_spill] sm:$0xff] %v12273_v9  ;;  %v5329_v60 = vunpack.c.l.b16 %v2978_v37  ;;  %v15927_v37 = vld [vmem:[#allocation46_spill] sm:$0xff]  ;;  %v2961_v9 = vpack.c.bf16 %v12037_v36, %v12037_v36  ;;  %v15930_v36 = vld [vmem:[#allocation44_spill] sm:$0xff] }
 0x551   : > { %3775 = vperm.xlu1 %9969, %v3203_v0   ;;  %9461 = vmatpush.xpose.msk.msrb.mxu2 %vm1553_vm4, %v15918_v48  ;;  %v2977_v0 = vpack.c.bf16 %v12026_v5, %v12026_v5  ;;  %v5339_v5 = vpack.c.b16 %v5331_v56, %v5330_v39  ;;  %v2974_v56 = vpack.c.bf16 %v11975_v15, %v11975_v15  ;;  %v15928_v39 = vld [vmem:[#allocation47_spill] sm:$0xff] }
 0x552   : > { %3615 = vperm.xlu0 %9968, %v3069_v22   ;;  %v12263_v22 = vpop.xlane.xlu1 %3141  ;;  %v2960_v15 = vpack.c.bf16 %v12020_v21, %v12020_v21 }
 0x553   : > { %9409 = vmatpush.xpose.msk.msra.mxu3 %vm1553_vm4, %v15919_v11  ;;  %9443 = vmatpush.xpose.msk.msra.mxu0 %vm1553_vm4, %v15920_v62  ;;  %15922 = vst [vmem:[#allocation55_spill] sm:$0xff] %v12263_v22  ;;  %v15923_v11 = vld [vmem:[#allocation49_spill] sm:$0xff]  ;;  %v5328_v53 = vunpack.c.l.b16 %v2977_v0  ;;  %v5327_v0 = vunpack.c.l.b16 %v2976_v45  ;;  %v5324_v45 = vunpack.c.l.b16 %v2973_v32  ;;  %v2956_v32 = vpack.c.bf16 %v11952_v10, %v11952_v10 }
 0x554   : > { %v2623_v22 = vld [vmem:[%s15593_s16 + $0x3] sm:$0x1]  ;;  %v2967_v10 = vpack.c.bf16 %v15918_v48, %v15918_v48  ;;  %v2953_v48 = vpack.c.bf16 %v15917_v33, %v15917_v33 }
 0x555   : > { %9462 = vmatpush.xpose.msk.msrb.mxu2 %vm1553_vm4, %v15921_v61 }
 0x557   : > { %9410 = vmatpush.xpose.msk.msra.mxu3 %vm1553_vm4, %v15923_v11  ;;  %9444 = vmatpush.xpose.msk.msra.mxu0 %vm1553_vm4, %v15924_v16  ;;  %v2975_v11 = vpack.c.bf16 %v11992_v57, %v11992_v57  ;;  %v5338_v57 = vpack.c.b16 %v5329_v60, %v5328_v53  ;;  %v2959_v53 = vpack.c.bf16 %v12003_v1, %v12003_v1  ;;  %v5182_v60 = vunpack.c.l.b16 %v2960_v15 }
 0x559   : > { %9463 = vmatpush.xpose.msk.msrb.mxu2 %vm1553_vm4, %v15926_v7  ;;  %v5326_v55 = vunpack.c.l.b16 %v2975_v11  ;;  %v5325_v11 = vunpack.c.l.b16 %v2974_v56  ;;  %v5181_v56 = vunpack.c.l.b16 %v2959_v53  ;;  %v2966_v53 = vpack.c.bf16 %v15921_v61, %v15921_v61 }
 0x55a   : > { %v12308_v21 = vpop.xlane.xlu1 %3077 }
 0x55b   : > { %9411 = vmatpush.xpose.msk.msra.mxu3 %vm1553_vm4, %v15927_v37  ;;  %9445 = vmatpush.xpose.msk.msra.mxu0 %vm1553_vm4, %v15928_v39  ;;  %v5194_v37 = vpack.c.b16 %v5186_v42, %v5185_v14  ;;  %v15931_v42 = vld [vmem:[#allocation66_spill] sm:$0xff]  ;;  %v5337_v2 = vpack.c.b16 %v5327_v0, %v5326_v55  ;;  %v5183_v14 = vunpack.c.l.b16 %v2961_v9  ;;  %v2957_v9 = vpack.c.bf16 %v11969_v3, %v11969_v3 }
 0x55c   : > { %9464 = vmatmul.msk.f32.vlgmr.msrb.gmra.mxu2 %vm1553_vm4, %v2623_v22  ;;  %v2971_v22 = vpack.c.bf16 %v11924_v43, %v11924_v43  ;;  %v5336_v43 = vpack.c.b16 %v5325_v11, %v5324_v45  ;;  %v5180_v55 = vunpack.c.l.b16 %v2958_v51  ;;  %v2968_v3 = vpack.c.bf16 %v15914_v63, %v15914_v63 }
 0x55d   : > { %5348 = vmatpush.bf16.msra.mxu2 %v5339_v5  ;;  %v5184_v5 = vunpack.c.l.b16 %v2962_v30  ;;  %v12316_v30 = vpop.xlane.xlu2 %3080  ;;  %v2954_v63 = vpack.c.bf16 %v11918_v17, %v11918_v17  ;;  %v2965_v45 = vpack.c.bf16 %v15926_v7, %v15926_v7  ;;  %v5318_v51 = vunpack.c.l.b16 %v2967_v10 }
 0x55e   : > { %v5322_v0 = vunpack.c.l.b16 %v2971_v22  ;;  %v5319_v22 = vunpack.c.l.b16 %v2968_v3  ;;  %v5175_v7 = vunpack.c.l.b16 %v2953_v48 }
 0x55f   : > { %9412 = vmatpush.xpose.msk.msra.mxu3 %vm1553_vm4, %v15929_v20  ;;  %9446 = vmatpush.xpose.msk.msra.mxu0 %vm1553_vm4, %v15930_v36  ;;  %v5193_v1 = vpack.c.b16 %v5184_v5, %v5183_v14  ;;  %v15932_v14 = vld [vmem:[#allocation65_spill] sm:$0xff]  ;;  %v5176_v61 = vunpack.c.l.b16 %v2954_v63 }
 0x560   : > { %v5335_v58 = vpack.c.b16 %v5323_v34, %v5322_v0  ;;  %v5316_v34 = vunpack.c.l.b16 %v2965_v45  ;;  %v15938_v45 = vld [vmem:[#allocation41_spill] sm:$0xff] }
 0x561   : > { %5349 = vmatpush.bf16.msra.mxu2 %v5338_v57  ;;  %v2969_v57 = vpack.c.bf16 %v11890_v18, %v11890_v18  ;;  %v5179_v18 = vunpack.c.l.b16 %v2957_v9  ;;  %v15933_v9 = vld [vmem:[#allocation63_spill] sm:$0xff]  ;;  %v5189_v0 = vpack.c.b16 %v5176_v61, %v5175_v7  ;;  %v15940_v61 = vld [vmem:[#allocation61_spill] sm:$0xff]  ;;  %v15941_v7 = vld [vmem:[#allocation60_spill] sm:$0xff] }
 0x562   : > { %9447 = vmatmul.msk.f32.vlgmr.msra.gmra.mxu0 %vm1553_vm4, %v2622_v12  ;;  %v5178_v12 = vunpack.c.l.b16 %v2956_v32 }
 0x563   : > { %9414 = vmatpush.xpose.msk.msrb.mxu3 %vm1553_vm4, %v15931_v42  ;;  %5203 = vmatpush.bf16.msrb.mxu0 %v5194_v37  ;;  %v2970_v37 = vpack.c.bf16 %v11907_v59, %v11907_v59  ;;  %v5192_v59 = vpack.c.b16 %v5182_v60, %v5181_v56  ;;  %v5320_v5 = vunpack.c.l.b16 %v2969_v57  ;;  %v2952_v60 = vpack.c.bf16 %v15920_v62, %v15920_v62 }
 0x564   : > { %v5317_v56 = vunpack.c.l.b16 %v2966_v53  ;;  %v2950_v62 = vpack.c.bf16 %v15928_v39, %v15928_v39  ;;  %v3132_v39 = vmul.f32 %v11828_v23, %v12073_v50  ;;  %v2930_v53 = vpack.c.bf16 %v12048_v24, %v12048_v24  ;;  %v15939_v24 = vld [vmem:[#allocation62_spill] sm:$0xff] }
 0x565   : > { %5350 = vmatpush.bf16.msra.mxu2 %v5337_v2  ;;  %v5321_v15 = vunpack.c.l.b16 %v2970_v37  ;;  %v12350_v2 = vpop.xlane.xlu2 %3217  ;;  %v2951_v37 = vpack.c.bf16 %v15924_v16, %v15924_v16  ;;  %v5174_v57 = vunpack.c.l.b16 %v2952_v60 }
 0x566   : > { %3695 = vperm.xlu2 %9970, %v12118_v49   ;;  %v2620_v49 = vld [vmem:[%s15593_s16] sm:$0x1]  ;;  %v5332_v16 = vpack.c.b16 %v5317_v56, %v5316_v34  ;;  %v2925_v56 = vpack.c.bf16 %v15941_v7, %v15941_v7 }
 0x567   : > { %9415 = vmatpush.xpose.msk.msrb.mxu3 %vm1553_vm4, %v12058_v28  ;;  %5204 = vmatpush.bf16.msrb.mxu0 %v5193_v1  ;;  %v2955_v28 = vpack.c.bf16 %v11935_v47, %v11935_v47  ;;  %v12343_v47 = vpop.xlane.xlu1 %3214  ;;  %v5334_v17 = vpack.c.b16 %v5321_v15, %v5320_v5  ;;  %v12358_v1 = vpop.xlane.xlu0 %3138 }
 0x568   : > { %9413 = vmatmul.msk.f32.vlgmr.msra.gmra.mxu3 %vm1553_vm4, %v2620_v49 }
 0x569   : > { %5351 = vmatpush.bf16.msra.mxu2 %v5336_v43  ;;  %v5177_v11 = vunpack.c.l.b16 %v2955_v28  ;;  %v5333_v43 = vpack.c.b16 %v5319_v22, %v5318_v51  ;;  %v4894_v22 = vunpack.c.l.b16 %v2930_v53 }
 0x56b   : > { %9416 = vmatpush.xpose.msk.msrb.mxu3 %vm1553_vm4, %v12041_v54  ;;  %5205 = vmatpush.bf16.msrb.mxu0 %v5192_v59  ;;  %v5191_v54 = vpack.c.b16 %v5180_v55, %v5179_v18  ;;  %v5190_v33 = vpack.c.b16 %v5178_v12, %v5177_v11  ;;  %v5173_v55 = vunpack.c.l.b16 %v2951_v37  ;;  %v5172_v59 = vunpack.c.l.b16 %v2950_v62  ;;  %v15935_v12 = vld [vmem:[#allocation67_spill] sm:$0xff] }
 0x56c   : > { %v3176_v18 = vsel %vm1553_vm4, %v3132_v39, 0.0  ;;  %v15942_v62 = vld [vmem:[#allocation59_spill] sm:$0xff]  ;;  %v15944_v39 = vld [vmem:[#allocation56_spill] sm:$0xff] }
 0x56d   : > { %5352 = vmatpush.bf16.msra.mxu2 %v5335_v58  ;;  %v12373_v3 = vpop.xlane.xlu2 %3016  ;;  %v5188_v28 = vpack.c.b16 %v5174_v57, %v5173_v55  ;;  %v3200_v58 = vmul.f32 %v11814_v4, %v12081_v44  ;;  %v3066_v4 = vmul.f32 %v11812_v29, %v15931_v42  ;;  %v2924_v57 = vpack.c.bf16 %v15942_v62, %v15942_v62  ;;  %v15952_v62 = vld [vmem:[#allocation48_spill] sm:$0xff] }
 0x56e   : > { %3620 = vperm.xlu2 %9970, %v12156_v40   ;;  %v2949_v40 = vpack.c.bf16 %v15930_v36, %v15930_v36 }
 0x56f   : > { %9417 = vmatpush.xpose.msk.msrb.mxu3 %vm1553_vm4, %v15932_v14  ;;  %5206 = vmatpush.bf16.msrb.mxu0 %v5191_v54  ;;  %v12369_v32 = vpop.xlane.xlu1 %3013  ;;  %v12379_v36 = vpop.xlane.xlu0 %3074  ;;  %v3246_v10 = vsel %vm1553_vm4, %v3200_v58, 0.0  ;;  %v3112_v5 = vsel %vm1553_vm4, %v3066_v4, 0.0  ;;  %v2922_v58 = vpack.c.bf16 %v15944_v39, %v15944_v39 }
 0x571   : > { %5353 = vmatpush.bf16.msra.mxu2 %v5334_v17  ;;  %v15937_v17 = vld [vmem:[#allocation69_spill] sm:$0xff] }
 0x573   : > { %9418 = vmatpush.xpose.msk.msrb.mxu3 %vm1553_vm4, %v15933_v9  ;;  %5207 = vmatpush.bf16.msrb.mxu0 %v5190_v33  ;;  %v2926_v33 = vpack.c.bf16 %v15940_v61, %v15940_v61 }
 0x575   : > { %5354 = vmatpush.bf16.msra.mxu2 %v5333_v43  ;;  %v12391_v44 = vpop.xlane.xlu2 %3153 }
 0x577   : > { %9419 = vmatpush.xpose.msk.msrb.mxu3 %vm1553_vm4, %v11990_v35  ;;  %5208 = vmatpush.bf16.msrb.mxu0 %v5189_v0  ;;  %v5171_v35 = vunpack.c.l.b16 %v2949_v40  ;;  %v12387_v50 = vpop.xlane.xlu1 %3150  ;;  %v12395_v49 = vpop.xlane.xlu0 %3007  ;;  %v4890_v40 = vunpack.c.l.b16 %v2926_v33 }
 0x579   : > { %5355 = vmatpush.bf16.msra.mxu2 %v5332_v16  ;;  %v5187_v15 = vpack.c.b16 %v5172_v59, %v5171_v35  ;;  %v15943_v16 = vld [vmem:[#allocation57_spill] sm:$0xff]  ;;  %v4889_v59 = vunpack.c.l.b16 %v2925_v56 }
 0x57a   : > { %v2923_v55 = vpack.c.bf16 %v15943_v16, %v15943_v16 }
 0x57b   : > { %9420 = vmatpush.xpose.msk.msrb.mxu3 %vm1553_vm4, %v11973_v6  ;;  %5209 = vmatpush.bf16.msrb.mxu0 %v5188_v28  ;;  %v15934_v6 = vld [vmem:[#allocation58_spill] sm:$0xff] }
 0x57c   : > { %3177 = vadd.xlane.f32.xlu1 %v3176_v18  ;;  %3247 = vadd.xlane.f32.xlu0 %v3246_v10  ;;  %v4901_v18 = vpack.c.b16 %v4890_v40, %v4889_v59  ;;  %v15945_v10 = vld [vmem:[#allocation54_spill] sm:$0xff]  ;;  %v15953_v59 = vld [vmem:[#allocation55_spill] sm:$0xff] }
 0x57d   : > { %v2921_v4 = vpack.c.bf16 %v15945_v10, %v15945_v10 }
 0x57f   : > { %5210 = vmatpush.bf16.msrb.mxu0 %v5187_v15  ;;  %9421 = vmatpush.xpose.msk.msrb.mxu3 %vm1553_vm4, %v11956_v26  ;;  %v12400_v63 = vpop.xlane.xlu1 %3086  ;;  %v12404_v26 = vpop.xlane.xlu2 %3089  ;;  %v4888_v15 = vunpack.c.l.b16 %v2924_v57 }
 0x580   : > { %v12406_v29 = vpop.xlane.xlu0 %3211 }
 0x583   : > { %9422 = vmatpush.xpose.msk.msrb.mxu3 %vm1553_vm4, %v15934_v6 }
 0x584   : > { %3113 = vadd.xlane.f32.xlu1 %v3112_v5  ;;  %v15946_v5 = vld [vmem:[#allocation52_spill] sm:$0xff] }
 0x587   : > { %9423 = vmatpush.xpose.msk.msrb.mxu3 %vm1553_vm4, %v11922_v41  ;;  %v12413_v42 = vpop.xlane.xlu1 %3223  ;;  %v3133_v41 = vmul.f32 %v11828_v23, %v12102_v38  ;;  %v12419_v54 = vpop.xlane.xlu2 %3226  ;;  %v2929_v38 = vpack.c.bf16 %v12031_v13, %v12031_v13  ;;  %v2927_v13 = vpack.c.bf16 %v15939_v24, %v15939_v24 }
 0x589   : > { %v4893_v51 = vunpack.c.l.b16 %v2929_v38  ;;  %v4891_v34 = vunpack.c.l.b16 %v2927_v13  ;;  %v15948_v38 = vld [vmem:[#allocation68_spill] sm:$0xff] }
 0x58b   : > { %9424 = vmatpush.xpose.msk.msrb.mxu3 %vm1553_vm4, %v11905_v31  ;;  %v2932_v31 = vpack.c.bf16 %v15935_v12, %v15935_v12  ;;  %v4903_v9 = vpack.c.b16 %v4894_v22, %v4893_v51  ;;  %v2917_v22 = vpack.c.bf16 %v15929_v20, %v15929_v20  ;;  %v10498_v51 = vld [vmem:[#allocation11] ss:$0 sm:$0xff] }
 0x58c   : > { %v2999_v61 = vmul.f32 %v10498_v51, %v15935_v12 }
 0x58d   : > { %v4896_v23 = vunpack.c.l.b16 %v2932_v31  ;;  %v4881_v33 = vunpack.c.l.b16 %v2917_v22 }
 0x58e   : > { %v3045_v7 = vsel %vm1553_vm4, %v2999_v61, 0.0 }
 0x58f   : > { %9425 = vmatpush.xpose.msk.msrb.mxu3 %vm1553_vm4, %v11888_v8  ;;  %v2931_v8 = vpack.c.bf16 %v12065_v19, %v12065_v19  ;;  %v12436_v19 = vpop.xlane.xlu1 %3022  ;;  %v12446_v60 = vpop.xlane.xlu2 %3025 }
 0x590   : > { %3780 = vperm.xlu0 %9968, %v12234_v46   ;;  %v12425_v46 = vpop.xlane.xlu0 %3147 }
 0x591   : > { %v4895_v48 = vunpack.c.l.b16 %v2931_v8  ;;  %v4886_v8 = vunpack.c.l.b16 %v2922_v58 }
 0x593   : > { %9426 = vmatpush.xpose.msk.msrb.mxu3 %vm1553_vm4, %v11869_v27  ;;  %v3179_v27 = vsel %vm1553_vm4, %v3133_v41, 0.0  ;;  %v4904_v11 = vpack.c.b16 %v4896_v23, %v4895_v48  ;;  %v2920_v41 = vpack.c.bf16 %v15946_v5, %v15946_v5  ;;  %v4885_v23 = vunpack.c.l.b16 %v2921_v4  ;;  %v15949_v48 = vld [vmem:[#allocation46_spill] sm:$0xff] }
 0x597   : > { %9427 = vmatpush.xpose.msk.msrb.mxu3 %vm1553_vm4, %v11852_v25  ;;  %3180 = vadd.xlane.f32.xlu2 %v3179_v27  ;;  %v15936_v25 = vld [vmem:[#allocation64_spill] sm:$0xff]  ;;  %v12458_v28 = vpop.xlane.xlu1 %3159  ;;  %v12462_v35 = vpop.xlane.xlu2 %3162  ;;  %v15947_v27 = vld [vmem:[#allocation49_spill] sm:$0xff] }
 0x598   : > { %v2928_v14 = vpack.c.bf16 %v15936_v25, %v15936_v25  ;;  %v3084_v37 = vpop.xlane.xlu0 %3083  ;;  %v2919_v53 = vpack.c.bf16 %v15947_v27, %v15947_v27  ;;  %v2918_v25 = vpack.c.bf16 %v15949_v48, %v15949_v48 }
 0x59a   : > { %v4892_v43 = vunpack.c.l.b16 %v2928_v14  ;;  %v4882_v13 = vunpack.c.l.b16 %v2918_v25 }
 0x59b   : > { %9428 = vmatpush.xpose.msk.msrb.mxu3 %vm1553_vm4, %v11836_v52  ;;  %v2621_v52 = vld [vmem:[%s15593_s16 + $0x1] sm:$0x1] }
 0x59c   : > { %v4902_v0 = vpack.c.b16 %v4892_v43, %v4891_v34  ;;  %v4897_v43 = vpack.c.b16 %v4882_v13, %v4881_v33  ;;  %v15951_v34 = vld [vmem:[#allocation51_spill] sm:$0xff] }
 0x59d   : > { %3535 = vperm.xlu1 %9969, %v15937_v17   ;;  %v4899_v17 = vpack.c.b16 %v4886_v8, %v4885_v23 }
 0x59f   : > { %9429 = vmatpush.xpose.msk.msrb.mxu3 %vm1553_vm4, %v15938_v45  ;;  %v12474_v14 = vpop.xlane.xlu1 %3095  ;;  %v12478_v45 = vpop.xlane.xlu2 %3098 }
 0x5a0   : > { %v3221_v6 = vpop.xlane.xlu0 %3220 }
 0x5a2   : > { %9430 = vmatmul.msk.f32.vlgmr.msrb.gmra.mxu3 %vm1553_vm4, %v2621_v52 }
 0x5a3   : > { %4913 = vmatpush.bf16.msra.mxu3 %v4904_v11  ;;  %v4884_v11 = vunpack.c.l.b16 %v2920_v41 }
 0x5a5   : > { %3700 = vperm.xlu1 %9969, %v12358_v1   ;;  %v4887_v1 = vunpack.c.l.b16 %v2923_v55 }
 0x5a7   : > { %4914 = vmatpush.bf16.msra.mxu3 %v4903_v9  ;;  %v4900_v31 = vpack.c.b16 %v4888_v15, %v4887_v1  ;;  %v15950_v9 = vld [vmem:[#allocation70_spill] sm:$0xff]  ;;  %v12484_v20 = vpop.xlane.xlu1 %3232  ;;  %v3236_v56 = vpop.xlane.xlu2 %3235 }
 0x5a8   : > { %v3020_v52 = vpop.xlane.xlu0 %3019 }
 0x5ab   : > { %4915 = vmatpush.bf16.msra.mxu3 %v4902_v0 }
 0x5ad   : > { %3625 = vperm.xlu1 %9969, %v12379_v36   ;;  %v4883_v36 = vunpack.c.l.b16 %v2919_v53 }
 0x5af   : > { %4916 = vmatpush.bf16.msra.mxu3 %v4901_v18  ;;  %3540 = vperm.xlu2 %9970, %v15948_v38   ;;  %v4898_v24 = vpack.c.b16 %v4884_v11, %v4883_v36  ;;  %v12488_v57 = vpop.xlane.xlu1 %3031  ;;  %v3035_v12 = vpop.xlane.xlu2 %3034 }
 0x5b3   : > { %4917 = vmatpush.bf16.msra.mxu3 %v4900_v31 }
 0x5b5   : > { %3790 = vperm.xlu1 %9969, %v12406_v29   ;;  %v3157_v29 = vpop.xlane.xlu0 %3156 }
 0x5b7   : > { %4918 = vmatpush.bf16.msra.mxu3 %v4899_v17  ;;  %3785 = vperm.xlu2 %9970, %v15950_v9   ;;  %v12492_v40 = vpop.xlane.xlu1 %3168  ;;  %v3172_v16 = vpop.xlane.xlu2 %3171 }
 0x5ba   : > { %3046 = vadd.xlane.f32.xlu0 %v3045_v7 }
 0x5bb   : > { %4919 = vmatpush.bf16.msra.mxu3 %v4898_v24 }
 0x5bd   : > { %3550 = vperm.xlu1 %9969, %v15951_v34   ;;  %v3093_v0 = vpop.xlane.xlu0 %3092 }
 0x5bf   : > { %4920 = vmatpush.bf16.msra.mxu3 %v4897_v43  ;;  %3710 = vperm.xlu2 %9970, %v15952_v62   ;;  %v12498_v39 = vpop.xlane.xlu1 %3104 }
 0x5c5   : > { %3715 = vperm.xlu1 %9969, %v12425_v46   ;;  %v3230_v55 = vpop.xlane.xlu0 %3229  ;;  %v3108_v46 = vpop.xlane.xlu2 %3107 }
 0x5c7   : > { %3635 = vperm.xlu2 %9970, %v12316_v30   ;;  %v12502_v30 = vpop.xlane.xlu1 %3241 }
 0x5cd   : > { %3640 = vperm.xlu1 %9969, %v3084_v37   ;;  %v3029_v58 = vpop.xlane.xlu0 %3028 }
 0x5ce   : > { %3545 = vperm.xlu0 %9968, %v12395_v49   ;;  %v3245_v49 = vpop.xlane.xlu2 %3244 }
 0x5cf   : > { %3800 = vperm.xlu2 %9970, %v12350_v2   ;;  %v12506_v37 = vpop.xlane.xlu1 %3040 }
 0x5d5   : > { %3805 = vperm.xlu1 %9969, %v3221_v6   ;;  %v3166_v2 = vpop.xlane.xlu0 %3165 }
 0x5d6   : > { %3705 = vperm.xlu0 %9968, %v15953_v59  }
 0x5d7   : > { %3560 = vperm.xlu2 %9970, %v12373_v3   ;;  %v3044_v3 = vpop.xlane.xlu2 %3043  ;;  %v12510_v18 = vpop.permute.xlu1 %3775 }
 0x5dd   : > { %3565 = vperm.xlu1 %9969, %v3020_v52  }
 0x5de   : > { %3630 = vperm.xlu0 %9968, %v12308_v21   ;;  %v3102_v21 = vpop.xlane.xlu0 %3101 }
 0x5df   : > { %3725 = vperm.xlu2 %9970, %v12391_v44   ;;  %v12514_v44 = vpop.permute.xlu2 %3695  ;;  %v3530_v22 = vpop.f32.mrf.mxu2 }
 0x5e0   : > { %v3459_v51 = vpop.f32.mrf.mxu0 }
 0x5e1   : > { %v12572_v61 = vperm.slane %v3459_v51, 0 }
 0x5e5   : > { %3730 = vperm.xlu1 %9969, %v3157_v29   ;;  %v3889_v29 = vadd.f32 %v12572_v61, %v12514_v44 }
 0x5e6   : > { %3795 = vperm.xlu0 %9968, %v12343_v47   ;;  %v3239_v47 = vpop.xlane.xlu0 %3238 }
 0x5e7   : > { %3650 = vperm.xlu2 %9970, %v12404_v26  }
 0x5ed   : > { %3655 = vperm.xlu1 %9969, %v3093_v0   ;;  %v3953_v0 = vmul.f32 0.2, %v3889_v29 }
 0x5ee   : > { %3555 = vperm.xlu0 %9968, %v12369_v32   ;;  %v12520_v32 = vpop.permute.xlu2 %3620 }
 0x5ef   : > { %3815 = vperm.xlu2 %9970, %v12419_v54   ;;  %v12516_v26 = vpop.xlane.xlu1 %3177  ;;  %v3038_v54 = vpop.xlane.xlu0 %3037 }
 0x5f5   : > { %3820 = vperm.xlu1 %9969, %v3230_v55  }
 0x5f6   : > { %3720 = vperm.xlu0 %9968, %v12387_v50  }
 0x5f7   : > { %3575 = vperm.xlu2 %9970, %v12446_v60   ;;  %v12522_v15 = vpop.xlane.xlu1 %3113  ;;  %v3175_v60 = vpop.xlane.xlu0 %3174 }
 0x5fd   : > { %3580 = vperm.xlu1 %9969, %v3029_v58   ;;  %v4017_v58 = vmax.f32 %v3889_v29, %v3953_v0 }
 0x5fe   : > { %3645 = vperm.xlu0 %9968, %v12400_v63  }
 0x5ff   : > { %3740 = vperm.xlu2 %9970, %v12462_v35   ;;  %v3111_v4 = vpop.xlane.xlu0 %3110 }
 0x605   : > { %3745 = vperm.xlu1 %9969, %v3166_v2  }
 0x606   : > { %3810 = vperm.xlu0 %9968, %v12413_v42  }
 0x607   : > { %3665 = vperm.xlu2 %9970, %v12478_v45   ;;  %v12535_v6 = vpop.permute.xlu0 %3615  ;;  %v12565_v45 = vperm.slane %v3530_v22, 0 }
 0x60a   : > { %v3181_v50 = vpop.xlane.xlu2 %3180 }
 0x60d   : > { %3670 = vperm.xlu1 %9969, %v3102_v21  }
 0x60e   : > { %3570 = vperm.xlu0 %9968, %v12436_v19  }
 0x60f   : > { %v12526_v10 = vpop.permute.xlu1 %3535  ;;  %3830 = vperm.xlu2 %9970, %v3236_v56   ;;  %v3248_v41 = vpop.xlane.xlu0 %3247 }
 0x612   : > { %v12529_v63 = vpop.permute.xlu2 %3540 }
 0x615   : > { %3835 = vperm.xlu1 %9969, %v3239_v47  }
 0x616   : > { %3735 = vperm.xlu0 %9968, %v12458_v28  }
 0x617   : > { %v3701_v35 = vpop.permute.xlu1 %3700  ;;  %3590 = vperm.xlu2 %9970, %v3035_v12   ;;  %v3781_v8 = vpop.permute.xlu0 %3780 }
 0x618   : > { %v3906_v13 = vadd.f32 %v12565_v45, %v3781_v8  ;;  %v3890_v43 = vadd.f32 %v12572_v61, %v3701_v35 }
 0x61a   : > { %v3786_v1 = vpop.permute.xlu2 %3785  ;;  %v3970_v33 = vmul.f32 0.2, %v3906_v13 }
 0x61c   : > { %v4034_v34 = vmax.f32 %v3906_v13, %v3970_v33 }
 0x61d   : > { %3595 = vperm.xlu1 %9969, %v3038_v54  }
 0x61e   : > { %3660 = vperm.xlu0 %9968, %v12474_v14  }
 0x61f   : > { %v12532_v42 = vpop.permute.xlu1 %3625  ;;  %3755 = vperm.xlu2 %9970, %v3172_v16  }
 0x622   : > { %v3711_v5 = vpop.permute.xlu2 %3710 }
 0x625   : > { %3760 = vperm.xlu1 %9969, %v3175_v60  }
 0x626   : > { %3825 = vperm.xlu0 %9968, %v12484_v20   ;;  %v9702_v20 = vld [vmem:[%s12580_s13] sm:$0xff]  }
 0x627   : > { %v12537_v19 = vpop.permute.xlu1 %3790  ;;  %3680 = vperm.xlu2 %9970, %v3108_v46   ;;  %v12586_v56 = vunpack.c.h.bf16 %v9702_v20  ;;  %v12603_v46 = vunpack.c.l.bf16 %v9702_v20 }
 0x629   : > { %15955 = vst [vmem:[#allocation53_spill] sm:$0xff] %v12586_v56  ;;  %v12594_v12 = vadd.f32 %v12586_v56, %v4034_v34  ;;  %v12613_v21 = vadd.f32 %v12603_v46, %v4017_v58 }
 0x62a   : > { %v12540_v28 = vpop.permute.xlu2 %3635  ;;  %15956 = vst [vmem:[#allocation45_spill] sm:$0xff] %v12603_v46 }
 0x62d   : > { %3685 = vperm.xlu1 %9969, %v3111_v4   ;;  %v3047_v23 = vpop.xlane.xlu0 %3046 }
 0x62e   : > { %3585 = vperm.xlu0 %9968, %v12488_v57   ;;  %v3954_v57 = vmul.f32 0.2, %v3890_v43 }
 0x62f   : > { %v12542_v31 = vpop.permute.xlu1 %3550  ;;  %3605 = vperm.xlu2 %9970, %v3044_v3  }
 0x630   : > { %v4018_v55 = vmax.f32 %v3890_v43, %v3954_v57 }
 0x632   : > { %v3801_v27 = vpop.permute.xlu2 %3800 }
 0x633   : > { %v3910_v47 = vadd.f32 %v12565_v45, %v3801_v27  ;;  %v9774_v27 = vld [vmem:[%s12580_s13 + $0x10] sm:$0xff]  }
 0x634   : > { %v12637_v51 = vunpack.c.h.bf16 %v9774_v27  ;;  %v12643_v34 = vunpack.c.l.bf16 %v9774_v27  ;;  %v3317_v27 = vpop.f32.mrf.mxu3 }
 0x635   : > { %3845 = vperm.xlu1 %9969, %v3245_v49   ;;  %v12606_v49 = vadd.f32 %v12586_v56, %v4018_v55  ;;  %v3974_v4 = vmul.f32 0.2, %v3910_v47 }
 0x636   : > { %3750 = vperm.xlu0 %9968, %v12492_v40   ;;  %v3907_v40 = vadd.f32 %v12565_v45, %v3786_v1  ;;  %15960 = vst [vmem:[#allocation43_spill] sm:$0xff] %v12637_v51 }
 0x637   : > { %v12545_v53 = vpop.permute.xlu1 %3715  ;;  %3770 = vperm.xlu2 %9970, %v3181_v50   ;;  %15962 = vst [vmem:[#allocation66_spill] sm:$0xff] %v12643_v34 }
 0x638   : > { %v3893_v22 = vadd.f32 %v12572_v61, %v12545_v53 }
 0x63a   : > { %v12548_v38 = vpop.permute.xlu2 %3560 }
 0x63d   : > { %3610 = vperm.xlu1 %9969, %v3047_v23   ;;  %v4038_v23 = vmax.f32 %v3910_v47, %v3974_v4 }
 0x63e   : > { %3675 = vperm.xlu0 %9968, %v12498_v39   ;;  %v3892_v39 = vadd.f32 %v12572_v61, %v3711_v5 }
 0x63f   : > { %v12550_v48 = vpop.permute.xlu1 %3640  ;;  %v12641_v20 = vadd.f32 %v12637_v51, %v4038_v23 }
 0x640   : > { %v12553_v25 = vpop.permute.xlu0 %3545  ;;  %v3956_v3 = vmul.f32 0.2, %v3892_v39 }
 0x641   : > { %15961 = vst [vmem:[#allocation44_spill] sm:$0xff] %v12641_v20 }
 0x642   : > { %v12555_v14 = vpop.permute.xlu2 %3725 }
 0x646   : > { %3840 = vperm.xlu0 %9968, %v12502_v30   ;;  %v3971_v30 = vmul.f32 0.2, %v3907_v40 }
 0x647   : > { %v12558_v17 = vpop.permute.xlu1 %3805 }
 0x648   : > { %v12560_v11 = vpop.permute.xlu0 %3705  ;;  %v4035_v44 = vmax.f32 %v3907_v40, %v3971_v30  ;;  %v3911_v40 = vadd.f32 %v12565_v45, %v12558_v17  ;;  %v9776_v30 = vld [vmem:[%s12580_s13 + $0x20] sm:$0xff]  }
 0x64a   : > { %v12562_v36 = vpop.permute.xlu2 %3650 }
 0x64e   : > { %3600 = vperm.xlu0 %9968, %v12506_v37   ;;  %v9773_v37 = vld [vmem:[%s12580_s13 + $0x8] sm:$0xff]  }
 0x64f   : > { %v12569_v24 = vpop.permute.xlu1 %3565  ;;  %v12619_v54 = vunpack.c.l.bf16 %v9773_v37  ;;  %v12622_v60 = vunpack.c.h.bf16 %v9773_v37  ;;  %v3975_v37 = vmul.f32 0.2, %v3911_v40 }
 0x650   : > { %v12567_v52 = vpop.permute.xlu0 %3630 }
 0x651   : > { %15957 = vst [vmem:[#allocation50_spill] sm:$0xff] %v12619_v54  ;;  %v12625_v1 = vadd.f32 %v12619_v54, %v4035_v44  ;;  %v12661_v44 = vunpack.c.h.bf16 %v9776_v30  ;;  %v4039_v4 = vmax.f32 %v3911_v40, %v3975_v37 }
 0x652   : > { %v12582_v9 = vpop.permute.xlu2 %3815  ;;  %15958 = vst [vmem:[#allocation42_spill] sm:$0xff] %v12622_v60 }
 0x653   : > { %15965 = vst [vmem:[#allocation58_spill] sm:$0xff] %v12661_v44 }
 0x656   : > { %3765 = vperm.xlu0 %9968, %v12516_v26  }
 0x657   : > { %v12590_v62 = vpop.permute.xlu1 %3730 }
 0x658   : > { %v3796_v7 = vpop.permute.xlu0 %3795 }
 0x659   : > { %v3909_v50 = vadd.f32 %v12565_v45, %v3796_v7  ;;  %v3957_v7 = vmul.f32 0.2, %v3893_v22 }
 0x65a   : > { %v12600_v59 = vpop.permute.xlu2 %3575 }
 0x65b   : > { %v3973_v5 = vmul.f32 0.2, %v3909_v50  ;;  %v4021_v0 = vmax.f32 %v3893_v22, %v3957_v7 }
 0x65d   : > { %v4037_v33 = vmax.f32 %v3909_v50, %v3973_v5  ;;  %v12668_v50 = vld [vmem:[%s12580_s13 + $0x18] sm:$0xff]  }
 0x65e   : > { %3690 = vperm.xlu0 %9968, %v12522_v15   ;;  %v4020_v15 = vmax.f32 %v3892_v39, %v3956_v3  ;;  %v12659_v3 = vadd.f32 %v12643_v34, %v4021_v0 }
 0x65f   : > { %v12608_v2 = vpop.permute.xlu1 %3655  ;;  %v12649_v53 = vadd.f32 %v12643_v34, %v4037_v33  ;;  %v12679_v33 = vunpack.c.l.bf16 %v12668_v50 }
 0x660   : > { %4211 = vmax.xlane.f32.xlu2 %v12594_v12  ;;  %v12598_v16 = vpop.permute.xlu0 %3555  ;;  %15964 = vst [vmem:[#allocation63_spill] sm:$0xff] %v12659_v3 }
 0x661   : > { %15963 = vst [vmem:[#allocation65_spill] sm:$0xff] %v12649_v53 }
 0x662   : > { %v3741_v35 = vpop.permute.xlu2 %3740  ;;  %15967 = vst [vmem:[#allocation64_spill] sm:$0xff] %v12679_v33 }
 0x663   : > { %v3898_v39 = vadd.f32 %v12572_v61, %v3741_v35  ;;  %v3895_v35 = vadd.f32 %v12572_v61, %v12555_v14  ;;  %v12684_v14 = vadd.f32 %v12679_v33, %v4039_v4  ;;  %v3908_v4 = vadd.f32 %v12565_v45, %v12537_v19 }
 0x665   : > { %v3962_v47 = vmul.f32 0.2, %v3898_v39  ;;  %v3959_v7 = vmul.f32 0.2, %v3895_v35  ;;  %15968 = vst [vmem:[#allocation69_spill] sm:$0xff] %v12684_v14 }
 0x666   : > { %3850 = vperm.xlu0 %9968, %v3248_v41   ;;  %v12629_v41 = vadd.f32 %v12622_v60, %v4020_v15 }
 0x667   : > { %4179 = vmax.xlane.f32.xlu1 %v12606_v49  ;;  %v3821_v8 = vpop.permute.xlu1 %3820  ;;  %v4026_v23 = vmax.f32 %v3898_v39, %v3962_v47 }
 0x668   : > { %4177 = vmax.xlane.f32.xlu2 %v12613_v21  ;;  %v12617_v26 = vpop.permute.xlu0 %3720  ;;  %15959 = vst [vmem:[#allocation47_spill] sm:$0xff] %v12629_v41  ;;  %v3914_v43 = vadd.f32 %v12565_v45, %v3821_v8 }
 0x669   : > { %v12690_v40 = vadd.f32 %v12661_v44, %v4026_v23 }
 0x66a   : > { %v12645_v29 = vpop.permute.xlu2 %3665  ;;  %v3978_v57 = vmul.f32 0.2, %v3914_v43 }
 0x66b   : > { %15969 = vst [vmem:[#allocation41_spill] sm:$0xff] %v12690_v40 }
 0x66c   : > { %v4042_v58 = vmax.f32 %v3914_v43, %v3978_v57  ;;  %v3905_v43 = vadd.f32 %v12565_v45, %v12510_v18  ;;  %v12686_v57 = vperm.slane %v3317_v27, 0 }
 0x66e   : > { %v12665_v15 = vadd.f32 %v12661_v44, %v4042_v58  ;;  %v3969_v39 = vmul.f32 0.2, %v3905_v43  ;;  %v4023_v58 = vmax.f32 %v3895_v35, %v3959_v7  ;;  %v3857_v18 = vadd.f32 %v12686_v57, %v12526_v10 }
 0x66f   : > { %4213 = vmax.xlane.f32.xlu1 %v12625_v1  ;;  %v12675_v8 = vpop.permute.xlu1 %3580 }
 0x670   : > { %4183 = vmax.xlane.f32.xlu2 %v12629_v41  ;;  %v12635_v13 = vpop.permute.xlu0 %3645  ;;  %15966 = vst [vmem:[#allocation67_spill] sm:$0xff] %v12665_v15  ;;  %v12702_v35 = vadd.f32 %v12679_v33, %v4023_v58  ;;  %v3921_v7 = vmul.f32 0.2, %v3857_v18  ;;  %v3891_v58 = vadd.f32 %v12572_v61, %v12560_v11 }
 0x672   : > { %v3831_v17 = vpop.permute.xlu2 %3830  ;;  %15971 = vst [vmem:[#allocation61_spill] sm:$0xff] %v12702_v35 }
 0x673   : > { %v3916_v22 = vadd.f32 %v12565_v45, %v3831_v17  ;;  %v9777_v17 = vld [vmem:[%s12580_s13 + $0x28] sm:$0xff]  }
 0x675   : > { %v3980_v0 = vmul.f32 0.2, %v3916_v22 }
 0x677   : > { %4219 = vmax.xlane.f32.xlu1 %v12641_v20  ;;  %v4044_v27 = vmax.f32 %v3916_v22, %v3980_v0  ;;  %v3746_v23 = vpop.permute.xlu1 %3745 }
 0x678   : > { %4217 = vmax.xlane.f32.xlu2 %v12649_v53  ;;  %v12654_v55 = vpop.permute.xlu0 %3810 }
 0x67f   : > { %4185 = vmax.xlane.f32.xlu1 %v12659_v3 }
 0x680   : > { %4227 = vmax.xlane.f32.xlu2 %v12665_v15  ;;  %v12673_v5 = vpop.permute.xlu0 %3570  ;;  %v4033_v15 = vmax.f32 %v3905_v43, %v3969_v39  ;;  %v3985_v43 = vmax.f32 %v3857_v18, %v3921_v7  ;;  %v3860_v39 = vadd.f32 %v12686_v57, %v12542_v31  ;;  %v3863_v7 = vadd.f32 %v12686_v57, %v12569_v24 }
 0x682   : > { %v12706_v10 = vadd.f32 %v12603_v46, %v4033_v15  ;;  %v12719_v15 = vunpack.c.l.bf16 %v9776_v30  ;;  %v3927_v53 = vmul.f32 0.2, %v3863_v7 }
 0x684   : > { %15973 = vst [vmem:[#allocation59_spill] sm:$0xff] %v12719_v15 }
 0x687   : > { %4221 = vmax.xlane.f32.xlu1 %v12684_v14  ;;  %v12699_v14 = vunpack.c.h.bf16 %v9777_v17 }
 0x688   : > { %4195 = vmax.xlane.f32.xlu2 %v12690_v40  ;;  %v3736_v37 = vpop.permute.xlu0 %3735  ;;  %v3972_v40 = vmul.f32 0.2, %v3908_v4 }
 0x689   : > { %v3897_v47 = vadd.f32 %v12572_v61, %v3736_v37  ;;  %15970 = vst [vmem:[#allocation62_spill] sm:$0xff] %v12699_v14  ;;  %v12709_v37 = vadd.f32 %v12699_v14, %v4044_v27 }
 0x68a   : > { %v4036_v0 = vmax.f32 %v3908_v4, %v3972_v40  ;;  %v12731_v40 = vadd.f32 %v12603_v46, %v3985_v43 }
 0x68b   : > { %v3961_v3 = vmul.f32 0.2, %v3897_v47  ;;  %15972 = vst [vmem:[#allocation60_spill] sm:$0xff] %v12709_v37 }
 0x68c   : > { %v12728_v18 = vadd.f32 %v12622_v60, %v4036_v0  ;;  %15975 = vst [vmem:[#allocation56_spill] sm:$0xff] %v12731_v40  ;;  %v3899_v0 = vadd.f32 %v12572_v61, %v3746_v23  ;;  %v3991_v23 = vmax.f32 %v3863_v7, %v3927_v53  ;;  %v3896_v7 = vadd.f32 %v12572_v61, %v12590_v62 }
 0x68d   : > { %v4025_v19 = vmax.f32 %v3897_v47, %v3961_v3  ;;  %v12724_v3 = vpop.permute.xlu1 %3670  ;;  %v3924_v47 = vmul.f32 0.2, %v3860_v39 }
 0x68f   : > { %4189 = vmax.xlane.f32.xlu1 %v12702_v35  ;;  %v12722_v27 = vadd.f32 %v12719_v15, %v4025_v19  ;;  %v3955_v35 = vmul.f32 0.2, %v3891_v58  ;;  %v3988_v30 = vmax.f32 %v3860_v39, %v3924_v47  ;;  %v3894_v19 = vadd.f32 %v12572_v61, %v12617_v26 }
 0x690   : > { %4209 = vmax.xlane.f32.xlu0 %v12706_v10  ;;  %4231 = vmax.xlane.f32.xlu2 %v12709_v37  ;;  %v12713_v22 = vpop.permute.xlu0 %3660  ;;  %v12741_v37 = vunpack.c.l.bf16 %v9777_v17  ;;  %v3858_v17 = vadd.f32 %v12686_v57, %v12529_v63  ;;  %v3912_v47 = vadd.f32 %v12565_v45, %v12654_v55 }
 0x691   : > { %15974 = vst [vmem:[#allocation57_spill] sm:$0xff] %v12722_v27  ;;  %v4019_v4 = vmax.f32 %v3891_v58, %v3955_v35  ;;  %v3958_v20 = vmul.f32 0.2, %v3894_v19  ;;  %v12747_v39 = vadd.f32 %v12622_v60, %v3988_v30  ;;  %v3963_v35 = vmul.f32 0.2, %v3899_v0 }
 0x692   : > { %15976 = vst [vmem:[#allocation54_spill] sm:$0xff] %v12741_v37  ;;  %v3922_v30 = vmul.f32 0.2, %v3858_v17 }
 0x693   : > { %15977 = vst [vmem:[#allocation52_spill] sm:$0xff] %v12747_v39 }
 0x694   : > { %v3986_v55 = vmax.f32 %v3858_v17, %v3922_v30 }
 0x695   : > { %v3836_v58 = vpop.permute.xlu1 %3835 }
 0x696   : > { %v12792_v62 = vadd.f32 %v12586_v56, %v3986_v55 }
 0x697   : > { %4193 = vmax.xlane.f32.xlu1 %v12722_v27 }
 0x698   : > { %4215 = vmax.xlane.f32.xlu0 %v12728_v18  ;;  %4113 = vmax.xlane.f32.xlu2 %v12731_v40  ;;  %v3826_v31 = vpop.permute.xlu0 %3825  ;;  %v12744_v40 = vadd.f32 %v12619_v54, %v4019_v4  ;;  %v3976_v4 = vmul.f32 0.2, %v3912_v47  ;;  %15984 = vst [vmem:[#allocation55_spill] sm:$0xff] %v12792_v62 }
 0x699   : > { %v3915_v11 = vadd.f32 %v12565_v45, %v3826_v31  ;;  %v4027_v31 = vmax.f32 %v3899_v0, %v3963_v35  ;;  %v3861_v0 = vadd.f32 %v12686_v57, %v12598_v16  ;;  %v3917_v35 = vadd.f32 %v12565_v45, %v3836_v58 }
 0x69b   : > { %v3979_v27 = vmul.f32 0.2, %v3915_v11  ;;  %v3925_v16 = vmul.f32 0.2, %v3861_v0  ;;  %v3981_v58 = vmul.f32 0.2, %v3917_v35 }
 0x69d   : > { %v4043_v43 = vmax.f32 %v3915_v11, %v3979_v27  ;;  %v4022_v27 = vmax.f32 %v3894_v19, %v3958_v20  ;;  %v12761_v11 = vpop.permute.xlu2 %3590  ;;  %v12774_v20 = vpop.permute.xlu1 %3595  ;;  %v4040_v19 = vmax.f32 %v3912_v47, %v3976_v4  ;;  %v3989_v55 = vmax.f32 %v3861_v0, %v3925_v16 }
 0x69f   : > { %v12750_v24 = vadd.f32 %v12741_v37, %v4043_v43  ;;  %v12764_v43 = vadd.f32 %v12679_v33, %v3991_v23 }
 0x6a0   : > { %4181 = vmax.xlane.f32.xlu0 %v12744_v40  ;;  %4119 = vmax.xlane.f32.xlu2 %v12747_v39  ;;  %v12754_v26 = vpop.permute.xlu0 %3585  ;;  %v12767_v39 = vadd.f32 %v12637_v51, %v4022_v27  ;;  %v3388_v27 = vpop.f32.mrf.mxu3 }
 0x6a1   : > { %15978 = vst [vmem:[#allocation49_spill] sm:$0xff] %v12750_v24  ;;  %4229 = vmax.xlane.f32.xlu1 %v12750_v24  ;;  %v12770_v24 = vadd.f32 %v12741_v37, %v4027_v31  ;;  %v12784_v31 = vunpack.c.h.bf16 %v12668_v50  ;;  %v12794_v47 = vperm.slane %v3388_v27, 0  ;;  %v3913_v50 = vadd.f32 %v12565_v45, %v12582_v9 }
 0x6a2   : > { %15979 = vst [vmem:[#allocation68_spill] sm:$0xff] %v12764_v43 }
 0x6a3   : > { %15980 = vst [vmem:[#allocation46_spill] sm:$0xff] %v12767_v39  ;;  %v12789_v17 = vadd.f32 %v12784_v31, %v4040_v19  ;;  %v3864_v19 = vadd.f32 %v12686_v57, %v12673_v5  ;;  %v3878_v16 = vadd.f32 %v12794_v47, %v12550_v48 }
 0x6a4   : > { %15981 = vst [vmem:[#allocation70_spill] sm:$0xff] %v12770_v24 }
 0x6a5   : > { %15982 = vst [vmem:[#allocation51_spill] sm:$0xff] %v12784_v31  ;;  %v12809_v27 = vpop.permute.xlu1 %3760  ;;  %v3928_v9 = vmul.f32 0.2, %v3864_v19 }
 0x6a6   : > { %15983 = vst [vmem:[#allocation48_spill] sm:$0xff] %v12789_v17 }
 0x6a8   : > { %4125 = vmax.xlane.f32.xlu2 %v12764_v43  ;;  %4187 = vmax.xlane.f32.xlu0 %v12767_v39  ;;  %v3751_v63 = vpop.permute.xlu0 %3750  ;;  %v12786_v43 = vpop.permute.xlu2 %3755 }
 0x6a9   : > { %v3900_v53 = vadd.f32 %v12572_v61, %v3751_v63  ;;  %4197 = vmax.xlane.f32.xlu1 %v12770_v24  ;;  %v3960_v24 = vmul.f32 0.2, %v3896_v7 }
 0x6ab   : > { %v3964_v23 = vmul.f32 0.2, %v3900_v53  ;;  %v4024_v4 = vmax.f32 %v3896_v7, %v3960_v24  ;;  %v12822_v7 = vadd.f32 %v12643_v34, %v3989_v55 }
 0x6ad   : > { %v4028_v63 = vmax.f32 %v3900_v53, %v3964_v23  ;;  %v12805_v53 = vld [vmem:[%s12580_s13 + $0x30] sm:$0xff]   ;;  %v4045_v23 = vmax.f32 %v3917_v35, %v3981_v58  ;;  %v12817_v39 = vadd.f32 %v12784_v31, %v4024_v4  ;;  %15988 = vst [vmem:[#allocation74_spill] sm:$0xff] %v12822_v7  ;;  %v3865_v58 = vadd.f32 %v12686_v57, %v12600_v59 }
 0x6ae   : > { %v3992_v4 = vmax.f32 %v3864_v19, %v3928_v9  ;;  %v3862_v59 = vadd.f32 %v12686_v57, %v12548_v38  ;;  %v3868_v9 = vadd.f32 %v12686_v57, %v12761_v11 }
 0x6af   : > { %v12797_v30 = vadd.f32 %v12699_v14, %v4028_v63  ;;  %v3875_v63 = vadd.f32 %v12794_v47, %v12532_v42  ;;  %15987 = vst [vmem:[#allocation73_spill] sm:$0xff] %v12817_v39  ;;  %v3859_v42 = vadd.f32 %v12686_v57, %v12553_v25 }
 0x6b0   : > { %4223 = vmax.xlane.f32.xlu0 %v12789_v17  ;;  %v12819_v24 = vpop.permute.xlu2 %3680  ;;  %v12842_v41 = vadd.f32 %v12784_v31, %v3992_v4 }
 0x6b1   : > { %15985 = vst [vmem:[#allocation71_spill] sm:$0xff] %v12797_v30  ;;  %4115 = vmax.xlane.f32.xlu1 %v12792_v62  ;;  %4199 = vmax.xlane.f32.xlu2 %v12797_v30  ;;  %v12814_v62 = vunpack.c.l.bf16 %v12805_v53  ;;  %v3977_v30 = vmul.f32 0.2, %v3913_v50  ;;  %v3939_v0 = vmul.f32 0.2, %v3875_v63 }
 0x6b2   : > { %v3923_v17 = vmul.f32 0.2, %v3859_v42 }
 0x6b3   : > { %15986 = vst [vmem:[#allocation72_spill] sm:$0xff] %v12814_v62  ;;  %v12825_v5 = vadd.f32 %v12814_v62, %v4045_v23  ;;  %v4041_v35 = vmax.f32 %v3913_v50, %v3977_v30  ;;  %v4003_v55 = vmax.f32 %v3875_v63, %v3939_v0  ;;  %v12836_v23 = vpop.permute.xlu1 %3685  ;;  %v3879_v63 = vadd.f32 %v12794_v47, %v12635_v13  ;;  %v12870_v13 = vpop.permute.xlu0 %3675 }
 0x6b4   : > { %v3987_v30 = vmax.f32 %v3859_v42, %v3923_v17  ;;  %v3926_v0 = vmul.f32 0.2, %v3862_v59  ;;  %v3866_v17 = vadd.f32 %v12686_v57, %v12675_v8 }
 0x6b5   : > { %15989 = vst [vmem:[#allocation75_spill] sm:$0xff] %v12825_v5  ;;  %v12845_v25 = vadd.f32 %v12619_v54, %v4003_v55  ;;  %v3943_v4 = vmul.f32 0.2, %v3879_v63  ;;  %v3932_v55 = vmul.f32 0.2, %v3868_v9 }
 0x6b6   : > { %v3990_v11 = vmax.f32 %v3862_v59, %v3926_v0 }
 0x6b7   : > { %15991 = vst [vmem:[#allocation77_spill] sm:$0xff] %v12845_v25  ;;  %v3996_v42 = vmax.f32 %v3868_v9, %v3932_v55  ;;  %v3876_v9 = vadd.f32 %v12794_v47, %v12567_v52  ;;  %v3882_v55 = vadd.f32 %v12794_v47, %v12713_v22 }
 0x6b8   : > { %4191 = vmax.xlane.f32.xlu0 %v12817_v39  ;;  %v12839_v39 = vadd.f32 %v12719_v15, %v4041_v35  ;;  %v12848_v48 = vpop.permute.xlu2 %3605  ;;  %v12859_v35 = vadd.f32 %v12619_v54, %v3987_v30  ;;  %v3930_v30 = vmul.f32 0.2, %v3866_v17 }
 0x6b9   : > { %4121 = vmax.xlane.f32.xlu1 %v12822_v7  ;;  %4233 = vmax.xlane.f32.xlu2 %v12825_v5  ;;  %v3942_v7 = vmul.f32 0.2, %v3878_v16  ;;  %v3929_v5 = vmul.f32 0.2, %v3865_v58  ;;  %v12886_v59 = vadd.f32 %v12699_v14, %v3996_v42 }
 0x6ba   : > { %15990 = vst [vmem:[#allocation76_spill] sm:$0xff] %v12839_v39 }
 0x6bb   : > { %v4006_v50 = vmax.f32 %v3878_v16, %v3942_v7  ;;  %v3993_v19 = vmax.f32 %v3865_v58, %v3929_v5  ;;  %v3881_v7 = vadd.f32 %v12794_v47, %v12608_v2  ;;  %v4007_v5 = vmax.f32 %v3879_v63, %v3943_v4  ;;  %15992 = vst [vmem:[#allocation78_spill] sm:$0xff] %v12886_v59 }
 0x6bc   : > { %v3873_v58 = vadd.f32 %v12794_v47, %v12535_v6  ;;  %v3994_v6 = vmax.f32 %v3866_v17, %v3930_v30  ;;  %v3867_v63 = vadd.f32 %v12686_v57, %v12754_v26  ;;  %v3940_v17 = vmul.f32 0.2, %v3876_v9 }
 0x6bd   : > { %v12867_v38 = vadd.f32 %v12637_v51, %v4006_v50  ;;  %v12883_v50 = vadd.f32 %v12637_v51, %v3990_v11  ;;  %v12889_v8 = vadd.f32 %v12679_v33, %v4007_v5  ;;  %v12902_v11 = vpop.permute.xlu0 %3840  ;;  %v3946_v30 = vmul.f32 0.2, %v3882_v55 }
 0x6be   : > { %v3937_v0 = vmul.f32 0.2, %v3873_v58  ;;  %v3931_v54 = vmul.f32 0.2, %v3867_v63  ;;  %v12907_v33 = vadd.f32 %v12661_v44, %v3994_v6  ;;  %v3901_v6 = vadd.f32 %v12572_v61, %v12786_v43 }
 0x6bf   : > { %v3877_v43 = vadd.f32 %v12794_v47, %v12540_v28 }
 0x6c0   : > { %4225 = vmax.xlane.f32.xlu0 %v12839_v39  ;;  %v12861_v39 = vpop.permute.xlu1 %3845  ;;  %v12878_v16 = vpop.permute.xlu2 %3770  ;;  %v4001_v42 = vmax.f32 %v3873_v58, %v3937_v0  ;;  %v3874_v58 = vadd.f32 %v12794_v47, %v12520_v32  ;;  %v4004_v0 = vmax.f32 %v3876_v9, %v3940_v17  ;;  %v3884_v17 = vadd.f32 %v12794_v47, %v12724_v3 }
 0x6c1   : > { %4127 = vmax.xlane.f32.xlu1 %v12842_v41  ;;  %4149 = vmax.xlane.f32.xlu2 %v12845_v25  ;;  %v12864_v25 = vadd.f32 %v12719_v15, %v3993_v19  ;;  %v3945_v19 = vmul.f32 0.2, %v3881_v7 }
 0x6c2   : > { %v12910_v26 = vadd.f32 %v12603_v46, %v4001_v42  ;;  %v3938_v46 = vmul.f32 0.2, %v3874_v58 }
 0x6c3   : > { %v4009_v4 = vmax.f32 %v3881_v7, %v3945_v19  ;;  %v3995_v7 = vmax.f32 %v3867_v63, %v3931_v54  ;;  %v3880_v19 = vadd.f32 %v12794_v47, %v12562_v36  ;;  %v3965_v54 = vmul.f32 0.2, %v3901_v6 }
 0x6c4   : > { %v12932_v63 = vadd.f32 %v12622_v60, %v4004_v0  ;;  %v4002_v9 = vmax.f32 %v3874_v58, %v3938_v46  ;;  %v3948_v60 = vmul.f32 0.2, %v3884_v17  ;;  %v12969_v58 = vunpack.c.h.bf16 %v12805_v53 }
 0x6c5   : > { %v12913_v52 = vadd.f32 %v12719_v15, %v4009_v4  ;;  %v4010_v4 = vmax.f32 %v3882_v55, %v3946_v30  ;;  %v3601_v15 = vpop.permute.xlu0 %3600  ;;  %v12929_v51 = vadd.f32 %v12741_v37, %v3995_v7  ;;  %v4029_v30 = vmax.f32 %v3901_v6, %v3965_v54 }
 0x6c6   : > { %v3886_v7 = vadd.f32 %v12794_v47, %v12819_v24  ;;  %15996 = vst [vmem:[#allocation82_spill] sm:$0xff] %v12969_v58  ;;  %v3885_v54 = vadd.f32 %v12794_v47, %v12870_v13 }
 0x6c7   : > { %15993 = vst [vmem:[#allocation79_spill] sm:$0xff] %v12913_v52  ;;  %v12935_v32 = vadd.f32 %v12661_v44, %v4010_v4  ;;  %v3941_v4 = vmul.f32 0.2, %v3877_v43  ;;  %v12951_v44 = vadd.f32 %v12586_v56, %v4002_v9  ;;  %v12959_v46 = vadd.f32 %v12814_v62, %v4029_v30 }
 0x6c8   : > { %4117 = vmax.xlane.f32.xlu0 %v12859_v35  ;;  %v12892_v2 = vpop.permute.xlu1 %3610  ;;  %v3870_v9 = vadd.f32 %v12686_v57, %v3601_v15 }
 0x6c9   : > { %4129 = vmax.xlane.f32.xlu1 %v12864_v25  ;;  %4155 = vmax.xlane.f32.xlu2 %v12867_v38  ;;  %15994 = vst [vmem:[#allocation80_spill] sm:$0xff] %v12935_v32  ;;  %v4005_v24 = vmax.f32 %v3877_v43, %v3941_v4  ;;  %v3949_v43 = vmul.f32 0.2, %v3885_v54 }
 0x6ca   : > { %15995 = vst [vmem:[#allocation81_spill] sm:$0xff] %v12959_v46  ;;  %v3934_v4 = vmul.f32 0.2, %v3870_v9 }
 0x6d0   : > { %4123 = vmax.xlane.f32.xlu0 %v12883_v50 }
 0x6d1   : > { %4135 = vmax.xlane.f32.xlu1 %v12886_v59  ;;  %4157 = vmax.xlane.f32.xlu2 %v12889_v8  ;;  %v3944_v59 = vmul.f32 0.2, %v3880_v19 }
 0x6d3   : > { %v12904_v5 = vpop.xlane.xlu2 %4211  ;;  %v4008_v55 = vmax.f32 %v3880_v19, %v3944_v59  ;;  %v3883_v59 = vadd.f32 %v12794_v47, %v12645_v29  ;;  %v4012_v19 = vmax.f32 %v3884_v17, %v3948_v60  ;;  %v3869_v17 = vadd.f32 %v12686_v57, %v12774_v20  ;;  %v9779_v20 = vld [vmem:[%s12580_s13 + $0x38] sm:$0xff]   ;;  %s8726_s13 = sshll.u32 %s8723_s4, 4  ;;  %s8727_s13 = int_to_ptr.hbm [resolvable:$true] %s8726_s13 }
 0x6d4   : > { %s10873_s27 = sshra.s32 %s8727_s13, 4  ;;  %s10874_s27 = int_to_ptr.hbm [resolvable:$true] %s10873_s27 }
 0x6d5   : > { %v12956_v28 = vadd.f32 %v12784_v31, %v4008_v55  ;;  %v3947_v30 = vmul.f32 0.2, %v3883_v59  ;;  %v12977_v31 = vadd.f32 %v12643_v34, %v4005_v24  ;;  %v12980_v29 = vadd.f32 %v12699_v14, %v4012_v19  ;;  %s10875_s8 = scalar_lea.hbm %s10874_s27, 64  ;;  %p10880_p7 = scmp.lt.s32.totalorder %s10874_s27, %s16301_s10 }
 0x6d6   : > { %v4013_v24 = vmax.f32 %v3885_v54, %v3949_v43  ;;  %v3998_v19 = vmax.f32 %v3870_v9, %v3934_v4  ;;  %v3933_v56 = vmul.f32 0.2, %v3869_v17  ;;  %v3902_v54 = vadd.f32 %v12572_v61, %v12809_v27  ;;  %p10876_p2 = scmp.ne.s32.totalorder %s10874_s27, %s10875_s8 }
 0x6d7   : > { %v4011_v15 = vmax.f32 %v3883_v59, %v3947_v30  ;;  %v4290_v30 = vsub.f32 %v12594_v12, %v12904_v5  ;;  %v3872_v12 = vadd.f32 %v12686_v57, %v12892_v2 }
 0x6d8   : > { %4131 = vmax.xlane.f32.xlu0 %v12907_v33  ;;  %v13004_v59 = vadd.f32 %v12814_v62, %v4013_v24  ;;  %v3997_v43 = vmax.f32 %v3869_v17, %v3933_v56  ;;  %p10877_p3 = pnand %p10876_p2, %p11185_p5 }
 0x6d9   : > { %4145 = vmax.xlane.f32.xlu1 %v12910_v26  ;;  %4161 = vmax.xlane.f32.xlu2 %v12913_v52  ;;  %v3950_v52 = vmul.f32 0.2, %v3886_v7  ;;  %v13001_v34 = vadd.f32 %v12741_v37, %v4011_v15  ;;  %v3966_v37 = vmul.f32 0.2, %v3902_v54  ;;  %v3936_v17 = vmul.f32 0.2, %v3872_v12 }
 0x6da   : > { %v12916_v22 = vpop.xlane.xlu1 %4179  ;;  %p10878_p4 = pneg %p10877_p3 }
 0x6db   : > { %v12926_v42 = vpop.xlane.xlu2 %4177  ;;  %v4014_v6 = vmax.f32 %v3886_v7, %v3950_v52  ;;  %v3918_v52 = vadd.f32 %v12565_v45, %v12902_v11  ;;  %v3871_v7 = vadd.f32 %v12686_v57, %v12848_v48  ;;  %15998 = vst [vmem:[#allocation84_spill] sm:$0xff] %v13001_v34  ;;  %v13007_v11 = vadd.f32 %v12969_v58, %v3998_v19 }
 0x6dc   : > { %v13023_v19 = vunpack.c.l.bf16 %v9779_v20  ;;  %v4030_v56 = vmax.f32 %v3902_v54, %v3966_v37  ;;  %v4274_v27 = vsub.f32 %v12606_v49, %v12916_v22  ;;  %v4000_v37 = vmax.f32 %v3872_v12, %v3936_v17 }
 0x6dd   : > { %v12983_v53 = vadd.f32 %v12969_v58, %v4014_v6  ;;  %v3982_v14 = vmul.f32 0.2, %v3918_v52  ;;  %15999 = vst [vmem:[#allocation85_spill] sm:$0xff] %v13007_v11  ;;  %v13059_v54 = vunpack.c.h.bf16 %v9779_v20  ;;  %v4273_v12 = vsub.f32 %v12613_v21, %v12926_v42  ;;  %v16006_v42 = vld [vmem:[#allocation47_spill] sm:$0xff] }
 0x6de   : > { %16000 = vst [vmem:[#allocation86_spill] sm:$0xff] %v13023_v19 }
 0x6df   : > { %15997 = vst [vmem:[#allocation83_spill] sm:$0xff] %v12983_v53  ;;  %v4046_v9 = vmax.f32 %v3918_v52, %v3982_v14 }
 0x6e0   : > { %4133 = vmax.xlane.f32.xlu0 %v12929_v51  ;;  %16004 = vst [vmem:[#allocation90_spill] sm:$0xff] %v13059_v54 }
 0x6e1   : > { %4151 = vmax.xlane.f32.xlu1 %v12932_v63  ;;  %4163 = vmax.xlane.f32.xlu2 %v12935_v32  ;;  %v12953_v32 = vpop.permute.xlu0 %3765 }
 0x6e2   : > { %v12938_v36 = vpop.xlane.xlu1 %4213 }
 0x6e3   : > { %v12948_v0 = vpop.xlane.xlu2 %4183  ;;  %v4291_v49 = vsub.f32 %v12625_v1, %v12938_v36 }
 0x6e8   : > { %4147 = vmax.xlane.f32.xlu0 %v12951_v44 }
 0x6e9   : > { %4159 = vmax.xlane.f32.xlu1 %v12956_v28  ;;  %4201 = vmax.xlane.f32.xlu2 %v12959_v46  ;;  %v12986_v60 = vpop.permute.xlu0 %3690  ;;  %v4403_v46 = vmul.f32 1.442695, %v4290_v30 }
 0x6ea   : > { %v12962_v3 = vpop.xlane.xlu1 %4219 }
 0x6eb   : > { %v12974_v55 = vpop.xlane.xlu2 %4217  ;;  %9986 = vpow2.f32 %v4403_v46 }
 0x6f0   : > { %4153 = vmax.xlane.f32.xlu0 %v12977_v31 }
 0x6f1   : > { %4167 = vmax.xlane.f32.xlu1 %v12980_v29  ;;  %4171 = vmax.xlane.f32.xlu2 %v12983_v53  ;;  %v3935_v53 = vmul.f32 0.2, %v3871_v7  ;;  %v13019_v15 = vpop.permute.xlu0 %3850  ;;  %v13048_v30 = vpop.eup %9986 }
 0x6f2   : > { %v12988_v13 = vpop.xlane.xlu1 %4185 }
 0x6f3   : > { %v12998_v6 = vpop.xlane.xlu2 %4227  ;;  %v3999_v4 = vmax.f32 %v3871_v7, %v3935_v53  ;;  %v4371_v7 = vmul.f32 1.442695, %v4274_v27 }
 0x6f5   : > { %v13032_v14 = vadd.f32 %v13023_v19, %v3999_v4  ;;  %9988 = vpow2.f32 %v4371_v7  ;;  %v4405_v4 = vmul.f32 1.442695, %v4291_v49 }
 0x6f7   : > { %16002 = vst [vmem:[#allocation88_spill] sm:$0xff] %v13032_v14 }
 0x6f8   : > { %4165 = vmax.xlane.f32.xlu0 %v13001_v34  ;;  %v13026_v34 = vadd.f32 %v12969_v58, %v4046_v9  ;;  %v13046_v9 = vadd.f32 %v12969_v58, %v4030_v56  ;;  %v13062_v56 = vadd.f32 %v13059_v54, %v4000_v37  ;;  %v4276_v37 = vsub.f32 %v16006_v42, %v12948_v0  ;;  %v16009_v0 = vld [vmem:[#allocation65_spill] sm:$0xff]  ;;  %v16010_v42 = vld [vmem:[#allocation48_spill] sm:$0xff] }
 0x6f9   : > { %4169 = vmax.xlane.f32.xlu1 %v13004_v59  ;;  %4139 = vmax.xlane.f32.xlu2 %v13007_v11  ;;  %v13029_v11 = vadd.f32 %v12814_v62, %v3997_v43 }
 0x6fa   : > { %v13011_v48 = vpop.xlane.xlu1 %4221  ;;  %16001 = vst [vmem:[#allocation87_spill] sm:$0xff] %v13026_v34 }
 0x6fb   : > { %v13021_v24 = vpop.xlane.xlu2 %4195  ;;  %16003 = vst [vmem:[#allocation89_spill] sm:$0xff] %v13046_v9 }
 0x6fc   : > { %16005 = vst [vmem:[#allocation91_spill] sm:$0xff] %v13062_v56 }
 0x700   : > { %4235 = vmax.xlane.f32.xlu0 %v13026_v34 }
 0x701   : > { %4137 = vmax.xlane.f32.xlu1 %v13029_v11  ;;  %4141 = vmax.xlane.f32.xlu2 %v13032_v14 }
 0x702   : > { %v13041_v5 = vpop.xlane.xlu1 %4189 }
 0x703   : > { %v13043_v53 = vpop.xlane.xlu2 %4231  ;;  %v4210_v52 = vpop.xlane.xlu0 %4209 }
 0x704   : > { %v4289_v57 = vsub.f32 %v12706_v10, %v4210_v52  ;;  %v13064_v10 = vpop.eup %9988  ;;  %v4369_v52 = vmul.f32 1.442695, %v4273_v12  ;;  %v4375_v12 = vmul.f32 1.442695, %v4276_v37 }
 0x706   : > { %v4401_v43 = vmul.f32 1.442695, %v4289_v57 }
 0x708   : > { %4203 = vmax.xlane.f32.xlu0 %v13046_v9  ;;  %9990 = vpow2.f32 %v4401_v43 }
 0x709   : > { %4531 = vadd.xlane.f32.xlu2 %v13048_v30  ;;  %9992 = vpow2.f32 %v4405_v4 }
 0x70a   : > { %v13057_v46 = vpop.xlane.xlu1 %4193  ;;  %9994 = vpow2.f32 %v4369_v52  ;;  %v4293_v52 = vsub.f32 %v16009_v0, %v12974_v55  ;;  %v16012_v55 = vld [vmem:[#allocation63_spill] sm:$0xff] }
 0x70b   : > { %v13055_v2 = vpop.xlane.xlu2 %4113  ;;  %v4216_v22 = vpop.xlane.xlu0 %4215 }
 0x70c   : > { %v4292_v21 = vsub.f32 %v12728_v18, %v4216_v22  ;;  %v16008_v18 = vld [vmem:[#allocation44_spill] sm:$0xff] }
 0x70d   : > { %v4294_v22 = vsub.f32 %v16008_v18, %v12962_v3  ;;  %v16011_v3 = vld [vmem:[#allocation46_spill] sm:$0xff] }
 0x70e   : > { %v13075_v7 = vpop.eup %9990  ;;  %v4407_v4 = vmul.f32 1.442695, %v4292_v21 }
 0x70f   : > { %v13077_v57 = vpop.eup %9992  ;;  %v4411_v58 = vmul.f32 1.442695, %v4294_v22  ;;  %v16013_v22 = vld [vmem:[#allocation73_spill] sm:$0xff] }
 0x710   : > { %4143 = vmax.xlane.f32.xlu0 %v13062_v56  ;;  %v4409_v56 = vmul.f32 1.442695, %v4293_v52 }
 0x711   : > { %4499 = vadd.xlane.f32.xlu2 %v13064_v10 }
 0x713   : > { %v13070_v1 = vpop.xlane.xlu2 %4119  ;;  %v4182_v36 = vpop.xlane.xlu0 %4181 }
 0x714   : > { %v4275_v20 = vsub.f32 %v12744_v40, %v4182_v36  ;;  %v13073_v27 = vpop.xlane.xlu1 %4229  ;;  %v13088_v36 = vpop.eup %9994 }
 0x716   : > { %v4373_v17 = vmul.f32 1.442695, %v4275_v20 }
 0x718   : > { %4529 = vadd.xlane.f32.xlu0 %v13075_v7  ;;  %9996 = vpow2.f32 %v4373_v17 }
 0x719   : > { %4533 = vadd.xlane.f32.xlu2 %v13077_v57  ;;  %9998 = vpow2.f32 %v4407_v4 }
 0x71a   : > { %10000 = vpow2.f32 %v4375_v12  ;;  %v4277_v12 = vsub.f32 %v16012_v55, %v12988_v13 }
 0x71b   : > { %v13084_v40 = vpop.xlane.xlu2 %4125  ;;  %v4188_v49 = vpop.xlane.xlu0 %4187 }
 0x71c   : > { %v13086_v43 = vpop.xlane.xlu1 %4197  ;;  %v4278_v4 = vsub.f32 %v16011_v3, %v4188_v49  ;;  %v16017_v3 = vld [vmem:[#allocation69_spill] sm:$0xff] }
 0x71d   : > { %v4295_v55 = vsub.f32 %v16017_v3, %v13011_v48 }
 0x71e   : > { %v13090_v20 = vpop.eup %9996 }
 0x71f   : > { %16007 = vst [vmem:[#allocation47_spill] sm:$0xff] %v13090_v20  ;;  %v13101_v34 = vpop.eup %9998 }
 0x720   : > { %4497 = vadd.xlane.f32.xlu0 %v13088_v36  ;;  %v13103_v9 = vpop.eup %10000 }
 0x721   : > { %4501 = vadd.xlane.f32.xlu2 %v13090_v20 }
 0x723   : > { %v4224_v17 = vpop.xlane.xlu0 %4223 }
 0x724   : > { %v4296_v21 = vsub.f32 %v16010_v42, %v4224_v17  ;;  %v4116_v37 = vpop.xlane.xlu1 %4115  ;;  %v13099_v62 = vpop.xlane.xlu2 %4199  ;;  %v4379_v42 = vmul.f32 1.442695, %v4278_v4  ;;  %v16018_v4 = vld [vmem:[#allocation55_spill] sm:$0xff] }
 0x726   : > { %v4415_v14 = vmul.f32 1.442695, %v4296_v21 }
 0x728   : > { %10002 = vpow2.f32 %v4415_v14  ;;  %4535 = vadd.xlane.f32.xlu0 %v13101_v34  ;;  %v4377_v14 = vmul.f32 1.442695, %v4277_v12  ;;  %v4242_v12 = vsub.f32 %v16018_v4, %v4116_v37  ;;  %v16021_v37 = vld [vmem:[#allocation61_spill] sm:$0xff] }
 0x729   : > { %10004 = vpow2.f32 %v4411_v58  ;;  %4503 = vadd.xlane.f32.xlu2 %v13103_v9 }
 0x72a   : > { %10006 = vpow2.f32 %v4409_v56  ;;  %v16016_v56 = vld [vmem:[#allocation52_spill] sm:$0xff] }
 0x72b   : > { %v4192_v18 = vpop.xlane.xlu0 %4191  ;;  %v4244_v13 = vsub.f32 %v16016_v56, %v13070_v1 }
 0x72c   : > { %v4280_v0 = vsub.f32 %v16013_v22, %v4192_v18  ;;  %v4122_v52 = vpop.xlane.xlu1 %4121  ;;  %v13111_v17 = vpop.xlane.xlu2 %4233 }
 0x72d   : > { %16014 = vst [vmem:[#allocation44_spill] sm:$0xff] %v13111_v17  ;;  %v4311_v22 = vmul.f32 1.442695, %v4244_v13  ;;  %v4413_v17 = vmul.f32 1.442695, %v4295_v55 }
 0x72e   : > { %v13113_v21 = vpop.eup %10002  ;;  %v4383_v20 = vmul.f32 1.442695, %v4280_v0 }
 0x72f   : > { %16015 = vst [vmem:[#allocation65_spill] sm:$0xff] %v13113_v21  ;;  %v13115_v58 = vpop.eup %10004  ;;  %4543 = vadd.xlane.f32.xlu1 %v13113_v21 }
 0x730   : > { %v13118_v49 = vpop.eup %10006  ;;  %10008 = vpow2.f32 %v4383_v20  ;;  %4539 = vadd.xlane.f32.xlu0 %v13115_v58  ;;  %v4307_v20 = vmul.f32 1.442695, %v4242_v12 }
 0x731   : > { %10010 = vpow2.f32 %v4379_v42  ;;  %4537 = vadd.xlane.f32.xlu2 %v13118_v49 }
 0x732   : > { %10012 = vpow2.f32 %v4377_v14  ;;  %v4279_v14 = vsub.f32 %v16021_v37, %v13041_v5 }
 0x733   : > { %v13127_v18 = vpop.xlane.xlu0 %4225  ;;  %10014 = vpow2.f32 %v4311_v22 }
 0x734   : > { %v4128_v0 = vpop.xlane.xlu1 %4127  ;;  %v13129_v21 = vpop.xlane.xlu2 %4149  ;;  %10016 = vpow2.f32 %v4413_v17  ;;  %v4381_v22 = vmul.f32 1.442695, %v4279_v14 }
 0x735   : > { %v4248_v42 = vsub.f32 %v12842_v41, %v4128_v0  ;;  %10018 = vpow2.f32 %v4307_v20  ;;  %v16025_v20 = vld [vmem:[#allocation74_spill] sm:$0xff] }
 0x736   : > { %v13131_v1 = vpop.eup %10008 }
 0x737   : > { %16019 = vst [vmem:[#allocation48_spill] sm:$0xff] %v13131_v1  ;;  %v13133_v56 = vpop.eup %10010  ;;  %4511 = vadd.xlane.f32.xlu1 %v13131_v1  ;;  %v4319_v3 = vmul.f32 1.442695, %v4248_v42  ;;  %v4245_v42 = vsub.f32 %v16025_v20, %v4122_v52 }
 0x738   : > { %v13136_v48 = vpop.eup %10012  ;;  %4507 = vadd.xlane.f32.xlu0 %v13133_v56 }
 0x739   : > { %16020 = vst [vmem:[#allocation46_spill] sm:$0xff] %v13136_v48  ;;  %4505 = vadd.xlane.f32.xlu2 %v13136_v48  ;;  %v13148_v1 = vpop.eup %10014  ;;  %10020 = vpow2.f32 %v4319_v3  ;;  %v4313_v3 = vmul.f32 1.442695, %v4245_v42 }
 0x73a   : > { %16022 = vst [vmem:[#allocation63_spill] sm:$0xff] %v13148_v1  ;;  %v13150_v0 = vpop.eup %10016  ;;  %10022 = vpow2.f32 %v4381_v22 }
 0x73b   : > { %v4118_v13 = vpop.xlane.xlu0 %4117  ;;  %v13153_v5 = vpop.eup %10018 }
 0x73c   : > { %v4243_v55 = vsub.f32 %v12859_v35, %v4118_v13  ;;  %v13144_v4 = vpop.xlane.xlu1 %4129  ;;  %v13146_v12 = vpop.xlane.xlu2 %4155  ;;  %16023 = vst [vmem:[#allocation73_spill] sm:$0xff] %v13153_v5  ;;  %v16024_v35 = vld [vmem:[#allocation56_spill] sm:$0xff] }
 0x73d   : > { %v4241_v17 = vsub.f32 %v16024_v35, %v13055_v2 }
 0x73e   : > { %v4309_v41 = vmul.f32 1.442695, %v4243_v55 }
 0x73f   : > { %4439 = vadd.xlane.f32.xlu1 %v13148_v1  ;;  %v4305_v55 = vmul.f32 1.442695, %v4241_v17  ;;  %v13164_v1 = vpop.eup %10020 }
 0x740   : > { %4541 = vadd.xlane.f32.xlu0 %v13150_v0  ;;  %10024 = vpow2.f32 %v4309_v41  ;;  %16026 = vst [vmem:[#allocation52_spill] sm:$0xff] %v13164_v1  ;;  %v13166_v48 = vpop.eup %10022 }
 0x741   : > { %4435 = vadd.xlane.f32.xlu2 %v13153_v5  ;;  %16027 = vst [vmem:[#allocation69_spill] sm:$0xff] %v13166_v48  ;;  %10026 = vpow2.f32 %v4305_v55 }
 0x742   : > { %10028 = vpow2.f32 %v4313_v3 }
 0x743   : > { %v4124_v37 = vpop.xlane.xlu0 %4123 }
 0x744   : > { %v13160_v14 = vpop.xlane.xlu1 %4135  ;;  %v13162_v13 = vpop.xlane.xlu2 %4157  ;;  %v4246_v2 = vsub.f32 %v12883_v50, %v4124_v37  ;;  %v16031_v50 = vld [vmem:[#allocation68_spill] sm:$0xff] }
 0x745   : > { %v4247_v37 = vsub.f32 %v16031_v50, %v13084_v40  ;;  %v3919_v40 = vadd.f32 %v12565_v45, %v12861_v39 }
 0x746   : > { %v13169_v22 = vpop.eup %10024  ;;  %v4315_v41 = vmul.f32 1.442695, %v4246_v2 }
 0x747   : > { %4447 = vadd.xlane.f32.xlu1 %v13164_v1  ;;  %16028 = vst [vmem:[#allocation55_spill] sm:$0xff] %v13169_v22  ;;  %v13177_v42 = vpop.eup %10026  ;;  %v3983_v50 = vmul.f32 0.2, %v3919_v40 }
 0x748   : > { %4509 = vadd.xlane.f32.xlu0 %v13166_v48  ;;  %16029 = vst [vmem:[#allocation61_spill] sm:$0xff] %v13177_v42  ;;  %v13179_v5 = vpop.eup %10028  ;;  %10030 = vpow2.f32 %v4315_v41 }
 0x749   : > { %4437 = vadd.xlane.f32.xlu2 %v13169_v22  ;;  %16030 = vst [vmem:[#allocation56_spill] sm:$0xff] %v13179_v5  ;;  %v4047_v39 = vmax.f32 %v3919_v40, %v3983_v50 }
 0x74b   : > { %v4132_v52 = vpop.xlane.xlu0 %4131 }
 0x74c   : > { %v4146_v35 = vpop.xlane.xlu1 %4145  ;;  %v13174_v17 = vpop.xlane.xlu2 %4161  ;;  %v4250_v55 = vsub.f32 %v12907_v33, %v4132_v52  ;;  %v3887_v33 = vadd.f32 %v12794_v47, %v12836_v23  ;;  %v16036_v23 = vld [vmem:[#allocation67_spill] sm:$0xff] }
 0x74d   : > { %v4257_v20 = vsub.f32 %v12910_v26, %v4146_v35  ;;  %v4317_v26 = vmul.f32 1.442695, %v4247_v37 }
 0x74e   : > { %v13190_v35 = vpop.eup %10030 }
 0x74f   : > { %v4337_v1 = vmul.f32 1.442695, %v4257_v20  ;;  %16032 = vst [vmem:[#allocation74_spill] sm:$0xff] %v13190_v35  ;;  %v4323_v20 = vmul.f32 1.442695, %v4250_v55 }
 0x750   : > { %4433 = vadd.xlane.f32.xlu0 %v13177_v42 }
 0x751   : > { %10032 = vpow2.f32 %v4337_v1  ;;  %4441 = vadd.xlane.f32.xlu2 %v13179_v5  ;;  %v3951_v5 = vmul.f32 0.2, %v3887_v33 }
 0x752   : > { %10034 = vpow2.f32 %v4317_v26 }
 0x753   : > { %v13186_v3 = vpop.xlane.xlu0 %4133  ;;  %10036 = vpow2.f32 %v4323_v20  ;;  %v4298_v20 = vsub.f32 %v16036_v23, %v12998_v6 }
 0x754   : > { %v13188_v2 = vpop.xlane.xlu2 %4163 }
 0x757   : > { %v13192_v22 = vpop.eup %10032 }
 0x758   : > { %16033 = vst [vmem:[#allocation68_spill] sm:$0xff] %v13192_v22  ;;  %4443 = vadd.xlane.f32.xlu0 %v13190_v35  ;;  %v13203_v55 = vpop.eup %10034  ;;  %v4249_v35 = vsub.f32 %v12864_v25, %v13144_v4  ;;  %v4419_v4 = vmul.f32 1.442695, %v4298_v20 }
 0x759   : > { %4465 = vadd.xlane.f32.xlu2 %v13192_v22  ;;  %16034 = vst [vmem:[#allocation92_spill] sm:$0xff] %v13203_v55  ;;  %v13205_v26 = vpop.eup %10036 }
 0x75a   : > { %16035 = vst [vmem:[#allocation93_spill] sm:$0xff] %v13205_v26  ;;  %v4321_v22 = vmul.f32 1.442695, %v4249_v35 }
 0x75b   : > { %v4148_v1 = vpop.xlane.xlu0 %4147 }
 0x75c   : > { %v4258_v52 = vsub.f32 %v12951_v44, %v4148_v1  ;;  %v13201_v41 = vpop.xlane.xlu2 %4201  ;;  %v3888_v44 = vadd.f32 %v12794_v47, %v12986_v60  ;;  %v4015_v1 = vmax.f32 %v3887_v33, %v3951_v5  ;;  %v3920_v47 = vadd.f32 %v12565_v45, %v13019_v15  ;;  %v16037_v5 = vld [vmem:[#allocation77_spill] sm:$0xff]  ;;  %v4152_v15 = vpop.xlane.xlu1 %4151 }
 0x75d   : > { %v3903_v60 = vadd.f32 %v12572_v61, %v12953_v32  ;;  %v4259_v35 = vsub.f32 %v16037_v5, %v13129_v21 }
 0x75e   : > { %v4339_v37 = vmul.f32 1.442695, %v4258_v52  ;;  %v3952_v25 = vmul.f32 0.2, %v3888_v44  ;;  %v13224_v40 = vadd.f32 %v13023_v19, %v4015_v1 }
 0x75f   : > { %v3967_v23 = vmul.f32 0.2, %v3903_v60  ;;  %v4341_v20 = vmul.f32 1.442695, %v4259_v35 }
 0x760   : > { %10038 = vpow2.f32 %v4339_v37  ;;  %4445 = vadd.xlane.f32.xlu0 %v13203_v55  ;;  %v13220_v37 = vadd.f32 %v13023_v19, %v4047_v39  ;;  %v4016_v6 = vmax.f32 %v3888_v44, %v3952_v25  ;;  %v16039_v44 = vld [vmem:[#allocation76_spill] sm:$0xff] }
 0x761   : > { %4451 = vadd.xlane.f32.xlu2 %v13205_v26  ;;  %10040 = vpow2.f32 %v4321_v22  ;;  %v3984_v22 = vmul.f32 0.2, %v3920_v47  ;;  %v4297_v21 = vsub.f32 %v16039_v44, %v13127_v18 }
 0x762   : > { %10042 = vpow2.f32 %v4419_v4  ;;  %v13241_v45 = vadd.f32 %v13059_v54, %v4016_v6  ;;  %v4031_v4 = vmax.f32 %v3903_v60, %v3967_v23  ;;  %v4260_v6 = vsub.f32 %v12932_v63, %v4152_v15  ;;  %v16040_v60 = vld [vmem:[#allocation41_spill] sm:$0xff] }
 0x763   : > { %v4154_v52 = vpop.xlane.xlu0 %4153  ;;  %v4048_v1 = vmax.f32 %v3920_v47, %v3984_v22  ;;  %10044 = vpow2.f32 %v4341_v20  ;;  %v4417_v35 = vmul.f32 1.442695, %v4297_v21  ;;  %v4262_v63 = vsub.f32 %v12867_v38, %v13146_v12 }
 0x764   : > { %v13215_v42 = vpop.xlane.xlu2 %4171  ;;  %v4261_v25 = vsub.f32 %v12977_v31, %v4154_v52  ;;  %v4343_v18 = vmul.f32 1.442695, %v4260_v6  ;;  %v13260_v47 = vadd.f32 %v13023_v19, %v4031_v4  ;;  %v4251_v52 = vsub.f32 %v12929_v51, %v13186_v3  ;;  %v16041_v3 = vld [vmem:[#allocation60_spill] sm:$0xff] }
 0x765   : > { %v13257_v55 = vadd.f32 %v13059_v54, %v4048_v1  ;;  %10046 = vpow2.f32 %v4417_v35  ;;  %v4282_v22 = vsub.f32 %v16040_v60, %v13021_v24  ;;  %v4347_v20 = vmul.f32 1.442695, %v4262_v63  ;;  %v4160_v1 = vpop.xlane.xlu1 %4159 }
 0x766   : > { %v13217_v48 = vpop.eup %10038  ;;  %v4325_v44 = vmul.f32 1.442695, %v4251_v52  ;;  %v3904_v24 = vadd.f32 %v12572_v61, %v12878_v16  ;;  %v4263_v60 = vsub.f32 %v12889_v8, %v13162_v13 }
 0x767   : > { %4467 = vadd.xlane.f32.xlu1 %v13217_v48  ;;  %v13238_v39 = vpop.eup %10040  ;;  %v4387_v38 = vmul.f32 1.442695, %v4282_v22  ;;  %v16043_v22 = vld [vmem:[#allocation70_spill] sm:$0xff] }
 0x768   : > { %4237 = vmax.xlane.f32.xlu0 %v13220_v37  ;;  %16038 = vst [vmem:[#allocation67_spill] sm:$0xff] %v13238_v39  ;;  %v13244_v32 = vpop.eup %10042 }
 0x769   : > { %4173 = vmax.xlane.f32.xlu2 %v13224_v40  ;;  %v13263_v31 = vpop.eup %10044 }
 0x76b   : > { %v13234_v33 = vpop.xlane.xlu0 %4165  ;;  %v13275_v21 = vpop.eup %10046 }
 0x76c   : > { %v13236_v50 = vpop.xlane.xlu2 %4139 }
 0x76f   : > { %4449 = vadd.xlane.f32.xlu1 %v13238_v39  ;;  %v4345_v39 = vmul.f32 1.442695, %v4261_v25  ;;  %v16042_v25 = vld [vmem:[#allocation49_spill] sm:$0xff] }
 0x770   : > { %4175 = vmax.xlane.f32.xlu0 %v13241_v45  ;;  %v4299_v4 = vsub.f32 %v16042_v25, %v13073_v27 }
 0x771   : > { %4547 = vadd.xlane.f32.xlu2 %v13244_v32  ;;  %10048 = vpow2.f32 %v4345_v39  ;;  %v4300_v39 = vsub.f32 %v16041_v3, %v13043_v53 }
 0x772   : > { %10050 = vpow2.f32 %v4343_v18  ;;  %v3968_v18 = vmul.f32 0.2, %v3904_v24  ;;  %v4421_v61 = vmul.f32 1.442695, %v4299_v4 }
 0x773   : > { %v13252_v5 = vpop.xlane.xlu0 %4235  ;;  %10052 = vpow2.f32 %v4347_v20  ;;  %v4423_v63 = vmul.f32 1.442695, %v4300_v39  ;;  %v4283_v20 = vsub.f32 %v16043_v22, %v13086_v43  ;;  %v4349_v39 = vmul.f32 1.442695, %v4263_v60  ;;  %v16046_v22 = vld [vmem:[#allocation79_spill] sm:$0xff] }
 0x774   : > { %v13254_v26 = vpop.xlane.xlu2 %4141  ;;  %10054 = vpow2.f32 %v4325_v44  ;;  %v4032_v27 = vmax.f32 %v3904_v24, %v3968_v18  ;;  %v4264_v44 = vsub.f32 %v12956_v28, %v4160_v1  ;;  %v16044_v28 = vld [vmem:[#allocation57_spill] sm:$0xff] }
 0x775   : > { %10056 = vpow2.f32 %v4387_v38  ;;  %v13306_v38 = vpop.xlane.xlu1 %4167  ;;  %v4389_v13 = vmul.f32 1.442695, %v4283_v20  ;;  %v4281_v1 = vsub.f32 %v16044_v28, %v13057_v46  ;;  %v4265_v20 = vsub.f32 %v16046_v22, %v13174_v17 }
 0x776   : > { %v13309_v24 = vadd.f32 %v13059_v54, %v4032_v27  ;;  %v4351_v4 = vmul.f32 1.442695, %v4264_v44  ;;  %v4268_v22 = vsub.f32 %v12980_v29, %v13306_v38  ;;  %v16048_v29 = vld [vmem:[#allocation71_spill] sm:$0xff] }
 0x777   : > { %4239 = vmax.xlane.f32.xlu1 %v13257_v55  ;;  %v13277_v12 = vpop.eup %10048  ;;  %v4385_v44 = vmul.f32 1.442695, %v4281_v1  ;;  %v4284_v38 = vsub.f32 %v16048_v29, %v13099_v62 }
 0x778   : > { %4205 = vmax.xlane.f32.xlu0 %v13260_v47  ;;  %v13280_v51 = vpop.eup %10050 }
 0x779   : > { %4469 = vadd.xlane.f32.xlu2 %v13263_v31  ;;  %v13292_v52 = vpop.eup %10052 }
 0x77a   : > { %v13294_v16 = vpop.eup %10054 }
 0x77b   : > { %v13273_v23 = vpop.xlane.xlu0 %4203  ;;  %v13297_v53 = vpop.eup %10056 }
 0x77c   : > { %v4532_v15 = vpop.xlane.xlu2 %4531 }
 0x77d   : > { %10058 = vrcp.f32 %v4532_v15 }
 0x77e   : > { %10060 = vpow2.f32 %v4423_v63  ;;  %v16045_v63 = vld [vmem:[#allocation80_spill] sm:$0xff] }
 0x77f   : > { %4545 = vadd.xlane.f32.xlu1 %v13275_v21  ;;  %10062 = vpow2.f32 %v4421_v61  ;;  %v4266_v61 = vsub.f32 %v16045_v63, %v13188_v2 }
 0x780   : > { %4473 = vadd.xlane.f32.xlu0 %v13277_v12 }
 0x781   : > { %4471 = vadd.xlane.f32.xlu2 %v13280_v51 }
 0x783   : > { %v13290_v6 = vpop.xlane.xlu0 %4143  ;;  %v10059_v15 = vpop.eup %10058 }
 0x784   : > { %v4500_v35 = vpop.xlane.xlu2 %4499  ;;  %v4674_v25 = vmul.f32 0.25, %v10059_v15  ;;  %v13311_v43 = vpop.eup %10060 }
 0x785   : > { %10064 = vrcp.f32 %v4500_v35  ;;  %v13314_v18 = vpop.eup %10062 }
 0x786   : > { %v4738_v60 = vmul.f32 %v13048_v30, %v4674_v25  ;;  %v4353_v25 = vmul.f32 1.442695, %v4265_v20 }
 0x787   : > { %4475 = vadd.xlane.f32.xlu1 %v13292_v52 }
 0x788   : > { %4453 = vadd.xlane.f32.xlu0 %v13294_v16  ;;  %v4802_v28 = vpack.c.bf16 %v4738_v60, %v4738_v60 }
 0x789   : > { %4515 = vadd.xlane.f32.xlu2 %v13297_v53 }
 0x78b   : > { %v4530_v3 = vpop.xlane.xlu0 %4529  ;;  %v10065_v35 = vpop.eup %10064 }
 0x78c   : > { %10066 = vrcp.f32 %v4530_v3  ;;  %v4534_v8 = vpop.xlane.xlu2 %4533  ;;  %v4658_v54 = vmul.f32 0.25, %v10065_v35 }
 0x78d   : > { %10068 = vpow2.f32 %v4349_v39  ;;  %v4355_v39 = vmul.f32 1.442695, %v4266_v61 }
 0x78e   : > { %10070 = vpow2.f32 %v4389_v13  ;;  %v4170_v13 = vpop.xlane.xlu1 %4169  ;;  %v4722_v61 = vmul.f32 %v13064_v10, %v4658_v54  ;;  %v4359_v10 = vmul.f32 1.442695, %v4268_v22 }
 0x78f   : > { %4207 = vmax.xlane.f32.xlu1 %v13309_v24  ;;  %10072 = vpow2.f32 %v4351_v4  ;;  %v4269_v1 = vsub.f32 %v13004_v59, %v4170_v13 }
 0x790   : > { %4551 = vadd.xlane.f32.xlu0 %v13311_v43  ;;  %10074 = vrcp.f32 %v4534_v8  ;;  %v16047_v8 = vld [vmem:[#allocation78_spill] sm:$0xff] }
 0x791   : > { %4549 = vadd.xlane.f32.xlu2 %v13314_v18  ;;  %v4252_v4 = vsub.f32 %v16047_v8, %v13160_v14  ;;  %v16049_v8 = vld [vmem:[#allocation85_spill] sm:$0xff] }
 0x792   : > { %v10067_v27 = vpop.eup %10066 }
 0x793   : > { %v4673_v15 = vmul.f32 0.25, %v10067_v27  ;;  %v4498_v46 = vpop.xlane.xlu0 %4497  ;;  %v13326_v30 = vpop.eup %10068  ;;  %v4327_v59 = vmul.f32 1.442695, %v4252_v4 }
 0x794   : > { %10076 = vrcp.f32 %v4498_v46  ;;  %v4502_v3 = vpop.xlane.xlu2 %4501  ;;  %v13328_v63 = vpop.eup %10070  ;;  %v4361_v46 = vmul.f32 1.442695, %v4269_v1 }
 0x795   : > { %v4737_v2 = vmul.f32 %v13075_v7, %v4673_v15  ;;  %v13331_v17 = vpop.eup %10072  ;;  %10078 = vpow2.f32 %v4385_v44  ;;  %v5269_v7 = vunpack.c.l.b16 %v4802_v28 }
 0x796   : > { %v10075_v35 = vpop.eup %10074  ;;  %10080 = vpow2.f32 %v4355_v39  ;;  %v4786_v39 = vpack.c.bf16 %v4722_v61, %v4722_v61 }
 0x797   : > { %v4801_v19 = vpack.c.bf16 %v4737_v2, %v4737_v2  ;;  %4477 = vadd.xlane.f32.xlu1 %v13326_v30  ;;  %10082 = vpow2.f32 %v4353_v25  ;;  %v4675_v13 = vmul.f32 0.25, %v10075_v35 }
 0x798   : > { %4517 = vadd.xlane.f32.xlu0 %v13328_v63  ;;  %10084 = vrcp.f32 %v4502_v3  ;;  %v4138_v3 = vpop.xlane.xlu1 %4137  ;;  %v5124_v1 = vunpack.c.l.b16 %v4786_v39 }
 0x799   : > { %v5268_v60 = vunpack.c.l.b16 %v4801_v19  ;;  %4479 = vadd.xlane.f32.xlu2 %v13331_v17  ;;  %v4739_v35 = vmul.f32 %v13077_v57, %v4675_v13  ;;  %v4253_v61 = vsub.f32 %v13029_v11, %v4138_v3 }
 0x79a   : > { %v10077_v27 = vpop.eup %10076 }
 0x79b   : > { %v5284_v20 = vpack.c.b16 %v5269_v7, %v5268_v60  ;;  %v4657_v15 = vmul.f32 0.25, %v10077_v27  ;;  %v4536_v14 = vpop.xlane.xlu0 %4535  ;;  %v13342_v19 = vpop.eup %10078  ;;  %v4391_v27 = vmul.f32 1.442695, %v4284_v38  ;;  %v4329_v13 = vmul.f32 1.442695, %v4253_v61  ;;  %v16050_v38 = vld [vmem:[#allocation84_spill] sm:$0xff] }
 0x79c   : > { %10086 = vrcp.f32 %v4536_v14  ;;  %v4504_v44 = vpop.xlane.xlu2 %4503  ;;  %v13344_v28 = vpop.eup %10080  ;;  %v4267_v3 = vsub.f32 %v16050_v38, %v13234_v33  ;;  %v16055_v38 = vld [vmem:[#allocation75_spill] sm:$0xff] }
 0x79d   : > { %v4721_v54 = vmul.f32 %v13088_v36, %v4657_v15  ;;  %10088 = vrcp.f32 %v4504_v44  ;;  %5356 = vmatmul.bf16.vlgmr.msra.gmra.mxu2 %v5284_v20  ;;  %v13349_v25 = vpop.eup %10082  ;;  %v4254_v36 = vsub.f32 %v16049_v8, %v13236_v50  ;;  %v16052_v8 = vld [vmem:[#allocation47_spill] sm:$0xff] }
 0x79e   : > { %10090 = vpow2.f32 %v4327_v59  ;;  %v10085_v4 = vpop.eup %10084 }
 0x79f   : > { %v4785_v2 = vpack.c.bf16 %v4721_v54, %v4721_v54  ;;  %4513 = vadd.xlane.f32.xlu1 %v13342_v19  ;;  %10092 = vpow2.f32 %v4361_v46  ;;  %v4331_v50 = vmul.f32 1.442695, %v4254_v36  ;;  %v4803_v46 = vpack.c.bf16 %v4739_v35, %v4739_v35  ;;  %v16053_v35 = vld [vmem:[#allocation81_spill] sm:$0xff] }
 0x7a0   : > { %4483 = vadd.xlane.f32.xlu0 %v13344_v28  ;;  %10094 = vpow2.f32 %v4359_v10  ;;  %v4659_v44 = vmul.f32 0.25, %v10085_v4 }
 0x7a1   : > { %v5123_v7 = vunpack.c.l.b16 %v4785_v2  ;;  %4481 = vadd.xlane.f32.xlu2 %v13349_v25  ;;  %v5270_v4 = vunpack.c.l.b16 %v4803_v46 }
 0x7a2   : > { %v10087_v62 = vpop.eup %10086  ;;  %v4723_v36 = vmul.f32 %v16052_v8, %v4659_v44 }
 0x7a3   : > { %v10089_v60 = vpop.eup %10088  ;;  %v5139_v22 = vpack.c.b16 %v5124_v1, %v5123_v7  ;;  %v4676_v20 = vmul.f32 0.25, %v10087_v62  ;;  %v4540_v15 = vpop.xlane.xlu0 %4539  ;;  %v4285_v7 = vsub.f32 %v16053_v35, %v13201_v41 }
 0x7a4   : > { %v4660_v14 = vmul.f32 0.25, %v10089_v60  ;;  %10096 = vrcp.f32 %v4540_v15  ;;  %v4538_v59 = vpop.xlane.xlu2 %4537  ;;  %v13358_v39 = vpop.eup %10090 }
 0x7a5   : > { %v4740_v57 = vmul.f32 %v13101_v34, %v4676_v20  ;;  %10098 = vrcp.f32 %v4538_v59  ;;  %5211 = vmatmul.bf16.vlgmr.msrb.gmra.mxu0 %v5139_v22  ;;  %v13360_v54 = vpop.eup %10092  ;;  %v16051_v34 = vld [vmem:[#allocation89_spill] sm:$0xff]  ;;  %v4357_v22 = vmul.f32 1.442695, %v4267_v3  ;;  %v4544_v59 = vpop.xlane.xlu1 %4543  ;;  %v4393_v41 = vmul.f32 1.442695, %v4285_v7 }
 0x7a6   : > { %10100 = vpow2.f32 %v4391_v27  ;;  %v4724_v10 = vmul.f32 %v13103_v9, %v4660_v14  ;;  %v13364_v29 = vpop.eup %10094  ;;  %v4286_v2 = vsub.f32 %v16051_v34, %v13273_v23  ;;  %v4787_v14 = vpack.c.bf16 %v4723_v36, %v4723_v36  ;;  %v16056_v34 = vld [vmem:[#allocation87_spill] sm:$0xff] }
 0x7a7   : > { %v4804_v11 = vpack.c.bf16 %v4740_v57, %v4740_v57  ;;  %4455 = vadd.xlane.f32.xlu1 %v13358_v39  ;;  %10102 = vpow2.f32 %v4331_v50 }
 0x7a8   : > { %4489 = vadd.xlane.f32.xlu0 %v13360_v54  ;;  %10104 = vpow2.f32 %v4329_v13  ;;  %v4788_v61 = vpack.c.bf16 %v4724_v10, %v4724_v10  ;;  %v4395_v50 = vmul.f32 1.442695, %v4286_v2  ;;  %v16054_v10 = vld [vmem:[#allocation44_spill] sm:$0xff]  ;;  %v4302_v2 = vsub.f32 %v16056_v34, %v13252_v5 }
 0x7a9   : > { %4487 = vadd.xlane.f32.xlu2 %v13364_v29  ;;  %v5271_v1 = vunpack.c.l.b16 %v4804_v11  ;;  %v4301_v3 = vsub.f32 %v16055_v38, %v16054_v10 }
 0x7aa   : > { %v10097_v9 = vpop.eup %10096  ;;  %v5126_v13 = vunpack.c.l.b16 %v4788_v61 }
 0x7ab   : > { %v10099_v62 = vpop.eup %10098  ;;  %v4678_v33 = vmul.f32 0.25, %v10097_v9  ;;  %v4508_v60 = vpop.xlane.xlu0 %4507  ;;  %v5285_v27 = vpack.c.b16 %v5271_v1, %v5270_v4  ;;  %v4425_v7 = vmul.f32 1.442695, %v4301_v3 }
 0x7ac   : > { %v4677_v20 = vmul.f32 0.25, %v10099_v62  ;;  %10106 = vrcp.f32 %v4508_v60  ;;  %v4506_v23 = vpop.xlane.xlu2 %4505  ;;  %v13375_v15 = vpop.eup %10100 }
 0x7ad   : > { %10108 = vrcp.f32 %v4506_v23  ;;  %5361 = vmatmul.bf16.gmra.mxu2 %v5285_v27  ;;  %v13377_v46 = vpop.eup %10102  ;;  %v4742_v44 = vmul.f32 %v13115_v58, %v4678_v33  ;;  %v5125_v58 = vunpack.c.l.b16 %v4787_v14  ;;  %v4427_v33 = vmul.f32 1.442695, %v4302_v2 }
 0x7ae   : > { %v4741_v57 = vmul.f32 %v13118_v49, %v4677_v20  ;;  %v13382_v11 = vpop.eup %10104  ;;  %10110 = vpow2.f32 %v4357_v22  ;;  %v4512_v20 = vpop.xlane.xlu1 %4511 }
 0x7af   : > { %4519 = vadd.xlane.f32.xlu1 %v13375_v15  ;;  %10112 = vpow2.f32 %v4395_v50  ;;  %v4806_v49 = vpack.c.bf16 %v4742_v44, %v4742_v44  ;;  %v5140_v35 = vpack.c.b16 %v5126_v13, %v5125_v58  ;;  %v16057_v50 = vld [vmem:[#allocation46_spill] sm:$0xff] }
 0x7b0   : > { %4459 = vadd.xlane.f32.xlu0 %v13377_v46  ;;  %10114 = vpow2.f32 %v4393_v41  ;;  %v4805_v36 = vpack.c.bf16 %v4741_v57, %v4741_v57  ;;  %v16058_v41 = vld [vmem:[#allocation83_spill] sm:$0xff] }
 0x7b1   : > { %4457 = vadd.xlane.f32.xlu2 %v13382_v11  ;;  %10116 = vrcp.f32 %v4544_v59  ;;  %v5273_v27 = vunpack.c.l.b16 %v4806_v49  ;;  %v4270_v44 = vsub.f32 %v16058_v41, %v13215_v42 }
 0x7b2   : > { %v10107_v8 = vpop.eup %10106  ;;  %v5272_v60 = vunpack.c.l.b16 %v4805_v36 }
 0x7b3   : > { %v10109_v4 = vpop.eup %10108  ;;  %v4662_v1 = vmul.f32 0.25, %v10107_v8  ;;  %v4542_v9 = vpop.xlane.xlu0 %4541  ;;  %v4363_v2 = vmul.f32 1.442695, %v4270_v44 }
 0x7b4   : > { %v4661_v62 = vmul.f32 0.25, %v10109_v4  ;;  %10118 = vrcp.f32 %v4542_v9  ;;  %v4436_v61 = vpop.xlane.xlu2 %4435  ;;  %v13390_v5 = vpop.eup %10110  ;;  %v5286_v10 = vpack.c.b16 %v5273_v27, %v5272_v60 }
 0x7b5   : > { %5216 = vmatmul.bf16.gmra.mxu0 %v5140_v35  ;;  %v13392_v22 = vpop.eup %10112  ;;  %v4726_v23 = vmul.f32 %v13133_v56, %v4662_v1  ;;  %10120 = vpow2.f32 %v4425_v7  ;;  %v16059_v35 = vld [vmem:[#allocation88_spill] sm:$0xff] }
 0x7b6   : > { %v4725_v14 = vmul.f32 %v16057_v50, %v4661_v62  ;;  %v13397_v59 = vpop.eup %10114  ;;  %10122 = vpow2.f32 %v4427_v33  ;;  %v4255_v7 = vsub.f32 %v16059_v35, %v13254_v26  ;;  %v16061_v26 = vld [vmem:[#allocation69_spill] sm:$0xff] }
 0x7b7   : > { %4485 = vadd.xlane.f32.xlu1 %v13390_v5  ;;  %v10117_v57 = vpop.eup %10116  ;;  %10124 = vrcp.f32 %v4512_v20  ;;  %v4790_v56 = vpack.c.bf16 %v4726_v23, %v4726_v23 }
 0x7b8   : > { %4523 = vadd.xlane.f32.xlu0 %v13392_v22  ;;  %v4789_v38 = vpack.c.bf16 %v4725_v14, %v4725_v14  ;;  %10126 = vrcp.f32 %v4436_v61  ;;  %v4680_v8 = vmul.f32 0.25, %v10117_v57  ;;  %v16060_v61 = vld [vmem:[#allocation65_spill] sm:$0xff] }
 0x7b9   : > { %4521 = vadd.xlane.f32.xlu2 %v13397_v59  ;;  %v5128_v1 = vunpack.c.l.b16 %v4790_v56 }
 0x7ba   : > { %v10119_v13 = vpop.eup %10118  ;;  %v5127_v4 = vunpack.c.l.b16 %v4789_v38  ;;  %v4744_v33 = vmul.f32 %v16060_v61, %v4680_v8  ;;  %v4440_v38 = vpop.xlane.xlu1 %4439 }
 0x7bb   : > { %v4679_v3 = vmul.f32 0.25, %v10119_v13  ;;  %v4510_v34 = vpop.xlane.xlu0 %4509  ;;  %v13403_v42 = vpop.eup %10120 }
 0x7bc   : > { %10128 = vrcp.f32 %v4510_v34  ;;  %v4438_v58 = vpop.xlane.xlu2 %4437  ;;  %v13405_v49 = vpop.eup %10122  ;;  %v5141_v50 = vpack.c.b16 %v5128_v1, %v5127_v4  ;;  %v4808_v41 = vpack.c.bf16 %v4744_v33, %v4744_v33 }
 0x7bd   : > { %5366 = vmatmul.bf16.gmra.mxu2 %v5286_v10  ;;  %v4743_v36 = vmul.f32 %v13150_v0, %v4679_v3  ;;  %v10125_v9 = vpop.eup %10124  ;;  %10130 = vpow2.f32 %v4363_v2  ;;  %v4333_v0 = vmul.f32 1.442695, %v4255_v7  ;;  %v16062_v3 = vld [vmem:[#allocation48_spill] sm:$0xff]  ;;  %v16063_v2 = vld [vmem:[#allocation73_spill] sm:$0xff] }
 0x7be   : > { %v10127_v62 = vpop.eup %10126  ;;  %v4664_v44 = vmul.f32 0.25, %v10125_v9 }
 0x7bf   : > { %4553 = vadd.xlane.f32.xlu1 %v13403_v42  ;;  %v4807_v27 = vpack.c.bf16 %v4743_v36, %v4743_v36  ;;  %v4626_v57 = vmul.f32 0.25, %v10127_v62  ;;  %v5275_v36 = vunpack.c.l.b16 %v4808_v41 }
 0x7c0   : > { %v4728_v34 = vmul.f32 %v16062_v3, %v4664_v44 }
 0x7c1   : > { %4555 = vadd.xlane.f32.xlu2 %v13405_v49  ;;  %v5274_v56 = vunpack.c.l.b16 %v4807_v27  ;;  %v4690_v8 = vmul.f32 %v16063_v2, %v4626_v57 }
 0x7c2   : > { %v10129_v60 = vpop.eup %10128  ;;  %v4792_v61 = vpack.c.bf16 %v4728_v34, %v4728_v34 }
 0x7c3   : > { %v4663_v20 = vmul.f32 0.25, %v10129_v60  ;;  %v4434_v23 = vpop.xlane.xlu0 %4433  ;;  %v13413_v13 = vpop.eup %10130  ;;  %v5287_v7 = vpack.c.b16 %v5275_v36, %v5274_v56  ;;  %v4754_v33 = vpack.c.bf16 %v4690_v8, %v4690_v8  ;;  %v16064_v60 = vld [vmem:[#allocation61_spill] sm:$0xff]  ;;  %v16065_v8 = vld [vmem:[#allocation55_spill] sm:$0xff] }
 0x7c4   : > { %10132 = vrcp.f32 %v4434_v23  ;;  %v4442_v14 = vpop.xlane.xlu2 %4441  ;;  %v5130_v44 = vunpack.c.l.b16 %v4792_v61 }
 0x7c5   : > { %5221 = vmatmul.bf16.gmra.mxu0 %v5141_v50  ;;  %v4727_v10 = vmul.f32 %v16061_v26, %v4663_v20  ;;  %10134 = vpow2.f32 %v4333_v0  ;;  %v4834_v41 = vunpack.c.l.b16 %v4754_v33  ;;  %v13423_v26 = vpop.xlane.xlu1 %4447 }
 0x7c6   : > { %10136 = vrcp.f32 %v4438_v58 }
 0x7c7   : > { %4491 = vadd.xlane.f32.xlu1 %v13413_v13  ;;  %v4791_v1 = vpack.c.bf16 %v4727_v10, %v4727_v10  ;;  %10138 = vrcp.f32 %v4440_v38 }
 0x7c9   : > { %v5129_v50 = vunpack.c.l.b16 %v4791_v1  ;;  %v16066_v1 = vld [vmem:[#allocation63_spill] sm:$0xff] }
 0x7ca   : > { %v10133_v4 = vpop.eup %10132 }
 0x7cb   : > { %v4625_v9 = vmul.f32 0.25, %v10133_v4  ;;  %v4444_v35 = vpop.xlane.xlu0 %4443  ;;  %v13420_v27 = vpop.eup %10134  ;;  %v5142_v3 = vpack.c.b16 %v5130_v44, %v5129_v50 }
 0x7cc   : > { %v4466_v62 = vpop.xlane.xlu2 %4465  ;;  %v10137_v0 = vpop.eup %10136 }
 0x7cd   : > { %v4689_v20 = vmul.f32 %v16064_v60, %v4625_v9  ;;  %5371 = vmatmul.bf16.gmra.mxu2 %v5287_v7  ;;  %v10139_v57 = vpop.eup %10138  ;;  %v4627_v10 = vmul.f32 0.25, %v10137_v0  ;;  %10140 = vrcp.f32 %v4466_v62 }
 0x7ce   : > { %v4628_v2 = vmul.f32 0.25, %v10139_v57  ;;  %10142 = vrcp.f32 %v4444_v35  ;;  %v16067_v57 = vld [vmem:[#allocation68_spill] sm:$0xff] }
 0x7cf   : > { %v4753_v23 = vpack.c.bf16 %v4689_v20, %v4689_v20  ;;  %4461 = vadd.xlane.f32.xlu1 %v13420_v27  ;;  %v4691_v36 = vmul.f32 %v16065_v8, %v4627_v10 }
 0x7d0   : > { %v4692_v9 = vmul.f32 %v16066_v1, %v4628_v2 }
 0x7d1   : > { %v4833_v58 = vunpack.c.l.b16 %v4753_v23  ;;  %v4755_v61 = vpack.c.bf16 %v4691_v36, %v4691_v36 }
 0x7d2   : > { %v4756_v23 = vpack.c.bf16 %v4692_v9, %v4692_v9 }
 0x7d3   : > { %v4849_v56 = vpack.c.b16 %v4834_v41, %v4833_v58  ;;  %v4446_v38 = vpop.xlane.xlu0 %4445  ;;  %v10141_v4 = vpop.eup %10140  ;;  %v4835_v58 = vunpack.c.l.b16 %v4755_v61 }
 0x7d4   : > { %v13425_v34 = vpop.xlane.xlu2 %4451  ;;  %v4641_v60 = vmul.f32 0.25, %v10141_v4  ;;  %v10143_v44 = vpop.eup %10142 }
 0x7d5   : > { %4921 = vmatmul.bf16.vlgmr.msra.gmra.mxu3 %v4849_v56  ;;  %5226 = vmatmul.bf16.gmra.mxu0 %v5142_v3  ;;  %v16068_v56 = vld [vmem:[#allocation91_spill] sm:$0xff]  ;;  %v4630_v36 = vmul.f32 0.25, %v10143_v44 }
 0x7d6   : > { %v4705_v10 = vmul.f32 %v16067_v57, %v4641_v60  ;;  %v4256_v3 = vsub.f32 %v16068_v56, %v13290_v6 }
 0x7d8   : > { %v4769_v1 = vpack.c.bf16 %v4705_v10, %v4705_v10 }
 0x7da   : > { %v4468_v7 = vpop.xlane.xlu1 %4467 }
 0x7db   : > { %10144 = vrcp.f32 %v4468_v7  ;;  %v4238_v33 = vpop.xlane.xlu0 %4237 }
 0x7dc   : > { %10146 = vrcp.f32 %v4442_v14  ;;  %v4303_v62 = vsub.f32 %v13220_v37, %v4238_v33  ;;  %v4174_v20 = vpop.xlane.xlu2 %4173  ;;  %v4836_v14 = vunpack.c.l.b16 %v4756_v23  ;;  %v4335_v33 = vmul.f32 1.442695, %v4256_v3 }
 0x7dd   : > { %v4271_v50 = vsub.f32 %v13224_v40, %v4174_v20 }
 0x7de   : > { %v4429_v0 = vmul.f32 1.442695, %v4303_v62  ;;  %v4850_v40 = vpack.c.b16 %v4836_v14, %v4835_v58 }
 0x7df   : > { %v4365_v41 = vmul.f32 1.442695, %v4271_v50  ;;  %v16069_v50 = vld [vmem:[#allocation74_spill] sm:$0xff] }
 0x7e0   : > { %10148 = vpow2.f32 %v4429_v0  ;;  %v4694_v0 = vmul.f32 %v16069_v50, %v4630_v36 }
 0x7e1   : > { %v10145_v35 = vpop.eup %10144  ;;  %10150 = vpow2.f32 %v4365_v41  ;;  %v4978_v41 = vunpack.c.l.b16 %v4769_v1 }
 0x7e2   : > { %v10147_v2 = vpop.eup %10146  ;;  %v4642_v8 = vmul.f32 0.25, %v10145_v35  ;;  %v13434_v37 = vpop.xlane.xlu1 %4449  ;;  %v4758_v10 = vpack.c.bf16 %v4694_v0, %v4694_v0 }
 0x7e3   : > { %v4176_v4 = vpop.xlane.xlu0 %4175  ;;  %v4629_v60 = vmul.f32 0.25, %v10147_v2 }
 0x7e4   : > { %v4706_v9 = vmul.f32 %v13217_v48, %v4642_v8  ;;  %v4272_v7 = vsub.f32 %v13241_v45, %v4176_v4  ;;  %v4548_v61 = vpop.xlane.xlu2 %4547  ;;  %v16070_v48 = vld [vmem:[#allocation56_spill] sm:$0xff]  ;;  %v4838_v4 = vunpack.c.l.b16 %v4758_v10 }
 0x7e5   : > { %4926 = vmatmul.bf16.gmra.mxu3 %v4850_v40  ;;  %v4693_v45 = vmul.f32 %v16070_v48, %v4629_v60 }
 0x7e6   : > { %v13438_v62 = vpop.eup %10148  ;;  %v4770_v6 = vpack.c.bf16 %v4706_v9, %v4706_v9  ;;  %v4367_v20 = vmul.f32 1.442695, %v4272_v7 }
 0x7e7   : > { %v13440_v23 = vpop.eup %10150  ;;  %4557 = vadd.xlane.f32.xlu0 %v13438_v62  ;;  %v4757_v14 = vpack.c.bf16 %v4693_v45, %v4693_v45 }
 0x7e8   : > { %v4979_v58 = vunpack.c.l.b16 %v4770_v6  ;;  %10152 = vpow2.f32 %v4367_v20  ;;  %4493 = vadd.xlane.f32.xlu2 %v13440_v23 }
 0x7e9   : > { %10154 = vpow2.f32 %v4335_v33 }
 0x7ea   : > { %10156 = vrcp.f32 %v4446_v38  ;;  %v4994_v44 = vpack.c.b16 %v4979_v58, %v4978_v41  ;;  %v4240_v57 = vpop.xlane.xlu1 %4239  ;;  %v16071_v58 = vld [vmem:[#allocation92_spill] sm:$0xff] }
 0x7eb   : > { %10158 = vrcp.f32 %v4548_v61  ;;  %v4304_v35 = vsub.f32 %v13257_v55, %v4240_v57  ;;  %v4206_v56 = vpop.xlane.xlu0 %4205  ;;  %v16072_v57 = vld [vmem:[#allocation52_spill] sm:$0xff] }
 0x7ec   : > { %10160 = vrcp.f32 %v13423_v26  ;;  %v4470_v3 = vpop.xlane.xlu2 %4469  ;;  %5066 = vmatmul.bf16.vlgmr.msrb.gmra.mxu1 %v4994_v44  ;;  %v4287_v38 = vsub.f32 %v13260_v47, %v4206_v56  ;;  %v4837_v26 = vunpack.c.l.b16 %v4757_v14 }
 0x7ed   : > { %v4431_v2 = vmul.f32 1.442695, %v4304_v35  ;;  %10162 = vrcp.f32 %v4470_v3 }
 0x7ee   : > { %v13448_v8 = vpop.eup %10152  ;;  %v4397_v33 = vmul.f32 1.442695, %v4287_v38  ;;  %v4851_v6 = vpack.c.b16 %v4838_v4, %v4837_v26 }
 0x7ef   : > { %v13450_v36 = vpop.eup %10154  ;;  %10164 = vpow2.f32 %v4431_v2  ;;  %4495 = vadd.xlane.f32.xlu0 %v13448_v8 }
 0x7f0   : > { %v10157_v40 = vpop.eup %10156  ;;  %4463 = vadd.xlane.f32.xlu2 %v13450_v36 }
 0x7f1   : > { %v10159_v55 = vpop.eup %10158  ;;  %v4631_v61 = vmul.f32 0.25, %v10157_v40 }
 0x7f2   : > { %v10161_v1 = vpop.eup %10160  ;;  %v4546_v9 = vpop.xlane.xlu1 %4545  ;;  %v4682_v20 = vmul.f32 0.25, %v10159_v55 }
 0x7f3   : > { %v10163_v7 = vpop.eup %10162  ;;  %10166 = vrcp.f32 %v4546_v9  ;;  %v4474_v60 = vpop.xlane.xlu0 %4473  ;;  %v4632_v47 = vmul.f32 0.25, %v10161_v1  ;;  %v4695_v48 = vmul.f32 %v16071_v58, %v4631_v61 }
 0x7f4   : > { %v4472_v50 = vpop.xlane.xlu2 %4471  ;;  %v4643_v41 = vmul.f32 0.25, %v10163_v7  ;;  %v4746_v45 = vmul.f32 %v13244_v32, %v4682_v20 }
 0x7f5   : > { %v13455_v0 = vpop.eup %10164  ;;  %10168 = vrcp.f32 %v4472_v50  ;;  %4931 = vmatmul.bf16.gmra.mxu3 %v4851_v6  ;;  %v4696_v10 = vmul.f32 %v16072_v57, %v4632_v47  ;;  %v4759_v2 = vpack.c.bf16 %v4695_v48, %v4695_v48 }
 0x7f6   : > { %4559 = vadd.xlane.f32.xlu1 %v13455_v0  ;;  %10170 = vpow2.f32 %v4397_v33  ;;  %v4707_v35 = vmul.f32 %v13263_v31, %v4643_v41  ;;  %v4810_v4 = vpack.c.bf16 %v4746_v45, %v4746_v45 }
 0x7f7   : > { %10172 = vrcp.f32 %v13434_v37  ;;  %v4760_v1 = vpack.c.bf16 %v4696_v10, %v4696_v10  ;;  %v4839_v7 = vunpack.c.l.b16 %v4759_v2 }
 0x7f8   : > { %v4771_v37 = vpack.c.bf16 %v4707_v35, %v4707_v35 }
 0x7f9   : > { %v10167_v44 = vpop.eup %10166  ;;  %v4840_v50 = vunpack.c.l.b16 %v4760_v1  ;;  %v16074_v1 = vld [vmem:[#allocation93_spill] sm:$0xff] }
 0x7fa   : > { %v4681_v56 = vmul.f32 0.25, %v10167_v44  ;;  %v4476_v3 = vpop.xlane.xlu1 %4475  ;;  %v4980_v58 = vunpack.c.l.b16 %v4771_v37 }
 0x7fb   : > { %v10169_v14 = vpop.eup %10168  ;;  %10174 = vrcp.f32 %v4476_v3  ;;  %v13463_v38 = vpop.xlane.xlu0 %4453 }
 0x7fc   : > { %10176 = vrcp.f32 %v13425_v34  ;;  %v4745_v40 = vmul.f32 %v13275_v21, %v4681_v56  ;;  %v4644_v32 = vmul.f32 0.25, %v10169_v14  ;;  %v4516_v55 = vpop.xlane.xlu2 %4515  ;;  %v13467_v26 = vpop.eup %10170  ;;  %v5277_v34 = vunpack.c.l.b16 %v4810_v4  ;;  %v16073_v4 = vld [vmem:[#allocation67_spill] sm:$0xff] }
 0x7fd   : > { %10178 = vrcp.f32 %v4474_v60  ;;  %v10173_v61 = vpop.eup %10172 }
 0x7fe   : > { %v4809_v31 = vpack.c.bf16 %v4745_v40, %v4745_v40  ;;  %v4708_v9 = vmul.f32 %v13280_v51, %v4644_v32  ;;  %4525 = vadd.xlane.f32.xlu1 %v13467_v26  ;;  %v4633_v60 = vmul.f32 0.25, %v10173_v61  ;;  %v4852_v51 = vpack.c.b16 %v4840_v50, %v4839_v7 }
 0x800   : > { %v4772_v33 = vpack.c.bf16 %v4708_v9, %v4708_v9  ;;  %v5276_v6 = vunpack.c.l.b16 %v4809_v31  ;;  %v4697_v40 = vmul.f32 %v16073_v4, %v4633_v60 }
 0x801   : > { %v10175_v20 = vpop.eup %10174 }
 0x802   : > { %v10177_v21 = vpop.eup %10176  ;;  %v4208_v47 = vpop.xlane.xlu1 %4207  ;;  %v5288_v41 = vpack.c.b16 %v5277_v34, %v5276_v6  ;;  %v4981_v48 = vunpack.c.l.b16 %v4772_v33  ;;  %v4646_v10 = vmul.f32 0.25, %v10175_v20  ;;  %v4761_v61 = vpack.c.bf16 %v4697_v40, %v4697_v40 }
 0x803   : > { %v10179_v45 = vpop.eup %10178  ;;  %v4288_v44 = vsub.f32 %v13309_v24, %v4208_v47  ;;  %v4552_v57 = vpop.xlane.xlu0 %4551  ;;  %v4634_v3 = vmul.f32 0.25, %v10177_v21 }
 0x804   : > { %10180 = vrcp.f32 %v4552_v57  ;;  %v4550_v35 = vpop.xlane.xlu2 %4549  ;;  %5376 = vmatmul.bf16.gmra.mxu2 %v5288_v41  ;;  %v4995_v56 = vpack.c.b16 %v4981_v48, %v4980_v58  ;;  %v4645_v2 = vmul.f32 0.25, %v10179_v45  ;;  %v4710_v32 = vmul.f32 %v13292_v52, %v4646_v10 }
 0x805   : > { %v4399_v14 = vmul.f32 1.442695, %v4288_v44  ;;  %10182 = vrcp.f32 %v4550_v35  ;;  %4936 = vmatmul.bf16.gmra.mxu3 %v4852_v51  ;;  %v4698_v24 = vmul.f32 %v16074_v1, %v4634_v3  ;;  %v4841_v48 = vunpack.c.l.b16 %v4761_v61 }
 0x806   : > { %5071 = vmatmul.bf16.gmra.mxu1 %v4995_v56  ;;  %v4709_v31 = vmul.f32 %v13277_v12, %v4645_v2  ;;  %v4774_v34 = vpack.c.bf16 %v4710_v32, %v4710_v32 }
 0x807   : > { %10184 = vpow2.f32 %v4399_v14  ;;  %v4762_v47 = vpack.c.bf16 %v4698_v24, %v4698_v24 }
 0x808   : > { %10186 = vrcp.f32 %v4516_v55  ;;  %v4773_v41 = vpack.c.bf16 %v4709_v31, %v4709_v31  ;;  %v4983_v45 = vunpack.c.l.b16 %v4774_v34 }
 0x809   : > { %v4842_v44 = vunpack.c.l.b16 %v4762_v47 }
 0x80a   : > { %v10181_v37 = vpop.eup %10180  ;;  %v4478_v9 = vpop.xlane.xlu1 %4477  ;;  %v4982_v35 = vunpack.c.l.b16 %v4773_v41 }
 0x80b   : > { %v10183_v7 = vpop.eup %10182  ;;  %v4684_v33 = vmul.f32 0.25, %v10181_v37  ;;  %v4518_v6 = vpop.xlane.xlu0 %4517  ;;  %10188 = vrcp.f32 %v4478_v9  ;;  %v4853_v14 = vpack.c.b16 %v4842_v44, %v4841_v48 }
 0x80c   : > { %v4683_v20 = vmul.f32 0.25, %v10183_v7  ;;  %v4480_v50 = vpop.xlane.xlu2 %4479  ;;  %v4996_v40 = vpack.c.b16 %v4983_v45, %v4982_v35 }
 0x80d   : > { %v13476_v21 = vpop.eup %10184  ;;  %v4748_v52 = vmul.f32 %v13311_v43, %v4684_v33  ;;  %10190 = vrcp.f32 %v4480_v50 }
 0x80e   : > { %v4747_v58 = vmul.f32 %v13314_v18, %v4683_v20  ;;  %4527 = vadd.xlane.f32.xlu2 %v13476_v21  ;;  %v10187_v60 = vpop.eup %10186  ;;  %10192 = vrcp.f32 %v13463_v38 }
 0x80f   : > { %v4812_v12 = vpack.c.bf16 %v4748_v52, %v4748_v52  ;;  %v4666_v18 = vmul.f32 0.25, %v10187_v60 }
 0x810   : > { %v4811_v55 = vpack.c.bf16 %v4747_v58, %v4747_v58 }
 0x811   : > { %v5279_v57 = vunpack.c.l.b16 %v4812_v12  ;;  %v10189_v51 = vpop.eup %10188  ;;  %v4730_v37 = vmul.f32 %v13297_v53, %v4666_v18 }
 0x812   : > { %v4514_v10 = vpop.xlane.xlu1 %4513  ;;  %v5278_v56 = vunpack.c.l.b16 %v4811_v55  ;;  %v4647_v1 = vmul.f32 0.25, %v10189_v51 }
 0x813   : > { %v10191_v43 = vpop.eup %10190  ;;  %10194 = vrcp.f32 %v4514_v10  ;;  %v4484_v3 = vpop.xlane.xlu0 %4483  ;;  %v4794_v20 = vpack.c.bf16 %v4730_v37, %v4730_v37 }
 0x814   : > { %v4648_v2 = vmul.f32 0.25, %v10191_v43  ;;  %v4482_v4 = vpop.xlane.xlu2 %4481  ;;  %v5289_v32 = vpack.c.b16 %v5279_v57, %v5278_v56  ;;  %v10193_v24 = vpop.eup %10192  ;;  %10196 = vrcp.f32 %v4518_v6  ;;  %v4711_v9 = vmul.f32 %v13326_v30, %v4647_v1 }
 0x815   : > { %4941 = vmatmul.bf16.gmra.mxu3 %v4853_v14  ;;  %10198 = vrcp.f32 %v4484_v3  ;;  %v4635_v33 = vmul.f32 0.25, %v10193_v24  ;;  %v5132_v48 = vunpack.c.l.b16 %v4794_v20 }
 0x816   : > { %5076 = vmatmul.bf16.gmra.mxu1 %v4996_v40  ;;  %5381 = vmatmul.bf16.gmra.mxu2 %v5289_v32  ;;  %v4712_v38 = vmul.f32 %v13331_v17, %v4648_v2  ;;  %10200 = vrcp.f32 %v4482_v4  ;;  %v4775_v6 = vpack.c.bf16 %v4711_v9, %v4711_v9 }
 0x817   : > { %v4699_v58 = vmul.f32 %v13294_v16, %v4635_v33 }
 0x818   : > { %v4776_v50 = vpack.c.bf16 %v4712_v38, %v4712_v38  ;;  %v4984_v51 = vunpack.c.l.b16 %v4775_v6 }
 0x819   : > { %v10195_v31 = vpop.eup %10194  ;;  %v4763_v10 = vpack.c.bf16 %v4699_v58, %v4699_v58 }
 0x81a   : > { %v4665_v7 = vmul.f32 0.25, %v10195_v31  ;;  %v4456_v61 = vpop.xlane.xlu1 %4455  ;;  %v10197_v53 = vpop.eup %10196  ;;  %v4985_v55 = vunpack.c.l.b16 %v4776_v50 }
 0x81b   : > { %10202 = vrcp.f32 %v4456_v61  ;;  %v13485_v34 = vpop.xlane.xlu0 %4489  ;;  %v10199_v17 = vpop.eup %10198  ;;  %v4667_v35 = vmul.f32 0.25, %v10197_v53  ;;  %v4843_v32 = vunpack.c.l.b16 %v4763_v10 }
 0x81c   : > { %v4729_v47 = vmul.f32 %v13342_v19, %v4665_v7  ;;  %v4488_v52 = vpop.xlane.xlu2 %4487  ;;  %v10201_v12 = vpop.eup %10200  ;;  %v4650_v56 = vmul.f32 0.25, %v10199_v17  ;;  %v4997_v16 = vpack.c.b16 %v4985_v55, %v4984_v51 }
 0x81d   : > { %v4649_v43 = vmul.f32 0.25, %v10201_v12  ;;  %v4731_v2 = vmul.f32 %v13328_v63, %v4667_v35 }
 0x81e   : > { %v4793_v41 = vpack.c.bf16 %v4729_v47, %v4729_v47  ;;  %v4714_v4 = vmul.f32 %v13344_v28, %v4650_v56 }
 0x81f   : > { %v4713_v40 = vmul.f32 %v13349_v25, %v4649_v43  ;;  %v4795_v7 = vpack.c.bf16 %v4731_v2, %v4731_v2 }
 0x820   : > { %v5131_v30 = vunpack.c.l.b16 %v4793_v41  ;;  %v4778_v61 = vpack.c.bf16 %v4714_v4, %v4714_v4 }
 0x821   : > { %v10203_v45 = vpop.eup %10202  ;;  %v4777_v50 = vpack.c.bf16 %v4713_v40, %v4713_v40  ;;  %v5133_v41 = vunpack.c.l.b16 %v4795_v7 }
 0x822   : > { %v4636_v60 = vmul.f32 0.25, %v10203_v45  ;;  %v4520_v44 = vpop.xlane.xlu1 %4519  ;;  %v5143_v57 = vpack.c.b16 %v5132_v48, %v5131_v30  ;;  %v4987_v12 = vunpack.c.l.b16 %v4778_v61 }
 0x823   : > { %10204 = vrcp.f32 %v4520_v44  ;;  %v4460_v19 = vpop.xlane.xlu0 %4459  ;;  %v4986_v58 = vunpack.c.l.b16 %v4777_v50 }
 0x824   : > { %v4700_v3 = vmul.f32 %v13358_v39, %v4636_v60  ;;  %10206 = vrcp.f32 %v4460_v19  ;;  %v4458_v14 = vpop.xlane.xlu2 %4457  ;;  %5231 = vmatmul.bf16.gmra.mxu0 %v5143_v57 }
 0x825   : > { %10208 = vrcp.f32 %v4458_v14 }
 0x826   : > { %v4764_v18 = vpack.c.bf16 %v4700_v3, %v4700_v3  ;;  %5081 = vmatmul.bf16.gmra.mxu1 %v4997_v16  ;;  %10210 = vrcp.f32 %v4488_v52 }
 0x828   : > { %v4844_v1 = vunpack.c.l.b16 %v4764_v18 }
 0x829   : > { %v10205_v24 = vpop.eup %10204 }
 0x82a   : > { %v10207_v37 = vpop.eup %10206  ;;  %v4668_v38 = vmul.f32 0.25, %v10205_v24  ;;  %v4486_v39 = vpop.xlane.xlu1 %4485  ;;  %v4854_v31 = vpack.c.b16 %v4844_v1, %v4843_v32 }
 0x82b   : > { %v10209_v9 = vpop.eup %10208  ;;  %v4638_v33 = vmul.f32 0.25, %v10207_v37  ;;  %10212 = vrcp.f32 %v4486_v39  ;;  %v4524_v20 = vpop.xlane.xlu0 %4523 }
 0x82c   : > { %v4732_v63 = vmul.f32 %v13375_v15, %v4668_v38  ;;  %v4637_v28 = vmul.f32 0.25, %v10209_v9  ;;  %10214 = vrcp.f32 %v4524_v20  ;;  %v4522_v25 = vpop.xlane.xlu2 %4521  ;;  %4946 = vmatmul.bf16.gmra.mxu3 %v4854_v31  ;;  %v10211_v6 = vpop.eup %10210 }
 0x82d   : > { %10216 = vrcp.f32 %v4522_v25  ;;  %v4702_v52 = vmul.f32 %v13377_v46, %v4638_v33  ;;  %v4998_v46 = vpack.c.b16 %v4987_v12, %v4986_v58 }
 0x82e   : > { %v4796_v47 = vpack.c.bf16 %v4732_v63, %v4732_v63  ;;  %v4701_v53 = vmul.f32 %v13382_v11, %v4637_v28  ;;  %v4652_v11 = vmul.f32 0.25, %v10211_v6 }
 0x82f   : > { %v4766_v55 = vpack.c.bf16 %v4702_v52, %v4702_v52 }
 0x830   : > { %v5134_v17 = vunpack.c.l.b16 %v4796_v47  ;;  %v4765_v45 = vpack.c.bf16 %v4701_v53, %v4701_v53  ;;  %v4716_v18 = vmul.f32 %v13364_v29, %v4652_v11 }
 0x831   : > { %v10213_v30 = vpop.eup %10212  ;;  %v4846_v3 = vunpack.c.l.b16 %v4766_v55  ;;  %v5212_v55 = vpop.f32.mrf.mxu0 }
 0x832   : > { %v10215_v48 = vpop.eup %10214  ;;  %v4554_v15 = vpop.xlane.xlu1 %4553  ;;  %v5144_v60 = vpack.c.b16 %v5134_v17, %v5133_v41  ;;  %v4651_v51 = vmul.f32 0.25, %v10213_v30  ;;  %v4845_v43 = vunpack.c.l.b16 %v4765_v45 }
 0x833   : > { %v10217_v44 = vpop.eup %10216  ;;  %v4670_v57 = vmul.f32 0.25, %v10215_v48  ;;  %10218 = vrcp.f32 %v4554_v15  ;;  %v9691_v15 = vld [vmem:[%s15596_s19 + $0x18] sm:$0xff] }
 0x834   : > { %v4669_v10 = vmul.f32 0.25, %v10217_v44  ;;  %v4556_v35 = vpop.xlane.xlu2 %4555  ;;  %5236 = vmatmul.bf16.gmra.mxu0 %v5144_v60  ;;  %v4715_v14 = vmul.f32 %v13390_v5, %v4651_v51  ;;  %v4855_v1 = vpack.c.b16 %v4846_v3, %v4845_v43  ;;  %5728 = vmatpush.bf16.msra.mxu1 %v9691_v15  ;;  %v5357_v44 = vpop.f32.mrf.mxu2  ;;  %v9688_v51 = vld [vmem:[%s15596_s19] sm:$0xff] }
 0x835   : > { %10220 = vrcp.f32 %v4556_v35  ;;  %v4734_v56 = vmul.f32 %v13392_v22, %v4670_v57  ;;  %v9695_v57 = vld [vmem:[%s15596_s19 + $0x38] sm:$0xff] }
 0x836   : > { %v4733_v19 = vmul.f32 %v13397_v59, %v4669_v10  ;;  %5086 = vmatmul.bf16.gmra.mxu1 %v4998_v46  ;;  %v4779_v37 = vpack.c.bf16 %v4715_v14, %v4715_v14  ;;  %v4780_v59 = vpack.c.bf16 %v4716_v18, %v4716_v18  ;;  %5850 = vmatpush.bf16.msrb.mxu2 %v9695_v57  ;;  %v9694_v14 = vld [vmem:[%s15596_s19 + $0x30] sm:$0xff] }
 0x837   : > { %v4798_v2 = vpack.c.bf16 %v4734_v56, %v4734_v56 }
 0x838   : > { %v4797_v4 = vpack.c.bf16 %v4733_v19, %v4733_v19  ;;  %v4988_v7 = vunpack.c.l.b16 %v4779_v37  ;;  %v4989_v20 = vunpack.c.l.b16 %v4780_v59 }
 0x839   : > { %v10219_v16 = vpop.eup %10218  ;;  %v5136_v29 = vunpack.c.l.b16 %v4798_v2  ;;  %v5214_v19 = vpop.f32.mrf.mxu0 }
 0x83a   : > { %v4685_v40 = vmul.f32 0.25, %v10219_v16  ;;  %v4492_v32 = vpop.xlane.xlu1 %4491  ;;  %v5135_v31 = vunpack.c.l.b16 %v4797_v4  ;;  %5851 = vmatpush.bf16.msrb.mxu2 %v9694_v14 }
 0x83b   : > { %v10221_v24 = vpop.eup %10220  ;;  %10222 = vrcp.f32 %v4492_v32 }
 0x83c   : > { %v4749_v22 = vmul.f32 %v13403_v42, %v4685_v40  ;;  %v4686_v38 = vmul.f32 0.25, %v10221_v24  ;;  %4951 = vmatmul.bf16.gmra.mxu3 %v4855_v1  ;;  %10224 = vrcp.f32 %v13485_v34  ;;  %v5145_v33 = vpack.c.b16 %v5136_v29, %v5135_v31 }
 0x83d   : > { %v4999_v42 = vpack.c.b16 %v4989_v20, %v4988_v7 }
 0x83e   : > { %v4813_v39 = vpack.c.bf16 %v4749_v22, %v4749_v22  ;;  %v4750_v5 = vmul.f32 %v13405_v49, %v4686_v38  ;;  %v5359_v38 = vpop.f32.mrf.mxu2 }
 0x840   : > { %v4814_v9 = vpack.c.bf16 %v4750_v5, %v4750_v5  ;;  %v5280_v50 = vunpack.c.l.b16 %v4813_v39  ;;  %v5400_v5 = vsel %vm1553_vm4, %v5212_v55, 0.0  ;;  %v5407_v55 = vsel %vm1553_vm4, %v5214_v19, 0.0 }
 0x841   : > { %v10223_v61 = vpop.eup %10222 }
 0x842   : > { %v5281_v63 = vunpack.c.l.b16 %v4814_v9  ;;  %v10225_v28 = vpop.eup %10224  ;;  %v4654_v25 = vmul.f32 0.25, %v10223_v61  ;;  %v4462_v12 = vpop.xlane.xlu1 %4461  ;;  %v5402_v61 = vsel %vm1553_vm4, %v5357_v44, 0.0 }
 0x843   : > { %v4653_v52 = vmul.f32 0.25, %v10225_v28  ;;  %10226 = vrcp.f32 %v4462_v12 }
 0x844   : > { %5241 = vmatmul.bf16.gmra.mxu0 %v5145_v33  ;;  %v5290_v47 = vpack.c.b16 %v5281_v63, %v5280_v50  ;;  %v4718_v34 = vmul.f32 %v13413_v13, %v4654_v25  ;;  %v9690_v13 = vld [vmem:[%s15596_s19 + $0x10] sm:$0xff]  ;;  %v5217_v50 = vpop.f32.mrf.mxu0  ;;  %v13532_v25 = vld [vmem:[#allocation13] ss:$0 sm:$0xff] }
 0x845   : > { %v4717_v49 = vmul.f32 %v13360_v54, %v4653_v52  ;;  %v9689_v54 = vld [vmem:[%s15596_s19 + $0x8] sm:$0xff]  ;;  %5729 = vmatpush.bf16.msra.mxu1 %v9690_v13  ;;  %v5409_v13 = vsel %vm1553_vm4, %v5359_v38, 0.0 }
 0x846   : > { %5091 = vmatmul.bf16.gmra.mxu1 %v4999_v42  ;;  %5386 = vmatmul.bf16.gmra.mxu2 %v5290_v47  ;;  %v4782_v53 = vpack.c.bf16 %v4718_v34, %v4718_v34 }
 0x847   : > { %v4781_v6 = vpack.c.bf16 %v4717_v49, %v4717_v49  ;;  %5667 = vmatpush.bf16.msrb.mxu3 %v9689_v54 }
 0x848   : > { %v4991_v41 = vunpack.c.l.b16 %v4782_v53 }
 0x849   : > { %v4990_v17 = vunpack.c.l.b16 %v4781_v6  ;;  %v10227_v60 = vpop.eup %10226 }
 0x84a   : > { %v4639_v43 = vmul.f32 0.25, %v10227_v60 }
 0x84b   : > { %v5000_v58 = vpack.c.b16 %v4991_v41, %v4990_v17  ;;  %5668 = vmatpush.bf16.msrb.mxu3 %v9688_v51 }
 0x84c   : > { %v4703_v2 = vmul.f32 %v13420_v27, %v4639_v43 }
 0x84e   : > { %v4767_v29 = vpack.c.bf16 %v4703_v2, %v4703_v2 }
 0x850   : > { %v4847_v49 = vunpack.c.l.b16 %v4767_v29 }
 0x856   : > { %5096 = vmatmul.bf16.gmra.mxu1 %v5000_v58 }
 0x858   : > { %v4922_v30 = vpop.f32.mrf.mxu3 }
 0x859   : > { %v5397_v4 = vsel %vm1553_vm4, %v4922_v30, 0.0 }
 0x85a   : > { %v4558_v48 = vpop.xlane.xlu0 %4557 }
 0x85b   : > { %v4494_v45 = vpop.xlane.xlu2 %4493 }
 0x85c   : > { %10228 = vrcp.f32 %v4494_v45  ;;  %v5362_v45 = vpop.f32.mrf.mxu2 }
 0x85d   : > { %10230 = vrcp.f32 %v4558_v48  ;;  %v5416_v29 = vsel %vm1553_vm4, %v5362_v45, 0.0 }
 0x860   : > { %v4924_v35 = vpop.f32.mrf.mxu3 }
 0x862   : > { %v10229_v10 = vpop.eup %10228  ;;  %v4496_v46 = vpop.xlane.xlu0 %4495 }
 0x863   : > { %10232 = vrcp.f32 %v4496_v46  ;;  %v4464_v11 = vpop.xlane.xlu2 %4463  ;;  %v4655_v56 = vmul.f32 0.25, %v10229_v10  ;;  %v10231_v3 = vpop.eup %10230 }
 0x864   : > { %10234 = vrcp.f32 %v4464_v11  ;;  %v4687_v24 = vmul.f32 0.25, %v10231_v3  ;;  %v5219_v46 = vpop.f32.mrf.mxu0  ;;  %v5364_v3 = vpop.f32.mrf.mxu2 }
 0x865   : > { %v4719_v16 = vmul.f32 %v13440_v23, %v4655_v56 }
 0x866   : > { %v4751_v33 = vmul.f32 %v13438_v62, %v4687_v24  ;;  %v5404_v62 = vsel %vm1553_vm4, %v4924_v35, 0.0 }
 0x867   : > { %v4783_v23 = vpack.c.bf16 %v4719_v16, %v4719_v16 }
 0x868   : > { %v4927_v27 = vpop.f32.mrf.mxu3  ;;  %v4815_v6 = vpack.c.bf16 %v4751_v33, %v4751_v33 }
 0x869   : > { %v10233_v18 = vpop.eup %10232  ;;  %v5067_v40 = vpop.f32.mrf.mxu1  ;;  %v4992_v47 = vunpack.c.l.b16 %v4783_v23 }
 0x86a   : > { %v4560_v32 = vpop.xlane.xlu1 %4559  ;;  %v10235_v1 = vpop.eup %10234  ;;  %v4656_v37 = vmul.f32 0.25, %v10233_v18  ;;  %v5398_v22 = vsel %vm1553_vm4, %v5067_v40, 0.0  ;;  %v5282_v10 = vunpack.c.l.b16 %v4815_v6  ;;  %v9692_v18 = vld [vmem:[%s15596_s19 + $0x20] sm:$0xff] }
 0x86b   : > { %10236 = vrcp.f32 %v4560_v32  ;;  %v4640_v59 = vmul.f32 0.25, %v10235_v1  ;;  %v5399_v39 = vadd.f32 %v5398_v22, %v5397_v4  ;;  %v5411_v22 = vsel %vm1553_vm4, %v4927_v27, 0.0 }
 0x86c   : > { %v4720_v31 = vmul.f32 %v13448_v8, %v4656_v37  ;;  %v5222_v1 = vpop.f32.mrf.mxu0 }
 0x86d   : > { %v4704_v9 = vmul.f32 %v13450_v36, %v4640_v59  ;;  %v5401_v7 = vadd.f32 %v5400_v5, %v5399_v39  ;;  %v9693_v36 = vld [vmem:[%s15596_s19 + $0x28] sm:$0xff]  ;;  %v5414_v39 = vsel %vm1553_vm4, %v5217_v50, 0.0 }
 0x86e   : > { %v4784_v20 = vpack.c.bf16 %v4720_v31, %v4720_v31  ;;  %5789 = vmatpush.bf16.msra.mxu0 %v9693_v36 }
 0x86f   : > { %v4768_v63 = vpack.c.bf16 %v4704_v9, %v4704_v9  ;;  %v5403_v28 = vadd.f32 %v5402_v61, %v5401_v7  ;;  %v5367_v9 = vpop.f32.mrf.mxu2 }
 0x870   : > { %v4993_v52 = vunpack.c.l.b16 %v4784_v20  ;;  %v4929_v60 = vpop.f32.mrf.mxu3 }
 0x871   : > { %v10237_v42 = vpop.eup %10236  ;;  %v5069_v8 = vpop.f32.mrf.mxu1  ;;  %v4848_v53 = vunpack.c.l.b16 %v4768_v63  ;;  %v5512_v58 = vadd.f32 %v13532_v25, %v5403_v28  ;;  %v5418_v28 = vsel %vm1553_vm4, %v4929_v60, 0.0 }
 0x872   : > { %v4688_v34 = vmul.f32 0.25, %v10237_v42  ;;  %v5405_v41 = vsel %vm1553_vm4, %v5069_v8, 0.0  ;;  %v5001_v17 = vpack.c.b16 %v4993_v52, %v4992_v47  ;;  %v4526_v51 = vpop.xlane.xlu1 %4525  ;;  %5790 = vmatpush.bf16.msra.mxu0 %v9692_v18 }
 0x873   : > { %v5406_v30 = vadd.f32 %v5405_v41, %v5404_v62  ;;  %v4856_v48 = vpack.c.b16 %v4848_v53, %v4847_v49  ;;  %v5528_v44 = vmax.f32 %v5512_v58, 0.0  ;;  %10238 = vrcp.f32 %v4526_v51 }
 0x874   : > { %v4752_v12 = vmul.f32 %v13455_v0, %v4688_v34  ;;  %5101 = vmatmul.bf16.gmra.mxu1 %v5001_v17  ;;  %v5421_v34 = vsel %vm1553_vm4, %v5219_v46, 0.0 }
 0x875   : > { %v5408_v54 = vadd.f32 %v5407_v55, %v5406_v30  ;;  %4956 = vmatmul.bf16.gmra.mxu3 %v4856_v48  ;;  %v5569_v56 = vpack.c.bf16 %v5528_v44, %v5528_v44 }
 0x876   : > { %v4816_v15 = vpack.c.bf16 %v4752_v12, %v4752_v12 }
 0x877   : > { %v5410_v57 = vadd.f32 %v5409_v13, %v5408_v54  ;;  %v5601_v14 = vunpack.c.l.b16 %v5569_v56  ;;  %v5369_v41 = vpop.f32.mrf.mxu2  ;;  %v5428_v54 = vsel %vm1553_vm4, %v5222_v1, 0.0 }
 0x878   : > { %v5283_v35 = vunpack.c.l.b16 %v4816_v15  ;;  %v4932_v4 = vpop.f32.mrf.mxu3 }
 0x879   : > { %v5513_v0 = vadd.f32 %v13532_v25, %v5410_v57  ;;  %v10239_v2 = vpop.eup %10238  ;;  %v5425_v12 = vsel %vm1553_vm4, %v4932_v4, 0.0  ;;  %v5430_v57 = vsel %vm1553_vm4, %v5367_v9, 0.0 }
 0x87a   : > { %v5291_v11 = vpack.c.b16 %v5283_v35, %v5282_v10  ;;  %v4671_v24 = vmul.f32 0.25, %v10239_v2  ;;  %v5437_v2 = vsel %vm1553_vm4, %v5369_v41, 0.0 }
 0x87b   : > { %v5529_v19 = vmax.f32 %v5513_v0, 0.0 }
 0x87c   : > { %5391 = vmatmul.bf16.gmra.mxu2 %v5291_v11  ;;  %v4735_v5 = vmul.f32 %v13467_v26, %v4671_v24  ;;  %v5224_v26 = vpop.f32.mrf.mxu0 }
 0x87d   : > { %v5570_v43 = vpack.c.bf16 %v5529_v19, %v5529_v19 }
 0x87e   : > { %v4799_v33 = vpack.c.bf16 %v4735_v5, %v4735_v5 }
 0x87f   : > { %v5602_v16 = vunpack.c.l.b16 %v5570_v43  ;;  %v5372_v19 = vpop.f32.mrf.mxu2 }
 0x880   : > { %v4934_v61 = vpop.f32.mrf.mxu3  ;;  %v5137_v49 = vunpack.c.l.b16 %v4799_v33 }
 0x881   : > { %v13547_v40 = vpack.c.b16 %v5602_v16, %v5601_v14  ;;  %v4528_v32 = vpop.xlane.xlu2 %4527  ;;  %v5432_v11 = vsel %vm1553_vm4, %v4934_v61, 0.0  ;;  %v5435_v14 = vsel %vm1553_vm4, %v5224_v26, 0.0 }
 0x882   : > { %10240 = vrcp.f32 %v4528_v32 }
 0x883   : > { %v5072_v37 = vpop.f32.mrf.mxu1 }
 0x884   : > { %v5412_v38 = vsel %vm1553_vm4, %v5072_v37, 0.0  ;;  %9489 = vmatmul.msk.bf16.vlgmr.msra.gmra.mxu1 %vm1553_vm4, %v13547_v40  ;;  %v5227_v13 = vpop.f32.mrf.mxu0 }
 0x885   : > { %v5413_v59 = vadd.f32 %v5412_v38, %v5411_v22  ;;  %9473 = vmatmul.msk.bf16.vlgmr.msrb.gmra.mxu3 %vm1553_vm4, %v13547_v40 }
 0x887   : > { %v5415_v23 = vadd.f32 %v5414_v39, %v5413_v59 }
 0x888   : > { %v10241_v31 = vpop.eup %10240  ;;  %v4937_v30 = vpop.f32.mrf.mxu3 }
 0x889   : > { %v4672_v7 = vmul.f32 0.25, %v10241_v31  ;;  %v5417_v27 = vadd.f32 %v5416_v29, %v5415_v23  ;;  %v5439_v22 = vsel %vm1553_vm4, %v4937_v30, 0.0  ;;  %v5442_v23 = vsel %vm1553_vm4, %v5227_v13, 0.0  ;;  %v5374_v31 = vpop.f32.mrf.mxu2 }
 0x88b   : > { %v4736_v20 = vmul.f32 %v13476_v21, %v4672_v7  ;;  %v5074_v63 = vpop.f32.mrf.mxu1  ;;  %v5514_v47 = vadd.f32 %v13532_v25, %v5417_v27  ;;  %v5423_v21 = vsel %vm1553_vm4, %v5364_v3, 0.0  ;;  %v5444_v7 = vsel %vm1553_vm4, %v5372_v19, 0.0 }
 0x88c   : > { %9521 = vmatmul.msk.bf16.vlgmr.msrb.gmra.mxu2 %vm1553_vm4, %v13547_v40  ;;  %v5419_v50 = vsel %vm1553_vm4, %v5074_v63, 0.0  ;;  %v5229_v4 = vpop.f32.mrf.mxu0 }
 0x88d   : > { %v4800_v42 = vpack.c.bf16 %v4736_v20, %v4736_v20  ;;  %v5420_v52 = vadd.f32 %v5419_v50, %v5418_v28  ;;  %v5530_v36 = vmax.f32 %v5514_v47, 0.0 }
 0x88f   : > { %v5422_v8 = vadd.f32 %v5421_v34, %v5420_v52  ;;  %v5138_v53 = vunpack.c.l.b16 %v4800_v42  ;;  %v5571_v55 = vpack.c.bf16 %v5530_v36, %v5530_v36  ;;  %v5449_v52 = vsel %vm1553_vm4, %v5229_v4, 0.0 }
 0x890   : > { %v4939_v16 = vpop.f32.mrf.mxu3 }
 0x891   : > { %v5424_v6 = vadd.f32 %v5423_v21, %v5422_v8  ;;  %v5146_v62 = vpack.c.b16 %v5138_v53, %v5137_v49  ;;  %v5603_v51 = vunpack.c.l.b16 %v5571_v55  ;;  %v5446_v50 = vsel %vm1553_vm4, %v4939_v16, 0.0  ;;  %v5377_v34 = vpop.f32.mrf.mxu2 }
 0x892   : > { %v5451_v49 = vsel %vm1553_vm4, %v5374_v31, 0.0 }
 0x893   : > { %v5515_v17 = vadd.f32 %v13532_v25, %v5424_v6  ;;  %v5077_v58 = vpop.f32.mrf.mxu1  ;;  %5246 = vmatmul.bf16.gmra.mxu0 %v5146_v62 }
 0x894   : > { %v5426_v48 = vsel %vm1553_vm4, %v5077_v58, 0.0 }
 0x895   : > { %v5531_v45 = vmax.f32 %v5515_v17, 0.0  ;;  %v5427_v15 = vadd.f32 %v5426_v48, %v5425_v12 }
 0x897   : > { %v5572_v60 = vpack.c.bf16 %v5531_v45, %v5531_v45  ;;  %v5429_v44 = vadd.f32 %v5428_v54, %v5427_v15  ;;  %v5458_v54 = vsel %vm1553_vm4, %v5377_v34, 0.0 }
 0x898   : > { %v4942_v27 = vpop.f32.mrf.mxu3 }
 0x899   : > { %v5431_v10 = vadd.f32 %v5430_v57, %v5429_v44  ;;  %v5604_v35 = vunpack.c.l.b16 %v5572_v60  ;;  %v5453_v17 = vsel %vm1553_vm4, %v4942_v27, 0.0  ;;  %v5379_v13 = vpop.f32.mrf.mxu2 }
 0x89b   : > { %v5079_v46 = vpop.f32.mrf.mxu1  ;;  %v5618_v0 = vpack.c.b16 %v5604_v35, %v5603_v51  ;;  %v5516_v43 = vadd.f32 %v13532_v25, %v5431_v10 }
 0x89c   : > { %v5433_v56 = vsel %vm1553_vm4, %v5079_v46, 0.0 }
 0x89d   : > { %v5434_v3 = vadd.f32 %v5433_v56, %v5432_v11  ;;  %9474 = vmatmul.msk.bf16.gmra.mxu3 %vm1553_vm4, %v5618_v0  ;;  %9490 = vmatmul.msk.bf16.gmra.mxu1 %vm1553_vm4, %v5618_v0  ;;  %v5532_v32 = vmax.f32 %v5516_v43, 0.0 }
 0x89e   : > { %9522 = vmatmul.msk.bf16.gmra.mxu2 %vm1553_vm4, %v5618_v0 }
 0x89f   : > { %v5436_v18 = vadd.f32 %v5435_v14, %v5434_v3  ;;  %v5573_v59 = vpack.c.bf16 %v5532_v32, %v5532_v32  ;;  %v5465_v14 = vsel %vm1553_vm4, %v5379_v13, 0.0 }
 0x8a0   : > { %v4944_v36 = vpop.f32.mrf.mxu3 }
 0x8a1   : > { %v5438_v1 = vadd.f32 %v5437_v2, %v5436_v18  ;;  %v5605_v61 = vunpack.c.l.b16 %v5573_v59  ;;  %v5232_v33 = vpop.f32.mrf.mxu0  ;;  %v5460_v46 = vsel %vm1553_vm4, %v4944_v36, 0.0  ;;  %v5382_v16 = vpop.f32.mrf.mxu2 }
 0x8a2   : > { %v5456_v55 = vsel %vm1553_vm4, %v5232_v33, 0.0 }
 0x8a3   : > { %v5517_v24 = vadd.f32 %v13532_v25, %v5438_v1  ;;  %v5082_v37 = vpop.f32.mrf.mxu1  ;;  %9505 = vmatmul.msk.bf16.vlgmr.msra.gmra.mxu0 %vm1553_vm4, %v13547_v40 }
 0x8a4   : > { %v5440_v38 = vsel %vm1553_vm4, %v5082_v37, 0.0 }
 0x8a5   : > { %v5533_v39 = vmax.f32 %v5517_v24, 0.0  ;;  %v5441_v5 = vadd.f32 %v5440_v38, %v5439_v22 }
 0x8a7   : > { %v5574_v29 = vpack.c.bf16 %v5533_v39, %v5533_v39  ;;  %v5443_v9 = vadd.f32 %v5442_v23, %v5441_v5 }
 0x8a9   : > { %v5445_v20 = vadd.f32 %v5444_v7, %v5443_v9  ;;  %v5606_v63 = vunpack.c.l.b16 %v5574_v29  ;;  %v5234_v6 = vpop.f32.mrf.mxu0  ;;  %v5472_v29 = vsel %vm1553_vm4, %v5382_v16, 0.0 }
 0x8aa   : > { %v5463_v43 = vsel %vm1553_vm4, %v5234_v6, 0.0 }
 0x8ab   : > { %v5084_v40 = vpop.f32.mrf.mxu1  ;;  %v5619_v28 = vpack.c.b16 %v5606_v63, %v5605_v61  ;;  %v5518_v42 = vadd.f32 %v13532_v25, %v5445_v20  ;;  %v5384_v61 = vpop.f32.mrf.mxu2 }
 0x8ac   : > { %v5447_v26 = vsel %vm1553_vm4, %v5084_v40, 0.0 }
 0x8ad   : > { %v5448_v47 = vadd.f32 %v5447_v26, %v5446_v50  ;;  %9475 = vmatmul.msk.bf16.gmra.mxu3 %vm1553_vm4, %v5619_v28  ;;  %9491 = vmatmul.msk.bf16.gmra.mxu1 %vm1553_vm4, %v5619_v28  ;;  %v5534_v53 = vmax.f32 %v5518_v42, 0.0 }
 0x8ae   : > { %9523 = vmatmul.msk.bf16.gmra.mxu2 %vm1553_vm4, %v5619_v28 }
 0x8af   : > { %v5450_v8 = vadd.f32 %v5449_v52, %v5448_v47  ;;  %v5575_v12 = vpack.c.bf16 %v5534_v53, %v5534_v53  ;;  %v4947_v51 = vpop.f32.mrf.mxu3  ;;  %v5479_v52 = vsel %vm1553_vm4, %v5384_v61, 0.0 }
 0x8b0   : > { %v5467_v1 = vsel %vm1553_vm4, %v4947_v51, 0.0 }
 0x8b1   : > { %v5452_v21 = vadd.f32 %v5451_v49, %v5450_v8  ;;  %v5607_v60 = vunpack.c.l.b16 %v5575_v12  ;;  %v5237_v11 = vpop.f32.mrf.mxu0 }
 0x8b2   : > { %v5470_v39 = vsel %vm1553_vm4, %v5237_v11, 0.0 }
 0x8b3   : > { %v5519_v62 = vadd.f32 %v13532_v25, %v5452_v21  ;;  %v5087_v41 = vpop.f32.mrf.mxu1  ;;  %9506 = vmatmul.msk.bf16.gmra.mxu0 %vm1553_vm4, %v5618_v0 }
 0x8b4   : > { %v5454_v58 = vsel %vm1553_vm4, %v5087_v41, 0.0 }
 0x8b5   : > { %v5535_v30 = vmax.f32 %v5519_v62, 0.0  ;;  %v5455_v48 = vadd.f32 %v5454_v58, %v5453_v17 }
 0x8b7   : > { %v5576_v45 = vpack.c.bf16 %v5535_v30, %v5535_v30  ;;  %v5457_v15 = vadd.f32 %v5456_v55, %v5455_v48  ;;  %v4949_v22 = vpop.f32.mrf.mxu3 }
 0x8b8   : > { %v5474_v63 = vsel %vm1553_vm4, %v4949_v22, 0.0 }
 0x8b9   : > { %v5459_v44 = vadd.f32 %v5458_v54, %v5457_v15  ;;  %v5608_v57 = vunpack.c.l.b16 %v5576_v45  ;;  %v5239_v5 = vpop.f32.mrf.mxu0 }
 0x8ba   : > { %v5477_v26 = vsel %vm1553_vm4, %v5239_v5, 0.0 }
 0x8bb   : > { %v5089_v10 = vpop.f32.mrf.mxu1  ;;  %v5620_v35 = vpack.c.b16 %v5608_v57, %v5607_v60  ;;  %v5520_v56 = vadd.f32 %v13532_v25, %v5459_v44 }
 0x8bc   : > { %v5461_v0 = vsel %vm1553_vm4, %v5089_v10, 0.0 }
 0x8bd   : > { %v5462_v19 = vadd.f32 %v5461_v0, %v5460_v46  ;;  %9476 = vmatmul.msk.bf16.gmra.mxu3 %vm1553_vm4, %v5620_v35  ;;  %9492 = vmatmul.msk.bf16.gmra.mxu1 %vm1553_vm4, %v5620_v35  ;;  %v5536_v18 = vmax.f32 %v5520_v56, 0.0 }
 0x8be   : > { %9524 = vmatmul.msk.bf16.gmra.mxu2 %vm1553_vm4, %v5620_v35 }
 0x8bf   : > { %v5464_v3 = vadd.f32 %v5463_v43, %v5462_v19  ;;  %v5577_v37 = vpack.c.bf16 %v5536_v18, %v5536_v18  ;;  %v4952_v42 = vpop.f32.mrf.mxu3 }
 0x8c0   : > { %v5481_v6 = vsel %vm1553_vm4, %v4952_v42, 0.0 }
 0x8c1   : > { %v5466_v2 = vadd.f32 %v5465_v14, %v5464_v3  ;;  %v5609_v27 = vunpack.c.l.b16 %v5577_v37  ;;  %v5242_v34 = vpop.f32.mrf.mxu0 }
 0x8c2   : > { %v5484_v12 = vsel %vm1553_vm4, %v5242_v34, 0.0 }
 0x8c3   : > { %v5521_v4 = vadd.f32 %v13532_v25, %v5466_v2  ;;  %v5092_v32 = vpop.f32.mrf.mxu1  ;;  %9507 = vmatmul.msk.bf16.gmra.mxu0 %vm1553_vm4, %v5619_v28 }
 0x8c4   : > { %v5468_v24 = vsel %vm1553_vm4, %v5092_v32, 0.0 }
 0x8c5   : > { %v5537_v38 = vmax.f32 %v5521_v4, 0.0  ;;  %v5469_v59 = vadd.f32 %v5468_v24, %v5467_v1 }
 0x8c7   : > { %v5578_v23 = vpack.c.bf16 %v5537_v38, %v5537_v38  ;;  %v5471_v31 = vadd.f32 %v5470_v39, %v5469_v59  ;;  %v4954_v45 = vpop.f32.mrf.mxu3  ;;  %v13642_v59 = vld [vmem:[#allocation16 + $0x1] ss:$0 sm:$0xff] }
 0x8c8   : > { %v5488_v51 = vsel %vm1553_vm4, %v4954_v45, 0.0 }
 0x8c9   : > { %v5610_v9 = vunpack.c.l.b16 %v5578_v23  ;;  %v5473_v7 = vadd.f32 %v5472_v29, %v5471_v31  ;;  %v5387_v53 = vpop.f32.mrf.mxu2  ;;  %v5244_v60 = vpop.f32.mrf.mxu0  ;;  %v13650_v29 = vld [vmem:[#allocation16] ss:$0 sm:$0xff] }
 0x8ca   : > { %v5486_v55 = vsel %vm1553_vm4, %v5387_v53, 0.0  ;;  %v5491_v11 = vsel %vm1553_vm4, %v5244_v60, 0.0  ;;  %16076 = vst [vmem:[#allocation76_spill] sm:$0xff] %v13650_v29 }
 0x8cb   : > { %v5094_v33 = vpop.f32.mrf.mxu1  ;;  %v5621_v20 = vpack.c.b16 %v5610_v9, %v5609_v27  ;;  %v5522_v28 = vadd.f32 %v13532_v25, %v5473_v7 }
 0x8cc   : > { %v5475_v40 = vsel %vm1553_vm4, %v5094_v33, 0.0  ;;  %v13657_v33 = vld [vmem:[#allocation16 + $0x3] ss:$0 sm:$0xff] }
 0x8cd   : > { %v5476_v50 = vadd.f32 %v5475_v40, %v5474_v63  ;;  %9477 = vmatmul.msk.bf16.gmra.mxu3 %vm1553_vm4, %v5621_v20  ;;  %9493 = vmatmul.msk.bf16.gmra.mxu1 %vm1553_vm4, %v5621_v20  ;;  %v5538_v8 = vmax.f32 %v5522_v28, 0.0  ;;  %16078 = vst [vmem:[#allocation60_spill] sm:$0xff] %v13657_v33 }
 0x8ce   : > { %9525 = vmatmul.msk.bf16.gmra.mxu2 %vm1553_vm4, %v5621_v20 }
 0x8cf   : > { %v5478_v47 = vadd.f32 %v5477_v26, %v5476_v50  ;;  %v5579_v41 = vpack.c.bf16 %v5538_v8, %v5538_v8 }
 0x8d1   : > { %v5480_v49 = vadd.f32 %v5479_v52, %v5478_v47  ;;  %v5611_v13 = vunpack.c.l.b16 %v5579_v41 }
 0x8d3   : > { %v5523_v21 = vadd.f32 %v13532_v25, %v5480_v49  ;;  %v5097_v36 = vpop.f32.mrf.mxu1  ;;  %9508 = vmatmul.msk.bf16.gmra.mxu0 %vm1553_vm4, %v5620_v35  ;;  %v5389_v35 = vpop.f32.mrf.mxu2 }
 0x8d4   : > { %v5482_v62 = vsel %vm1553_vm4, %v5097_v36, 0.0  ;;  %v5493_v19 = vsel %vm1553_vm4, %v5389_v35, 0.0 }
 0x8d5   : > { %v5539_v17 = vmax.f32 %v5523_v21, 0.0  ;;  %v5483_v58 = vadd.f32 %v5482_v62, %v5481_v6 }
 0x8d7   : > { %v5580_v30 = vpack.c.bf16 %v5539_v17, %v5539_v17  ;;  %v5485_v48 = vadd.f32 %v5484_v12, %v5483_v58 }
 0x8d9   : > { %v5612_v15 = vunpack.c.l.b16 %v5580_v30  ;;  %v5487_v54 = vadd.f32 %v5486_v55, %v5485_v48 }
 0x8db   : > { %v5099_v44 = vpop.f32.mrf.mxu1  ;;  %v5622_v57 = vpack.c.b16 %v5612_v15, %v5611_v13  ;;  %v5524_v46 = vadd.f32 %v13532_v25, %v5487_v54  ;;  %v13683_v13 = vld [vmem:[#allocation16 + $0x2] ss:$0 sm:$0xff] }
 0x8dc   : > { %v5489_v10 = vsel %vm1553_vm4, %v5099_v44, 0.0  ;;  %16082 = vst [vmem:[#allocation80_spill] sm:$0xff] %v13683_v13 }
 0x8dd   : > { %v5490_v0 = vadd.f32 %v5489_v10, %v5488_v51  ;;  %9478 = vmatmul.msk.bf16.gmra.mxu3 %vm1553_vm4, %v5622_v57  ;;  %9494 = vmatmul.msk.bf16.gmra.mxu1 %vm1553_vm4, %v5622_v57  ;;  %v5540_v43 = vmax.f32 %v5524_v46, 0.0 }
 0x8de   : > { %9526 = vmatmul.msk.bf16.gmra.mxu2 %vm1553_vm4, %v5622_v57 }
 0x8df   : > { %v5492_v56 = vadd.f32 %v5491_v11, %v5490_v0  ;;  %v5581_v16 = vpack.c.bf16 %v5540_v43, %v5540_v43 }
 0x8e1   : > { %v5494_v3 = vadd.f32 %v5493_v19, %v5492_v56  ;;  %v5613_v32 = vunpack.c.l.b16 %v5581_v16 }
 0x8e3   : > { %v5525_v14 = vadd.f32 %v13532_v25, %v5494_v3  ;;  %9509 = vmatmul.msk.bf16.gmra.mxu0 %vm1553_vm4, %v5621_v20 }
 0x8e5   : > { %v5541_v18 = vmax.f32 %v5525_v14, 0.0 }
 0x8e7   : > { %v5582_v2 = vpack.c.bf16 %v5541_v18, %v5541_v18 }
 0x8e9   : > { %v5614_v4 = vunpack.c.l.b16 %v5582_v2 }
 0x8eb   : > { %v5623_v1 = vpack.c.b16 %v5614_v4, %v5613_v32 }
 0x8ed   : > { %9479 = vmatmul.msk.bf16.gmra.mxu3 %vm1553_vm4, %v5623_v1  ;;  %9495 = vmatmul.msk.bf16.gmra.mxu1 %vm1553_vm4, %v5623_v1 }
 0x8ee   : > { %9527 = vmatmul.msk.bf16.gmra.mxu2 %vm1553_vm4, %v5623_v1 }
 0x8f1   : > { %v5102_v24 = vpop.f32.mrf.mxu1 }
 0x8f2   : > { %v5496_v40 = vsel %vm1553_vm4, %v5102_v24, 0.0 }
 0x8f3   : > { %9510 = vmatmul.msk.bf16.gmra.mxu0 %vm1553_vm4, %v5622_v57 }
 0x8f8   : > { %v4957_v37 = vpop.f32.mrf.mxu3 }
 0x8f9   : > { %v5104_v22 = vpop.f32.mrf.mxu1  ;;  %v5495_v20 = vsel %vm1553_vm4, %v4957_v37, 0.0 }
 0x8fa   : > { %v5497_v50 = vadd.f32 %v5496_v40, %v5495_v20  ;;  %v5503_v62 = vsel %vm1553_vm4, %v5104_v22, 0.0 }
 0x8ff   : > { %v5392_v38 = vpop.f32.mrf.mxu2 }
 0x900   : > { %v4959_v39 = vpop.f32.mrf.mxu3  ;;  %v5500_v8 = vsel %vm1553_vm4, %v5392_v38, 0.0 }
 0x901   : > { %v13644_v5 = vpop.f32.mrf.mxu1  ;;  %v5502_v36 = vsel %vm1553_vm4, %v4959_v39, 0.0 }
 0x902   : > { %16075 = vst [vmem:[#allocation77_spill] sm:$0xff] %v13644_v5  ;;  %v6027_v23 = vmul.f32 %v13642_v59, %v13644_v5  ;;  %v5504_v17 = vadd.f32 %v5503_v62, %v5502_v36 }
 0x903   : > { %9511 = vmatmul.msk.bf16.gmra.mxu0 %vm1553_vm4, %v5623_v1 }
 0x904   : > { %v6043_v31 = vsel %vm1553_vm4, %v6027_v23, 0.0 }
 0x905   : > { %6044 = vadd.xlane.f32.xlu1 %v6043_v31 }
 0x907   : > { %v5394_v9 = vpop.f32.mrf.mxu2 }
 0x908   : > { %v13652_v7 = vpop.f32.mrf.mxu3  ;;  %v5507_v55 = vsel %vm1553_vm4, %v5394_v9, 0.0 }
 0x909   : > { %16077 = vst [vmem:[#allocation41_spill] sm:$0xff] %v13652_v7  ;;  %v5960_v27 = vmul.f32 %v13650_v29, %v13652_v7  ;;  %v13690_v35 = vpop.f32.mrf.mxu1 }
 0x90a   : > { %16084 = vst [vmem:[#allocation78_spill] sm:$0xff] %v13690_v35  ;;  %v6028_v43 = vmul.f32 %v13642_v59, %v13690_v35 }
 0x90b   : > { %v5976_v61 = vsel %vm1553_vm4, %v5960_v27, 0.0 }
 0x90c   : > { %5977 = vadd.xlane.f32.xlu0 %v5976_v61  ;;  %v6046_v18 = vsel %vm1553_vm4, %v6028_v43, 0.0 }
 0x90f   : > { %v13660_v63 = vpop.f32.mrf.mxu2 }
 0x910   : > { %16079 = vst [vmem:[#allocation49_spill] sm:$0xff] %v13660_v63  ;;  %v6161_v28 = vmul.f32 %v13657_v33, %v13660_v63  ;;  %v5247_v26 = vpop.f32.mrf.mxu0  ;;  %v13665_v42 = vpop.f32.mrf.mxu3 }
 0x911   : > { %16080 = vst [vmem:[#allocation70_spill] sm:$0xff] %v13665_v42  ;;  %v5498_v47 = vsel %vm1553_vm4, %v5247_v26, 0.0  ;;  %v5961_v52 = vmul.f32 %v13650_v29, %v13665_v42 }
 0x912   : > { %v5499_v34 = vadd.f32 %v5498_v47, %v5497_v50  ;;  %v6177_v49 = vsel %vm1553_vm4, %v6161_v28, 0.0 }
 0x913   : > { %v5979_v53 = vsel %vm1553_vm4, %v5961_v52, 0.0 }
 0x914   : > { %v5501_v21 = vadd.f32 %v5500_v8, %v5499_v34  ;;  %6178 = vadd.xlane.f32.xlu0 %v6177_v49  ;;  %5980 = vadd.xlane.f32.xlu1 %v5979_v53 }
 0x916   : > { %v5526_v58 = vadd.f32 %v13532_v25, %v5501_v21 }
 0x917   : > { %v13674_v6 = vpop.f32.mrf.mxu2 }
 0x918   : > { %16081 = vst [vmem:[#allocation57_spill] sm:$0xff] %v13674_v6  ;;  %v6162_v41 = vmul.f32 %v13657_v33, %v13674_v6  ;;  %v5249_v12 = vpop.f32.mrf.mxu0  ;;  %v5542_v15 = vmax.f32 %v5526_v58, 0.0 }
 0x919   : > { %v5505_v30 = vsel %vm1553_vm4, %v5249_v12, 0.0 }
 0x91a   : > { %v5506_v48 = vadd.f32 %v5505_v30, %v5504_v17  ;;  %v6180_v45 = vsel %vm1553_vm4, %v6162_v41, 0.0  ;;  %v5583_v44 = vpack.c.bf16 %v5542_v15, %v5542_v15  ;;  %v13704_v16 = vpop.f32.mrf.mxu1 }
 0x91b   : > { %v6029_v4 = vmul.f32 %v13642_v59, %v13704_v16 }
 0x91c   : > { %v5508_v54 = vadd.f32 %v5507_v55, %v5506_v48  ;;  %6181 = vadd.xlane.f32.xlu1 %v6180_v45  ;;  %v5615_v11 = vunpack.c.l.b16 %v5583_v44 }
 0x91d   : > { %v6049_v38 = vsel %vm1553_vm4, %v6029_v4, 0.0 }
 0x91e   : > { %v5527_v60 = vadd.f32 %v13532_v25, %v5508_v54 }
 0x920   : > { %v5543_v57 = vmax.f32 %v5527_v60, 0.0  ;;  %v13686_v51 = vpop.f32.mrf.mxu0  ;;  %v13695_v25 = vpop.f32.mrf.mxu3 }
 0x921   : > { %16083 = vst [vmem:[#allocation79_spill] sm:$0xff] %v13686_v51  ;;  %v6094_v10 = vmul.f32 %v13683_v13, %v13686_v51  ;;  %v13711_v32 = vpop.f32.mrf.mxu2  ;;  %v5962_v24 = vmul.f32 %v13650_v29, %v13695_v25 }
 0x922   : > { %v5584_v46 = vpack.c.bf16 %v5543_v57, %v5543_v57  ;;  %16085 = vst [vmem:[#allocation71_spill] sm:$0xff] %v13695_v25  ;;  %v13723_v23 = vpop.f32.mrf.mxu1  ;;  %v6163_v20 = vmul.f32 %v13657_v33, %v13711_v32 }
 0x923   : > { %v6110_v0 = vsel %vm1553_vm4, %v6094_v10, 0.0  ;;  %16087 = vst [vmem:[#allocation84_spill] sm:$0xff] %v13711_v32  ;;  %v5982_v31 = vsel %vm1553_vm4, %v5962_v24, 0.0  ;;  %v6030_v9 = vmul.f32 %v13642_v59, %v13723_v23 }
 0x924   : > { %v5616_v56 = vunpack.c.l.b16 %v5584_v46  ;;  %6111 = vadd.xlane.f32.xlu2 %v6110_v0  ;;  %v6183_v47 = vsel %vm1553_vm4, %v6163_v20, 0.0 }
 0x925   : > { %v6052_v28 = vsel %vm1553_vm4, %v6030_v9, 0.0 }
 0x926   : > { %v5624_v19 = vpack.c.b16 %v5616_v56, %v5615_v11 }
 0x928   : > { %9480 = vmatmul.msk.bf16.gmra.mxu3 %vm1553_vm4, %v5624_v19  ;;  %9496 = vmatmul.msk.bf16.gmra.mxu1 %vm1553_vm4, %v5624_v19  ;;  %v13699_v3 = vpop.f32.mrf.mxu0  ;;  %v13719_v22 = vpop.f32.mrf.mxu3 }
 0x929   : > { %16086 = vst [vmem:[#allocation85_spill] sm:$0xff] %v13699_v3  ;;  %v6095_v14 = vmul.f32 %v13683_v13, %v13699_v3  ;;  %9512 = vmatmul.msk.bf16.gmra.mxu0 %vm1553_vm4, %v5624_v19  ;;  %9528 = vmatmul.msk.bf16.gmra.mxu2 %vm1553_vm4, %v5624_v19  ;;  %v5963_v27 = vmul.f32 %v13650_v29, %v13719_v22  ;;  %v13734_v40 = vpop.f32.mrf.mxu2 }
 0x92a   : > { %16089 = vst [vmem:[#allocation47_spill] sm:$0xff] %v13719_v22  ;;  %v6164_v52 = vmul.f32 %v13657_v33, %v13734_v40  ;;  %v13745_v8 = vpop.f32.mrf.mxu1 }
 0x92b   : > { %v6113_v2 = vsel %vm1553_vm4, %v6095_v14, 0.0  ;;  %16090 = vst [vmem:[#allocation81_spill] sm:$0xff] %v13734_v40  ;;  %v5985_v50 = vsel %vm1553_vm4, %v5963_v27, 0.0  ;;  %v6031_v48 = vmul.f32 %v13642_v59, %v13745_v8 }
 0x92c   : > { %6047 = vadd.xlane.f32.xlu2 %v6046_v18  ;;  %6114 = vadd.xlane.f32.xlu0 %v6113_v2  ;;  %v6186_v21 = vsel %vm1553_vm4, %v6164_v52, 0.0 }
 0x92d   : > { %v6055_v54 = vsel %vm1553_vm4, %v6031_v48, 0.0 }
 0x930   : > { %v13713_v1 = vpop.f32.mrf.mxu0  ;;  %v13738_v26 = vpop.f32.mrf.mxu3 }
 0x931   : > { %16088 = vst [vmem:[#allocation89_spill] sm:$0xff] %v13713_v1  ;;  %v6096_v37 = vmul.f32 %v13683_v13, %v13713_v1  ;;  %v5964_v34 = vmul.f32 %v13650_v29, %v13738_v26  ;;  %v13753_v62 = vpop.f32.mrf.mxu2 }
 0x932   : > { %v6165_v58 = vmul.f32 %v13657_v33, %v13753_v62  ;;  %v13766_v55 = vpop.f32.mrf.mxu1 }
 0x933   : > { %v6116_v39 = vsel %vm1553_vm4, %v6096_v37, 0.0  ;;  %v5988_v36 = vsel %vm1553_vm4, %v5964_v34, 0.0  ;;  %v6032_v60 = vmul.f32 %v13642_v59, %v13766_v55 }
 0x934   : > { %6050 = vadd.xlane.f32.xlu0 %v6049_v38  ;;  %6117 = vadd.xlane.f32.xlu1 %v6116_v39  ;;  %v6189_v15 = vsel %vm1553_vm4, %v6165_v58, 0.0 }
 0x935   : > { %5983 = vadd.xlane.f32.xlu2 %v5982_v31  ;;  %v6058_v11 = vsel %vm1553_vm4, %v6032_v60, 0.0 }
 0x938   : > { %v13730_v61 = vpop.f32.mrf.mxu0  ;;  %v13760_v12 = vpop.f32.mrf.mxu3 }
 0x939   : > { %v6097_v49 = vmul.f32 %v13683_v13, %v13730_v61  ;;  %v5965_v57 = vmul.f32 %v13650_v29, %v13760_v12  ;;  %v13777_v10 = vpop.f32.mrf.mxu2 }
 0x93a   : > { %v13785_v19 = vpop.f32.mrf.mxu1  ;;  %v6166_v2 = vmul.f32 %v13657_v33, %v13777_v10 }
 0x93b   : > { %v6119_v41 = vsel %vm1553_vm4, %v6097_v49, 0.0  ;;  %v5991_v43 = vsel %vm1553_vm4, %v5965_v57, 0.0  ;;  %v6033_v14 = vmul.f32 %v13642_v59, %v13785_v19 }
 0x93c   : > { %6053 = vadd.xlane.f32.xlu1 %v6052_v28  ;;  %5986 = vadd.xlane.f32.xlu0 %v5985_v50  ;;  %v6192_v31 = vsel %vm1553_vm4, %v6166_v2, 0.0 }
 0x93d   : > { %6184 = vadd.xlane.f32.xlu2 %v6183_v47  ;;  %v6061_v37 = vsel %vm1553_vm4, %v6033_v14, 0.0 }
 0x940   : > { %v13749_v53 = vpop.f32.mrf.mxu0  ;;  %v13781_v0 = vpop.f32.mrf.mxu3 }
 0x941   : > { %v6098_v17 = vmul.f32 %v13683_v13, %v13749_v53  ;;  %v5966_v18 = vmul.f32 %v13650_v29, %v13781_v0  ;;  %v13796_v24 = vpop.f32.mrf.mxu2 }
 0x942   : > { %v6167_v27 = vmul.f32 %v13657_v33, %v13796_v24  ;;  %v13807_v20 = vpop.f32.mrf.mxu1 }
 0x943   : > { %v6122_v45 = vsel %vm1553_vm4, %v6098_v17, 0.0  ;;  %v5994_v38 = vsel %vm1553_vm4, %v5966_v18, 0.0 }
 0x944   : > { %6187 = vadd.xlane.f32.xlu0 %v6186_v21  ;;  %5989 = vadd.xlane.f32.xlu1 %v5988_v36  ;;  %v6195_v47 = vsel %vm1553_vm4, %v6167_v27, 0.0 }
 0x945   : > { %6120 = vadd.xlane.f32.xlu2 %v6119_v41  ;;  %v6034_v41 = vmul.f32 %v13642_v59, %v13807_v20 }
 0x948   : > { %v13762_v30 = vpop.f32.mrf.mxu0  ;;  %v13800_v39 = vpop.f32.mrf.mxu3 }
 0x949   : > { %v6099_v44 = vmul.f32 %v13683_v13, %v13762_v30  ;;  %v5967_v9 = vmul.f32 %v13650_v29, %v13800_v39  ;;  %v13815_v34 = vpop.f32.mrf.mxu2 }
 0x94a   : > { %v6168_v21 = vmul.f32 %v13657_v33, %v13815_v34  ;;  %v13828_v48 = vpop.f32.mrf.mxu1 }
 0x94b   : > { %v6125_v56 = vsel %vm1553_vm4, %v6099_v44, 0.0  ;;  %v5997_v52 = vsel %vm1553_vm4, %v5967_v9, 0.0  ;;  %v6035_v60 = vmul.f32 %v13642_v59, %v13828_v48 }
 0x94c   : > { %6123 = vadd.xlane.f32.xlu0 %v6122_v45  ;;  %6190 = vadd.xlane.f32.xlu1 %v6189_v15  ;;  %v6198_v15 = vsel %vm1553_vm4, %v6168_v21, 0.0 }
 0x94d   : > { %6056 = vadd.xlane.f32.xlu2 %v6055_v54  ;;  %v6064_v54 = vsel %vm1553_vm4, %v6034_v41, 0.0  ;;  %v6067_v14 = vsel %vm1553_vm4, %v6035_v60, 0.0 }
 0x950   : > { %v13779_v46 = vpop.f32.mrf.mxu0  ;;  %v13824_v17 = vpop.f32.mrf.mxu3 }
 0x951   : > { %v6100_v50 = vmul.f32 %v13683_v13, %v13779_v46  ;;  %v13837_v57 = vpop.f32.mrf.mxu2 }
 0x952   : > { %v13847_v2 = vpop.f32.mrf.mxu1  ;;  %v6169_v9 = vmul.f32 %v13657_v33, %v13837_v57 }
 0x953   : > { %v6128_v49 = vsel %vm1553_vm4, %v6100_v50, 0.0 }
 0x954   : > { %6059 = vadd.xlane.f32.xlu0 %v6058_v11  ;;  %6126 = vadd.xlane.f32.xlu1 %v6125_v56  ;;  %v5968_v56 = vmul.f32 %v13650_v29, %v13824_v17  ;;  %v6201_v21 = vsel %vm1553_vm4, %v6169_v9, 0.0 }
 0x955   : > { %5992 = vadd.xlane.f32.xlu2 %v5991_v43 }
 0x958   : > { %v13794_v4 = vpop.f32.mrf.mxu0  ;;  %v13843_v43 = vpop.f32.mrf.mxu3 }
 0x959   : > { %v6101_v36 = vmul.f32 %v13683_v13, %v13794_v4  ;;  %v13858_v50 = vpop.f32.mrf.mxu2 }
 0x95a   : > { %v13867_v41 = vpop.f32.mrf.mxu1 }
 0x95b   : > { %v6131_v45 = vsel %vm1553_vm4, %v6101_v36, 0.0  ;;  %v6170_v36 = vmul.f32 %v13657_v33, %v13858_v50  ;;  %v6037_v9 = vmul.f32 %v13642_v59, %v13867_v41 }
 0x95c   : > { %6062 = vadd.xlane.f32.xlu1 %v6061_v37  ;;  %5995 = vadd.xlane.f32.xlu0 %v5994_v38  ;;  %v6000_v37 = vsel %vm1553_vm4, %v5968_v56, 0.0  ;;  %v6036_v38 = vmul.f32 %v13642_v59, %v13847_v2 }
 0x95d   : > { %6193 = vadd.xlane.f32.xlu2 %v6192_v31  ;;  %v5969_v31 = vmul.f32 %v13650_v29, %v13843_v43  ;;  %v6204_v60 = vsel %vm1553_vm4, %v6170_v36, 0.0 }
 0x960   : > { %v13809_v28 = vpop.f32.mrf.mxu0 }
 0x961   : > { %v6102_v44 = vmul.f32 %v13683_v13, %v13809_v28  ;;  %v13877_v56 = vpop.f32.mrf.mxu2 }
 0x963   : > { %v6134_v18 = vsel %vm1553_vm4, %v6102_v44, 0.0 }
 0x964   : > { %6196 = vadd.xlane.f32.xlu0 %v6195_v47  ;;  %5998 = vadd.xlane.f32.xlu1 %v5997_v52  ;;  %v6070_v47 = vsel %vm1553_vm4, %v6036_v38, 0.0  ;;  %v6003_v52 = vsel %vm1553_vm4, %v5969_v31, 0.0 }
 0x965   : > { %6129 = vadd.xlane.f32.xlu2 %v6128_v49  ;;  %v13862_v49 = vpop.f32.mrf.mxu3 }
 0x968   : > { %v13826_v58 = vpop.f32.mrf.mxu0 }
 0x96c   : > { %6132 = vadd.xlane.f32.xlu0 %v6131_v45  ;;  %6199 = vadd.xlane.f32.xlu1 %v6198_v15  ;;  %v5970_v45 = vmul.f32 %v13650_v29, %v13862_v49  ;;  %v6103_v15 = vmul.f32 %v13683_v13, %v13826_v58 }
 0x96d   : > { %6065 = vadd.xlane.f32.xlu2 %v6064_v54  ;;  %v13884_v38 = vpop.f32.mrf.mxu3 }
 0x96e   : > { %v6006_v44 = vsel %vm1553_vm4, %v5970_v45, 0.0 }
 0x970   : > { %v13839_v11 = vpop.f32.mrf.mxu0 }
 0x974   : > { %6068 = vadd.xlane.f32.xlu0 %v6067_v14  ;;  %6135 = vadd.xlane.f32.xlu1 %v6134_v18  ;;  %v6137_v14 = vsel %vm1553_vm4, %v6103_v15, 0.0  ;;  %v6171_v18 = vmul.f32 %v13657_v33, %v13877_v56 }
 0x975   : > { %6001 = vadd.xlane.f32.xlu2 %v6000_v37  ;;  %v6104_v37 = vmul.f32 %v13683_v13, %v13839_v11 }
 0x976   : > { %v6207_v45 = vsel %vm1553_vm4, %v6171_v18, 0.0 }
 0x977   : > { %v6140_v36 = vsel %vm1553_vm4, %v6104_v37, 0.0  ;;  %v5971_v37 = vmul.f32 %v13650_v29, %v13884_v38 }
 0x978   : > { %v13856_v27 = vpop.f32.mrf.mxu0 }
 0x979   : > { %v6105_v18 = vmul.f32 %v13683_v13, %v13856_v27 }
 0x97c   : > { %6071 = vadd.xlane.f32.xlu1 %v6070_v47  ;;  %6004 = vadd.xlane.f32.xlu0 %v6003_v52  ;;  %v13890_v47 = vpop.f32.mrf.mxu1 }
 0x97d   : > { %6202 = vadd.xlane.f32.xlu2 %v6201_v21  ;;  %v6038_v7 = vmul.f32 %v13642_v59, %v13890_v47 }
 0x980   : > { %v13873_v54 = vpop.f32.mrf.mxu0 }
 0x981   : > { %v5937_v31 = vpack.c.bf16 %v13873_v54, %v13873_v54 }
 0x983   : > { %v13898_v15 = vunpack.c.l.b16 %v5937_v31  ;;  %v13913_v31 = vpop.f32.mrf.mxu2 }
 0x984   : > { %6205 = vadd.xlane.f32.xlu0 %v6204_v60  ;;  %6007 = vadd.xlane.f32.xlu1 %v6006_v44  ;;  %v6073_v44 = vsel %vm1553_vm4, %v6037_v9, 0.0  ;;  %v13915_v9 = vpop.f32.mrf.mxu3  ;;  %v6172_v6 = vmul.f32 %v13657_v33, %v13913_v31 }
 0x985   : > { %6138 = vadd.xlane.f32.xlu2 %v6137_v14  ;;  %16091 = vst [vmem:[#allocation44_spill] sm:$0xff] %v13898_v15  ;;  %v13903_v14 = vpop.xlane.xlu1 %6044 }
 0x988   : > { %v13892_v52 = vpop.f32.mrf.mxu0 }
 0x989   : > { %v5938_v21 = vpack.c.bf16 %v13892_v52, %v13892_v52 }
 0x98b   : > { %v13900_v60 = vunpack.c.l.b16 %v5938_v21  ;;  %v13917_v21 = vpop.f32.mrf.mxu1  ;;  %v13930_v42 = vpop.f32.mrf.mxu2 }
 0x98c   : > { %6141 = vadd.xlane.f32.xlu0 %v6140_v36  ;;  %6208 = vadd.xlane.f32.xlu1 %v6207_v45  ;;  %v6076_v36 = vsel %vm1553_vm4, %v6038_v7, 0.0  ;;  %v6143_v45 = vsel %vm1553_vm4, %v6105_v18, 0.0  ;;  %v6039_v15 = vmul.f32 %v13642_v59, %v13917_v21 }
 0x98d   : > { %16092 = vst [vmem:[#allocation75_spill] sm:$0xff] %v13900_v60  ;;  %6074 = vadd.xlane.f32.xlu2 %v6073_v44  ;;  %v6009_v44 = vsel %vm1553_vm4, %v5971_v37, 0.0  ;;  %v13922_v63 = vpop.xlane.xlu1 %5980  ;;  %v5972_v60 = vmul.f32 %v13650_v29, %v13915_v9  ;;  %v6210_v37 = vsel %vm1553_vm4, %v6172_v6, 0.0 }
 0x98e   : > { %16093 = vst [vmem:[#allocation87_spill] sm:$0xff] %v13922_v63  ;;  %v6079_v7 = vsel %vm1553_vm4, %v6039_v15, 0.0  ;;  %v6106_v15 = vmul.f32 %v13683_v13, %v13873_v54 }
 0x98f   : > { %v6012_v18 = vsel %vm1553_vm4, %v5972_v60, 0.0 }
 0x993   : > { %v13949_v6 = vpop.f32.mrf.mxu2 }
 0x994   : > { %6077 = vadd.xlane.f32.xlu0 %v6076_v36  ;;  %6144 = vadd.xlane.f32.xlu1 %v6143_v45  ;;  %v13934_v36 = vpop.f32.mrf.mxu3  ;;  %v13937_v45 = vpop.f32.mrf.mxu1  ;;  %v6174_v25 = vmul.f32 %v13657_v33, %v13949_v6 }
 0x995   : > { %6010 = vadd.xlane.f32.xlu2 %v6009_v44  ;;  %v6173_v44 = vmul.f32 %v13657_v33, %v13930_v42  ;;  %v5973_v63 = vmul.f32 %v13650_v29, %v13934_v36  ;;  %v13943_v51 = vpop.xlane.xlu1 %6181  ;;  %v6040_v40 = vmul.f32 %v13642_v59, %v13937_v45 }
 0x996   : > { %16094 = vst [vmem:[#allocation46_spill] sm:$0xff] %v13943_v51 }
 0x997   : > { %v6213_v60 = vsel %vm1553_vm4, %v6173_v44, 0.0  ;;  %v6112_v29 = vpop.xlane.xlu2 %6111 }
 0x99c   : > { %6080 = vadd.xlane.f32.xlu1 %v6079_v7  ;;  %6013 = vadd.xlane.f32.xlu0 %v6012_v18  ;;  %v6015_v7 = vsel %vm1553_vm4, %v5973_v63, 0.0  ;;  %v13951_v18 = vpop.xlane.xlu0 %5977  ;;  %v6107_v63 = vmul.f32 %v13683_v13, %v13892_v52 }
 0x99d   : > { %6211 = vadd.xlane.f32.xlu2 %v6210_v37  ;;  %v6146_v37 = vsel %vm1553_vm4, %v6106_v15, 0.0 }
 0x9a4   : > { %6214 = vadd.xlane.f32.xlu0 %v6213_v60  ;;  %6016 = vadd.xlane.f32.xlu1 %v6015_v7  ;;  %v6149_v60 = vsel %vm1553_vm4, %v6107_v63, 0.0  ;;  %v6216_v7 = vsel %vm1553_vm4, %v6174_v25, 0.0  ;;  %v13975_v1 = vpop.xlane.xlu0 %6178 }
 0x9a5   : > { %6147 = vadd.xlane.f32.xlu2 %v6146_v37  ;;  %v13954_v32 = vpop.f32.mrf.mxu1  ;;  %v6082_v37 = vsel %vm1553_vm4, %v6040_v40, 0.0 }
 0x9a6   : > { %v13956_v51 = vpop.f32.mrf.mxu0  ;;  %v6041_v63 = vmul.f32 %v13642_v59, %v13954_v32 }
 0x9a7   : > { %v13962_v44 = vpop.xlane.xlu1 %6117  ;;  %v6108_v25 = vmul.f32 %v13683_v13, %v13956_v51 }
 0x9a8   : > { %16095 = vst [vmem:[#allocation83_spill] sm:$0xff] %v13962_v44  ;;  %v6085_v3 = vsel %vm1553_vm4, %v6041_v63, 0.0 }
 0x9ab   : > { %v13966_v15 = vpop.f32.mrf.mxu3 }
 0x9ac   : > { %6150 = vadd.xlane.f32.xlu0 %v6149_v60  ;;  %6217 = vadd.xlane.f32.xlu1 %v6216_v7  ;;  %v13971_v22 = vpop.f32.mrf.mxu2  ;;  %v13989_v60 = vpop.xlane.xlu2 %6047 }
 0x9ad   : > { %6083 = vadd.xlane.f32.xlu2 %v6082_v37  ;;  %v13973_v33 = vpop.f32.mrf.mxu1  ;;  %v6152_v37 = vsel %vm1553_vm4, %v6108_v25, 0.0 }
 0x9ae   : > { %v13977_v44 = vpop.f32.mrf.mxu0  ;;  %9546 = vmatpush.xpose.msk.msrb.mxu1 %vm1553_vm4, %v13973_v33  ;;  %v6042_v25 = vmul.f32 %v13642_v59, %v13973_v33 }
 0x9af   : > { %9563 = vmatpush.xpose.msk.msrb.mxu0 %vm1553_vm4, %v13977_v44  ;;  %v13987_v40 = vpop.xlane.xlu1 %6053 }
 0x9b0   : > { %16096 = vst [vmem:[#allocation88_spill] sm:$0xff] %v13987_v40  ;;  %v14003_v40 = vpop.xlane.xlu0 %6114  ;;  %v6088_v59 = vsel %vm1553_vm4, %v6042_v25, 0.0 }
 0x9b1   : > { %16097 = vst [vmem:[#allocation65_spill] sm:$0xff] %v14003_v40  ;;  %v5923_v40 = vpack.c.bf16 %v13954_v32, %v13954_v32 }
 0x9b2   : > { %9547 = vmatpush.xpose.msk.msrb.mxu1 %vm1553_vm4, %v13954_v32 }
 0x9b3   : > { %9564 = vmatpush.xpose.msk.msrb.mxu0 %vm1553_vm4, %v13956_v51  ;;  %v13995_v7 = vpop.f32.mrf.mxu3 }
 0x9b4   : > { %6153 = vadd.xlane.f32.xlu1 %v6152_v37  ;;  %6086 = vadd.xlane.f32.xlu0 %v6085_v3  ;;  %v13999_v13 = vpop.f32.mrf.mxu2  ;;  %v14017_v63 = vpop.xlane.xlu2 %5983 }
 0x9b5   : > { %9529 = vmatpush.xpose.msk.msra.mxu3 %vm1553_vm4, %v13995_v7  ;;  %9580 = vmatpush.xpose.msk.msra.mxu2 %vm1553_vm4, %v13999_v13  ;;  %16099 = vst [vmem:[#allocation48_spill] sm:$0xff] %v14017_v63 }
 0x9b6   : > { %9548 = vmatpush.xpose.msk.msrb.mxu1 %vm1553_vm4, %v13937_v45 }
 0x9b7   : > { %9565 = vmatpush.xpose.msk.msrb.mxu0 %vm1553_vm4, %v13892_v52  ;;  %v14013_v3 = vpop.xlane.xlu1 %5989 }
 0x9b8   : > { %16098 = vst [vmem:[#allocation69_spill] sm:$0xff] %v14013_v3  ;;  %v14034_v52 = vpop.xlane.xlu0 %6050 }
 0x9b9   : > { %9530 = vmatpush.xpose.msk.msra.mxu3 %vm1553_vm4, %v13966_v15  ;;  %9581 = vmatpush.xpose.msk.msra.mxu2 %vm1553_vm4, %v13971_v22  ;;  %16100 = vst [vmem:[#allocation73_spill] sm:$0xff] %v14034_v52  ;;  %v5915_v52 = vpack.c.bf16 %v13785_v19, %v13785_v19 }
 0x9ba   : > { %9549 = vmatpush.xpose.msk.msrb.mxu1 %vm1553_vm4, %v13917_v21 }
 0x9bb   : > { %9566 = vmatpush.xpose.msk.msrb.mxu0 %vm1553_vm4, %v13873_v54 }
 0x9bc   : > { %6089 = vadd.xlane.f32.xlu1 %v6088_v59  ;;  %v14046_v37 = vpop.xlane.xlu2 %6184 }
 0x9bd   : > { %9531 = vmatpush.xpose.msk.msra.mxu3 %vm1553_vm4, %v13934_v36  ;;  %9582 = vmatpush.xpose.msk.msra.mxu2 %vm1553_vm4, %v13949_v6 }
 0x9be   : > { %9550 = vmatpush.xpose.msk.msrb.mxu1 %vm1553_vm4, %v13890_v47 }
 0x9bf   : > { %9567 = vmatpush.xpose.msk.msrb.mxu0 %vm1553_vm4, %v13856_v27  ;;  %v14038_v54 = vpop.xlane.xlu1 %6190 }
 0x9c0   : > { %16101 = vst [vmem:[#allocation61_spill] sm:$0xff] %v14038_v54  ;;  %v14059_v25 = vpop.xlane.xlu0 %5986 }
 0x9c1   : > { %9532 = vmatpush.xpose.msk.msra.mxu3 %vm1553_vm4, %v13915_v9  ;;  %9583 = vmatpush.xpose.msk.msra.mxu2 %vm1553_vm4, %v13930_v42  ;;  %16102 = vst [vmem:[#allocation55_spill] sm:$0xff] %v14059_v25  ;;  %v5935_v25 = vpack.c.bf16 %v13839_v11, %v13839_v11 }
 0x9c2   : > { %9551 = vmatpush.xpose.msk.msrb.mxu1 %vm1553_vm4, %v13867_v41 }
 0x9c3   : > { %9568 = vmatpush.xpose.msk.msrb.mxu0 %vm1553_vm4, %v13839_v11 }
 0x9c5   : > { %6591 = vperm.xlu2 %9970, %v13903_v14   ;;  %9533 = vmatpush.xpose.msk.msra.mxu3 %vm1553_vm4, %v13884_v38 }
 0x9c6   : > { %9584 = vmatpush.xpose.msk.msra.mxu2 %vm1553_vm4, %v13913_v31  ;;  %9552 = vmatpush.xpose.msk.msrb.mxu1 %vm1553_vm4, %v13847_v2 }
 0x9c7   : > { %9569 = vmatpush.xpose.msk.msrb.mxu0 %vm1553_vm4, %v13826_v58  ;;  %v14067_v14 = vpop.xlane.xlu1 %6126 }
 0x9c8   : > { %6671 = vperm.xlu0 %9968, %v6112_v29   ;;  %16103 = vst [vmem:[#allocation63_spill] sm:$0xff] %v14067_v14  ;;  %v14071_v29 = vpop.xlane.xlu2 %6120  ;;  %v14087_v59 = vpop.xlane.xlu0 %6187 }
 0x9c9   : > { %9534 = vmatpush.xpose.msk.msra.mxu3 %vm1553_vm4, %v13862_v49  ;;  %16104 = vst [vmem:[#allocation68_spill] sm:$0xff] %v14071_v29  ;;  %v5914_v29 = vpack.c.bf16 %v13766_v55, %v13766_v55 }
 0x9ca   : > { %9585 = vmatpush.xpose.msk.msra.mxu2 %vm1553_vm4, %v13877_v56  ;;  %9553 = vmatpush.xpose.msk.msrb.mxu1 %vm1553_vm4, %v13828_v48  ;;  %16105 = vst [vmem:[#allocation91_spill] sm:$0xff] %v14087_v59 }
 0x9cb   : > { %9570 = vmatpush.xpose.msk.msrb.mxu0 %vm1553_vm4, %v13809_v28  ;;  %v14163_v54 = vunpack.c.l.b16 %v5914_v29  ;;  %v14178_v29 = vunpack.c.l.b16 %v5915_v52  ;;  %v8016_v52 = vunpack.c.l.b16 %v5923_v40 }
 0x9cd   : > { %9535 = vmatpush.xpose.msk.msra.mxu3 %vm1553_vm4, %v13843_v43 }
 0x9ce   : > { %9586 = vmatpush.xpose.msk.msra.mxu2 %vm1553_vm4, %v13858_v50  ;;  %9554 = vmatpush.xpose.msk.msrb.mxu1 %vm1553_vm4, %v13807_v20 }
 0x9cf   : > { %9571 = vmatpush.xpose.msk.msrb.mxu0 %vm1553_vm4, %v13794_v4  ;;  %v14092_v14 = vpop.xlane.xlu1 %6062 }
 0x9d0   : > { %16106 = vst [vmem:[#allocation74_spill] sm:$0xff] %v14092_v14  ;;  %v14100_v3 = vpop.xlane.xlu2 %6056  ;;  %v14115_v14 = vpop.xlane.xlu0 %6123 }
 0x9d1   : > { %9536 = vmatpush.xpose.msk.msra.mxu3 %vm1553_vm4, %v13824_v17  ;;  %16107 = vst [vmem:[#allocation56_spill] sm:$0xff] %v14100_v3  ;;  %v5912_v3 = vpack.c.bf16 %v13723_v23, %v13723_v23 }
 0x9d2   : > { %9587 = vmatpush.xpose.msk.msra.mxu2 %vm1553_vm4, %v13837_v57  ;;  %9555 = vmatpush.xpose.msk.msrb.mxu1 %vm1553_vm4, %v13785_v19  ;;  %16108 = vst [vmem:[#allocation92_spill] sm:$0xff] %v14115_v14  ;;  %v16113_v14 = vld [vmem:[#allocation85_spill] sm:$0xff] }
 0x9d3   : > { %9572 = vmatpush.xpose.msk.msrb.mxu0 %vm1553_vm4, %v13779_v46  ;;  %v14153_v19 = vunpack.c.l.b16 %v5912_v3  ;;  %v5939_v3 = vpack.c.bf16 %v13956_v51, %v13956_v51  ;;  %v5908_v51 = vpack.c.bf16 %v13995_v7, %v13995_v7 }
 0x9d5   : > { %9537 = vmatpush.xpose.msk.msra.mxu3 %vm1553_vm4, %v13800_v39  ;;  %6511 = vperm.xlu1 %9969, %v13951_v18   ;;  %v5911_v18 = vpack.c.bf16 %v13704_v16, %v13704_v16  ;;  %16112 = vst [vmem:[#allocation94_spill] sm:$0xff] %v14153_v19  ;;  %v16115_v19 = vld [vmem:[#allocation47_spill] sm:$0xff] }
 0x9d6   : > { %9588 = vmatpush.xpose.msk.msra.mxu2 %vm1553_vm4, %v13815_v34  ;;  %9556 = vmatpush.xpose.msk.msrb.mxu1 %vm1553_vm4, %v13766_v55  ;;  %v5916_v55 = vpack.c.bf16 %v13807_v20, %v13807_v20  ;;  %v5917_v20 = vpack.c.bf16 %v13828_v48, %v13828_v48  ;;  %v5918_v48 = vpack.c.bf16 %v13847_v2, %v13847_v2 }
 0x9d7   : > { %9573 = vmatpush.xpose.msk.msrb.mxu0 %vm1553_vm4, %v13762_v30  ;;  %v14129_v59 = vpop.xlane.xlu1 %5998 }
 0x9d8   : > { %16109 = vst [vmem:[#allocation52_spill] sm:$0xff] %v14129_v59  ;;  %v5940_v59 = vpack.c.bf16 %v13977_v44, %v13977_v44  ;;  %v14145_v63 = vpop.xlane.xlu2 %5992  ;;  %v14204_v2 = vpop.xlane.xlu0 %6059 }
 0x9d9   : > { %9538 = vmatpush.xpose.msk.msra.mxu3 %vm1553_vm4, %v13781_v0  ;;  %16110 = vst [vmem:[#allocation67_spill] sm:$0xff] %v14145_v63  ;;  %v16114_v63 = vld [vmem:[#allocation89_spill] sm:$0xff] }
 0x9da   : > { %9589 = vmatpush.xpose.msk.msra.mxu2 %vm1553_vm4, %v13796_v24  ;;  %9557 = vmatpush.xpose.msk.msrb.mxu1 %vm1553_vm4, %v13745_v8  ;;  %16117 = vst [vmem:[#allocation89_spill] sm:$0xff] %v14204_v2  ;;  %v16120_v2 = vld [vmem:[#allocation84_spill] sm:$0xff] }
 0x9db   : > { %9574 = vmatpush.xpose.msk.msrb.mxu0 %vm1553_vm4, %v13749_v53 }
 0x9dd   : > { %9539 = vmatpush.xpose.msk.msra.mxu3 %vm1553_vm4, %v13760_v12  ;;  %6751 = vperm.xlu1 %9969, %v13975_v1   ;;  %v5913_v1 = vpack.c.bf16 %v13745_v8, %v13745_v8  ;;  %v8162_v8 = vunpack.c.l.b16 %v5940_v59  ;;  %v5921_v59 = vpack.c.bf16 %v13917_v21, %v13917_v21  ;;  %v5907_v21 = vpack.c.bf16 %v13966_v15, %v13966_v15 }
 0x9de   : > { %9590 = vmatpush.xpose.msk.msra.mxu2 %vm1553_vm4, %v13777_v10  ;;  %9558 = vmatpush.xpose.msk.msrb.mxu1 %vm1553_vm4, %v13723_v23  ;;  %v5924_v23 = vpack.c.bf16 %v13973_v33, %v13973_v33  ;;  %v14151_v33 = vunpack.c.l.b16 %v5911_v18 }
 0x9df   : > { %9575 = vmatpush.xpose.msk.msrb.mxu0 %vm1553_vm4, %v13730_v61  ;;  %v14169_v18 = vunpack.c.l.b16 %v5913_v1  ;;  %v5922_v1 = vpack.c.bf16 %v13937_v45, %v13937_v45  ;;  %v5920_v45 = vpack.c.bf16 %v13890_v47, %v13890_v47 }
 0x9e0   : > { %16111 = vst [vmem:[#allocation93_spill] sm:$0xff] %v14151_v33  ;;  %v8017_v32 = vunpack.c.l.b16 %v5924_v23  ;;  %v16116_v33 = vld [vmem:[#allocation81_spill] sm:$0xff]  ;;  %v14196_v23 = vunpack.c.l.b16 %v5917_v20  ;;  %v5956_v20 = vpack.c.bf16 %v13999_v13, %v13999_v13 }
 0x9e1   : > { %9540 = vmatpush.xpose.msk.msra.mxu3 %vm1553_vm4, %v13738_v26  ;;  %v8015_v47 = vunpack.c.l.b16 %v5922_v1  ;;  %v5936_v1 = vpack.c.bf16 %v13856_v27, %v13856_v27  ;;  %v5905_v27 = vpack.c.bf16 %v13915_v9, %v13915_v9 }
 0x9e2   : > { %9591 = vmatpush.xpose.msk.msra.mxu2 %vm1553_vm4, %v13753_v62  ;;  %9559 = vmatpush.xpose.msk.msrb.mxu1 %vm1553_vm4, %v13704_v16  ;;  %v14180_v16 = vunpack.c.l.b16 %v5916_v55  ;;  %v8161_v55 = vunpack.c.l.b16 %v5939_v3  ;;  %v8025_v40 = vpack.c.b16 %v8017_v32, %v8016_v52  ;;  %v16121_v32 = vld [vmem:[#allocation76_spill] sm:$0xff] }
 0x9e3   : > { %9576 = vmatpush.xpose.msk.msrb.mxu0 %vm1553_vm4, %v16114_v63  ;;  %v5974_v52 = vmul.f32 %v16121_v32, %v13966_v15  ;;  %v7872_v15 = vunpack.c.l.b16 %v5908_v51  ;;  %v5975_v51 = vmul.f32 %v16121_v32, %v13995_v7  ;;  %v5933_v7 = vpack.c.bf16 %v13809_v28, %v13809_v28  ;;  %v5560_v28 = vld [vmem:[#allocation14] sm:$0x1] }
 0x9e4   : > { %v8170_v3 = vpack.c.b16 %v8162_v8, %v8161_v55  ;;  %v5955_v8 = vpack.c.bf16 %v13971_v22, %v13971_v22  ;;  %v16122_v55 = vld [vmem:[#allocation79_spill] sm:$0xff]  ;;  %v8157_v32 = vunpack.c.l.b16 %v5935_v25  ;;  %v7869_v25 = vunpack.c.l.b16 %v5905_v27 }
 0x9e5   : > { %9541 = vmatpush.xpose.msk.msra.mxu3 %vm1553_vm4, %v16115_v19  ;;  %6596 = vperm.xlu1 %9969, %v13989_v60   ;;  %v5919_v60 = vpack.c.bf16 %v13867_v41, %v13867_v41  ;;  %v14234_v19 = vpop.xlane.xlu2 %6193  ;;  %v8014_v41 = vunpack.c.l.b16 %v5921_v59  ;;  %v6018_v11 = vsel %vm1553_vm4, %v5974_v52, 0.0  ;;  %v5953_v59 = vpack.c.bf16 %v13930_v42, %v13930_v42 }
 0x9e6   : > { %9592 = vmatpush.xpose.msk.msra.mxu2 %vm1553_vm4, %v16116_v33  ;;  %9560 = vmatpush.xpose.msk.msrb.mxu1 %vm1553_vm4, %v13690_v35  ;;  %v14206_v35 = vunpack.c.l.b16 %v5918_v48  ;;  %v14216_v33 = vpop.xlane.xlu1 %6199  ;;  %v5561_v48 = vld [vmem:[#allocation14 + $0x1] sm:$0x1]  ;;  %v5952_v42 = vpack.c.bf16 %v13913_v31, %v13913_v31 }
 0x9e7   : > { %9577 = vmatpush.xpose.msk.msrb.mxu0 %vm1553_vm4, %v16113_v14  ;;  %v16118_v14 = vld [vmem:[#allocation71_spill] sm:$0xff]  ;;  %16119 = vst [vmem:[#allocation95_spill] sm:$0xff] %v14216_v33  ;;  %v8024_v9 = vpack.c.b16 %v8015_v47, %v8014_v41  ;;  %v16126_v47 = vld [vmem:[#allocation44_spill] sm:$0xff] }
 0x9e8   : > { %v5562_v33 = vld [vmem:[#allocation14 + $0x2] sm:$0x1] }
 0x9e9   : > { %9542 = vmatpush.xpose.msk.msra.mxu3 %vm1553_vm4, %v16118_v14  ;;  %v5906_v14 = vpack.c.bf16 %v13934_v36, %v13934_v36  ;;  %v7871_v36 = vunpack.c.l.b16 %v5907_v21  ;;  %v16125_v41 = vld [vmem:[#allocation75_spill] sm:$0xff] }
 0x9ea   : > { %9593 = vmatpush.xpose.msk.msra.mxu2 %vm1553_vm4, %v16120_v2  ;;  %9561 = vmatpush.xpose.msk.msrb.mxu1 %vm1553_vm4, %v13644_v5  ;;  %v8012_v2 = vunpack.c.l.b16 %v5919_v60  ;;  %v8013_v5 = vunpack.c.l.b16 %v5920_v45  ;;  %v16123_v60 = vld [vmem:[#allocation70_spill] sm:$0xff]  ;;  %v16124_v45 = vld [vmem:[#allocation57_spill] sm:$0xff] }
 0x9eb   : > { %9578 = vmatpush.xpose.msk.msrb.mxu0 %vm1553_vm4, %v16122_v55  ;;  %v8307_v55 = vunpack.c.l.b16 %v5956_v20  ;;  %v8158_v20 = vunpack.c.l.b16 %v5936_v1  ;;  %v7870_v21 = vunpack.c.l.b16 %v5906_v14  ;;  %v16128_v1 = vld [vmem:[#allocation41_spill] sm:$0xff]  ;;  %v14269_v14 = vpop.xlane.xlu0 %5995 }
 0x9ec   : > { %v8023_v31 = vpack.c.b16 %v8013_v5, %v8012_v2  ;;  %v5950_v2 = vpack.c.bf16 %v13858_v50, %v13858_v50  ;;  %v16131_v50 = vpack.c.bf16 %v13862_v49, %v13862_v49 }
 0x9ed   : > { %9543 = vmatpush.xpose.msk.msra.mxu3 %vm1553_vm4, %v16123_v60  ;;  %9562 = vmatmul.msk.f32.vlgmr.msrb.gmra.mxu1 %vm1553_vm4, %v5561_v48  ;;  %v7880_v48 = vpack.c.b16 %v7872_v15, %v7871_v36  ;;  %v6021_v15 = vsel %vm1553_vm4, %v5975_v51, 0.0  ;;  %v5563_v36 = vld [vmem:[#allocation14 + $0x3] sm:$0x1]  ;;  %v7879_v5 = vpack.c.b16 %v7870_v21, %v7869_v25  ;;  %v8155_v51 = vunpack.c.l.b16 %v5933_v7 }
 0x9ee   : > { %8034 = vmatpush.bf16.msra.mxu1 %v8025_v40  ;;  %v5954_v40 = vpack.c.bf16 %v13949_v6, %v13949_v6  ;;  %9594 = vmatpush.xpose.msk.msra.mxu2 %vm1553_vm4, %v16124_v45  ;;  %v5934_v6 = vpack.c.bf16 %v13826_v58, %v13826_v58  ;;  %v16127_v58 = vpack.c.b16 %v16125_v41, %v16126_v47  ;;  %v14280_v47 = vpop.xlane.xlu1 %6135 }
 0x9ef   : > { %8179 = vmatpush.bf16.msra.mxu0 %v8170_v3  ;;  %v8306_v3 = vunpack.c.l.b16 %v5955_v8  ;;  %6761 = vperm.xlu1 %9969, %v14046_v37   ;;  %v16129_v8 = vld [vmem:[#allocation49_spill] sm:$0xff]  ;;  %v5902_v41 = vpack.c.bf16 %v13843_v43, %v13843_v43 }
 0x9f0   : > { %9579 = vmatmul.msk.f32.vlgmr.msrb.gmra.mxu0 %vm1553_vm4, %v5562_v33  ;;  %6019 = vadd.xlane.f32.xlu2 %v6018_v11  ;;  %v5904_v33 = vpack.c.bf16 %v13884_v38, %v13884_v38  ;;  %v8305_v52 = vunpack.c.l.b16 %v5954_v40  ;;  %v5951_v38 = vpack.c.bf16 %v13877_v56, %v13877_v56  ;;  %v8156_v40 = vunpack.c.l.b16 %v5934_v6  ;;  %v16130_v11 = vld [vmem:[#allocation60_spill] sm:$0xff]  ;;  %v14290_v6 = vpop.xlane.xlu2 %6129 }
 0x9f1   : > { %v8315_v37 = vpack.c.b16 %v8307_v55, %v8306_v3  ;;  %9544 = vmatpush.xpose.msk.msra.mxu3 %vm1553_vm4, %v16128_v1  ;;  %v8304_v55 = vunpack.c.l.b16 %v5953_v59  ;;  %v8168_v3 = vpack.c.b16 %v8158_v20, %v8157_v32  ;;  %v5931_v56 = vpack.c.bf16 %v13779_v46, %v13779_v46 }
 0x9f2   : > { %8035 = vmatpush.bf16.msra.mxu1 %v8024_v9  ;;  %9595 = vmatpush.xpose.msk.msra.mxu2 %vm1553_vm4, %v16129_v8  ;;  %v6175_v9 = vmul.f32 %v16130_v11, %v13971_v22  ;;  %v8303_v22 = vunpack.c.l.b16 %v5952_v42  ;;  %v5949_v46 = vpack.c.bf16 %v13837_v57, %v13837_v57  ;;  %v6176_v43 = vmul.f32 %v16130_v11, %v13999_v13  ;;  %v16133_v57 = vld [vmem:[#allocation88_spill] sm:$0xff] }
 0x9f3   : > { %8180 = vmatpush.bf16.msra.mxu0 %v16127_v58  ;;  %6022 = vadd.xlane.f32.xlu0 %v6021_v15  ;;  %v8314_v27 = vpack.c.b16 %v8305_v52, %v8304_v55  ;;  %v8022_v59 = vpack.c.b16 %v14206_v35, %v14196_v23  ;;  %v7867_v20 = vunpack.c.l.b16 %v16131_v50  ;;  %v8302_v21 = vunpack.c.l.b16 %v5951_v38 }
 0x9f4   : > { %9545 = vmatmul.msk.f32.vlgmr.msra.gmra.mxu3 %vm1553_vm4, %v5560_v28  ;;  %v6219_v13 = vsel %vm1553_vm4, %v6175_v9, 0.0  ;;  %v8167_v58 = vpack.c.b16 %v8156_v40, %v8155_v51  ;;  %v5929_v42 = vpack.c.bf16 %v13749_v53, %v13749_v53  ;;  %v5900_v35 = vpack.c.bf16 %v13800_v39, %v13800_v39  ;;  %v16140_v51 = vld [vmem:[#allocation79_spill] sm:$0xff] }
 0x9f5   : > { %7889 = vmatpush.bf16.msrb.mxu3 %v7880_v48  ;;  %v7868_v48 = vunpack.c.l.b16 %v5904_v33  ;;  %9596 = vmatmul.msk.f32.vlgmr.msra.gmra.mxu2 %vm1553_vm4, %v5563_v36  ;;  %v16132_v33 = vpack.c.bf16 %v13794_v4, %v13794_v4  ;;  %v7866_v23 = vunpack.c.l.b16 %v5902_v41  ;;  %v5948_v4 = vpack.c.bf16 %v13815_v34, %v13815_v34 }
 0x9f6   : > { %8324 = vmatpush.bf16.msrb.mxu2 %v8315_v37  ;;  %8036 = vmatpush.bf16.msra.mxu1 %v8023_v31  ;;  %v8301_v32 = vunpack.c.l.b16 %v5950_v2  ;;  %v8313_v52 = vpack.c.b16 %v8303_v22, %v8302_v21  ;;  %v8153_v37 = vunpack.c.l.b16 %v5931_v56  ;;  %v5947_v28 = vpack.c.bf16 %v13796_v24, %v13796_v24  ;;  %v16136_v31 = vld [vmem:[#allocation80_spill] sm:$0xff]  ;;  %v14333_v41 = vpop.xlane.xlu1 %6071  ;;  %v16139_v22 = vld [vmem:[#allocation55_spill] sm:$0xff]  ;;  %v16143_v21 = vld [vmem:[#allocation78_spill] sm:$0xff] }
 0x9f7   : > { %8181 = vmatpush.bf16.msra.mxu0 %v8168_v3  ;;  %v8154_v7 = vunpack.c.l.b16 %v16132_v33  ;;  %6606 = vperm.xlu1 %9969, %v16133_v57   ;;  %v7878_v49 = vpack.c.b16 %v7868_v48, %v7867_v20  ;;  %v6222_v53 = vsel %vm1553_vm4, %v6176_v43, 0.0  ;;  %v8021_v39 = vpack.c.b16 %v14180_v16, %v14178_v29  ;;  %v16141_v43 = vld [vmem:[#allocation47_spill] sm:$0xff] }
 0x9f8   : > { %6220 = vadd.xlane.f32.xlu2 %v6219_v13  ;;  %v16134_v38 = vpack.c.bf16 %v13824_v17, %v13824_v17  ;;  %v16135_v34 = vpack.c.bf16 %v13762_v30, %v13762_v30  ;;  %v6109_v25 = vmul.f32 %v16136_v31, %v13977_v44  ;;  %v8300_v40 = vunpack.c.l.b16 %v5949_v46  ;;  %v14325_v17 = vpop.xlane.xlu0 %6196  ;;  %v16151_v31 = vld [vmem:[#allocation77_spill] sm:$0xff] }
 0x9f9   : > { %7890 = vmatpush.bf16.msrb.mxu3 %v7879_v5  ;;  %v8166_v24 = vpack.c.b16 %v8154_v7, %v8153_v37  ;;  %v5927_v55 = vpack.c.bf16 %v16114_v63, %v16114_v63  ;;  %v5898_v16 = vpack.c.bf16 %v13760_v12, %v13760_v12  ;;  %v7864_v29 = vunpack.c.l.b16 %v5900_v35  ;;  %v16146_v35 = vld [vmem:[#allocation93_spill] sm:$0xff] }
 0x9fa   : > { %8325 = vmatpush.bf16.msrb.mxu2 %v8314_v27  ;;  %8037 = vmatpush.bf16.msra.mxu1 %v8022_v59  ;;  %v7865_v15 = vunpack.c.l.b16 %v16134_v38  ;;  %v8152_v36 = vunpack.c.l.b16 %v16135_v34  ;;  %v5946_v30 = vpack.c.bf16 %v13777_v10, %v13777_v10  ;;  %v8299_v9 = vunpack.c.l.b16 %v5948_v4  ;;  %v16142_v59 = vld [vmem:[#allocation81_spill] sm:$0xff] }
 0x9fb   : > { %8182 = vmatpush.bf16.msra.mxu0 %v8167_v58  ;;  %6223 = vadd.xlane.f32.xlu0 %v6222_v53  ;;  %v8312_v44 = vpack.c.b16 %v8301_v32, %v8300_v40  ;;  %v8151_v3 = vunpack.c.l.b16 %v5929_v42  ;;  %v5897_v56 = vpack.c.bf16 %v13738_v26, %v13738_v26  ;;  %v5945_v63 = vpack.c.bf16 %v13753_v62, %v13753_v62  ;;  %v16145_v58 = vld [vmem:[#allocation71_spill] sm:$0xff]  ;;  %v16148_v32 = vld [vmem:[#allocation84_spill] sm:$0xff]  ;;  %v16149_v37 = vld [vmem:[#allocation85_spill] sm:$0xff] }
 0x9fc   : > { %v7877_v11 = vpack.c.b16 %v7866_v23, %v7865_v15  ;;  %v8020_v12 = vpack.c.b16 %v14163_v54, %v14169_v18  ;;  %v16137_v48 = vpack.c.bf16 %v13781_v0, %v13781_v0  ;;  %v16138_v5 = vpack.c.bf16 %v13730_v61, %v13730_v61  ;;  %v14349_v0 = vpop.xlane.xlu2 %6065  ;;  %v16147_v23 = vld [vmem:[#allocation94_spill] sm:$0xff] }
 0x9fd   : > { %7891 = vmatpush.bf16.msrb.mxu3 %v7878_v49  ;;  %v6155_v26 = vsel %vm1553_vm4, %v6109_v25, 0.0  ;;  %v8165_v62 = vpack.c.b16 %v8152_v36, %v8151_v3  ;;  %v8298_v27 = vunpack.c.l.b16 %v5947_v28  ;;  %v5925_v46 = vpack.c.bf16 %v16140_v51, %v16140_v51  ;;  %v16153_v3 = vld [vmem:[#allocation61_spill] sm:$0xff]  ;;  %v16155_v51 = vld [vmem:[#allocation46_spill] sm:$0xff] }
 0x9fe   : > { %8326 = vmatpush.bf16.msrb.mxu2 %v8313_v52  ;;  %8038 = vmatpush.bf16.msra.mxu1 %v8021_v39  ;;  %v7863_v10 = vunpack.c.l.b16 %v16137_v48  ;;  %v8150_v2 = vunpack.c.l.b16 %v16138_v5  ;;  %v5896_v54 = vpack.c.bf16 %v16141_v43, %v16141_v43  ;;  %v7862_v18 = vunpack.c.l.b16 %v5898_v16 }
 0x9ff   : > { %8183 = vmatpush.bf16.msra.mxu0 %v8166_v24  ;;  %6526 = vperm.xlu1 %9969, %v16139_v22   ;;  %v5944_v50 = vpack.c.bf16 %v16142_v59, %v16142_v59  ;;  %v8297_v20 = vunpack.c.l.b16 %v5946_v30  ;;  %v8311_v33 = vpack.c.b16 %v8299_v9, %v8298_v27  ;;  %v8149_v7 = vunpack.c.l.b16 %v5927_v55 }
 0xa00   : > { %6156 = vadd.xlane.f32.xlu2 %v6155_v26  ;;  %v7876_v61 = vpack.c.b16 %v7864_v29, %v7863_v10  ;;  %v16144_v57 = vpack.c.bf16 %v16143_v21, %v16143_v21  ;;  %v5895_v42 = vpack.c.bf16 %v16145_v58, %v16145_v58  ;;  %v8019_v49 = vpack.c.b16 %v16147_v23, %v16146_v35  ;;  %v6133_v30 = vpop.xlane.xlu0 %6132  ;;  %v16162_v35 = vld [vmem:[#allocation68_spill] sm:$0xff] }
 0xa01   : > { %7892 = vmatpush.bf16.msrb.mxu3 %v7877_v11  ;;  %v7861_v4 = vunpack.c.l.b16 %v5897_v56  ;;  %v5943_v52 = vpack.c.bf16 %v16148_v32, %v16148_v32  ;;  %v16150_v28 = vpack.c.bf16 %v16149_v37, %v16149_v37  ;;  %v8164_v39 = vpack.c.b16 %v8150_v2, %v8149_v7  ;;  %v16166_v37 = vld [vmem:[#allocation63_spill] sm:$0xff] }
 0xa02   : > { %8327 = vmatpush.bf16.msrb.mxu2 %v8312_v44  ;;  %8039 = vmatpush.bf16.msra.mxu1 %v8020_v12  ;;  %v8003_v13 = vunpack.c.l.b16 %v16144_v57  ;;  %v8296_v38 = vunpack.c.l.b16 %v5945_v63  ;;  %v5894_v15 = vpack.c.bf16 %v16123_v60, %v16123_v60  ;;  %v7860_v34 = vunpack.c.l.b16 %v5896_v54  ;;  %v14377_v12 = vpop.xlane.xlu1 %6007  ;;  %v16156_v54 = vld [vmem:[#allocation65_spill] sm:$0xff] }
 0xa03   : > { %8184 = vmatpush.bf16.msra.mxu0 %v8165_v62  ;;  %v8148_v53 = vunpack.c.l.b16 %v16150_v28  ;;  %v7875_v36 = vpack.c.b16 %v7862_v18, %v7861_v4  ;;  %v16152_v25 = vpack.c.bf16 %v16151_v31, %v16151_v31  ;;  %v5942_v40 = vpack.c.bf16 %v16124_v45, %v16124_v45  ;;  %v16154_v62 = vld [vmem:[#allocation89_spill] sm:$0xff]  ;;  %v16157_v18 = vld [vmem:[#allocation83_spill] sm:$0xff]  ;;  %v16164_v4 = vld [vmem:[#allocation56_spill] sm:$0xff] }
 0xa04   : > { %v8295_v55 = vunpack.c.l.b16 %v5944_v50  ;;  %v8310_v16 = vpack.c.b16 %v8297_v20, %v8296_v38  ;;  %v8147_v29 = vunpack.c.l.b16 %v5925_v46  ;;  %v5893_v11 = vpack.c.bf16 %v16128_v1, %v16128_v1  ;;  %v14379_v5 = vpop.xlane.xlu2 %6001  ;;  %v16158_v20 = vld [vmem:[#allocation87_spill] sm:$0xff]  ;;  %v16169_v31 = vld [vmem:[#allocation52_spill] sm:$0xff] }
 0xa05   : > { %7893 = vmatpush.bf16.msrb.mxu3 %v7876_v61  ;;  %v8002_v24 = vunpack.c.l.b16 %v16152_v25  ;;  %v7859_v9 = vunpack.c.l.b16 %v5895_v42  ;;  %v5941_v44 = vpack.c.bf16 %v16129_v8, %v16129_v8  ;;  %v8294_v63 = vunpack.c.l.b16 %v5943_v52  ;;  %v16167_v38 = vld [vmem:[#allocation67_spill] sm:$0xff] }
 0xa06   : > { %8328 = vmatpush.bf16.msrb.mxu2 %v8311_v33  ;;  %8040 = vmatpush.bf16.msra.mxu1 %v8019_v49  ;;  %v8163_v56 = vpack.c.b16 %v8148_v53, %v8147_v29  ;;  %v7858_v45 = vunpack.c.l.b16 %v5894_v15  ;;  %v8293_v10 = vunpack.c.l.b16 %v5942_v40  ;;  %v7857_v2 = vunpack.c.l.b16 %v5893_v11  ;;  %v16159_v33 = vld [vmem:[#allocation48_spill] sm:$0xff] }
 0xa07   : > { %8185 = vmatpush.bf16.msra.mxu0 %v8164_v39  ;;  %v8018_v60 = vpack.c.b16 %v8003_v13, %v8002_v24  ;;  %6771 = vperm.xlu1 %9969, %v16153_v3   ;;  %v7874_v48 = vpack.c.b16 %v7860_v34, %v7859_v9  ;;  %v8309_v1 = vpack.c.b16 %v8295_v55, %v8294_v63  ;;  %v8292_v22 = vunpack.c.l.b16 %v5941_v44  ;;  %v16161_v13 = vld [vmem:[#allocation91_spill] sm:$0xff] }
 0xa08   : > { %v7873_v8 = vpack.c.b16 %v7858_v45, %v7857_v2  ;;  %v6069_v27 = vpop.xlane.xlu0 %6068  ;;  %v16170_v24 = vld [vmem:[#allocation95_spill] sm:$0xff] }
 0xa09   : > { %7894 = vmatpush.bf16.msrb.mxu3 %v7875_v36  ;;  %v8308_v26 = vpack.c.b16 %v8293_v10, %v8292_v22 }
 0xa0a   : > { %8329 = vmatpush.bf16.msrb.mxu2 %v8310_v16  ;;  %8041 = vmatpush.bf16.msra.mxu1 %v8018_v60  ;;  %v14383_v46 = vpop.xlane.xlu1 %6208 }
 0xa0b   : > { %8186 = vmatpush.bf16.msra.mxu0 %v8163_v56 }
 0xa0c   : > { %v6203_v43 = vpop.xlane.xlu2 %6202 }
 0xa0d   : > { %7895 = vmatpush.bf16.msrb.mxu3 %v7874_v48 }
 0xa0e   : > { %8330 = vmatpush.bf16.msrb.mxu2 %v8309_v1 }
 0xa0f   : > { %6616 = vperm.xlu1 %9969, %v16154_v62   ;;  %6756 = vperm.xlu0 %9968, %v16155_v51  }
 0xa10   : > { %v6005_v61 = vpop.xlane.xlu0 %6004 }
 0xa11   : > { %7896 = vmatpush.bf16.msrb.mxu3 %v7873_v8 }
 0xa12   : > { %8331 = vmatpush.bf16.msrb.mxu2 %v8308_v26  ;;  %v14388_v59 = vpop.xlane.xlu1 %6144 }
 0xa14   : > { %v6139_v50 = vpop.xlane.xlu2 %6138 }
 0xa17   : > { %6701 = vperm.xlu1 %9969, %v14290_v6   ;;  %6681 = vperm.xlu0 %9968, %v16157_v18   ;;  %v16160_v6 = vld [vmem:[#allocation73_spill] sm:$0xff] }
 0xa18   : > { %6676 = vperm.xlu2 %9970, %v16156_v54   ;;  %v6206_v7 = vpop.xlane.xlu0 %6205 }
 0xa1a   : > { %v6081_v21 = vpop.xlane.xlu1 %6080 }
 0xa1c   : > { %v6075_v57 = vpop.xlane.xlu2 %6074 }
 0xa1f   : > { %6541 = vperm.xlu1 %9969, %v14269_v14   ;;  %6521 = vperm.xlu0 %9968, %v16159_v33   ;;  %v16163_v14 = vld [vmem:[#allocation92_spill] sm:$0xff] }
 0xa20   : > { %6516 = vperm.xlu2 %9970, %v16158_v20   ;;  %v6142_v58 = vpop.xlane.xlu0 %6141 }
 0xa22   : > { %v14396_v42 = vpop.xlane.xlu1 %6016 }
 0xa24   : > { %v6011_v23 = vpop.xlane.xlu2 %6010 }
 0xa27   : > { %6626 = vperm.xlu1 %9969, %v14349_v0   ;;  %6766 = vperm.xlu0 %9968, %v16161_v13   ;;  %v16165_v0 = vld [vmem:[#allocation69_spill] sm:$0xff] }
 0xa28   : > { %6601 = vperm.xlu2 %9970, %v16160_v6   ;;  %v6078_v49 = vpop.xlane.xlu0 %6077 }
 0xa2a   : > { %v6218_v32 = vpop.xlane.xlu1 %6217 }
 0xa2c   : > { %v6212_v52 = vpop.xlane.xlu2 %6211 }
 0xa2f   : > { %6706 = vperm.xlu1 %9969, %v6133_v30   ;;  %6691 = vperm.xlu0 %9968, %v16163_v14  }
 0xa30   : > { %6686 = vperm.xlu2 %9970, %v16162_v35   ;;  %v6014_v28 = vpop.xlane.xlu0 %6013 }
 0xa32   : > { %v14405_v53 = vpop.xlane.xlu1 %6153 }
 0xa34   : > { %v14407_v39 = vpop.xlane.xlu2 %6147 }
 0xa37   : > { %6636 = vperm.xlu1 %9969, %v14333_v41   ;;  %6531 = vperm.xlu0 %9968, %v16165_v0   ;;  %v16168_v41 = vld [vmem:[#allocation74_spill] sm:$0xff] }
 0xa38   : > { %6611 = vperm.xlu2 %9970, %v16164_v4   ;;  %v14411_v15 = vpop.xlane.xlu0 %6214 }
 0xa3a   : > { %v6090_v34 = vpop.xlane.xlu1 %6089 }
 0xa3c   : > { %v6084_v36 = vpop.xlane.xlu2 %6083 }
 0xa3f   : > { %6646 = vperm.xlu1 %9969, %v6078_v49   ;;  %6776 = vperm.xlu0 %9968, %v14234_v19  }
 0xa40   : > { %6696 = vperm.xlu2 %9970, %v16166_v37   ;;  %v6151_v19 = vpop.xlane.xlu0 %6150  ;;  %v16173_v37 = vld [vmem:[#allocation42_spill] sm:$0xff] }
 0xa44   : > { %v6592_v40 = vpop.permute.xlu2 %6591 }
 0xa47   : > { %6566 = vperm.xlu1 %9969, %v6011_v23   ;;  %6621 = vperm.xlu0 %9968, %v16168_v41   ;;  %v14415_v25 = vpop.permute.xlu1 %6511 }
 0xa48   : > { %6536 = vperm.xlu2 %9970, %v16167_v38   ;;  %v14418_v55 = vpop.xlane.xlu0 %6086 }
 0xa4f   : > { %6651 = vperm.xlu1 %9969, %v6081_v21   ;;  %6546 = vperm.xlu0 %9968, %v16169_v31   ;;  %v14420_v16 = vpop.permute.xlu1 %6751 }
 0xa50   : > { %6781 = vperm.xlu2 %9970, %v14325_v17   ;;  %v14424_v17 = vpop.permute.xlu0 %6671 }
 0xa57   : > { %6571 = vperm.xlu1 %9969, %v6014_v28   ;;  %6786 = vperm.xlu0 %9968, %v16170_v24   ;;  %v6597_v11 = vpop.permute.xlu1 %6596 }
 0xa58   : > { %6631 = vperm.xlu2 %9970, %v6069_v27  }
 0xa5f   : > { %6711 = vperm.xlu0 %9968, %v14280_v47  }
 0xa60   : > { %6551 = vperm.xlu2 %9970, %v14379_v5  }
 0xa61   : > { %v14428_v44 = vpop.permute.xlu1 %6761 }
 0xa63   : > { %v6020_v29 = vpop.xlane.xlu2 %6019 }
 0xa64   : > { %6581 = vperm.xlu1 %9969, %v6020_v29  }
 0xa66   : > { %v14426_v60 = vpop.xlane.xlu0 %6022 }
 0xa67   : > { %6716 = vperm.xlu0 %9968, %v6139_v50  }
 0xa68   : > { %6791 = vperm.xlu2 %9970, %v6203_v43  }
 0xa69   : > { %v6607_v56 = vpop.permute.xlu1 %6606 }
 0xa6a   : > { %v6364_v1 = vpop.f32.mrf.mxu1 }
 0xa6b   : > { %v6221_v30 = vpop.xlane.xlu2 %6220  ;;  %v14450_v8 = vperm.slane %v6364_v1, 0 }
 0xa6c   : > { %6666 = vperm.xlu1 %9969, %v6090_v34  }
 0xa6d   : > { %v6849_v26 = vadd.f32 %v14450_v8, %v6592_v40  ;;  %v6850_v54 = vadd.f32 %v14450_v8, %v6597_v11  ;;  %v6852_v21 = vadd.f32 %v14450_v8, %v6607_v56  ;;  %v6435_v6 = vpop.f32.mrf.mxu0 }
 0xa6e   : > { %v6224_v47 = vpop.xlane.xlu0 %6223  ;;  %v14479_v14 = vperm.slane %v6435_v6, 0 }
 0xa6f   : > { %6556 = vperm.xlu0 %9968, %v6005_v61   ;;  %v6914_v20 = vmul.f32 0.2, %v6850_v54  ;;  %v6916_v35 = vmul.f32 0.2, %v6852_v21 }
 0xa70   : > { %6641 = vperm.xlu2 %9970, %v6075_v57   ;;  %v6865_v29 = vadd.f32 %v14479_v14, %v14424_v17 }
 0xa71   : > { %v14437_v48 = vpop.permute.xlu1 %6526  ;;  %v6980_v4 = vmax.f32 %v6852_v21, %v6916_v35 }
 0xa72   : > { %v6929_v56 = vmul.f32 0.2, %v6865_v29 }
 0xa73   : > { %v6157_v9 = vpop.xlane.xlu2 %6156  ;;  %v14491_v28 = vadd.f32 %v16173_v37, %v6980_v4 }
 0xa74   : > { %6746 = vperm.xlu1 %9969, %v6157_v9   ;;  %v16176_v9 = vld [vmem:[#allocation43_spill] sm:$0xff] }
 0xa75   : > { %16174 = vst [vmem:[#allocation76_spill] sm:$0xff] %v14491_v28 }
 0xa77   : > { %6796 = vperm.xlu0 %9968, %v6206_v7   ;;  %v6978_v7 = vmax.f32 %v6850_v54, %v6914_v20  ;;  %v6293_v24 = vpop.f32.mrf.mxu3  ;;  %v6993_v54 = vmax.f32 %v6865_v29, %v6929_v56 }
 0xa78   : > { %6561 = vperm.xlu2 %9970, %v14377_v12   ;;  %v14511_v11 = vperm.slane %v6293_v24, 0 }
 0xa79   : > { %v14446_v5 = vpop.permute.xlu1 %6771 }
 0xa7b   : > { %v14431_v3 = vpop.permute.xlu2 %6676 }
 0xa7c   : > { %6826 = vperm.xlu1 %9969, %v6224_v47  }
 0xa7f   : > { %6721 = vperm.xlu0 %9968, %v6142_v58   ;;  %v16172_v58 = vld [vmem:[#allocation53_spill] sm:$0xff] }
 0xa80   : > { %6656 = vperm.xlu2 %9970, %v6084_v36  }
 0xa81   : > { %v14433_v63 = vpop.permute.xlu0 %6756  ;;  %v14457_v51 = vpop.permute.xlu1 %6616 }
 0xa83   : > { %v14435_v45 = vpop.permute.xlu2 %6516 }
 0xa87   : > { %6801 = vperm.xlu0 %9968, %v14383_v46   ;;  %v6913_v46 = vmul.f32 0.2, %v6849_v26 }
 0xa88   : > { %6736 = vperm.xlu2 %9970, %v6151_v19  }
 0xa89   : > { %v14440_v10 = vpop.permute.xlu0 %6681  ;;  %v6977_v43 = vmax.f32 %v6849_v26, %v6913_v46  ;;  %v14467_v33 = vpop.permute.xlu1 %6701 }
 0xa8a   : > { %v6506_v46 = vpop.f32.mrf.mxu2  ;;  %v6867_v17 = vadd.f32 %v14479_v14, %v14440_v10 }
 0xa8b   : > { %v14442_v12 = vpop.permute.xlu2 %6601  ;;  %v14530_v21 = vperm.slane %v6506_v46, 0 }
 0xa8d   : > { %v6882_v10 = vadd.f32 %v14530_v21, %v14433_v63 }
 0xa8f   : > { %6726 = vperm.xlu0 %9968, %v14388_v59   ;;  %v16171_v59 = vld [vmem:[#allocation45_spill] sm:$0xff] }
 0xa90   : > { %6576 = vperm.xlu2 %9970, %v14396_v42   ;;  %v14465_v50 = vadd.f32 %v16171_v59, %v6977_v43  ;;  %v14477_v42 = vadd.f32 %v16172_v58, %v6978_v7  ;;  %v14536_v35 = vadd.f32 %v16171_v59, %v6993_v54  ;;  %v6851_v54 = vadd.f32 %v14450_v8, %v14442_v12 }
 0xa91   : > { %v14448_v2 = vpop.permute.xlu0 %6521  ;;  %v14482_v23 = vpop.permute.xlu1 %6541 }
 0xa93   : > { %v6687_v22 = vpop.permute.xlu2 %6686 }
 0xa94   : > { %v6868_v49 = vadd.f32 %v14479_v14, %v6687_v22  ;;  %v6833_v22 = vadd.f32 %v14511_v11, %v14415_v25  ;;  %v6931_v25 = vmul.f32 0.2, %v6867_v17 }
 0xa96   : > { %v6897_v7 = vmul.f32 0.2, %v6833_v22 }
 0xa97   : > { %6806 = vperm.xlu0 %9968, %v6212_v52   ;;  %v6932_v52 = vmul.f32 0.2, %v6868_v49 }
 0xa98   : > { %6816 = vperm.xlu2 %9970, %v6218_v32  }
 0xa99   : > { %v14453_v62 = vpop.permute.xlu0 %6766  ;;  %v14496_v38 = vpop.permute.xlu1 %6626 }
 0xa9b   : > { %v14455_v27 = vpop.permute.xlu2 %6611 }
 0xa9f   : > { %6731 = vperm.xlu0 %9968, %v14407_v39  }
 0xaa0   : > { %6741 = vperm.xlu2 %9970, %v14405_v53   ;;  %v6996_v53 = vmax.f32 %v6868_v49, %v6932_v52  ;;  %v6961_v49 = vmax.f32 %v6833_v22, %v6897_v7  ;;  %v6995_v52 = vmax.f32 %v6867_v17, %v6931_v25 }
 0xaa1   : > { %v14462_v18 = vpop.permute.xlu0 %6691 }
 0xaa2   : > { %v14501_v36 = vadd.f32 %v16173_v37, %v6996_v53  ;;  %v6853_v53 = vadd.f32 %v14450_v8, %v14455_v27  ;;  %v6835_v27 = vadd.f32 %v14511_v11, %v14448_v2  ;;  %v6869_v22 = vadd.f32 %v14479_v14, %v14462_v18 }
 0xaa3   : > { %v6697_v61 = vpop.permute.xlu2 %6696 }
 0xaa4   : > { %v6870_v39 = vadd.f32 %v14479_v14, %v6697_v61  ;;  %16175 = vst [vmem:[#allocation70_spill] sm:$0xff] %v14501_v36  ;;  %v16177_v61 = vld [vmem:[#allocation64_spill] sm:$0xff]  ;;  %v6917_v63 = vmul.f32 0.2, %v6853_v53  ;;  %v6899_v7 = vmul.f32 0.2, %v6835_v27 }
 0xaa5   : > { %v6933_v2 = vmul.f32 0.2, %v6869_v22 }
 0xaa6   : > { %7121 = vmax.xlane.f32.xlu1 %v14465_v50  ;;  %v6934_v34 = vmul.f32 0.2, %v6870_v39 }
 0xaa7   : > { %6811 = vperm.xlu0 %9968, %v14411_v15  }
 0xaa8   : > { %6821 = vperm.xlu2 %9970, %v6221_v30   ;;  %v6998_v31 = vmax.f32 %v6870_v39, %v6934_v34  ;;  %v14513_v30 = vpop.permute.xlu1 %6706  ;;  %v6946_v34 = vmul.f32 0.2, %v6882_v10 }
 0xaa9   : > { %v14472_v57 = vpop.permute.xlu0 %6531 }
 0xaaa   : > { %v14516_v47 = vadd.f32 %v16176_v9, %v6998_v31  ;;  %v14548_v31 = vadd.f32 %v16171_v59, %v6961_v49 }
 0xaab   : > { %v14474_v13 = vpop.permute.xlu2 %6536 }
 0xaac   : > { %16179 = vst [vmem:[#allocation75_spill] sm:$0xff] %v14548_v31 }
 0xaae   : > { %7123 = vmax.xlane.f32.xlu1 %v14477_v42 }
 0xaaf   : > { %6661 = vperm.xlu0 %9968, %v14418_v55  }
 0xab0   : > { %v14532_v6 = vpop.permute.xlu1 %6636 }
 0xab1   : > { %v14486_v0 = vpop.permute.xlu0 %6776 }
 0xab2   : > { %v6886_v18 = vadd.f32 %v14530_v21, %v14486_v0 }
 0xab3   : > { %v14488_v32 = vpop.permute.xlu2 %6781 }
 0xab6   : > { %7127 = vmax.xlane.f32.xlu1 %v14491_v28 }
 0xab7   : > { %6586 = vperm.xlu0 %9968, %v14426_v60  }
 0xab8   : > { %v14556_v56 = vpop.permute.xlu1 %6646 }
 0xab9   : > { %v6622_v41 = vpop.permute.xlu0 %6621 }
 0xaba   : > { %v6855_v19 = vadd.f32 %v14450_v8, %v6622_v41  ;;  %v6866_v41 = vadd.f32 %v14479_v14, %v14431_v3 }
 0xabb   : > { %v14498_v15 = vpop.permute.xlu2 %6631 }
 0xabc   : > { %v6919_v60 = vmul.f32 0.2, %v6855_v19  ;;  %v6930_v29 = vmul.f32 0.2, %v6866_v41 }
 0xabe   : > { %7159 = vmax.xlane.f32.xlu1 %v14501_v36  ;;  %v6983_v1 = vmax.f32 %v6855_v19, %v6919_v60  ;;  %v16180_v19 = vld [vmem:[#allocation50_spill] sm:$0xff]  ;;  %v7010_v60 = vmax.f32 %v6882_v10, %v6946_v34  ;;  %v6994_v17 = vmax.f32 %v6866_v41, %v6930_v29  ;;  %v6857_v29 = vadd.f32 %v14450_v8, %v14498_v15 }
 0xabf   : > { %v14552_v24 = vadd.f32 %v16180_v19, %v6995_v52  ;;  %v16183_v10 = vld [vmem:[#allocation66_spill] sm:$0xff]  ;;  %v6915_v52 = vmul.f32 0.2, %v6851_v54 }
 0xac0   : > { %v14528_v20 = vadd.f32 %v16177_v61, %v6983_v1  ;;  %v6981_v1 = vmax.f32 %v6853_v53, %v6917_v63  ;;  %v14564_v25 = vadd.f32 %v16172_v58, %v7010_v60  ;;  %v6963_v53 = vmax.f32 %v6835_v27, %v6899_v7  ;;  %v14576_v12 = vpop.permute.xlu1 %6566 }
 0xac1   : > { %v14505_v40 = vpop.permute.xlu0 %6546  ;;  %16181 = vst [vmem:[#allocation44_spill] sm:$0xff] %v14552_v24  ;;  %v14573_v41 = vadd.f32 %v16172_v58, %v6994_v17  ;;  %v6997_v63 = vmax.f32 %v6869_v22, %v6933_v2  ;;  %v6854_v27 = vadd.f32 %v14450_v8, %v14457_v51  ;;  %v6979_v0 = vmax.f32 %v6851_v54, %v6915_v52 }
 0xac2   : > { %16178 = vst [vmem:[#allocation57_spill] sm:$0xff] %v14528_v20  ;;  %v14568_v49 = vadd.f32 %v16183_v10, %v6981_v1  ;;  %v6950_v1 = vmul.f32 0.2, %v6886_v18  ;;  %v14586_v17 = vadd.f32 %v16180_v19, %v6963_v53  ;;  %v6921_v7 = vmul.f32 0.2, %v6857_v29 }
 0xac3   : > { %v14507_v55 = vpop.permute.xlu2 %6551  ;;  %16182 = vst [vmem:[#allocation41_spill] sm:$0xff] %v14564_v25  ;;  %v6918_v22 = vmul.f32 0.2, %v6854_v27 }
 0xac4   : > { %16184 = vst [vmem:[#allocation49_spill] sm:$0xff] %v14586_v17  ;;  %v7014_v2 = vmax.f32 %v6886_v18, %v6950_v1  ;;  %v6985_v54 = vmax.f32 %v6857_v29, %v6921_v7 }
 0xac6   : > { %7163 = vmax.xlane.f32.xlu1 %v14516_v47 }
 0xac8   : > { %v14603_v18 = vpop.permute.xlu1 %6651 }
 0xac9   : > { %v14521_v26 = vpop.permute.xlu0 %6786 }
 0xacb   : > { %v14525_v43 = vpop.permute.xlu2 %6791 }
 0xace   : > { %7133 = vmax.xlane.f32.xlu1 %v14528_v20  ;;  %v14594_v20 = vadd.f32 %v16180_v19, %v6979_v0  ;;  %v14606_v0 = vadd.f32 %v16176_v9, %v7014_v2 }
 0xad0   : > { %16186 = vst [vmem:[#allocation88_spill] sm:$0xff] %v14594_v20 }
 0xad1   : > { %7153 = vmax.xlane.f32.xlu2 %v14536_v35  ;;  %v6712_v4 = vpop.permute.xlu0 %6711  ;;  %16187 = vst [vmem:[#allocation80_spill] sm:$0xff] %v14606_v0 }
 0xad2   : > { %v6873_v52 = vadd.f32 %v14479_v14, %v6712_v4 }
 0xad3   : > { %v14543_v39 = vpop.permute.xlu2 %6641 }
 0xad4   : > { %v6937_v1 = vmul.f32 0.2, %v6873_v52 }
 0xad6   : > { %7089 = vmax.xlane.f32.xlu1 %v14548_v31  ;;  %v16188_v31 = vld [vmem:[#allocation59_spill] sm:$0xff] }
 0xad7   : > { %v14610_v36 = vadd.f32 %v16188_v31, %v6985_v54  ;;  %v6871_v54 = vadd.f32 %v14479_v14, %v14467_v33 }
 0xad9   : > { %7157 = vmax.xlane.f32.xlu2 %v14552_v24  ;;  %v6717_v3 = vpop.permute.xlu0 %6716  ;;  %16189 = vst [vmem:[#allocation55_spill] sm:$0xff] %v14610_v36 }
 0xada   : > { %v6874_v2 = vadd.f32 %v14479_v14, %v6717_v3 }
 0xadb   : > { %v6562_v46 = vpop.permute.xlu2 %6561 }
 0xadc   : > { %v6843_v4 = vadd.f32 %v14511_v11, %v6562_v46  ;;  %v16191_v46 = vld [vmem:[#allocation58_spill] sm:$0xff] }
 0xade   : > { %7187 = vmax.xlane.f32.xlu1 %v14564_v25  ;;  %v14590_v25 = vadd.f32 %v16183_v10, %v6997_v63  ;;  %v6856_v63 = vadd.f32 %v14450_v8, %v14496_v38  ;;  %v6907_v24 = vmul.f32 0.2, %v6843_v4 }
 0xae0   : > { %16185 = vst [vmem:[#allocation60_spill] sm:$0xff] %v14590_v25  ;;  %v6920_v29 = vmul.f32 0.2, %v6856_v63  ;;  %v6971_v3 = vmax.f32 %v6843_v4, %v6907_v24  ;;  %v6872_v24 = vadd.f32 %v14479_v14, %v14513_v30 }
 0xae1   : > { %7129 = vmax.xlane.f32.xlu2 %v14568_v49  ;;  %7155 = vmax.xlane.f32.xlu0 %v14573_v41  ;;  %v6557_v34 = vpop.permute.xlu0 %6556 }
 0xae2   : > { %v6842_v15 = vadd.f32 %v14511_v11, %v6557_v34 }
 0xae3   : > { %v14581_v60 = vpop.permute.xlu2 %6656 }
 0xae4   : > { %v6906_v34 = vmul.f32 0.2, %v6842_v15 }
 0xae6   : > { %7093 = vmax.xlane.f32.xlu1 %v14586_v17  ;;  %v6982_v17 = vmax.f32 %v6854_v27, %v6918_v22  ;;  %v6970_v7 = vmax.f32 %v6842_v15, %v6906_v34  ;;  %v7001_v22 = vmax.f32 %v6873_v52, %v6937_v1  ;;  %v6938_v34 = vmul.f32 0.2, %v6874_v2 }
 0xae7   : > { %v6935_v52 = vmul.f32 0.2, %v6871_v54 }
 0xae8   : > { %v14614_v27 = vadd.f32 %v16176_v9, %v6982_v17  ;;  %v14624_v15 = vadd.f32 %v16191_v46, %v6970_v7  ;;  %v14626_v17 = vpop.permute.xlu1 %6571 }
 0xae9   : > { %7161 = vmax.xlane.f32.xlu2 %v14590_v25  ;;  %7125 = vmax.xlane.f32.xlu0 %v14594_v20  ;;  %v14598_v51 = vpop.permute.xlu0 %6796  ;;  %v6984_v25 = vmax.f32 %v6856_v63, %v6920_v29  ;;  %v6859_v63 = vadd.f32 %v14450_v8, %v14543_v39  ;;  %v7002_v29 = vmax.f32 %v6874_v2, %v6938_v34  ;;  %v6936_v20 = vmul.f32 0.2, %v6872_v24 }
 0xaea   : > { %16190 = vst [vmem:[#allocation79_spill] sm:$0xff] %v14614_v27 }
 0xaeb   : > { %v6737_v53 = vpop.permute.xlu2 %6736  ;;  %16192 = vst [vmem:[#allocation47_spill] sm:$0xff] %v14624_v15 }
 0xaec   : > { %v6878_v1 = vadd.f32 %v14479_v14, %v6737_v53  ;;  %v16196_v53 = vld [vmem:[#allocation54_spill] sm:$0xff] }
 0xaee   : > { %7195 = vmax.xlane.f32.xlu1 %v14606_v0  ;;  %v6942_v4 = vmul.f32 0.2, %v6878_v1 }
 0xaf0   : > { %v7006_v39 = vmax.f32 %v6878_v1, %v6942_v4  ;;  %v16201_v4 = vld [vmem:[#allocation82_spill] sm:$0xff] }
 0xaf1   : > { %7137 = vmax.xlane.f32.xlu2 %v14610_v36  ;;  %7131 = vmax.xlane.f32.xlu0 %v14614_v27  ;;  %v6722_v38 = vpop.permute.xlu0 %6721  ;;  %v14630_v36 = vadd.f32 %v16188_v31, %v7001_v22  ;;  %v16194_v27 = vld [vmem:[#allocation51_spill] sm:$0xff]  ;;  %v6999_v22 = vmax.f32 %v6871_v54, %v6935_v52 }
 0xaf2   : > { %v14634_v28 = vadd.f32 %v16194_v27, %v6984_v25  ;;  %v14647_v25 = vpop.permute.xlu1 %6581 }
 0xaf3   : > { %v14619_v0 = vpop.permute.xlu2 %6576  ;;  %16193 = vst [vmem:[#allocation81_spill] sm:$0xff] %v14630_v36  ;;  %v14655_v54 = vadd.f32 %v16177_v61, %v6999_v22 }
 0xaf4   : > { %16195 = vst [vmem:[#allocation78_spill] sm:$0xff] %v14634_v28 }
 0xaf5   : > { %16198 = vst [vmem:[#allocation93_spill] sm:$0xff] %v14647_v25 }
 0xaf6   : > { %7107 = vmax.xlane.f32.xlu1 %v14624_v15  ;;  %v14645_v15 = vadd.f32 %v16196_v53, %v6971_v3 }
 0xaf8   : > { %16197 = vst [vmem:[#allocation71_spill] sm:$0xff] %v14645_v15 }
 0xaf9   : > { %7169 = vmax.xlane.f32.xlu2 %v14630_v36  ;;  %7135 = vmax.xlane.f32.xlu0 %v14634_v28  ;;  %v14638_v33 = vpop.permute.xlu0 %6801  ;;  %v6923_v36 = vmul.f32 0.2, %v6859_v63  ;;  %v14651_v28 = vadd.f32 %v16191_v46, %v7002_v29  ;;  %v6858_v29 = vadd.f32 %v14450_v8, %v14532_v6 }
 0xafb   : > { %v6817_v7 = vpop.permute.xlu2 %6816  ;;  %16199 = vst [vmem:[#allocation94_spill] sm:$0xff] %v14651_v28  ;;  %v6987_v34 = vmax.f32 %v6859_v63, %v6923_v36  ;;  %v6922_v25 = vmul.f32 0.2, %v6858_v29  ;;  %v14671_v36 = vpop.permute.xlu1 %6666 }
 0xafc   : > { %v6894_v2 = vadd.f32 %v14530_v21, %v6817_v7  ;;  %v14665_v7 = vadd.f32 %v16201_v4, %v7006_v39  ;;  %16204 = vst [vmem:[#allocation61_spill] sm:$0xff] %v14671_v36  ;;  %v6881_v39 = vadd.f32 %v14530_v21, %v14420_v16 }
 0xafe   : > { %7109 = vmax.xlane.f32.xlu1 %v14645_v15  ;;  %v7000_v15 = vmax.f32 %v6872_v24, %v6936_v20  ;;  %v6958_v1 = vmul.f32 0.2, %v6894_v2  ;;  %16202 = vst [vmem:[#allocation85_spill] sm:$0xff] %v14665_v7 }
 0xb00   : > { %v7022_v63 = vmax.f32 %v6894_v2, %v6958_v1  ;;  %v16207_v1 = vld [vmem:[#allocation62_spill] sm:$0xff] }
 0xb01   : > { %7171 = vmax.xlane.f32.xlu2 %v14651_v28  ;;  %7165 = vmax.xlane.f32.xlu0 %v14655_v54  ;;  %v6727_v30 = vpop.permute.xlu0 %6726  ;;  %v14669_v28 = vadd.f32 %v16196_v53, %v6987_v34  ;;  %v6986_v34 = vmax.f32 %v6858_v29, %v6922_v25  ;;  %v6836_v29 = vadd.f32 %v14511_v11, %v14437_v48 }
 0xb02   : > { %v6876_v3 = vadd.f32 %v14479_v14, %v6727_v30  ;;  %v14674_v30 = vadd.f32 %v16194_v27, %v7000_v15  ;;  %v14685_v2 = vadd.f32 %v16201_v4, %v7022_v63  ;;  %v6860_v63 = vadd.f32 %v14450_v8, %v14556_v56 }
 0xb03   : > { %v14659_v52 = vpop.permute.xlu2 %6741  ;;  %16203 = vst [vmem:[#allocation77_spill] sm:$0xff] %v14669_v28  ;;  %v14692_v36 = vadd.f32 %v16191_v46, %v6986_v34  ;;  %v14695_v16 = vpop.permute.xlu1 %6746 }
 0xb04   : > { %16200 = vst [vmem:[#allocation84_spill] sm:$0xff] %v14659_v52  ;;  %v6940_v22 = vmul.f32 0.2, %v6876_v3 }
 0xb05   : > { %16205 = vst [vmem:[#allocation89_spill] sm:$0xff] %v14674_v30 }
 0xb06   : > { %7179 = vmax.xlane.f32.xlu1 %v14665_v7  ;;  %v7004_v6 = vmax.f32 %v6876_v3, %v6940_v22  ;;  %v6875_v7 = vadd.f32 %v14479_v14, %v6722_v38  ;;  %16206 = vst [vmem:[#allocation46_spill] sm:$0xff] %v14685_v2 }
 0xb07   : > { %16209 = vst [vmem:[#allocation83_spill] sm:$0xff] %v14692_v36 }
 0xb08   : > { %v6939_v3 = vmul.f32 0.2, %v6875_v7 }
 0xb09   : > { %7141 = vmax.xlane.f32.xlu2 %v14669_v28  ;;  %7167 = vmax.xlane.f32.xlu0 %v14674_v30  ;;  %v14678_v20 = vpop.permute.xlu0 %6806  ;;  %v14689_v28 = vadd.f32 %v16207_v1, %v7004_v6  ;;  %v6945_v30 = vmul.f32 0.2, %v6881_v39 }
 0xb0a   : > { %v7003_v6 = vmax.f32 %v6875_v7, %v6939_v3  ;;  %v6883_v7 = vadd.f32 %v14530_v21, %v14428_v44  ;;  %v6884_v44 = vadd.f32 %v14530_v21, %v14453_v62 }
 0xb0b   : > { %v6822_v24 = vpop.permute.xlu2 %6821  ;;  %16208 = vst [vmem:[#allocation65_spill] sm:$0xff] %v14689_v28  ;;  %v7009_v25 = vmax.f32 %v6881_v39, %v6945_v30  ;;  %v6834_v30 = vadd.f32 %v14511_v11, %v14435_v45  ;;  %v14722_v39 = vpop.permute.xlu1 %6826 }
 0xb0c   : > { %v6895_v52 = vadd.f32 %v14530_v21, %v6822_v24 }
 0xb0d   : > { %v14709_v34 = vadd.f32 %v16171_v59, %v7009_v25  ;;  %v6898_v25 = vmul.f32 0.2, %v6834_v30 }
 0xb0e   : > { %v6959_v15 = vmul.f32 0.2, %v6895_v52  ;;  %7211 = vmax.xlane.f32.xlu1 %v14685_v2  ;;  %v6924_v2 = vmul.f32 0.2, %v6860_v63 }
 0xb10   : > { %v7023_v22 = vmax.f32 %v6895_v52, %v6959_v15  ;;  %v16210_v52 = vld [vmem:[#allocation86_spill] sm:$0xff]  ;;  %v6900_v15 = vmul.f32 0.2, %v6836_v29  ;;  %v6988_v59 = vmax.f32 %v6860_v63, %v6924_v2  ;;  %v6962_v2 = vmax.f32 %v6834_v30, %v6898_v25 }
 0xb11   : > { %7175 = vmax.xlane.f32.xlu2 %v14689_v28  ;;  %7139 = vmax.xlane.f32.xlu0 %v14692_v36  ;;  %v14698_v38 = vpop.permute.xlu0 %6731  ;;  %v14712_v28 = vadd.f32 %v16196_v53, %v7003_v6  ;;  %v6838_v63 = vadd.f32 %v14511_v11, %v14474_v13 }
 0xb12   : > { %v14705_v24 = vadd.f32 %v16210_v52, %v7023_v22  ;;  %v6964_v56 = vmax.f32 %v6836_v29, %v6900_v15  ;;  %v6947_v22 = vmul.f32 0.2, %v6883_v7  ;;  %v14728_v6 = vadd.f32 %v16207_v1, %v6988_v59 }
 0xb13   : > { %16212 = vst [vmem:[#allocation48_spill] sm:$0xff] %v14712_v28  ;;  %v6902_v59 = vmul.f32 0.2, %v6838_v63 }
 0xb14   : > { %16211 = vst [vmem:[#allocation87_spill] sm:$0xff] %v14705_v24  ;;  %v14725_v3 = vadd.f32 %v16173_v37, %v6964_v56  ;;  %v7011_v45 = vmax.f32 %v6883_v7, %v6947_v22  ;;  %v6948_v56 = vmul.f32 0.2, %v6884_v44  ;;  %v6837_v7 = vadd.f32 %v14511_v11, %v14472_v57 }
 0xb15   : > { %16213 = vst [vmem:[#allocation73_spill] sm:$0xff] %v14728_v6  ;;  %v6966_v30 = vmax.f32 %v6838_v63, %v6902_v59 }
 0xb16   : > { %7213 = vmax.xlane.f32.xlu1 %v14705_v24  ;;  %v14739_v24 = vadd.f32 %v16180_v19, %v7011_v45  ;;  %v7012_v62 = vmax.f32 %v6884_v44, %v6948_v56  ;;  %v6840_v19 = vadd.f32 %v14511_v11, %v14505_v40  ;;  %v6901_v45 = vmul.f32 0.2, %v6837_v7 }
 0xb17   : > { %v14758_v57 = vadd.f32 %v16176_v9, %v6966_v30 }
 0xb18   : > { %v6904_v44 = vmul.f32 0.2, %v6840_v19  ;;  %v6965_v40 = vmax.f32 %v6837_v7, %v6901_v45 }
 0xb19   : > { %7185 = vmax.xlane.f32.xlu2 %v14709_v34  ;;  %7173 = vmax.xlane.f32.xlu0 %v14712_v28  ;;  %v14716_v48 = vpop.permute.xlu0 %6811  ;;  %v7122_v15 = vpop.xlane.xlu1 %7121  ;;  %v14742_v28 = vadd.f32 %v16172_v58, %v6962_v2 }
 0xb1a   : > { %v7233_v22 = vsub.f32 %v14465_v50, %v7122_v15  ;;  %v6885_v50 = vadd.f32 %v14530_v21, %v14446_v5  ;;  %v6968_v15 = vmax.f32 %v6840_v19, %v6904_v44  ;;  %v14771_v59 = vadd.f32 %v16183_v10, %v6965_v40 }
 0xb1c   : > { %v7313_v56 = vmul.f32 1.442695, %v7233_v22  ;;  %v6949_v9 = vmul.f32 0.2, %v6885_v50  ;;  %v14776_v30 = vadd.f32 %v16194_v27, %v6968_v15  ;;  %v6888_v22 = vadd.f32 %v14530_v21, %v14521_v26 }
 0xb1d   : > { %v6889_v26 = vadd.f32 %v14530_v21, %v14525_v43  ;;  %v6890_v43 = vadd.f32 %v14530_v21, %v14598_v51  ;;  %v6891_v51 = vadd.f32 %v14530_v21, %v14638_v33 }
 0xb1e   : > { %10242 = vpow2.f32 %v7313_v56  ;;  %v7013_v7 = vmax.f32 %v6885_v50, %v6949_v9  ;;  %v6841_v50 = vadd.f32 %v14511_v11, %v14507_v55 }
 0xb20   : > { %v14788_v45 = vadd.f32 %v16183_v10, %v7013_v7  ;;  %v6905_v15 = vmul.f32 0.2, %v6841_v50  ;;  %v6953_v7 = vmul.f32 0.2, %v6889_v26 }
 0xb21   : > { %7095 = vmax.xlane.f32.xlu2 %v14725_v3  ;;  %7143 = vmax.xlane.f32.xlu0 %v14728_v6  ;;  %v14732_v29 = vpop.permute.xlu0 %6661  ;;  %v14752_v58 = vpop.xlane.xlu1 %7123  ;;  %v14755_v6 = vadd.f32 %v16173_v37, %v7012_v62  ;;  %v6887_v37 = vadd.f32 %v14530_v21, %v14488_v32  ;;  %v6839_v32 = vadd.f32 %v14511_v11, %v14482_v23 }
 0xb22   : > { %v6969_v55 = vmax.f32 %v6841_v50, %v6905_v15 }
 0xb23   : > { %v6951_v62 = vmul.f32 0.2, %v6887_v37 }
 0xb24   : > { %v14779_v5 = vpop.eup %10242 }
 0xb25   : > { %v7015_v19 = vmax.f32 %v6887_v37, %v6951_v62 }
 0xb27   : > { %v14791_v44 = vadd.f32 %v16177_v61, %v7015_v19 }
 0xb29   : > { %7189 = vmax.xlane.f32.xlu2 %v14739_v24  ;;  %7091 = vmax.xlane.f32.xlu0 %v14742_v28  ;;  %v6587_v36 = vpop.permute.xlu0 %6586 }
 0xb2a   : > { %v6848_v13 = vadd.f32 %v14511_v11, %v6587_v36  ;;  %v16214_v36 = vld [vmem:[#allocation90_spill] sm:$0xff] }
 0xb2c   : > { %v6912_v25 = vmul.f32 0.2, %v6848_v13 }
 0xb2e   : > { %v6976_v2 = vmax.f32 %v6848_v13, %v6912_v25  ;;  %v14773_v13 = vpop.xlane.xlu1 %7127  ;;  %v6903_v25 = vmul.f32 0.2, %v6839_v32 }
 0xb30   : > { %v14762_v63 = vadd.f32 %v16214_v36, %v6976_v2  ;;  %v6952_v2 = vmul.f32 0.2, %v6888_v22  ;;  %v6967_v23 = vmax.f32 %v6839_v32, %v6903_v25  ;;  %v7017_v32 = vmax.f32 %v6889_v26, %v6953_v7 }
 0xb31   : > { %7191 = vmax.xlane.f32.xlu2 %v14755_v6  ;;  %7099 = vmax.xlane.f32.xlu0 %v14758_v57 }
 0xb32   : > { %16215 = vst [vmem:[#allocation91_spill] sm:$0xff] %v14762_v63  ;;  %7119 = vmax.xlane.f32.xlu1 %v14762_v63  ;;  %v7016_v40 = vmax.f32 %v6888_v22, %v6952_v2  ;;  %v14803_v62 = vadd.f32 %v16177_v61, %v6967_v23  ;;  %v14819_v2 = vadd.f32 %v16188_v31, %v6969_v55 }
 0xb33   : > { %v14823_v50 = vadd.f32 %v16188_v31, %v7017_v32  ;;  %v6955_v31 = vmul.f32 0.2, %v6891_v51 }
 0xb34   : > { %v14806_v19 = vadd.f32 %v16194_v27, %v7016_v40  ;;  %v6954_v27 = vmul.f32 0.2, %v6890_v43  ;;  %v6892_v40 = vadd.f32 %v14530_v21, %v14678_v20 }
 0xb35   : > { %v7019_v20 = vmax.f32 %v6891_v51, %v6955_v31  ;;  %v6845_v31 = vadd.f32 %v14511_v11, %v14626_v17 }
 0xb36   : > { %v14794_v56 = vpop.xlane.xlu1 %7159  ;;  %v6956_v55 = vmul.f32 0.2, %v6892_v40 }
 0xb39   : > { %7097 = vmax.xlane.f32.xlu2 %v14771_v59  ;;  %7103 = vmax.xlane.f32.xlu0 %v14776_v30 }
 0xb3a   : > { %7441 = vadd.xlane.f32.xlu1 %v14779_v5 }
 0xb3e   : > { %v7164_v22 = vpop.xlane.xlu1 %7163 }
 0xb41   : > { %7193 = vmax.xlane.f32.xlu2 %v14788_v45  ;;  %7197 = vmax.xlane.f32.xlu0 %v14791_v44 }
 0xb44   : > { %v7154_v10 = vpop.xlane.xlu2 %7153 }
 0xb45   : > { %v7249_v37 = vsub.f32 %v14536_v35, %v7154_v10  ;;  %v6844_v35 = vadd.f32 %v14511_v11, %v14576_v12  ;;  %v7018_v12 = vmax.f32 %v6890_v43, %v6954_v27 }
 0xb46   : > { %v14831_v15 = vpop.xlane.xlu1 %7133 }
 0xb47   : > { %v7345_v9 = vmul.f32 1.442695, %v7249_v37  ;;  %v6908_v23 = vmul.f32 0.2, %v6844_v35  ;;  %v14835_v7 = vadd.f32 %v16191_v46, %v7018_v12  ;;  %v6861_v46 = vadd.f32 %v14450_v8, %v14603_v18 }
 0xb48   : > { %v7254_v18 = vsub.f32 %v14516_v47, %v7164_v22  ;;  %v6909_v22 = vmul.f32 0.2, %v6845_v31 }
 0xb49   : > { %10244 = vpow2.f32 %v7345_v9  ;;  %7101 = vmax.xlane.f32.xlu2 %v14803_v62  ;;  %7199 = vmax.xlane.f32.xlu0 %v14806_v19  ;;  %v6972_v26 = vmax.f32 %v6844_v35, %v6908_v23  ;;  %v7020_v35 = vmax.f32 %v6892_v40, %v6956_v55 }
 0xb4b   : > { %v14838_v43 = vadd.f32 %v16207_v1, %v6972_v26 }
 0xb4c   : > { %v14814_v61 = vpop.xlane.xlu2 %7157 }
 0xb4e   : > { %v14856_v51 = vpop.xlane.xlu1 %7089 }
 0xb4f   : > { %v14816_v25 = vpop.eup %10244 }
 0xb50   : > { %7473 = vadd.xlane.f32.xlu1 %v14816_v25 }
 0xb51   : > { %7105 = vmax.xlane.f32.xlu2 %v14819_v2  ;;  %7201 = vmax.xlane.f32.xlu0 %v14823_v50 }
 0xb54   : > { %v7130_v10 = vpop.xlane.xlu2 %7129  ;;  %v7156_v37 = vpop.xlane.xlu0 %7155 }
 0xb55   : > { %v7250_v9 = vsub.f32 %v14573_v41, %v7156_v37  ;;  %v7237_v33 = vsub.f32 %v14568_v49, %v7130_v10  ;;  %v6877_v41 = vadd.f32 %v14479_v14, %v14698_v38  ;;  %v14852_v37 = vadd.f32 %v16196_v53, %v7019_v20  ;;  %v16216_v20 = vld [vmem:[#allocation72_spill] sm:$0xff] }
 0xb56   : > { %v6925_v10 = vmul.f32 0.2, %v6861_v46  ;;  %v14859_v38 = vadd.f32 %v16207_v1, %v7020_v35  ;;  %v6893_v53 = vadd.f32 %v14530_v21, %v14716_v48  ;;  %v14883_v17 = vpop.xlane.xlu1 %7187  ;;  %v6862_v48 = vadd.f32 %v14450_v8, %v14581_v60 }
 0xb57   : > { %v7347_v32 = vmul.f32 1.442695, %v7250_v9  ;;  %v7321_v12 = vmul.f32 1.442695, %v7237_v33  ;;  %v6941_v26 = vmul.f32 0.2, %v6877_v41  ;;  %v6846_v60 = vadd.f32 %v14511_v11, %v14619_v0 }
 0xb58   : > { %v6989_v9 = vmax.f32 %v6861_v46, %v6925_v10  ;;  %v6957_v33 = vmul.f32 0.2, %v6893_v53 }
 0xb59   : > { %7203 = vmax.xlane.f32.xlu2 %v14835_v7  ;;  %10246 = vpow2.f32 %v7347_v32  ;;  %7111 = vmax.xlane.f32.xlu0 %v14838_v43  ;;  %v7005_v40 = vmax.f32 %v6877_v41, %v6941_v26  ;;  %v7355_v32 = vmul.f32 1.442695, %v7254_v18  ;;  %v6896_v26 = vadd.f32 %v14530_v21, %v14722_v39 }
 0xb5a   : > { %10248 = vpow2.f32 %v7321_v12  ;;  %v14879_v41 = vadd.f32 %v16216_v20, %v6989_v9  ;;  %v7021_v46 = vmax.f32 %v6893_v53, %v6957_v33  ;;  %v6973_v12 = vmax.f32 %v6845_v31, %v6909_v22 }
 0xb5b   : > { %v14874_v35 = vadd.f32 %v16216_v20, %v7005_v40  ;;  %10250 = vpow2.f32 %v7355_v32  ;;  %v6926_v40 = vmul.f32 0.2, %v6862_v48  ;;  %v6960_v63 = vmul.f32 0.2, %v6896_v26 }
 0xb5c   : > { %v14847_v27 = vpop.xlane.xlu2 %7161  ;;  %v14849_v23 = vpop.xlane.xlu0 %7125  ;;  %v14895_v9 = vadd.f32 %v16216_v20, %v7021_v46  ;;  %v7234_v39 = vsub.f32 %v14477_v42, %v14752_v58  ;;  %v6910_v46 = vmul.f32 0.2, %v6846_v60  ;;  %v16222_v42 = vld [vmem:[#allocation93_spill] sm:$0xff] }
 0xb5d   : > { %v6990_v21 = vmax.f32 %v6862_v48, %v6926_v40  ;;  %v7024_v53 = vmax.f32 %v6896_v26, %v6960_v63  ;;  %v6847_v0 = vadd.f32 %v14511_v11, %v16222_v42  ;;  %v16226_v11 = vld [vmem:[#allocation76_spill] sm:$0xff] }
 0xb5e   : > { %16218 = vst [vmem:[#allocation92_spill] sm:$0xff] %v14895_v9  ;;  %v14909_v31 = vpop.xlane.xlu1 %7093  ;;  %v6974_v58 = vmax.f32 %v6846_v60, %v6910_v46  ;;  %v16227_v46 = vld [vmem:[#allocation44_spill] sm:$0xff] }
 0xb5f   : > { %v14854_v49 = vpop.eup %10246  ;;  %v14918_v40 = vadd.f32 %v16214_v36, %v7024_v53  ;;  %v6911_v53 = vmul.f32 0.2, %v6847_v0 }
 0xb60   : > { %7475 = vadd.xlane.f32.xlu1 %v14854_v49  ;;  %v14876_v47 = vpop.eup %10248 }
 0xb61   : > { %7205 = vmax.xlane.f32.xlu2 %v14852_v37  ;;  %7207 = vmax.xlane.f32.xlu0 %v14859_v38  ;;  %16217 = vst [vmem:[#allocation68_spill] sm:$0xff] %v14876_v47  ;;  %v14897_v32 = vpop.eup %10250  ;;  %v6975_v60 = vmax.f32 %v6847_v0, %v6911_v53  ;;  %v16231_v0 = vld [vmem:[#allocation70_spill] sm:$0xff] }
 0xb62   : > { %16219 = vst [vmem:[#allocation56_spill] sm:$0xff] %v14897_v32  ;;  %v7252_v53 = vsub.f32 %v16231_v0, %v14794_v56  ;;  %v16235_v56 = vld [vmem:[#allocation79_spill] sm:$0xff] }
 0xb63   : > { %16221 = vst [vmem:[#allocation63_spill] sm:$0xff] %v14918_v40 }
 0xb64   : > { %v14869_v55 = vpop.xlane.xlu2 %7137  ;;  %v14871_v1 = vpop.xlane.xlu0 %7131 }
 0xb68   : > { %7449 = vadd.xlane.f32.xlu1 %v14876_v47  ;;  %v14900_v47 = vadd.f32 %v16216_v20, %v6973_v12  ;;  %v7315_v12 = vmul.f32 1.442695, %v7234_v39  ;;  %v14930_v39 = vpop.xlane.xlu1 %7195 }
 0xb69   : > { %7177 = vmax.xlane.f32.xlu2 %v14874_v35  ;;  %7145 = vmax.xlane.f32.xlu0 %v14879_v41 }
 0xb6c   : > { %v14890_v10 = vpop.xlane.xlu2 %7169  ;;  %v14892_v18 = vpop.xlane.xlu0 %7135 }
 0xb70   : > { %7483 = vadd.xlane.f32.xlu1 %v14897_v32  ;;  %v14915_v32 = vadd.f32 %v16201_v4, %v6990_v21 }
 0xb71   : > { %7209 = vmax.xlane.f32.xlu2 %v14895_v9  ;;  %7113 = vmax.xlane.f32.xlu0 %v14900_v47 }
 0xb72   : > { %16220 = vst [vmem:[#allocation69_spill] sm:$0xff] %v14915_v32 }
 0xb74   : > { %v14911_v33 = vpop.xlane.xlu2 %7171  ;;  %v7166_v20 = vpop.xlane.xlu0 %7165 }
 0xb75   : > { %v7255_v22 = vsub.f32 %v14655_v54, %v7166_v20  ;;  %v16223_v54 = vld [vmem:[#allocation88_spill] sm:$0xff] }
 0xb76   : > { %v7235_v63 = vsub.f32 %v16223_v54, %v14849_v23  ;;  %v7236_v23 = vsub.f32 %v16226_v11, %v14773_v13  ;;  %v16230_v13 = vld [vmem:[#allocation60_spill] sm:$0xff] }
 0xb77   : > { %v7357_v48 = vmul.f32 1.442695, %v7255_v22  ;;  %v14933_v22 = vadd.f32 %v16201_v4, %v6974_v58 }
 0xb78   : > { %v7317_v20 = vmul.f32 1.442695, %v7235_v63  ;;  %v7319_v58 = vmul.f32 1.442695, %v7236_v23  ;;  %v14951_v63 = vadd.f32 %v16210_v52, %v6975_v60  ;;  %v7351_v60 = vmul.f32 1.442695, %v7252_v53 }
 0xb79   : > { %7147 = vmax.xlane.f32.xlu2 %v14915_v32  ;;  %10252 = vpow2.f32 %v7357_v48  ;;  %7215 = vmax.xlane.f32.xlu0 %v14918_v40  ;;  %16224 = vst [vmem:[#allocation67_spill] sm:$0xff] %v14933_v22 }
 0xb7a   : > { %10254 = vpow2.f32 %v7315_v12  ;;  %v7251_v12 = vsub.f32 %v16227_v46, %v14814_v61  ;;  %16228 = vst [vmem:[#allocation52_spill] sm:$0xff] %v14951_v63  ;;  %v7253_v61 = vsub.f32 %v16230_v13, %v14847_v27  ;;  %v16234_v27 = vld [vmem:[#allocation78_spill] sm:$0xff] }
 0xb7b   : > { %10256 = vpow2.f32 %v7317_v20 }
 0xb7c   : > { %v14926_v26 = vpop.xlane.xlu2 %7141  ;;  %v14928_v21 = vpop.xlane.xlu0 %7167  ;;  %v7349_v54 = vmul.f32 1.442695, %v7251_v12  ;;  %10258 = vpow2.f32 %v7319_v58  ;;  %v7353_v23 = vmul.f32 1.442695, %v7253_v61  ;;  %v7240_v58 = vsub.f32 %v16234_v27, %v14892_v18  ;;  %v16238_v18 = vld [vmem:[#allocation75_spill] sm:$0xff] }
 0xb7d   : > { %v7217_v27 = vsub.f32 %v16238_v18, %v14856_v51 }
 0xb7e   : > { %10260 = vpow2.f32 %v7349_v54  ;;  %v7238_v54 = vsub.f32 %v16235_v56, %v14871_v1  ;;  %v7327_v53 = vmul.f32 1.442695, %v7240_v58  ;;  %v16239_v1 = vld [vmem:[#allocation57_spill] sm:$0xff] }
 0xb7f   : > { %v14935_v48 = vpop.eup %10252  ;;  %10262 = vpow2.f32 %v7353_v23 }
 0xb80   : > { %16225 = vst [vmem:[#allocation74_spill] sm:$0xff] %v14935_v48  ;;  %v14937_v40 = vpop.eup %10254  ;;  %7485 = vadd.xlane.f32.xlu1 %v14935_v48  ;;  %v14953_v48 = vpop.xlane.xlu1 %7107  ;;  %10264 = vpow2.f32 %v7351_v60  ;;  %v7239_v60 = vsub.f32 %v16239_v1, %v14831_v15 }
 0xb81   : > { %7115 = vmax.xlane.f32.xlu2 %v14933_v22  ;;  %7443 = vadd.xlane.f32.xlu0 %v14937_v40  ;;  %v14955_v32 = vpop.eup %10256  ;;  %10266 = vpow2.f32 %v7327_v53 }
 0xb82   : > { %16229 = vst [vmem:[#allocation95_spill] sm:$0xff] %v14955_v32  ;;  %v14965_v46 = vpop.eup %10258  ;;  %v7325_v22 = vmul.f32 1.442695, %v7239_v60 }
 0xb83   : > { %16232 = vst [vmem:[#allocation45_spill] sm:$0xff] %v14965_v46 }
 0xb84   : > { %v14946_v4 = vpop.xlane.xlu2 %7175  ;;  %v14948_v42 = vpop.xlane.xlu0 %7139 }
 0xb85   : > { %v14967_v12 = vpop.eup %10260 }
 0xb86   : > { %16233 = vst [vmem:[#allocation53_spill] sm:$0xff] %v14967_v12 }
 0xb88   : > { %v14972_v13 = vpop.xlane.xlu1 %7109 }
 0xb89   : > { %7117 = vmax.xlane.f32.xlu2 %v14951_v63  ;;  %7445 = vadd.xlane.f32.xlu0 %v14955_v32  ;;  %v7323_v63 = vmul.f32 1.442695, %v7238_v54  ;;  %v14981_v32 = vpop.eup %10262  ;;  %v7281_v54 = vmul.f32 1.442695, %v7217_v27 }
 0xb8a   : > { %16236 = vst [vmem:[#allocation42_spill] sm:$0xff] %v14981_v32  ;;  %v14983_v23 = vpop.eup %10264 }
 0xb8b   : > { %16237 = vst [vmem:[#allocation43_spill] sm:$0xff] %v14983_v23  ;;  %10268 = vpow2.f32 %v7323_v63  ;;  %v14996_v9 = vpop.eup %10266  ;;  %v16242_v63 = vld [vmem:[#allocation61_spill] sm:$0xff] }
 0xb8c   : > { %v7186_v20 = vpop.xlane.xlu2 %7185  ;;  %v14963_v11 = vpop.xlane.xlu0 %7173  ;;  %16240 = vst [vmem:[#allocation64_spill] sm:$0xff] %v14996_v9  ;;  %10270 = vpow2.f32 %v7281_v54  ;;  %v6864_v53 = vadd.f32 %v14450_v8, %v16242_v63 }
 0xb8d   : > { %v7265_v15 = vsub.f32 %v14709_v34, %v7186_v20 }
 0xb8f   : > { %v7377_v60 = vmul.f32 1.442695, %v7265_v15  ;;  %v6863_v15 = vadd.f32 %v14450_v8, %v14732_v29  ;;  %v16250_v8 = vld [vmem:[#allocation49_spill] sm:$0xff] }
 0xb90   : > { %v14991_v56 = vpop.xlane.xlu1 %7179  ;;  %v7219_v29 = vsub.f32 %v16250_v8, %v14909_v31 }
 0xb91   : > { %7447 = vadd.xlane.f32.xlu2 %v14965_v46  ;;  %7477 = vadd.xlane.f32.xlu0 %v14967_v12  ;;  %v14998_v18 = vpop.eup %10268 }
 0xb92   : > { %16241 = vst [vmem:[#allocation50_spill] sm:$0xff] %v14998_v18  ;;  %v15011_v54 = vpop.eup %10270 }
 0xb93   : > { %16244 = vst [vmem:[#allocation66_spill] sm:$0xff] %v15011_v54 }
 0xb94   : > { %v14977_v61 = vpop.xlane.xlu2 %7095  ;;  %v14979_v0 = vpop.xlane.xlu0 %7143 }
 0xb99   : > { %7481 = vadd.xlane.f32.xlu2 %v14981_v32  ;;  %7479 = vadd.xlane.f32.xlu0 %v14983_v23 }
 0xb9c   : > { %v14993_v58 = vpop.xlane.xlu2 %7189  ;;  %v7092_v12 = vpop.xlane.xlu0 %7091 }
 0xb9d   : > { %v7218_v46 = vsub.f32 %v14742_v28, %v7092_v12  ;;  %v16243_v28 = vld [vmem:[#allocation89_spill] sm:$0xff] }
 0xb9e   : > { %v7256_v12 = vsub.f32 %v16243_v28, %v14928_v21  ;;  %v16247_v21 = vld [vmem:[#allocation41_spill] sm:$0xff]  ;;  %v6880_v28 = vadd.f32 %v14479_v14, %v14695_v16  ;;  %v7220_v16 = vsub.f32 %v14725_v3, %v14977_v61 }
 0xb9f   : > { %v7283_v51 = vmul.f32 1.442695, %v7218_v46  ;;  %v15009_v46 = vpop.xlane.xlu1 %7211 }
 0xba0   : > { %v7359_v34 = vmul.f32 1.442695, %v7256_v12  ;;  %v7287_v23 = vmul.f32 1.442695, %v7220_v16 }
 0xba1   : > { %7455 = vadd.xlane.f32.xlu2 %v14996_v9  ;;  %10272 = vpow2.f32 %v7283_v51  ;;  %7451 = vadd.xlane.f32.xlu0 %v14998_v18  ;;  %v6928_v9 = vmul.f32 0.2, %v6864_v53  ;;  %v6927_v18 = vmul.f32 0.2, %v6863_v15 }
 0xba2   : > { %10274 = vpow2.f32 %v7325_v22  ;;  %v7266_v22 = vsub.f32 %v16247_v21, %v14883_v17 }
 0xba3   : > { %10276 = vpow2.f32 %v7377_v60  ;;  %v6992_v63 = vmax.f32 %v6864_v53, %v6928_v9  ;;  %v6944_v60 = vmul.f32 0.2, %v6880_v28  ;;  %v6991_v53 = vmax.f32 %v6863_v15, %v6927_v18 }
 0xba4   : > { %v7192_v27 = vpop.xlane.xlu2 %7191  ;;  %v15007_v1 = vpop.xlane.xlu0 %7099  ;;  %10278 = vpow2.f32 %v7359_v34  ;;  %v7267_v18 = vsub.f32 %v14739_v24, %v14993_v58 }
 0xba5   : > { %v7268_v34 = vsub.f32 %v14755_v6, %v7192_v27  ;;  %v15048_v8 = vadd.f32 %v16210_v52, %v6991_v53  ;;  %v16251_v6 = vld [vmem:[#allocation55_spill] sm:$0xff] }
 0xba6   : > { %v7241_v61 = vsub.f32 %v16251_v6, %v14869_v55 }
 0xba7   : > { %v15013_v20 = vpop.eup %10272  ;;  %v15033_v21 = vpop.xlane.xlu1 %7213  ;;  %v7383_v31 = vmul.f32 1.442695, %v7268_v34 }
 0xba8   : > { %16245 = vst [vmem:[#allocation59_spill] sm:$0xff] %v15013_v20  ;;  %v15015_v51 = vpop.eup %10274  ;;  %7411 = vadd.xlane.f32.xlu1 %v15013_v20  ;;  %v15029_v20 = vadd.f32 %v16214_v36, %v6992_v63 }
 0xba9   : > { %16246 = vst [vmem:[#allocation58_spill] sm:$0xff] %v15015_v51  ;;  %7409 = vadd.xlane.f32.xlu2 %v15011_v54  ;;  %7453 = vadd.xlane.f32.xlu0 %v15015_v51  ;;  %v7379_v54 = vmul.f32 1.442695, %v7266_v22  ;;  %v15031_v17 = vpop.eup %10276  ;;  %v7008_v22 = vmax.f32 %v6880_v28, %v6944_v60  ;;  %v7285_v51 = vmul.f32 1.442695, %v7219_v29 }
 0xbaa   : > { %16248 = vst [vmem:[#allocation51_spill] sm:$0xff] %v15031_v17  ;;  %v15035_v9 = vpop.eup %10278 }
 0xbab   : > { %16249 = vst [vmem:[#allocation54_spill] sm:$0xff] %v15033_v21  ;;  %10280 = vpow2.f32 %v7379_v54  ;;  %v15055_v3 = vadd.f32 %v16214_v36, %v7008_v22  ;;  %v7329_v36 = vmul.f32 1.442695, %v7241_v61 }
 0xbac   : > { %v7098_v12 = vpop.xlane.xlu2 %7097  ;;  %v15026_v32 = vpop.xlane.xlu0 %7103  ;;  %10282 = vpow2.f32 %v7285_v51  ;;  %v7381_v51 = vmul.f32 1.442695, %v7267_v18 }
 0xbad   : > { %10284 = vpow2.f32 %v7287_v23  ;;  %v7221_v27 = vsub.f32 %v14771_v59, %v7098_v12  ;;  %v16252_v23 = vld [vmem:[#allocation84_spill] sm:$0xff]  ;;  %v7222_v12 = vsub.f32 %v14758_v57, %v15007_v1  ;;  %v16254_v57 = vld [vmem:[#allocation94_spill] sm:$0xff] }
 0xbae   : > { %10286 = vpow2.f32 %v7383_v31  ;;  %v6879_v58 = vadd.f32 %v14479_v14, %v16252_v23  ;;  %v7258_v1 = vsub.f32 %v16254_v57, %v14911_v33 }
 0xbaf   : > { %v15052_v54 = vpop.xlane.xlu1 %7119  ;;  %v7289_v55 = vmul.f32 1.442695, %v7221_v27  ;;  %10288 = vpow2.f32 %v7329_v36  ;;  %v7291_v61 = vmul.f32 1.442695, %v7222_v12 }
 0xbb0   : > { %7151 = vmax.xlane.f32.xlu1 %v15029_v20  ;;  %10290 = vpow2.f32 %v7381_v51  ;;  %v6943_v6 = vmul.f32 0.2, %v6879_v58  ;;  %v7224_v51 = vsub.f32 %v14776_v30, %v15026_v32  ;;  %v7363_v23 = vmul.f32 1.442695, %v7258_v1 }
 0xbb1   : > { %7505 = vadd.xlane.f32.xlu2 %v15031_v17  ;;  %7487 = vadd.xlane.f32.xlu0 %v15035_v9  ;;  %v15050_v17 = vpop.eup %10280  ;;  %10292 = vpow2.f32 %v7289_v55 }
 0xbb2   : > { %v15067_v60 = vpop.eup %10282  ;;  %v7007_v36 = vmax.f32 %v6879_v58, %v6943_v6  ;;  %v7295_v12 = vmul.f32 1.442695, %v7224_v51  ;;  %v16255_v58 = vld [vmem:[#allocation73_spill] sm:$0xff] }
 0xbb3   : > { %v15069_v29 = vpop.eup %10284  ;;  %v7244_v6 = vsub.f32 %v16255_v58, %v14979_v0 }
 0xbb4   : > { %v7194_v63 = vpop.xlane.xlu2 %7193  ;;  %v15045_v21 = vpop.xlane.xlu0 %7197 }
 0xbb5   : > { %v15071_v16 = vpop.eup %10286  ;;  %v7269_v59 = vsub.f32 %v14788_v45, %v7194_v63  ;;  %v16253_v63 = vld [vmem:[#allocation80_spill] sm:$0xff]  ;;  %v7335_v1 = vmul.f32 1.442695, %v7244_v6 }
 0xbb6   : > { %v15087_v31 = vpop.eup %10288  ;;  %v7270_v14 = vsub.f32 %v16253_v63, %v14930_v39  ;;  %v15107_v63 = vadd.f32 %v16210_v52, %v7007_v36  ;;  %v16256_v52 = vld [vmem:[#allocation81_spill] sm:$0xff] }
 0xbb7   : > { %v15075_v24 = vpop.xlane.xlu1 %7441  ;;  %v7385_v22 = vmul.f32 1.442695, %v7269_v59  ;;  %v15089_v18 = vpop.eup %10290 }
 0xbb8   : > { %7507 = vadd.xlane.f32.xlu1 %v15050_v17  ;;  %v15091_v45 = vpop.eup %10292  ;;  %v7387_v59 = vmul.f32 1.442695, %v7270_v14 }
 0xbb9   : > { %7149 = vmax.xlane.f32.xlu2 %v15048_v8  ;;  %7183 = vmax.xlane.f32.xlu0 %v15055_v3  ;;  %10294 = vpow2.f32 %v7385_v22 }
 0xbba   : > { %10296 = vpow2.f32 %v7291_v61  ;;  %v7257_v61 = vsub.f32 %v16256_v52, %v14890_v10 }
 0xbbc   : > { %v7102_v15 = vpop.xlane.xlu2 %7101  ;;  %v15065_v28 = vpop.xlane.xlu0 %7199 }
 0xbbd   : > { %v7223_v30 = vsub.f32 %v14803_v62, %v7102_v15 }
 0xbbf   : > { %v15109_v33 = vpop.eup %10294 }
 0xbc0   : > { %7413 = vadd.xlane.f32.xlu1 %v15067_v60  ;;  %v15111_v22 = vpop.eup %10296 }
 0xbc1   : > { %7415 = vadd.xlane.f32.xlu2 %v15069_v29  ;;  %7511 = vadd.xlane.f32.xlu0 %v15071_v16 }
 0xbc3   : > { %v7474_v27 = vpop.xlane.xlu1 %7473 }
 0xbc4   : > { %v15083_v53 = vpop.xlane.xlu2 %7105  ;;  %v15085_v34 = vpop.xlane.xlu0 %7201  ;;  %10298 = vrcp.f32 %v7474_v27  ;;  %v7293_v27 = vmul.f32 1.442695, %v7223_v30  ;;  %v16258_v30 = vld [vmem:[#allocation77_spill] sm:$0xff] }
 0xbc5   : > { %10300 = vpow2.f32 %v7387_v59  ;;  %v7361_v59 = vmul.f32 1.442695, %v7257_v61 }
 0xbc6   : > { %10302 = vpow2.f32 %v7363_v23  ;;  %v16257_v23 = vld [vmem:[#allocation47_spill] sm:$0xff] }
 0xbc7   : > { %10304 = vpow2.f32 %v7295_v12  ;;  %v7226_v10 = vsub.f32 %v16257_v23, %v14953_v48  ;;  %v7271_v12 = vsub.f32 %v14791_v44, %v15045_v21 }
 0xbc8   : > { %7509 = vadd.xlane.f32.xlu1 %v15089_v18 }
 0xbc9   : > { %7457 = vadd.xlane.f32.xlu2 %v15087_v31  ;;  %7417 = vadd.xlane.f32.xlu0 %v15091_v45  ;;  %v7299_v61 = vmul.f32 1.442695, %v7226_v10 }
 0xbca   : > { %v10299_v32 = vpop.eup %10298 }
 0xbcb   : > { %v7633_v36 = vmul.f32 0.25, %v10299_v32  ;;  %v15125_v51 = vpop.eup %10300  ;;  %v7243_v32 = vsub.f32 %v16258_v30, %v14926_v26  ;;  %v16259_v26 = vld [vmem:[#allocation83_spill] sm:$0xff] }
 0xbcc   : > { %v15102_v55 = vpop.xlane.xlu2 %7203  ;;  %v15104_v39 = vpop.xlane.xlu0 %7111 }
 0xbcd   : > { %v15127_v62 = vpop.eup %10302  ;;  %v7697_v58 = vmul.f32 %v14816_v25, %v7633_v36  ;;  %v7333_v25 = vmul.f32 1.442695, %v7243_v32 }
 0xbce   : > { %v15129_v15 = vpop.eup %10304 }
 0xbcf   : > { %v7761_v23 = vpack.c.bf16 %v7697_v58, %v7697_v58  ;;  %v7272_v58 = vsub.f32 %v14806_v19, %v15065_v28  ;;  %v7225_v28 = vsub.f32 %v14819_v2, %v15083_v53 }
 0xbd0   : > { %7181 = vmax.xlane.f32.xlu1 %v15107_v63 }
 0xbd1   : > { %7513 = vadd.xlane.f32.xlu2 %v15109_v33  ;;  %7419 = vadd.xlane.f32.xlu0 %v15111_v22  ;;  %v8099_v10 = vunpack.c.l.b16 %v7761_v23 }
 0xbd3   : > { %v7476_v57 = vpop.xlane.xlu1 %7475 }
 0xbd4   : > { %v15121_v14 = vpop.xlane.xlu2 %7205  ;;  %10306 = vrcp.f32 %v7476_v57  ;;  %v15123_v0 = vpop.xlane.xlu0 %7207 }
 0xbd5   : > { %10308 = vpow2.f32 %v7335_v1  ;;  %v7389_v1 = vmul.f32 1.442695, %v7271_v12  ;;  %v7275_v19 = vsub.f32 %v14852_v37, %v15121_v14  ;;  %v16261_v14 = vld [vmem:[#allocation71_spill] sm:$0xff] }
 0xbd6   : > { %10310 = vpow2.f32 %v7293_v27 }
 0xbd7   : > { %10312 = vpow2.f32 %v7361_v59 }
 0xbd8   : > { %7515 = vadd.xlane.f32.xlu1 %v15125_v51  ;;  %10314 = vpow2.f32 %v7299_v61 }
 0xbd9   : > { %7491 = vadd.xlane.f32.xlu2 %v15127_v62  ;;  %7423 = vadd.xlane.f32.xlu0 %v15129_v15  ;;  %10316 = vpow2.f32 %v7389_v1  ;;  %v7391_v1 = vmul.f32 1.442695, %v7272_v58  ;;  %v7227_v58 = vsub.f32 %v16261_v14, %v14972_v13 }
 0xbda   : > { %v10307_v6 = vpop.eup %10306  ;;  %10318 = vpow2.f32 %v7333_v25 }
 0xbdb   : > { %v7634_v52 = vmul.f32 0.25, %v10307_v6  ;;  %v15146_v21 = vpop.eup %10308  ;;  %v7242_v6 = vsub.f32 %v16259_v26, %v14948_v42 }
 0xbdc   : > { %v15141_v48 = vpop.xlane.xlu2 %7177  ;;  %v15143_v57 = vpop.xlane.xlu0 %7145 }
 0xbdd   : > { %v7698_v44 = vmul.f32 %v14854_v49, %v7634_v52  ;;  %v15148_v27 = vpop.eup %10310  ;;  %v7274_v49 = vsub.f32 %v14835_v7, %v15102_v55  ;;  %v7331_v42 = vmul.f32 1.442695, %v7242_v6  ;;  %v16260_v55 = vld [vmem:[#allocation48_spill] sm:$0xff]  ;;  %v7261_v2 = vsub.f32 %v14874_v35, %v15141_v48 }
 0xbde   : > { %v15150_v59 = vpop.eup %10312  ;;  %v7259_v25 = vsub.f32 %v16260_v55, %v14963_v11  ;;  %v7397_v11 = vmul.f32 1.442695, %v7275_v19  ;;  %v7276_v48 = vsub.f32 %v14859_v38, %v15123_v0 }
 0xbdf   : > { %v7762_v36 = vpack.c.bf16 %v7698_v44, %v7698_v44  ;;  %v7395_v61 = vmul.f32 1.442695, %v7274_v49  ;;  %v15163_v44 = vpop.eup %10314  ;;  %10320 = vpow2.f32 %v7331_v42  ;;  %v7297_v49 = vmul.f32 1.442695, %v7225_v28 }
 0xbe0   : > { %7421 = vadd.xlane.f32.xlu1 %v15148_v27  ;;  %v15165_v23 = vpop.eup %10316  ;;  %v7365_v26 = vmul.f32 1.442695, %v7259_v25  ;;  %v7301_v42 = vmul.f32 1.442695, %v7227_v58  ;;  %v7399_v14 = vmul.f32 1.442695, %v7276_v48 }
 0xbe1   : > { %7463 = vadd.xlane.f32.xlu2 %v15146_v21  ;;  %v8100_v12 = vunpack.c.l.b16 %v7762_v36  ;;  %7489 = vadd.xlane.f32.xlu0 %v15150_v59  ;;  %v15167_v7 = vpop.eup %10318  ;;  %10322 = vpow2.f32 %v7395_v61  ;;  %v7369_v61 = vmul.f32 1.442695, %v7261_v2 }
 0xbe2   : > { %10324 = vpow2.f32 %v7391_v1 }
 0xbe3   : > { %v8115_v30 = vpack.c.b16 %v8100_v12, %v8099_v10  ;;  %10326 = vrcp.f32 %v15075_v24  ;;  %v7273_v24 = vsub.f32 %v14823_v50, %v15085_v34  ;;  %v16262_v34 = vld [vmem:[#allocation65_spill] sm:$0xff] }
 0xbe4   : > { %v15161_v32 = vpop.xlane.xlu2 %7209  ;;  %v7114_v52 = vpop.xlane.xlu0 %7113  ;;  %10328 = vpow2.f32 %v7365_v26  ;;  %v7260_v28 = vsub.f32 %v16262_v34, %v14946_v4 }
 0xbe5   : > { %8187 = vmatmul.bf16.vlgmr.msra.gmra.mxu0 %v8115_v30  ;;  %v15183_v10 = vpop.eup %10320  ;;  %10330 = vpow2.f32 %v7397_v11  ;;  %v7393_v25 = vmul.f32 1.442695, %v7273_v24  ;;  %v7229_v50 = vsub.f32 %v14900_v47, %v7114_v52 }
 0xbe6   : > { %10332 = vpow2.f32 %v7297_v49  ;;  %v7367_v24 = vmul.f32 1.442695, %v7260_v28 }
 0xbe7   : > { %v15185_v12 = vpop.eup %10322  ;;  %v7305_v58 = vmul.f32 1.442695, %v7229_v50 }
 0xbe8   : > { %7517 = vadd.xlane.f32.xlu1 %v15165_v23  ;;  %v15187_v37 = vpop.eup %10324 }
 0xbe9   : > { %7427 = vadd.xlane.f32.xlu2 %v15163_v44  ;;  %7461 = vadd.xlane.f32.xlu0 %v15167_v7  ;;  %v10327_v53 = vpop.eup %10326 }
 0xbea   : > { %v15200_v1 = vpop.eup %10328  ;;  %v7617_v55 = vmul.f32 0.25, %v10327_v53 }
 0xbeb   : > { %v15202_v19 = vpop.eup %10330 }
 0xbec   : > { %v15178_v36 = vpop.xlane.xlu2 %7147  ;;  %v15180_v6 = vpop.xlane.xlu0 %7215  ;;  %v7681_v26 = vmul.f32 %v14779_v5, %v7617_v55  ;;  %v16263_v5 = vld [vmem:[#allocation46_spill] sm:$0xff]  ;;  %v7245_v55 = vsub.f32 %v14879_v41, %v15143_v57 }
 0xbed   : > { %v15204_v35 = vpop.eup %10332 }
 0xbee   : > { %v7745_v47 = vpack.c.bf16 %v7681_v26, %v7681_v26 }
 0xbf0   : > { %7459 = vadd.xlane.f32.xlu1 %v15183_v10 }
 0xbf1   : > { %7523 = vadd.xlane.f32.xlu2 %v15185_v12  ;;  %7519 = vadd.xlane.f32.xlu0 %v15187_v37 }
 0xbf4   : > { %v15198_v30 = vpop.xlane.xlu2 %7115  ;;  %v7444_v13 = vpop.xlane.xlu0 %7443 }
 0xbf5   : > { %10334 = vrcp.f32 %v7444_v13 }
 0xbf6   : > { %10336 = vpow2.f32 %v7301_v42  ;;  %v7278_v42 = vsub.f32 %v16263_v5, %v15009_v46 }
 0xbf7   : > { %10338 = vpow2.f32 %v7369_v61  ;;  %v7450_v61 = vpop.xlane.xlu1 %7449 }
 0xbf8   : > { %7493 = vadd.xlane.f32.xlu1 %v15200_v1  ;;  %10340 = vpow2.f32 %v7393_v25  ;;  %v7228_v25 = vsub.f32 %v14838_v43, %v15104_v39  ;;  %v7403_v34 = vmul.f32 1.442695, %v7278_v42  ;;  %v16265_v43 = vld [vmem:[#allocation92_spill] sm:$0xff] }
 0xbf9   : > { %7525 = vadd.xlane.f32.xlu2 %v15202_v19  ;;  %7425 = vadd.xlane.f32.xlu0 %v15204_v35  ;;  %v7277_v39 = vsub.f32 %v16265_v43, %v15161_v32 }
 0xbfa   : > { %v7303_v41 = vmul.f32 1.442695, %v7228_v25 }
 0xbfb   : > { %v10335_v11 = vpop.eup %10334  ;;  %v7401_v32 = vmul.f32 1.442695, %v7277_v39 }
 0xbfc   : > { %v15215_v49 = vpop.xlane.xlu2 %7117  ;;  %v7618_v38 = vmul.f32 0.25, %v10335_v11  ;;  %v7446_v0 = vpop.xlane.xlu0 %7445  ;;  %v7337_v11 = vmul.f32 1.442695, %v7245_v55 }
 0xbfd   : > { %10342 = vrcp.f32 %v7446_v0  ;;  %v15217_v2 = vpop.eup %10336 }
 0xbfe   : > { %v7682_v52 = vmul.f32 %v14937_v40, %v7618_v38  ;;  %v15220_v53 = vpop.eup %10338  ;;  %10344 = vpow2.f32 %v7399_v14  ;;  %v7954_v40 = vunpack.c.l.b16 %v7745_v47 }
 0xbff   : > { %v15222_v4 = vpop.eup %10340  ;;  %10346 = vpow2.f32 %v7305_v58  ;;  %v16266_v58 = vld [vmem:[#allocation67_spill] sm:$0xff] }
 0xc00   : > { %v7746_v13 = vpack.c.bf16 %v7682_v52, %v7682_v52  ;;  %7429 = vadd.xlane.f32.xlu1 %v15217_v2  ;;  %10348 = vpow2.f32 %v7367_v24  ;;  %v7230_v24 = vsub.f32 %v16266_v58, %v15198_v30  ;;  %v16267_v52 = vld [vmem:[#allocation95_spill] sm:$0xff]  ;;  %v16272_v58 = vld [vmem:[#allocation69_spill] sm:$0xff] }
 0xc01   : > { %7497 = vadd.xlane.f32.xlu2 %v15220_v53  ;;  %7521 = vadd.xlane.f32.xlu0 %v15222_v4 }
 0xc02   : > { %v7955_v48 = vunpack.c.l.b16 %v7746_v13  ;;  %v7484_v13 = vpop.xlane.xlu1 %7483 }
 0xc03   : > { %v10343_v46 = vpop.eup %10342 }
 0xc04   : > { %v7448_v50 = vpop.xlane.xlu2 %7447  ;;  %v7970_v28 = vpack.c.b16 %v7955_v48, %v7954_v40  ;;  %v7478_v26 = vpop.xlane.xlu0 %7477  ;;  %v7619_v57 = vmul.f32 0.25, %v10343_v46  ;;  %v7307_v48 = vmul.f32 1.442695, %v7230_v24  ;;  %v16268_v46 = vld [vmem:[#allocation45_spill] sm:$0xff]  ;;  %v7246_v24 = vsub.f32 %v16272_v58, %v15178_v36  ;;  %v16277_v58 = vld [vmem:[#allocation87_spill] sm:$0xff] }
 0xc05   : > { %10350 = vrcp.f32 %v7448_v50  ;;  %v15233_v14 = vpop.eup %10344 }
 0xc06   : > { %10352 = vrcp.f32 %v7478_v26  ;;  %8042 = vmatmul.bf16.vlgmr.msra.gmra.mxu1 %v7970_v28  ;;  %v15235_v38 = vpop.eup %10346  ;;  %v7683_v5 = vmul.f32 %v16267_v52, %v7619_v57  ;;  %v16273_v52 = vld [vmem:[#allocation53_spill] sm:$0xff] }
 0xc07   : > { %16264 = vst [vmem:[#allocation82_spill] sm:$0xff] %v15235_v38  ;;  %v15237_v0 = vpop.eup %10348  ;;  %10354 = vpow2.f32 %v7403_v34 }
 0xc08   : > { %7527 = vadd.xlane.f32.xlu1 %v15233_v14  ;;  %10356 = vpow2.f32 %v7337_v11  ;;  %v7747_v30 = vpack.c.bf16 %v7683_v5, %v7683_v5 }
 0xc09   : > { %7433 = vadd.xlane.f32.xlu2 %v15235_v38  ;;  %7495 = vadd.xlane.f32.xlu0 %v15237_v0  ;;  %10358 = vpow2.f32 %v7303_v41  ;;  %v16275_v38 = vld [vmem:[#allocation43_spill] sm:$0xff] }
 0xc0a   : > { %10360 = vrcp.f32 %v7450_v61  ;;  %v16271_v61 = vld [vmem:[#allocation85_spill] sm:$0xff] }
 0xc0b   : > { %v10351_v47 = vpop.eup %10350  ;;  %v7262_v57 = vsub.f32 %v16271_v61, %v14991_v56  ;;  %v7339_v61 = vmul.f32 1.442695, %v7246_v24  ;;  %v16279_v24 = vld [vmem:[#allocation52_spill] sm:$0xff] }
 0xc0c   : > { %v10353_v42 = vpop.eup %10352  ;;  %v7620_v55 = vmul.f32 0.25, %v10351_v47  ;;  %v7482_v40 = vpop.xlane.xlu2 %7481  ;;  %v7956_v47 = vunpack.c.l.b16 %v7747_v30 }
 0xc0d   : > { %v7480_v25 = vpop.xlane.xlu0 %7479  ;;  %v15248_v34 = vpop.eup %10354  ;;  %v7635_v28 = vmul.f32 0.25, %v10353_v42  ;;  %v7371_v56 = vmul.f32 1.442695, %v7262_v57  ;;  %v16278_v57 = vld [vmem:[#allocation68_spill] sm:$0xff] }
 0xc0e   : > { %v7684_v50 = vmul.f32 %v16268_v46, %v7620_v55  ;;  %10362 = vrcp.f32 %v7480_v25  ;;  %16269 = vst [vmem:[#allocation62_spill] sm:$0xff] %v15248_v34  ;;  %v15250_v26 = vpop.eup %10356  ;;  %v7486_v55 = vpop.xlane.xlu1 %7485 }
 0xc0f   : > { %16270 = vst [vmem:[#allocation86_spill] sm:$0xff] %v15250_v26  ;;  %v15252_v41 = vpop.eup %10358  ;;  %10364 = vpow2.f32 %v7401_v32  ;;  %v7699_v5 = vmul.f32 %v16273_v52, %v7635_v28 }
 0xc10   : > { %v7748_v11 = vpack.c.bf16 %v7684_v50, %v7684_v50  ;;  %7465 = vadd.xlane.f32.xlu1 %v15250_v26  ;;  %10366 = vpow2.f32 %v7307_v48  ;;  %v10361_v39 = vpop.eup %10360 }
 0xc11   : > { %7531 = vadd.xlane.f32.xlu2 %v15248_v34  ;;  %7431 = vadd.xlane.f32.xlu0 %v15252_v41  ;;  %10368 = vrcp.f32 %v7482_v40  ;;  %v7621_v48 = vmul.f32 0.25, %v10361_v39  ;;  %v7763_v34 = vpack.c.bf16 %v7699_v5, %v7699_v5 }
 0xc12   : > { %v7957_v43 = vunpack.c.l.b16 %v7748_v11  ;;  %10370 = vrcp.f32 %v7484_v13  ;;  %v16276_v13 = vld [vmem:[#allocation54_spill] sm:$0xff] }
 0xc13   : > { %v7685_v39 = vmul.f32 %v16278_v57, %v7621_v48  ;;  %v8101_v52 = vunpack.c.l.b16 %v7763_v34  ;;  %v16282_v34 = vld [vmem:[#allocation42_spill] sm:$0xff] }
 0xc14   : > { %v10363_v42 = vpop.eup %10362  ;;  %v7456_v32 = vpop.xlane.xlu2 %7455  ;;  %v7971_v50 = vpack.c.b16 %v7957_v43, %v7956_v47  ;;  %v7279_v43 = vsub.f32 %v16277_v58, %v16276_v13 }
 0xc15   : > { %v7636_v25 = vmul.f32 0.25, %v10363_v42  ;;  %v7452_v46 = vpop.xlane.xlu0 %7451  ;;  %v15262_v11 = vpop.eup %10364  ;;  %v7749_v57 = vpack.c.bf16 %v7685_v39, %v7685_v39 }
 0xc16   : > { %10372 = vrcp.f32 %v7452_v46  ;;  %16274 = vst [vmem:[#allocation90_spill] sm:$0xff] %v15262_v11  ;;  %8047 = vmatmul.bf16.gmra.mxu1 %v7971_v50  ;;  %v15265_v30 = vpop.eup %10366  ;;  %v7405_v58 = vmul.f32 1.442695, %v7279_v43  ;;  %v16284_v43 = vld [vmem:[#allocation56_spill] sm:$0xff] }
 0xc17   : > { %v7700_v36 = vmul.f32 %v16275_v38, %v7636_v25  ;;  %v10369_v40 = vpop.eup %10368  ;;  %10374 = vpow2.f32 %v7371_v56  ;;  %v7231_v38 = vsub.f32 %v16279_v24, %v15215_v49 }
 0xc18   : > { %7435 = vadd.xlane.f32.xlu1 %v15265_v30  ;;  %v10371_v47 = vpop.eup %10370  ;;  %10376 = vpow2.f32 %v7339_v61  ;;  %v7637_v25 = vmul.f32 0.25, %v10369_v40  ;;  %v16280_v61 = vld [vmem:[#allocation50_spill] sm:$0xff] }
 0xc19   : > { %v7764_v28 = vpack.c.bf16 %v7700_v36, %v7700_v36  ;;  %7529 = vadd.xlane.f32.xlu0 %v15262_v11  ;;  %10378 = vrcp.f32 %v7456_v32  ;;  %v7638_v48 = vmul.f32 0.25, %v10371_v47  ;;  %v7309_v11 = vmul.f32 1.442695, %v7231_v38 }
 0xc1a   : > { %v7701_v40 = vmul.f32 %v16282_v34, %v7637_v25  ;;  %v7958_v38 = vunpack.c.l.b16 %v7749_v57  ;;  %v16286_v57 = vld [vmem:[#allocation66_spill] sm:$0xff] }
 0xc1b   : > { %v8102_v5 = vunpack.c.l.b16 %v7764_v28  ;;  %v7412_v50 = vpop.xlane.xlu1 %7411  ;;  %v7702_v47 = vmul.f32 %v16284_v43, %v7638_v48 }
 0xc1c   : > { %v10373_v42 = vpop.eup %10372  ;;  %v7410_v46 = vpop.xlane.xlu2 %7409  ;;  %v7765_v25 = vpack.c.bf16 %v7701_v40, %v7701_v40 }
 0xc1d   : > { %v7622_v56 = vmul.f32 0.25, %v10373_v42  ;;  %10380 = vrcp.f32 %v7410_v46  ;;  %v7454_v36 = vpop.xlane.xlu0 %7453  ;;  %v8116_v13 = vpack.c.b16 %v8102_v5, %v8101_v52  ;;  %v15275_v49 = vpop.eup %10374  ;;  %v16285_v52 = vld [vmem:[#allocation63_spill] sm:$0xff]  ;;  %v7766_v34 = vpack.c.bf16 %v7702_v47, %v7702_v47 }
 0xc1e   : > { %10382 = vrcp.f32 %v7412_v50  ;;  %16281 = vst [vmem:[#allocation72_spill] sm:$0xff] %v15275_v49  ;;  %v15278_v32 = vpop.eup %10376  ;;  %v7280_v5 = vsub.f32 %v16285_v52, %v15180_v6  ;;  %v8103_v52 = vunpack.c.l.b16 %v7765_v25 }
 0xc1f   : > { %v7686_v26 = vmul.f32 %v16280_v61, %v7622_v56  ;;  %10384 = vrcp.f32 %v7454_v36  ;;  %8192 = vmatmul.bf16.gmra.mxu0 %v8116_v13  ;;  %16283 = vst [vmem:[#allocation93_spill] sm:$0xff] %v15278_v32  ;;  %v10379_v24 = vpop.eup %10378 }
 0xc20   : > { %7499 = vadd.xlane.f32.xlu1 %v15275_v49  ;;  %10386 = vpow2.f32 %v7405_v58  ;;  %v7407_v6 = vmul.f32 1.442695, %v7280_v5 }
 0xc21   : > { %v7750_v28 = vpack.c.bf16 %v7686_v26, %v7686_v26  ;;  %7467 = vadd.xlane.f32.xlu0 %v15278_v32  ;;  %10388 = vpow2.f32 %v7309_v11  ;;  %v7624_v11 = vmul.f32 0.25, %v10379_v24 }
 0xc22   : > { %10390 = vrcp.f32 %v7486_v55 }
 0xc23   : > { %v10381_v39 = vpop.eup %10380  ;;  %v7959_v42 = vunpack.c.l.b16 %v7750_v28  ;;  %v7152_v56 = vpop.xlane.xlu1 %7151  ;;  %v16287_v28 = vld [vmem:[#allocation59_spill] sm:$0xff] }
 0xc24   : > { %v10383_v46 = vpop.eup %10382  ;;  %v7601_v50 = vmul.f32 0.25, %v10381_v39  ;;  %v7506_v26 = vpop.xlane.xlu2 %7505  ;;  %v7248_v58 = vsub.f32 %v15029_v20, %v7152_v56 }
 0xc25   : > { %v10385_v36 = vpop.eup %10384  ;;  %v7602_v13 = vmul.f32 0.25, %v10383_v46  ;;  %10392 = vrcp.f32 %v7506_v26  ;;  %v7488_v48 = vpop.xlane.xlu0 %7487  ;;  %v7972_v61 = vpack.c.b16 %v7959_v42, %v7958_v38  ;;  %v16288_v26 = vld [vmem:[#allocation58_spill] sm:$0xff]  ;;  %v8104_v42 = vunpack.c.l.b16 %v7766_v34 }
 0xc26   : > { %v7665_v43 = vmul.f32 %v16286_v57, %v7601_v50  ;;  %v7623_v32 = vmul.f32 0.25, %v10385_v36  ;;  %10394 = vrcp.f32 %v7488_v48  ;;  %v7343_v40 = vmul.f32 1.442695, %v7248_v58  ;;  %v15288_v39 = vpop.eup %10386  ;;  %v16289_v50 = vld [vmem:[#allocation64_spill] sm:$0xff] }
 0xc27   : > { %v7666_v55 = vmul.f32 %v16287_v28, %v7602_v13  ;;  %8052 = vmatmul.bf16.gmra.mxu1 %v7972_v61  ;;  %v15291_v20 = vpop.eup %10388  ;;  %v7688_v56 = vmul.f32 %v16289_v50, %v7624_v11  ;;  %v8117_v48 = vpack.c.b16 %v8104_v42, %v8103_v52 }
 0xc28   : > { %v7729_v46 = vpack.c.bf16 %v7665_v43, %v7665_v43  ;;  %v7687_v49 = vmul.f32 %v16288_v26, %v7623_v32  ;;  %10396 = vpow2.f32 %v7343_v40  ;;  %7533 = vadd.xlane.f32.xlu1 %v15288_v39  ;;  %v10391_v47 = vpop.eup %10390 }
 0xc29   : > { %v7730_v38 = vpack.c.bf16 %v7666_v55, %v7666_v55  ;;  %7437 = vadd.xlane.f32.xlu0 %v15291_v20  ;;  %10398 = vpow2.f32 %v7407_v6  ;;  %v7639_v40 = vmul.f32 0.25, %v10391_v47 }
 0xc2a   : > { %v7809_v5 = vunpack.c.l.b16 %v7729_v46  ;;  %v7751_v13 = vpack.c.bf16 %v7687_v49, %v7687_v49  ;;  %v7752_v46 = vpack.c.bf16 %v7688_v56, %v7688_v56  ;;  %v16290_v49 = vld [vmem:[#allocation91_spill] sm:$0xff] }
 0xc2b   : > { %v10393_v24 = vpop.eup %10392  ;;  %v7810_v36 = vunpack.c.l.b16 %v7730_v38  ;;  %v7508_v32 = vpop.xlane.xlu1 %7507  ;;  %v7232_v26 = vsub.f32 %v16290_v49, %v15052_v54 }
 0xc2c   : > { %v10395_v25 = vpop.eup %10394  ;;  %v7150_v58 = vpop.xlane.xlu2 %7149  ;;  %10400 = vrcp.f32 %v7508_v32  ;;  %v7649_v34 = vmul.f32 0.25, %v10393_v24  ;;  %v7960_v52 = vunpack.c.l.b16 %v7751_v13  ;;  %v7961_v50 = vunpack.c.l.b16 %v7752_v46 }
 0xc2d   : > { %v7825_v61 = vpack.c.b16 %v7810_v36, %v7809_v5  ;;  %v7640_v57 = vmul.f32 0.25, %v10395_v25  ;;  %v7247_v43 = vsub.f32 %v15048_v8, %v7150_v58  ;;  %v7184_v28 = vpop.xlane.xlu0 %7183  ;;  %v16291_v8 = vld [vmem:[#allocation51_spill] sm:$0xff]  ;;  %v16292_v5 = vld [vmem:[#allocation74_spill] sm:$0xff]  ;;  %v7311_v58 = vmul.f32 1.442695, %v7232_v26 }
 0xc2e   : > { %v15297_v55 = vpop.eup %10396  ;;  %v7713_v42 = vmul.f32 %v16291_v8, %v7649_v34  ;;  %v7703_v24 = vmul.f32 %v16292_v5, %v7639_v40  ;;  %v7973_v13 = vpack.c.b16 %v7961_v50, %v7960_v52  ;;  %v7264_v40 = vsub.f32 %v15055_v3, %v7184_v28 }
 0xc2f   : > { %v7341_v6 = vmul.f32 1.442695, %v7247_v43  ;;  %7897 = vmatmul.bf16.vlgmr.msrb.gmra.mxu3 %v7825_v61  ;;  %8197 = vmatmul.bf16.gmra.mxu0 %v8117_v48  ;;  %v15299_v11 = vpop.eup %10398  ;;  %v7704_v38 = vmul.f32 %v15035_v9, %v7640_v57 }
 0xc30   : > { %7471 = vadd.xlane.f32.xlu1 %v15297_v55  ;;  %v7777_v9 = vpack.c.bf16 %v7713_v42, %v7713_v42  ;;  %v7767_v57 = vpack.c.bf16 %v7703_v24, %v7703_v24  ;;  %v7375_v5 = vmul.f32 1.442695, %v7264_v40 }
 0xc31   : > { %10402 = vpow2.f32 %v7341_v6  ;;  %7535 = vadd.xlane.f32.xlu0 %v15299_v11  ;;  %v7768_v32 = vpack.c.bf16 %v7704_v38, %v7704_v38 }
 0xc32   : > { %v10401_v47 = vpop.eup %10400  ;;  %v8244_v46 = vunpack.c.l.b16 %v7777_v9  ;;  %v8105_v26 = vunpack.c.l.b16 %v7767_v57 }
 0xc33   : > { %v7650_v56 = vmul.f32 0.25, %v10401_v47  ;;  %v7414_v25 = vpop.xlane.xlu1 %7413  ;;  %v8106_v34 = vunpack.c.l.b16 %v7768_v32 }
 0xc34   : > { %v7416_v36 = vpop.xlane.xlu2 %7415 }
 0xc35   : > { %10404 = vrcp.f32 %v7416_v36  ;;  %v7512_v54 = vpop.xlane.xlu0 %7511  ;;  %v7714_v48 = vmul.f32 %v15050_v17, %v7650_v56  ;;  %v8118_v56 = vpack.c.b16 %v8106_v34, %v8105_v26 }
 0xc36   : > { %10406 = vrcp.f32 %v7414_v25 }
 0xc37   : > { %v15309_v61 = vpop.eup %10402  ;;  %10408 = vrcp.f32 %v7512_v54  ;;  %8057 = vmatmul.bf16.gmra.mxu1 %v7973_v13  ;;  %v7778_v43 = vpack.c.bf16 %v7714_v48, %v7714_v48 }
 0xc38   : > { %7469 = vadd.xlane.f32.xlu2 %v15309_v61  ;;  %10410 = vpow2.f32 %v7311_v58 }
 0xc39   : > { %v8245_v6 = vunpack.c.l.b16 %v7778_v43 }
 0xc3b   : > { %v10405_v49 = vpop.eup %10404  ;;  %v8260_v38 = vpack.c.b16 %v8245_v6, %v8244_v46  ;;  %v7510_v42 = vpop.xlane.xlu1 %7509 }
 0xc3c   : > { %v10407_v52 = vpop.eup %10406  ;;  %v7604_v17 = vmul.f32 0.25, %v10405_v49  ;;  %v15313_v8 = vpop.xlane.xlu2 %7457  ;;  %10412 = vrcp.f32 %v7510_v42 }
 0xc3d   : > { %v10409_v47 = vpop.eup %10408  ;;  %v7603_v24 = vmul.f32 0.25, %v10407_v52  ;;  %v7418_v50 = vpop.xlane.xlu0 %7417  ;;  %8332 = vmatmul.bf16.vlgmr.msrb.gmra.mxu2 %v8260_v38 }
 0xc3e   : > { %v7668_v36 = vmul.f32 %v15069_v29, %v7604_v17  ;;  %v15316_v3 = vpop.eup %10410  ;;  %v7652_v25 = vmul.f32 0.25, %v10409_v47  ;;  %10414 = vrcp.f32 %v7418_v50 }
 0xc3f   : > { %v7667_v28 = vmul.f32 %v15067_v60, %v7603_v24  ;;  %8202 = vmatmul.bf16.gmra.mxu0 %v8118_v56  ;;  %10416 = vpow2.f32 %v7375_v5 }
 0xc40   : > { %v7732_v58 = vpack.c.bf16 %v7668_v36, %v7668_v36  ;;  %7439 = vadd.xlane.f32.xlu2 %v15316_v3  ;;  %v7716_v9 = vmul.f32 %v15071_v16, %v7652_v25 }
 0xc41   : > { %v7731_v32 = vpack.c.bf16 %v7667_v28, %v7667_v28 }
 0xc42   : > { %v7812_v54 = vunpack.c.l.b16 %v7732_v58  ;;  %v10413_v48 = vpop.eup %10412  ;;  %v7780_v49 = vpack.c.bf16 %v7716_v9, %v7716_v9 }
 0xc43   : > { %v7811_v13 = vunpack.c.l.b16 %v7731_v32  ;;  %v7182_v57 = vpop.xlane.xlu1 %7181  ;;  %v7651_v34 = vmul.f32 0.25, %v10413_v48 }
 0xc44   : > { %v7514_v29 = vpop.xlane.xlu2 %7513  ;;  %v10415_v43 = vpop.eup %10414  ;;  %v7263_v60 = vsub.f32 %v15107_v63, %v7182_v57  ;;  %v8247_v42 = vunpack.c.l.b16 %v7780_v49 }
 0xc45   : > { %10418 = vrcp.f32 %v7514_v29  ;;  %v7420_v40 = vpop.xlane.xlu0 %7419  ;;  %v7826_v46 = vpack.c.b16 %v7812_v54, %v7811_v13  ;;  %v15322_v6 = vpop.eup %10416  ;;  %v7715_v26 = vmul.f32 %v15089_v18, %v7651_v34  ;;  %v7605_v52 = vmul.f32 0.25, %v10415_v43 }
 0xc46   : > { %10420 = vrcp.f32 %v7420_v40  ;;  %v7373_v38 = vmul.f32 1.442695, %v7263_v60 }
 0xc47   : > { %7902 = vmatmul.bf16.gmra.mxu3 %v7826_v46  ;;  %v7779_v16 = vpack.c.bf16 %v7715_v26, %v7715_v26  ;;  %v7669_v63 = vmul.f32 %v15091_v45, %v7605_v52 }
 0xc48   : > { %7503 = vadd.xlane.f32.xlu2 %v15322_v6  ;;  %10422 = vpow2.f32 %v7373_v38 }
 0xc49   : > { %v8246_v47 = vunpack.c.l.b16 %v7779_v16  ;;  %v7733_v25 = vpack.c.bf16 %v7669_v63, %v7669_v63 }
 0xc4b   : > { %v10419_v17 = vpop.eup %10418  ;;  %v7516_v50 = vpop.xlane.xlu1 %7515  ;;  %v8261_v28 = vpack.c.b16 %v8247_v42, %v8246_v47  ;;  %v7813_v13 = vunpack.c.l.b16 %v7733_v25 }
 0xc4c   : > { %v10421_v5 = vpop.eup %10420  ;;  %v7492_v24 = vpop.xlane.xlu2 %7491  ;;  %v7653_v58 = vmul.f32 0.25, %v10419_v17 }
 0xc4d   : > { %v7606_v56 = vmul.f32 0.25, %v10421_v5  ;;  %10424 = vrcp.f32 %v7492_v24  ;;  %v7424_v36 = vpop.xlane.xlu0 %7423  ;;  %8337 = vmatmul.bf16.gmra.mxu2 %v8261_v28 }
 0xc4e   : > { %10426 = vrcp.f32 %v7516_v50  ;;  %v15327_v18 = vpop.eup %10422  ;;  %v7717_v9 = vmul.f32 %v15109_v33, %v7653_v58 }
 0xc4f   : > { %v7670_v32 = vmul.f32 %v15111_v22, %v7606_v56  ;;  %10428 = vrcp.f32 %v7424_v36  ;;  %7501 = vadd.xlane.f32.xlu0 %v15327_v18 }
 0xc50   : > { %v7781_v49 = vpack.c.bf16 %v7717_v9, %v7717_v9 }
 0xc51   : > { %v7734_v54 = vpack.c.bf16 %v7670_v32, %v7670_v32 }
 0xc52   : > { %v8248_v16 = vunpack.c.l.b16 %v7781_v49 }
 0xc53   : > { %v10425_v45 = vpop.eup %10424  ;;  %v7814_v48 = vunpack.c.l.b16 %v7734_v54  ;;  %v7422_v43 = vpop.xlane.xlu1 %7421 }
 0xc54   : > { %v10427_v29 = vpop.eup %10426  ;;  %v7464_v57 = vpop.xlane.xlu2 %7463  ;;  %10430 = vrcp.f32 %v7422_v43  ;;  %v7642_v52 = vmul.f32 0.25, %v10425_v45 }
 0xc55   : > { %v10429_v34 = vpop.eup %10428  ;;  %v7654_v60 = vmul.f32 0.25, %v10427_v29  ;;  %v7490_v40 = vpop.xlane.xlu0 %7489  ;;  %v7827_v46 = vpack.c.b16 %v7814_v48, %v7813_v13 }
 0xc56   : > { %v7608_v26 = vmul.f32 0.25, %v10429_v34  ;;  %10432 = vrcp.f32 %v7490_v40  ;;  %v7706_v47 = vmul.f32 %v15127_v62, %v7642_v52 }
 0xc57   : > { %v7718_v22 = vmul.f32 %v15125_v51, %v7654_v60  ;;  %7907 = vmatmul.bf16.gmra.mxu3 %v7827_v46  ;;  %10434 = vrcp.f32 %v15313_v8 }
 0xc58   : > { %v7672_v33 = vmul.f32 %v15129_v15, %v7608_v26  ;;  %v7770_v58 = vpack.c.bf16 %v7706_v47, %v7706_v47 }
 0xc59   : > { %v7782_v38 = vpack.c.bf16 %v7718_v22, %v7718_v22 }
 0xc5a   : > { %v10431_v42 = vpop.eup %10430  ;;  %v7736_v28 = vpack.c.bf16 %v7672_v33, %v7672_v33  ;;  %v8108_v9 = vunpack.c.l.b16 %v7770_v58 }
 0xc5b   : > { %v8249_v17 = vunpack.c.l.b16 %v7782_v38  ;;  %v7518_v5 = vpop.xlane.xlu1 %7517  ;;  %v7607_v50 = vmul.f32 0.25, %v10431_v42 }
 0xc5c   : > { %v7428_v63 = vpop.xlane.xlu2 %7427  ;;  %v10433_v24 = vpop.eup %10432  ;;  %10436 = vrcp.f32 %v7518_v5  ;;  %v7816_v62 = vunpack.c.l.b16 %v7736_v28 }
 0xc5d   : > { %v7462_v56 = vpop.xlane.xlu0 %7461  ;;  %v8262_v36 = vpack.c.b16 %v8249_v17, %v8248_v16  ;;  %v7641_v51 = vmul.f32 0.25, %v10433_v24  ;;  %v7671_v25 = vmul.f32 %v15148_v27, %v7607_v50  ;;  %v10435_v13 = vpop.eup %10434  ;;  %10438 = vrcp.f32 %v7428_v63 }
 0xc5e   : > { %v7625_v40 = vmul.f32 0.25, %v10435_v13 }
 0xc5f   : > { %8342 = vmatmul.bf16.gmra.mxu2 %v8262_v36  ;;  %v7705_v15 = vmul.f32 %v15150_v59, %v7641_v51  ;;  %v7735_v32 = vpack.c.bf16 %v7671_v25, %v7671_v25 }
 0xc60   : > { %v7689_v49 = vmul.f32 %v15087_v31, %v7625_v40 }
 0xc61   : > { %v7769_v54 = vpack.c.bf16 %v7705_v15, %v7705_v15  ;;  %v7815_v45 = vunpack.c.l.b16 %v7735_v32 }
 0xc62   : > { %v10437_v43 = vpop.eup %10436  ;;  %v7753_v42 = vpack.c.bf16 %v7689_v49, %v7689_v49 }
 0xc63   : > { %v8107_v48 = vunpack.c.l.b16 %v7769_v54  ;;  %v7460_v29 = vpop.xlane.xlu1 %7459  ;;  %v7828_v60 = vpack.c.b16 %v7816_v62, %v7815_v45  ;;  %v7655_v46 = vmul.f32 0.25, %v10437_v43  ;;  %v10439_v59 = vpop.eup %10438 }
 0xc64   : > { %v7524_v8 = vpop.xlane.xlu2 %7523  ;;  %10440 = vrcp.f32 %v7460_v29  ;;  %v7610_v5 = vmul.f32 0.25, %v10439_v59 }
 0xc65   : > { %v7520_v34 = vpop.xlane.xlu0 %7519  ;;  %v8119_v27 = vpack.c.b16 %v8108_v9, %v8107_v48  ;;  %v7719_v26 = vmul.f32 %v15165_v23, %v7655_v46 }
 0xc66   : > { %10442 = vrcp.f32 %v7520_v34  ;;  %v7674_v25 = vmul.f32 %v15163_v44, %v7610_v5 }
 0xc67   : > { %7912 = vmatmul.bf16.gmra.mxu3 %v7828_v60  ;;  %8207 = vmatmul.bf16.gmra.mxu0 %v8119_v27  ;;  %10444 = vrcp.f32 %v7462_v56  ;;  %v7783_v24 = vpack.c.bf16 %v7719_v26, %v7719_v26  ;;  %v7962_v56 = vunpack.c.l.b16 %v7753_v42 }
 0xc68   : > { %10446 = vrcp.f32 %v7464_v57 }
 0xc69   : > { %v8250_v57 = vunpack.c.l.b16 %v7783_v24 }
 0xc6a   : > { %v10441_v22 = vpop.eup %10440 }
 0xc6b   : > { %v7494_v52 = vpop.xlane.xlu1 %7493  ;;  %v7626_v16 = vmul.f32 0.25, %v10441_v22 }
 0xc6c   : > { %v10443_v38 = vpop.eup %10442  ;;  %v7526_v63 = vpop.xlane.xlu2 %7525 }
 0xc6d   : > { %v7426_v17 = vpop.xlane.xlu0 %7425  ;;  %v7656_v33 = vmul.f32 0.25, %v10443_v38  ;;  %v7690_v47 = vmul.f32 %v15183_v10, %v7626_v16  ;;  %v10445_v36 = vpop.eup %10444 }
 0xc6e   : > { %10448 = vrcp.f32 %v7426_v17  ;;  %v10447_v28 = vpop.eup %10446  ;;  %v7627_v10 = vmul.f32 0.25, %v10445_v36 }
 0xc6f   : > { %10450 = vrcp.f32 %v7524_v8  ;;  %v7720_v31 = vmul.f32 %v15187_v37, %v7656_v33  ;;  %v7754_v50 = vpack.c.bf16 %v7690_v47, %v7690_v47  ;;  %v7628_v48 = vmul.f32 0.25, %v10447_v28 }
 0xc70   : > { %v7738_v37 = vpack.c.bf16 %v7674_v25, %v7674_v25  ;;  %v7691_v44 = vmul.f32 %v15167_v7, %v7627_v10 }
 0xc71   : > { %v7784_v23 = vpack.c.bf16 %v7720_v31, %v7720_v31  ;;  %v7963_v51 = vunpack.c.l.b16 %v7754_v50  ;;  %v7692_v60 = vmul.f32 %v15146_v21, %v7628_v48 }
 0xc72   : > { %v7818_v27 = vunpack.c.l.b16 %v7738_v37  ;;  %v7755_v49 = vpack.c.bf16 %v7691_v44, %v7691_v44 }
 0xc73   : > { %v8251_v58 = vunpack.c.l.b16 %v7784_v23  ;;  %v7430_v15 = vpop.xlane.xlu1 %7429  ;;  %v7974_v62 = vpack.c.b16 %v7963_v51, %v7962_v56  ;;  %v7756_v16 = vpack.c.bf16 %v7692_v60, %v7692_v60 }
 0xc74   : > { %v10449_v32 = vpop.eup %10448  ;;  %v7498_v8 = vpop.xlane.xlu2 %7497  ;;  %v7964_v21 = vunpack.c.l.b16 %v7755_v49 }
 0xc75   : > { %v7522_v54 = vpop.xlane.xlu0 %7521  ;;  %v10451_v45 = vpop.eup %10450  ;;  %v7609_v13 = vmul.f32 0.25, %v10449_v32  ;;  %v8263_v9 = vpack.c.b16 %v8251_v58, %v8250_v57  ;;  %8062 = vmatmul.bf16.gmra.mxu1 %v7974_v62  ;;  %v7965_v5 = vunpack.c.l.b16 %v7756_v16 }
 0xc76   : > { %10452 = vrcp.f32 %v7522_v54  ;;  %v7658_v43 = vmul.f32 0.25, %v10451_v45 }
 0xc77   : > { %10454 = vrcp.f32 %v7494_v52  ;;  %v7673_v29 = vmul.f32 %v15204_v35, %v7609_v13  ;;  %8347 = vmatmul.bf16.gmra.mxu2 %v8263_v9  ;;  %v7975_v28 = vpack.c.b16 %v7965_v5, %v7964_v21 }
 0xc78   : > { %v7722_v22 = vmul.f32 %v15185_v12, %v7658_v43  ;;  %10456 = vrcp.f32 %v7430_v15 }
 0xc79   : > { %v7737_v34 = vpack.c.bf16 %v7673_v29, %v7673_v29 }
 0xc7a   : > { %v7786_v17 = vpack.c.bf16 %v7722_v22, %v7722_v22 }
 0xc7b   : > { %v7817_v40 = vunpack.c.l.b16 %v7737_v34  ;;  %v7528_v46 = vpop.xlane.xlu1 %7527 }
 0xc7c   : > { %v10453_v59 = vpop.eup %10452  ;;  %10458 = vrcp.f32 %v7528_v46  ;;  %v7434_v24 = vpop.xlane.xlu2 %7433  ;;  %v8253_v23 = vunpack.c.l.b16 %v7786_v17 }
 0xc7d   : > { %v7496_v26 = vpop.xlane.xlu0 %7495  ;;  %v10455_v52 = vpop.eup %10454  ;;  %v7657_v38 = vmul.f32 0.25, %v10453_v59  ;;  %v7829_v35 = vpack.c.b16 %v7818_v27, %v7817_v40 }
 0xc7e   : > { %10460 = vrcp.f32 %v7496_v26  ;;  %v7643_v33 = vmul.f32 0.25, %v10455_v52  ;;  %v10457_v47 = vpop.eup %10456 }
 0xc7f   : > { %10462 = vrcp.f32 %v7526_v63  ;;  %v7721_v7 = vmul.f32 %v15222_v4, %v7657_v38  ;;  %7917 = vmatmul.bf16.gmra.mxu3 %v7829_v35  ;;  %v7611_v58 = vmul.f32 0.25, %v10457_v47 }
 0xc80   : > { %v7707_v56 = vmul.f32 %v15200_v1, %v7643_v33 }
 0xc81   : > { %v7785_v42 = vpack.c.bf16 %v7721_v7, %v7721_v7  ;;  %v7675_v1 = vmul.f32 %v15217_v2, %v7611_v58 }
 0xc82   : > { %v10459_v12 = vpop.eup %10458  ;;  %v7771_v10 = vpack.c.bf16 %v7707_v56, %v7707_v56 }
 0xc83   : > { %v8252_v31 = vunpack.c.l.b16 %v7785_v42  ;;  %v7466_v50 = vpop.xlane.xlu1 %7465  ;;  %v7660_v4 = vmul.f32 0.25, %v10459_v12 }
 0xc84   : > { %v10461_v36 = vpop.eup %10460  ;;  %v8109_v37 = vunpack.c.l.b16 %v7771_v10  ;;  %v7532_v29 = vpop.xlane.xlu2 %7531 }
 0xc85   : > { %v7432_v51 = vpop.xlane.xlu0 %7431  ;;  %v10463_v63 = vpop.eup %10462  ;;  %v7644_v25 = vmul.f32 0.25, %v10461_v36  ;;  %8067 = vmatmul.bf16.gmra.mxu1 %v7975_v28  ;;  %v8264_v57 = vpack.c.b16 %v8253_v23, %v8252_v31  ;;  %v7724_v62 = vmul.f32 %v15233_v14, %v7660_v4  ;;  %v16294_v23 = vld [vmem:[#allocation90_spill] sm:$0xff] }
 0xc86   : > { %10464 = vrcp.f32 %v7432_v51  ;;  %v7659_v32 = vmul.f32 0.25, %v10463_v63  ;;  %v16295_v28 = vld [vmem:[#allocation82_spill] sm:$0xff] }
 0xc87   : > { %v7708_v15 = vmul.f32 %v15237_v0, %v7644_v25  ;;  %8352 = vmatmul.bf16.gmra.mxu2 %v8264_v57  ;;  %10466 = vrcp.f32 %v7498_v8  ;;  %v7788_v43 = vpack.c.bf16 %v7724_v62, %v7724_v62  ;;  %v7739_v8 = vpack.c.bf16 %v7675_v1, %v7675_v1  ;;  %v16296_v57 = vld [vmem:[#allocation62_spill] sm:$0xff]  ;;  %v16297_v62 = vld [vmem:[#allocation72_spill] sm:$0xff] }
 0xc88   : > { %10468 = vrcp.f32 %v7466_v50  ;;  %v7723_v48 = vmul.f32 %v15202_v19, %v7659_v32  ;;  %v16293_v50 = vld [vmem:[#allocation86_spill] sm:$0xff] }
 0xc89   : > { %v7772_v54 = vpack.c.bf16 %v7708_v15, %v7708_v15  ;;  %v8255_v19 = vunpack.c.l.b16 %v7788_v43  ;;  %v7819_v49 = vunpack.c.l.b16 %v7739_v8 }
 0xc8a   : > { %v7787_v60 = vpack.c.bf16 %v7723_v48, %v7723_v48 }
 0xc8b   : > { %v8110_v45 = vunpack.c.l.b16 %v7772_v54  ;;  %v7436_v13 = vpop.xlane.xlu1 %7435 }
 0xc8c   : > { %v10465_v9 = vpop.eup %10464  ;;  %10470 = vrcp.f32 %v7436_v13  ;;  %v8254_v38 = vunpack.c.l.b16 %v7787_v60 }
 0xc8d   : > { %v7530_v44 = vpop.xlane.xlu0 %7529  ;;  %v7612_v0 = vmul.f32 0.25, %v10465_v9  ;;  %v8120_v34 = vpack.c.b16 %v8110_v45, %v8109_v37  ;;  %v10467_v2 = vpop.eup %10466  ;;  %v16298_v45 = vld [vmem:[#allocation93_spill] sm:$0xff] }
 0xc8e   : > { %10472 = vrcp.f32 %v7530_v44  ;;  %v10469_v27 = vpop.eup %10468  ;;  %v7645_v7 = vmul.f32 0.25, %v10467_v2  ;;  %v8265_v42 = vpack.c.b16 %v8255_v19, %v8254_v38 }
 0xc8f   : > { %10474 = vrcp.f32 %v7434_v24  ;;  %v7676_v14 = vmul.f32 %v15252_v41, %v7612_v0  ;;  %8212 = vmatmul.bf16.gmra.mxu0 %v8120_v34  ;;  %v7629_v17 = vmul.f32 0.25, %v10469_v27 }
 0xc90   : > { %10476 = vrcp.f32 %v7532_v29  ;;  %v7709_v24 = vmul.f32 %v15220_v53, %v7645_v7 }
 0xc91   : > { %v7740_v40 = vpack.c.bf16 %v7676_v14, %v7676_v14  ;;  %v7693_v36 = vmul.f32 %v16293_v50, %v7629_v17  ;;  %v8043_v17 = vpop.f32.mrf.mxu1 }
 0xc92   : > { %v10471_v46 = vpop.eup %10470  ;;  %v7773_v10 = vpack.c.bf16 %v7709_v24, %v7709_v24 }
 0xc93   : > { %v7820_v22 = vunpack.c.l.b16 %v7740_v40  ;;  %v7500_v26 = vpop.xlane.xlu1 %7499  ;;  %v7614_v21 = vmul.f32 0.25, %v10471_v46 }
 0xc94   : > { %v10473_v59 = vpop.eup %10472  ;;  %10478 = vrcp.f32 %v7500_v26  ;;  %v8111_v44 = vunpack.c.l.b16 %v7773_v10 }
 0xc95   : > { %v10475_v52 = vpop.eup %10474  ;;  %v7468_v35 = vpop.xlane.xlu0 %7467  ;;  %v7830_v41 = vpack.c.b16 %v7820_v22, %v7819_v49  ;;  %v7661_v33 = vmul.f32 0.25, %v10473_v59  ;;  %v7678_v12 = vmul.f32 %v15265_v30, %v7614_v21  ;;  %v7757_v30 = vpack.c.bf16 %v7693_v36, %v7693_v36 }
 0xc96   : > { %v10477_v16 = vpop.eup %10476  ;;  %10480 = vrcp.f32 %v7468_v35  ;;  %v7613_v47 = vmul.f32 0.25, %v10475_v52 }
 0xc97   : > { %7922 = vmatmul.bf16.gmra.mxu3 %v7830_v41  ;;  %v7662_v5 = vmul.f32 0.25, %v10477_v16  ;;  %8357 = vmatmul.bf16.gmra.mxu2 %v8265_v42  ;;  %v7725_v56 = vmul.f32 %v16294_v23, %v7661_v33  ;;  %v7742_v54 = vpack.c.bf16 %v7678_v12, %v7678_v12  ;;  %v7966_v34 = vunpack.c.l.b16 %v7757_v30  ;;  %v9697_v41 = vld [vmem:[#allocation19 + $0x8] sm:$0xff]  ;;  %v9696_v12 = vld [vmem:[#allocation19] sm:$0xff] }
 0xc98   : > { %v7677_v63 = vmul.f32 %v16295_v28, %v7613_v47  ;;  %8578 = vmatpush.bf16.msra.mxu3 %v9697_v41 }
 0xc99   : > { %v7726_v58 = vmul.f32 %v16296_v57, %v7662_v5  ;;  %v7789_v1 = vpack.c.bf16 %v7725_v56, %v7725_v56  ;;  %v7822_v0 = vunpack.c.l.b16 %v7742_v54  ;;  %v8188_v56 = vpop.f32.mrf.mxu0  ;;  %v8045_v57 = vpop.f32.mrf.mxu1 }
 0xc9a   : > { %v10479_v31 = vpop.eup %10478  ;;  %v7741_v9 = vpack.c.bf16 %v7677_v63, %v7677_v63 }
 0xc9b   : > { %v7646_v25 = vmul.f32 0.25, %v10479_v31  ;;  %v7534_v4 = vpop.xlane.xlu1 %7533  ;;  %v7790_v37 = vpack.c.bf16 %v7726_v58, %v7726_v58  ;;  %v8256_v8 = vunpack.c.l.b16 %v7789_v1 }
 0xc9c   : > { %v10481_v51 = vpop.eup %10480  ;;  %10482 = vrcp.f32 %v7534_v4  ;;  %v7821_v60 = vunpack.c.l.b16 %v7741_v9  ;;  %8579 = vmatpush.bf16.msra.mxu3 %v9696_v12  ;;  %v8374_v9 = vsel %vm1553_vm4, %v8043_v17, 0.0 }
 0xc9d   : > { %v7630_v15 = vmul.f32 0.25, %v10481_v51  ;;  %v7438_v32 = vpop.xlane.xlu0 %7437  ;;  %v7710_v53 = vmul.f32 %v16297_v62, %v7646_v25  ;;  %v8257_v46 = vunpack.c.l.b16 %v7790_v37 }
 0xc9e   : > { %v7831_v49 = vpack.c.b16 %v7822_v0, %v7821_v60 }
 0xc9f   : > { %v7694_v13 = vmul.f32 %v16298_v45, %v7630_v15  ;;  %v7774_v48 = vpack.c.bf16 %v7710_v53, %v7710_v53  ;;  %v8266_v26 = vpack.c.b16 %v8257_v46, %v8256_v8 }
 0xca1   : > { %v7758_v29 = vpack.c.bf16 %v7694_v13, %v7694_v13  ;;  %v8112_v43 = vunpack.c.l.b16 %v7774_v48  ;;  %v8190_v1 = vpop.f32.mrf.mxu0 }
 0xca2   : > { %v10483_v2 = vpop.eup %10482 }
 0xca3   : > { %v7967_v14 = vunpack.c.l.b16 %v7758_v29  ;;  %v7472_v27 = vpop.xlane.xlu1 %7471  ;;  %v8121_v40 = vpack.c.b16 %v8112_v43, %v8111_v44  ;;  %v7663_v22 = vmul.f32 0.25, %v10483_v2  ;;  %v8048_v43 = vpop.f32.mrf.mxu1 }
 0xca4   : > { %10484 = vrcp.f32 %v7472_v27 }
 0xca5   : > { %v7536_v19 = vpop.xlane.xlu0 %7535  ;;  %v7976_v59 = vpack.c.b16 %v7967_v14, %v7966_v34  ;;  %8217 = vmatmul.bf16.gmra.mxu0 %v8121_v40  ;;  %v7727_v38 = vmul.f32 %v15288_v39, %v7663_v22  ;;  %v8381_v14 = vsel %vm1553_vm4, %v8045_v57, 0.0 }
 0xca6   : > { %10486 = vrcp.f32 %v7536_v19 }
 0xca7   : > { %8072 = vmatmul.bf16.gmra.mxu1 %v7976_v59  ;;  %7927 = vmatmul.bf16.gmra.mxu3 %v7831_v49  ;;  %10488 = vrcp.f32 %v7438_v32  ;;  %v7791_v33 = vpack.c.bf16 %v7727_v38, %v7727_v38  ;;  %v15374_v59 = vld [vmem:[#allocation17] ss:$0 sm:$0xff]  ;;  %v8383_v49 = vsel %vm1553_vm4, %v8190_v1, 0.0 }
 0xca8   : > { %8362 = vmatmul.bf16.gmra.mxu2 %v8266_v26 }
 0xca9   : > { %v8258_v50 = vunpack.c.l.b16 %v7791_v33  ;;  %v8193_v46 = vpop.f32.mrf.mxu0 }
 0xcaa   : > { %v10485_v52 = vpop.eup %10484 }
 0xcab   : > { %v7470_v35 = vpop.xlane.xlu2 %7469  ;;  %v7632_v7 = vmul.f32 0.25, %v10485_v52  ;;  %v8050_v17 = vpop.f32.mrf.mxu1 }
 0xcac   : > { %v10487_v16 = vpop.eup %10486  ;;  %10490 = vrcp.f32 %v7470_v35 }
 0xcad   : > { %v7664_v21 = vmul.f32 0.25, %v10487_v16  ;;  %v10489_v47 = vpop.eup %10488  ;;  %v7696_v5 = vmul.f32 %v15297_v55, %v7632_v7 }
 0xcae   : > { %v7615_v51 = vmul.f32 0.25, %v10489_v47 }
 0xcaf   : > { %v7728_v42 = vmul.f32 %v15299_v11, %v7664_v21  ;;  %v7760_v28 = vpack.c.bf16 %v7696_v5, %v7696_v5 }
 0xcb0   : > { %v7679_v55 = vmul.f32 %v15291_v20, %v7615_v51 }
 0xcb1   : > { %v7792_v24 = vpack.c.bf16 %v7728_v42, %v7728_v42  ;;  %v7969_v58 = vunpack.c.l.b16 %v7760_v28 }
 0xcb2   : > { %v10491_v31 = vpop.eup %10490  ;;  %v7898_v25 = vpop.f32.mrf.mxu3  ;;  %v7743_v53 = vpack.c.bf16 %v7679_v55, %v7679_v55 }
 0xcb3   : > { %v8259_v39 = vunpack.c.l.b16 %v7792_v24  ;;  %v7631_v36 = vmul.f32 0.25, %v10491_v31  ;;  %v7440_v23 = vpop.xlane.xlu2 %7439  ;;  %v8388_v31 = vsel %vm1553_vm4, %v8048_v43, 0.0 }
 0xcb4   : > { %10492 = vrcp.f32 %v7440_v23  ;;  %v7823_v20 = vunpack.c.l.b16 %v7743_v53 }
 0xcb5   : > { %v7695_v63 = vmul.f32 %v15309_v61, %v7631_v36  ;;  %v8267_v11 = vpack.c.b16 %v8259_v39, %v8258_v50  ;;  %v8373_v61 = vsel %vm1553_vm4, %v7898_v25, 0.0  ;;  %v8195_v50 = vpop.f32.mrf.mxu0  ;;  %v8395_v25 = vsel %vm1553_vm4, %v8050_v17, 0.0 }
 0xcb6   : > { %v8375_v48 = vadd.f32 %v8374_v9, %v8373_v61 }
 0xcb7   : > { %v7759_v4 = vpack.c.bf16 %v7695_v63, %v7695_v63 }
 0xcb8   : > { %8367 = vmatmul.bf16.gmra.mxu2 %v8267_v11  ;;  %v8390_v11 = vsel %vm1553_vm4, %v8193_v46, 0.0 }
 0xcb9   : > { %v7968_v15 = vunpack.c.l.b16 %v7759_v4 }
 0xcba   : > { %v10493_v32 = vpop.eup %10492  ;;  %v7900_v13 = vpop.f32.mrf.mxu3 }
 0xcbb   : > { %v7616_v10 = vmul.f32 0.25, %v10493_v32  ;;  %v7504_v54 = vpop.xlane.xlu2 %7503  ;;  %v7977_v62 = vpack.c.b16 %v7969_v58, %v7968_v15  ;;  %v8380_v0 = vsel %vm1553_vm4, %v7900_v13, 0.0  ;;  %v8053_v58 = vpop.f32.mrf.mxu1  ;;  %v8397_v32 = vsel %vm1553_vm4, %v8195_v50, 0.0 }
 0xcbc   : > { %10494 = vrcp.f32 %v7504_v54  ;;  %v8382_v60 = vadd.f32 %v8381_v14, %v8380_v0 }
 0xcbd   : > { %v7680_v30 = vmul.f32 %v15316_v3, %v7616_v10  ;;  %8077 = vmatmul.bf16.gmra.mxu1 %v7977_v62  ;;  %v8376_v3 = vsel %vm1553_vm4, %v8188_v56, 0.0 }
 0xcbe   : > { %v8377_v40 = vadd.f32 %v8376_v3, %v8375_v48  ;;  %v8384_v52 = vadd.f32 %v8383_v49, %v8382_v60  ;;  %v8402_v48 = vsel %vm1553_vm4, %v8053_v58, 0.0 }
 0xcbf   : > { %v7744_v45 = vpack.c.bf16 %v7680_v30, %v7680_v30  ;;  %v8198_v30 = vpop.f32.mrf.mxu0 }
 0xcc0   : > { %v8333_v29 = vpop.f32.mrf.mxu2  ;;  %v8404_v3 = vsel %vm1553_vm4, %v8198_v30, 0.0 }
 0xcc1   : > { %v7824_v37 = vunpack.c.l.b16 %v7744_v45  ;;  %v8378_v2 = vsel %vm1553_vm4, %v8333_v29, 0.0 }
 0xcc2   : > { %v10495_v44 = vpop.eup %10494  ;;  %v7502_v34 = vpop.xlane.xlu0 %7501  ;;  %v8379_v19 = vadd.f32 %v8378_v2, %v8377_v40 }
 0xcc3   : > { %v7832_v8 = vpack.c.b16 %v7824_v37, %v7823_v20  ;;  %10496 = vrcp.f32 %v7502_v34  ;;  %v7648_v27 = vmul.f32 0.25, %v10495_v44  ;;  %v8055_v37 = vpop.f32.mrf.mxu1 }
 0xcc4   : > { %v8488_v7 = vadd.f32 %v15374_v59, %v8379_v19 }
 0xcc5   : > { %7932 = vmatmul.bf16.gmra.mxu3 %v7832_v8  ;;  %v7712_v22 = vmul.f32 %v15322_v6, %v7648_v27  ;;  %v8409_v8 = vsel %vm1553_vm4, %v8055_v37, 0.0 }
 0xcc6   : > { %v8504_v5 = vmax.f32 %v8488_v7, 0.0 }
 0xcc7   : > { %v7776_v33 = vpack.c.bf16 %v7712_v22, %v7712_v22  ;;  %v8200_v2 = vpop.f32.mrf.mxu0 }
 0xcc8   : > { %v8335_v26 = vpop.f32.mrf.mxu2  ;;  %v8411_v46 = vsel %vm1553_vm4, %v8200_v2, 0.0 }
 0xcc9   : > { %v10497_v38 = vpop.eup %10496  ;;  %v8385_v16 = vsel %vm1553_vm4, %v8335_v26, 0.0  ;;  %v8114_v39 = vunpack.c.l.b16 %v7776_v33 }
 0xcca   : > { %v7903_v35 = vpop.f32.mrf.mxu3  ;;  %v7647_v21 = vmul.f32 0.25, %v10497_v38  ;;  %v8386_v41 = vadd.f32 %v8385_v16, %v8384_v52 }
 0xccb   : > { %v8387_v6 = vsel %vm1553_vm4, %v7903_v35, 0.0  ;;  %v8058_v35 = vpop.f32.mrf.mxu1 }
 0xccc   : > { %v7711_v42 = vmul.f32 %v15327_v18, %v7647_v21  ;;  %v8489_v47 = vadd.f32 %v15374_v59, %v8386_v41  ;;  %v8389_v56 = vadd.f32 %v8388_v31, %v8387_v6 }
 0xcce   : > { %v7775_v24 = vpack.c.bf16 %v7711_v42, %v7711_v42  ;;  %v8505_v12 = vmax.f32 %v8489_v47, 0.0  ;;  %v8391_v55 = vadd.f32 %v8390_v11, %v8389_v56 }
 0xccf   : > { %v8203_v17 = vpop.f32.mrf.mxu0 }
 0xcd0   : > { %v8113_v36 = vunpack.c.l.b16 %v7775_v24  ;;  %v15384_v23 = vpack.c.bf16 %v8505_v12, %v8504_v5  ;;  %v8338_v28 = vpop.f32.mrf.mxu2  ;;  %v8416_v5 = vsel %vm1553_vm4, %v8058_v35, 0.0 }
 0xcd1   : > { %v8392_v4 = vsel %vm1553_vm4, %v8338_v28, 0.0 }
 0xcd2   : > { %v7905_v51 = vpop.f32.mrf.mxu3  ;;  %v8122_v18 = vpack.c.b16 %v8114_v39, %v8113_v36  ;;  %v8393_v15 = vadd.f32 %v8392_v4, %v8391_v55  ;;  %v8418_v39 = vsel %vm1553_vm4, %v8203_v17, 0.0 }
 0xcd3   : > { %v8394_v63 = vsel %vm1553_vm4, %v7905_v51, 0.0  ;;  %v8060_v42 = vpop.f32.mrf.mxu1 }
 0xcd4   : > { %8222 = vmatmul.bf16.gmra.mxu0 %v8122_v18  ;;  %v8396_v57 = vadd.f32 %v8395_v25, %v8394_v63  ;;  %v8490_v61 = vadd.f32 %v15374_v59, %v8393_v15  ;;  %v8423_v50 = vsel %vm1553_vm4, %v8060_v42, 0.0 }
 0xcd5   : > { %9605 = vmatmul.msk.bf16.vlgmr.msra.gmra.mxu3 %vm1553_vm4, %v15384_v23 }
 0xcd6   : > { %v8398_v54 = vadd.f32 %v8397_v32, %v8396_v57  ;;  %v8506_v9 = vmax.f32 %v8490_v61, 0.0 }
 0xcd7   : > { %v8205_v31 = vpop.f32.mrf.mxu0 }
 0xcd8   : > { %v8340_v10 = vpop.f32.mrf.mxu2  ;;  %v8425_v18 = vsel %vm1553_vm4, %v8205_v31, 0.0 }
 0xcd9   : > { %v8399_v53 = vsel %vm1553_vm4, %v8340_v10, 0.0 }
 0xcda   : > { %v7908_v62 = vpop.f32.mrf.mxu3  ;;  %v8400_v1 = vadd.f32 %v8399_v53, %v8398_v54 }
 0xcdb   : > { %v8401_v13 = vsel %vm1553_vm4, %v7908_v62, 0.0 }
 0xcdc   : > { %v8491_v45 = vadd.f32 %v15374_v59, %v8400_v1  ;;  %v8403_v44 = vadd.f32 %v8402_v48, %v8401_v13 }
 0xcde   : > { %v8507_v20 = vmax.f32 %v8491_v45, 0.0  ;;  %v8405_v60 = vadd.f32 %v8404_v3, %v8403_v44 }
 0xce0   : > { %v15398_v29 = vpack.c.bf16 %v8507_v20, %v8506_v9 }
 0xce2   : > { %v8343_v0 = vpop.f32.mrf.mxu2  ;;  %v7910_v43 = vpop.f32.mrf.mxu3 }
 0xce3   : > { %v8408_v34 = vsel %vm1553_vm4, %v7910_v43, 0.0  ;;  %v8406_v14 = vsel %vm1553_vm4, %v8343_v0, 0.0 }
 0xce4   : > { %v8410_v27 = vadd.f32 %v8409_v8, %v8408_v34  ;;  %v8407_v40 = vadd.f32 %v8406_v14, %v8405_v60  ;;  %v8208_v55 = vpop.f32.mrf.mxu0 }
 0xce5   : > { %9606 = vmatmul.msk.bf16.gmra.mxu3 %vm1553_vm4, %v15398_v29  ;;  %v8432_v20 = vsel %vm1553_vm4, %v8208_v55, 0.0 }
 0xce6   : > { %v8412_v49 = vadd.f32 %v8411_v46, %v8410_v27  ;;  %v8492_v26 = vadd.f32 %v15374_v59, %v8407_v40 }
 0xce8   : > { %v8508_v7 = vmax.f32 %v8492_v26, 0.0 }
 0xcea   : > { %v8345_v19 = vpop.f32.mrf.mxu2  ;;  %v7913_v16 = vpop.f32.mrf.mxu3 }
 0xceb   : > { %v8413_v22 = vsel %vm1553_vm4, %v8345_v19, 0.0  ;;  %v8415_v33 = vsel %vm1553_vm4, %v7913_v16, 0.0 }
 0xcec   : > { %v8414_v52 = vadd.f32 %v8413_v22, %v8412_v49  ;;  %v8417_v24 = vadd.f32 %v8416_v5, %v8415_v33  ;;  %v8210_v48 = vpop.f32.mrf.mxu0 }
 0xced   : > { %v8439_v8 = vsel %vm1553_vm4, %v8210_v48, 0.0 }
 0xcee   : > { %v8493_v38 = vadd.f32 %v15374_v59, %v8414_v52  ;;  %v8419_v51 = vadd.f32 %v8418_v39, %v8417_v24 }
 0xcf0   : > { %v8509_v21 = vmax.f32 %v8493_v38, 0.0 }
 0xcf2   : > { %v15410_v41 = vpack.c.bf16 %v8509_v21, %v8508_v7  ;;  %v7915_v47 = vpop.f32.mrf.mxu3  ;;  %v8063_v28 = vpop.f32.mrf.mxu1 }
 0xcf3   : > { %v8422_v12 = vsel %vm1553_vm4, %v7915_v47, 0.0  ;;  %v8430_v53 = vsel %vm1553_vm4, %v8063_v28, 0.0 }
 0xcf4   : > { %v8424_v56 = vadd.f32 %v8423_v50, %v8422_v12 }
 0xcf5   : > { %9607 = vmatmul.msk.bf16.gmra.mxu3 %vm1553_vm4, %v15410_v41 }
 0xcf6   : > { %v8426_v4 = vadd.f32 %v8425_v18, %v8424_v56 }
 0xcfa   : > { %v8348_v6 = vpop.f32.mrf.mxu2  ;;  %v8065_v30 = vpop.f32.mrf.mxu1 }
 0xcfb   : > { %v8420_v36 = vsel %vm1553_vm4, %v8348_v6, 0.0  ;;  %v8437_v37 = vsel %vm1553_vm4, %v8065_v30, 0.0 }
 0xcfc   : > { %v8421_v63 = vadd.f32 %v8420_v36, %v8419_v51 }
 0xcfe   : > { %v8494_v58 = vadd.f32 %v15374_v59, %v8421_v63 }
 0xd00   : > { %v8510_v10 = vmax.f32 %v8494_v58, 0.0 }
 0xd02   : > { %v7918_v25 = vpop.f32.mrf.mxu3  ;;  %v8350_v11 = vpop.f32.mrf.mxu2 }
 0xd03   : > { %v8427_v57 = vsel %vm1553_vm4, %v8350_v11, 0.0  ;;  %v8429_v54 = vsel %vm1553_vm4, %v7918_v25, 0.0  ;;  %v8068_v2 = vpop.f32.mrf.mxu1 }
 0xd04   : > { %v8428_v15 = vadd.f32 %v8427_v57, %v8426_v4  ;;  %v8431_v45 = vadd.f32 %v8430_v53, %v8429_v54  ;;  %v8444_v52 = vsel %vm1553_vm4, %v8068_v2, 0.0 }
 0xd06   : > { %v8495_v32 = vadd.f32 %v15374_v59, %v8428_v15  ;;  %v8433_v43 = vadd.f32 %v8432_v20, %v8431_v45 }
 0xd08   : > { %v8511_v62 = vmax.f32 %v8495_v32, 0.0 }
 0xd0a   : > { %v15426_v61 = vpack.c.bf16 %v8511_v62, %v8510_v10  ;;  %v7920_v1 = vpop.f32.mrf.mxu3  ;;  %v8353_v13 = vpop.f32.mrf.mxu2 }
 0xd0b   : > { %v8436_v9 = vsel %vm1553_vm4, %v7920_v1, 0.0  ;;  %v8434_v44 = vsel %vm1553_vm4, %v8353_v13, 0.0  ;;  %v8070_v21 = vpop.f32.mrf.mxu1 }
 0xd0c   : > { %9608 = vmatmul.msk.bf16.gmra.mxu3 %vm1553_vm4, %v15426_v61  ;;  %v8438_v0 = vadd.f32 %v8437_v37, %v8436_v9  ;;  %v8435_v34 = vadd.f32 %v8434_v44, %v8433_v43  ;;  %v8213_v46 = vpop.f32.mrf.mxu0  ;;  %v8451_v5 = vsel %vm1553_vm4, %v8070_v21, 0.0 }
 0xd0d   : > { %v8446_v17 = vsel %vm1553_vm4, %v8213_v46, 0.0 }
 0xd0e   : > { %v8440_v14 = vadd.f32 %v8439_v8, %v8438_v0  ;;  %v8496_v27 = vadd.f32 %v15374_v59, %v8435_v34 }
 0xd10   : > { %v8512_v49 = vmax.f32 %v8496_v27, 0.0 }
 0xd12   : > { %v8355_v3 = vpop.f32.mrf.mxu2 }
 0xd13   : > { %v8441_v60 = vsel %vm1553_vm4, %v8355_v3, 0.0 }
 0xd14   : > { %v8442_v40 = vadd.f32 %v8441_v60, %v8440_v14  ;;  %v8215_v33 = vpop.f32.mrf.mxu0 }
 0xd15   : > { %v8453_v39 = vsel %vm1553_vm4, %v8215_v33, 0.0 }
 0xd16   : > { %v8497_v19 = vadd.f32 %v15374_v59, %v8442_v40 }
 0xd18   : > { %v8513_v22 = vmax.f32 %v8497_v19, 0.0 }
 0xd1a   : > { %v7923_v26 = vpop.f32.mrf.mxu3  ;;  %v15439_v38 = vpack.c.bf16 %v8513_v22, %v8512_v49  ;;  %v8358_v16 = vpop.f32.mrf.mxu2 }
 0xd1b   : > { %v8443_v35 = vsel %vm1553_vm4, %v7923_v26, 0.0  ;;  %v8448_v24 = vsel %vm1553_vm4, %v8358_v16, 0.0 }
 0xd1c   : > { %v8445_v7 = vadd.f32 %v8444_v52, %v8443_v35  ;;  %9609 = vmatmul.msk.bf16.gmra.mxu3 %vm1553_vm4, %v15439_v38 }
 0xd1e   : > { %v8447_v42 = vadd.f32 %v8446_v17, %v8445_v7 }
 0xd20   : > { %v8449_v31 = vadd.f32 %v8448_v24, %v8447_v42 }
 0xd22   : > { %v7925_v47 = vpop.f32.mrf.mxu3  ;;  %v8360_v12 = vpop.f32.mrf.mxu2  ;;  %v8498_v28 = vadd.f32 %v15374_v59, %v8449_v31 }
 0xd23   : > { %v8450_v6 = vsel %vm1553_vm4, %v7925_v47, 0.0  ;;  %v8455_v51 = vsel %vm1553_vm4, %v8360_v12, 0.0  ;;  %v8218_v18 = vpop.f32.mrf.mxu0 }
 0xd24   : > { %v8452_v50 = vadd.f32 %v8451_v5, %v8450_v6  ;;  %v8073_v56 = vpop.f32.mrf.mxu1  ;;  %v8514_v58 = vmax.f32 %v8498_v28, 0.0  ;;  %v8460_v54 = vsel %vm1553_vm4, %v8218_v18, 0.0 }
 0xd25   : > { %v8458_v4 = vsel %vm1553_vm4, %v8073_v56, 0.0 }
 0xd26   : > { %v8454_v36 = vadd.f32 %v8453_v39, %v8452_v50  ;;  %v15481_v39 = vld [vmem:[%s15601_s24] ss:$0 sm:$0xff] }
 0xd28   : > { %v8456_v63 = vadd.f32 %v8455_v51, %v8454_v36 }
 0xd2a   : > { %v8499_v25 = vadd.f32 %v15374_v59, %v8456_v63  ;;  %v7928_v11 = vpop.f32.mrf.mxu3 }
 0xd2b   : > { %v8457_v57 = vsel %vm1553_vm4, %v7928_v11, 0.0  ;;  %v8363_v55 = vpop.f32.mrf.mxu2  ;;  %v8220_v30 = vpop.f32.mrf.mxu0 }
 0xd2c   : > { %v8515_v15 = vmax.f32 %v8499_v25, 0.0  ;;  %v8459_v32 = vadd.f32 %v8458_v4, %v8457_v57  ;;  %v8075_v53 = vpop.f32.mrf.mxu1  ;;  %v8462_v45 = vsel %vm1553_vm4, %v8363_v55, 0.0  ;;  %v8467_v44 = vsel %vm1553_vm4, %v8220_v30, 0.0 }
 0xd2d   : > { %v8465_v13 = vsel %vm1553_vm4, %v8075_v53, 0.0 }
 0xd2e   : > { %v15454_v10 = vpack.c.bf16 %v8515_v15, %v8514_v58  ;;  %v8461_v62 = vadd.f32 %v8460_v54, %v8459_v32 }
 0xd30   : > { %9610 = vmatmul.msk.bf16.gmra.mxu3 %vm1553_vm4, %v15454_v10  ;;  %v8463_v20 = vadd.f32 %v8462_v45, %v8461_v62 }
 0xd32   : > { %v7930_v1 = vpop.f32.mrf.mxu3  ;;  %v8500_v34 = vadd.f32 %v15374_v59, %v8463_v20 }
 0xd33   : > { %v8464_v9 = vsel %vm1553_vm4, %v7930_v1, 0.0  ;;  %v8365_v37 = vpop.f32.mrf.mxu2 }
 0xd34   : > { %v8466_v48 = vadd.f32 %v8465_v13, %v8464_v9  ;;  %v8469_v43 = vsel %vm1553_vm4, %v8365_v37, 0.0  ;;  %v8516_v14 = vmax.f32 %v8500_v34, 0.0 }
 0xd36   : > { %v8468_v0 = vadd.f32 %v8467_v44, %v8466_v48 }
 0xd38   : > { %v8470_v8 = vadd.f32 %v8469_v43, %v8468_v0 }
 0xd3a   : > { %v8501_v3 = vadd.f32 %v15374_v59, %v8470_v8  ;;  %v8078_v40 = vpop.f32.mrf.mxu1 }
 0xd3b   : > { %v8368_v46 = vpop.f32.mrf.mxu2  ;;  %v8472_v26 = vsel %vm1553_vm4, %v8078_v40, 0.0  ;;  %v9698_v40 = vld [vmem:[#allocation20] sm:$0xff] }
 0xd3c   : > { %v8517_v2 = vmax.f32 %v8501_v3, 0.0  ;;  %v8476_v33 = vsel %vm1553_vm4, %v8368_v46, 0.0 }
 0xd3e   : > { %v8526_v60 = vpack.c.bf16 %v8517_v2, %v8516_v14 }
 0xd40   : > { %9611 = vmatmul.msk.bf16.gmra.mxu3 %vm1553_vm4, %v8526_v60 }
 0xd42   : > { %v8080_v16 = vpop.f32.mrf.mxu1 }
 0xd43   : > { %v8479_v42 = vsel %vm1553_vm4, %v8080_v16, 0.0  ;;  %v8370_v47 = vpop.f32.mrf.mxu2 }
 0xd44   : > { %v8483_v50 = vsel %vm1553_vm4, %v8370_v47, 0.0 }
 0xd48   : > { %v7933_v27 = vpop.f32.mrf.mxu3 }
 0xd49   : > { %v8471_v49 = vsel %vm1553_vm4, %v7933_v27, 0.0  ;;  %v9699_v27 = vld [vmem:[#allocation20 + $0x8] sm:$0xff] }
 0xd4a   : > { %v8473_v35 = vadd.f32 %v8472_v26, %v8471_v49 }
 0xd50   : > { %v7935_v19 = vpop.f32.mrf.mxu3 }
 0xd51   : > { %v8223_v22 = vpop.f32.mrf.mxu0  ;;  %v8478_v21 = vsel %vm1553_vm4, %v7935_v19, 0.0 }
 0xd52   : > { %v8474_v52 = vsel %vm1553_vm4, %v8223_v22, 0.0  ;;  %v8480_v5 = vadd.f32 %v8479_v42, %v8478_v21 }
 0xd53   : > { %v8475_v7 = vadd.f32 %v8474_v52, %v8473_v35 }
 0xd55   : > { %v8477_v24 = vadd.f32 %v8476_v33, %v8475_v7 }
 0xd57   : > { %v8502_v36 = vadd.f32 %v15374_v59, %v8477_v24 }
 0xd58   : > { %v8581_v17 = vpop.f32.mrf.mxu3 }
 0xd59   : > { %v8225_v6 = vpop.f32.mrf.mxu0  ;;  %v8582_v63 = vadd.f32 %v15481_v39, %v8581_v17  ;;  %v8518_v25 = vmax.f32 %v8502_v36, 0.0 }
 0xd5a   : > { %v8481_v12 = vsel %vm1553_vm4, %v8225_v6, 0.0 }
 0xd5b   : > { %v8482_v31 = vadd.f32 %v8481_v12, %v8480_v5 }
 0xd5d   : > { %v8484_v56 = vadd.f32 %v8483_v50, %v8482_v31 }
 0xd5f   : > { %v8503_v51 = vadd.f32 %v15374_v59, %v8484_v56 }
 0xd60   : > { %v8583_v28 = vpop.f32.mrf.mxu3 }
 0xd61   : > { %v8584_v18 = vadd.f32 %v15481_v39, %v8583_v28  ;;  %v8519_v11 = vmax.f32 %v8503_v51, 0.0 }
 0xd63   : > { %v9736_v4 = vpack.c.bf16 %v8584_v18, %v8582_v63  ;;  %v8527_v57 = vpack.c.bf16 %v8519_v11, %v8518_v25 }
 0xd65   : > { %9737 = vst [vmem:[%s15488_s6] sm:$0xff] %v9736_v4   ;;  %9612 = vmatmul.msk.bf16.gmra.mxu3 %vm1553_vm4, %v8527_v57  ;;  %8654 = vmatpush.bf16.msrb.mxu1 %v8527_v57 }
 0xd68   : > { %v8586_v59 = vpop.f32.mrf.mxu3 }
 0xd69   : > { %8655 = vmatpush.bf16.msrb.mxu1 %v8526_v60  ;;  %v8587_v58 = vadd.f32 %v15481_v39, %v8586_v59 }
 0xd6d   : > { %8656 = vmatpush.bf16.msrb.mxu1 %v15454_v10 }
 0xd70   : > { %v8588_v55 = vpop.f32.mrf.mxu3 }
 0xd71   : > { %v8589_v15 = vadd.f32 %v15481_v39, %v8588_v55  ;;  %8657 = vmatpush.bf16.msrb.mxu1 %v15439_v38 }
 0xd73   : > { %v9741_v32 = vpack.c.bf16 %v8589_v15, %v8587_v58 }
 0xd75   : > { %9780 = vst [vmem:[%s15488_s6 + $0x8] sm:$0xff] %v9741_v32   ;;  %8658 = vmatpush.bf16.msrb.mxu1 %v15426_v61  ;;  %v8653_v61 = vld [vmem:[%s1175_s9] sm:$0xf] }
 0xd78   : > { %v8591_v54 = vpop.f32.mrf.mxu3 }
 0xd79   : > { %8659 = vmatpush.bf16.msrb.mxu1 %v15410_v41  ;;  %v8592_v38 = vadd.f32 %v15481_v39, %v8591_v54 }
 0xd7d   : > { %8660 = vmatpush.bf16.msrb.mxu1 %v15398_v29 }
 0xd80   : > { %v8593_v10 = vpop.f32.mrf.mxu3 }
 0xd81   : > { %v8594_v62 = vadd.f32 %v15481_v39, %v8593_v10  ;;  %8661 = vmatpush.bf16.msrb.mxu1 %v15384_v23 }
 0xd83   : > { %v9746_v53 = vpack.c.bf16 %v8594_v62, %v8592_v38 }
 0xd84   : > { %8662 = vmatmul.bf16.vlgmr.msrb.gmra.mxu1 %v8653_v61 }
 0xd85   : > { %9781 = vst [vmem:[%s15488_s6 + $0x10] sm:$0xff] %v9746_v53   ;;  %8697 = vmatpush.bf16.msra.mxu1 %v9699_v27 }
 0xd89   : > { %8698 = vmatpush.bf16.msra.mxu1 %v9698_v40 }
 0xd8f   : > { %v8596_v41 = vpop.f32.mrf.mxu3 }
 0xd90   : > { %v8597_v29 = vadd.f32 %v15481_v39, %v8596_v41 }
 0xd97   : > { %v8598_v30 = vpop.f32.mrf.mxu3 }
 0xd98   : > { %v8599_v1 = vadd.f32 %v15481_v39, %v8598_v30 }
 0xd9a   : > { %v9751_v45 = vpack.c.bf16 %v8599_v1, %v8597_v29 }
 0xd9c   : > { %9782 = vst [vmem:[%s15488_s6 + $0x18] sm:$0xff] %v9751_v45  }
 0xd9f   : > { %v8601_v13 = vpop.f32.mrf.mxu3 }
 0xda0   : > { %v8602_v20 = vadd.f32 %v15481_v39, %v8601_v13 }
 0xda7   : > { %v8603_v9 = vpop.f32.mrf.mxu3 }
 0xda8   : > { %v8604_v23 = vadd.f32 %v15481_v39, %v8603_v9 }
 0xdaa   : > { %v9756_v48 = vpack.c.bf16 %v8604_v23, %v8602_v20 }
 0xdac   : > { %9783 = vst [vmem:[%s15488_s6 + $0x20] sm:$0xff] %v9756_v48  }
 0xdb3   : > { %v8606_v37 = vpop.f32.mrf.mxu3 }
 0xdb4   : > { %v8607_v0 = vadd.f32 %v15481_v39, %v8606_v37 }
 0xdbb   : > { %v8608_v44 = vpop.f32.mrf.mxu3 }
 0xdbc   : > { %v8609_v43 = vadd.f32 %v15481_v39, %v8608_v44 }
 0xdbe   : > { %v9761_v34 = vpack.c.bf16 %v8609_v43, %v8607_v0 }
 0xdc0   : > { %9784 = vst [vmem:[%s15488_s6 + $0x28] sm:$0xff] %v9761_v34  }
 0xdc3   : > { %v8611_v8 = vpop.f32.mrf.mxu3 }
 0xdc4   : > { %v8612_v14 = vadd.f32 %v15481_v39, %v8611_v8 }
 0xdcb   : > { %v8613_v3 = vpop.f32.mrf.mxu3 }
 0xdcc   : > { %v8614_v2 = vadd.f32 %v15481_v39, %v8613_v3 }
 0xdce   : > { %v9766_v60 = vpack.c.bf16 %v8614_v2, %v8612_v14 }
 0xdd0   : > { %9785 = vst [vmem:[%s15488_s6 + $0x30] sm:$0xff] %v9766_v60  }
 0xde8   : > { %v8616_v46 = vpop.f32.mrf.mxu3 }
 0xde9   : > { %v8617_v49 = vadd.f32 %v15481_v39, %v8616_v46 }
 0xdf0   : > { %v8618_v19 = vpop.f32.mrf.mxu3 }
 0xdf1   : > { %v8619_v22 = vadd.f32 %v15481_v39, %v8618_v19 }
 0xdf3   : > { %v9771_v26 = vpack.c.bf16 %v8619_v22, %v8617_v49 }
 0xdf5   : > { %9786 = vst [vmem:[%s15488_s6 + $0x38] sm:$0xff] %v9771_v26   ;;  %s10879_s6 = scalar_lea.hbm %s16301_s10, 128 }
 0xdf6   : > { %p10881_p8 = scmp.lt.s32.totalorder %s10879_s6, %s10875_s8 }
 0xdf8   : > { %p10882_p9 = por %p10881_p8, %p10880_p7 }
 0xdfa   : > { %p10883_p10 = pnand %p10882_p9, %p10878_p4 }
 0xe01   : > { %v8663_v52 = vpop.f32.mrf.mxu1 }
 0xe02   : > { %v8667_v35 = vpack.c.bf16 %v8663_v52, %v8663_v52 }
 0xe04   : > { %9621 = vmatmul.msk.bf16.vlgmr.msra.gmra.mxu1 %vm1553_vm4, %v8667_v35 }
 0xe09   : > { %v8665_v16 = vpop.f32.mrf.mxu1 }
 0xe0a   : > { %10886 = shalt.err (!%p10883_p10)
}
 0xe0b   : > { %s11000_s9 = smov 64   ;;  %s11001_s0 = smov 4  }
 0xe0c   : > { %9844 = dma.vmem_to_hbm [thread:$0]  (%p11185_p5), %s8725_s29, 1024, %s8727_s13, %s8707_s2, %s11000_s9, %s11000_s9, %s11001_s0  }
 0xe0d   : > { %s9054_s1 = sshll.u32 %s15475_s7, 2  ;;  %s9626_s28 = sshll.u32 %s11168_s3, 2 }
 0xe0e   : > { %s16302_s26 = sld [smem:[#allocation114_spill]]  ;;  %s1134_s10 = scalar_lea.vmem [#allocation23], %s9054_s1 }
 0xe0f   : > { %s16303_s8 = sld [smem:[#allocation116_spill]]  ;;  %s8741_s14 = sshll.u32 %s1134_s10, 4  ;;  %s8742_s14 = int_to_ptr.vmem [resolvable:$true] %s8741_s14 }
 0xe10   : > { %s8712_s29 = scalar_lea.sflag [#allocation24], %s15475_s7 }
 0xe14   : > { %v9985_v7 = vld [vmem:[%s16302_s26] ss:$0 sm:$0xff] }
 0xe15   : > { %s16304_s6 = smov %s16303_s8  ;;  %s8739_s20 = scalar_lea.hbm %s16303_s8, %s9626_s28 }
 0xe16   : > { %s8743_s15 = sshll.u32 %s8739_s20, 4  ;;  %s10907_s0 = scalar_lea.hbm %s16304_s6, 8  ;;  %s8744_s15 = int_to_ptr.hbm [resolvable:$true] %s8743_s15 }
 0xe17   : > { %s10901_s3 = sshra.s32 %s8744_s15, 4  ;;  %s10902_s3 = int_to_ptr.hbm [resolvable:$true] %s10901_s3 }
 0xe18   : > { %s10903_s13 = scalar_lea.hbm %s10902_s3, 4  ;;  %p10908_p0 = scmp.lt.s32.totalorder %s10902_s3, %s16304_s6 }
 0xe19   : > { %p10904_p11 = scmp.ne.s32.totalorder %s10902_s3, %s10903_s13  ;;  %p10909_p1 = scmp.lt.s32.totalorder %s10907_s0, %s10903_s13 }
 0xe1b   : > { %p10905_p12 = pnand %p10904_p11, %p11185_p5  ;;  %p10910_p2 = por %p10909_p1, %p10908_p0 }
 0xe1d   : > { %p10906_p13 = pneg %p10905_p12 }
 0xe1f   : > { %p10911_p3 = pnand %p10910_p2, %p10906_p13 }
 0xe81   : > { %v8700_v21 = vpop.f32.mrf.mxu1 }
 0xe82   : > { %v8701_v17 = vadd.f32 %v9985_v7, %v8700_v21 }
 0xe84   : > { %v8704_v33 = vpack.c.bf16 %v8701_v17, %v8701_v17 }
 0xe86   : > { %8705 = vst [vmem:[%s1134_s10] sm:$0xf] %v8704_v33 }
 0xe87   : > { %10914 = shalt.err (!%p10911_p3)
}
 0xe88   : > { %9845 = dma.vmem_to_hbm [thread:$0]  (%p11185_p5), %s8742_s14, 64, %s8744_s15, %s8712_s29  }
 0xe89   : > { %v8702_v42 = vpop.f32.mrf.mxu1 }
 0xe8a PF: > { %s16305_s7 = sld [smem:[#allocation36_spill]] }
 0xe8b   : > { %s16306_s10 = sld [smem:[#allocation34_spill]] }
 0xe90   : > { %p9916_p4 = scmp.ge.s32.totalorder %s16305_s7, 2 }
 0xe91   : > { %s8755_s11 = sand.u32 1, %s16306_s10  }
 0xe92   : > { %p9886_p7 = pnand %p9916_p4, %p11189_p6  ;;  %s8756_s26 = scalar_lea.sflag [#allocation4], %s8755_s11 }
 0xe94   : > { %p9887_p8 = pneg %p9886_p7 }
 0xe96   : > { %10960 = dma.done.wait (%p9887_p8), %s8756_s26, 1024  }
 0xe97   : > { %10962 = vsyncadd (%p9887_p8), %s8756_s26, 4294966272  ;;  %s8766_s30 = scalar_lea.sflag [#allocation24], %s8755_s11 }
 0xe98   : > { %10964 = dma.done.wait (%p9887_p8), %s8766_s30, 64  }
 0xe99   : > { %10966 = vsyncadd (%p9887_p8), %s8766_s30, 4294967232  ;;  %s16308_s30 = sld [smem:[#allocation37_spill]]  ;;  %s16311_s8 = smov %s10973_s5 }
 0xe9a   : > { %s16309_s12 = sld [smem:[#allocation35_spill]] }
 0xe9b   : > { %s16310_s9 = sld [smem:[#allocation38_spill]] }
 0xe9f   : > { %p49_p5 = scmp.ge.s32.totalorder %s16308_s30, 4  }
 0xea0   : > { %s16312_s5 = smov %s16309_s12 }
 0xea1   :  { %51 = sbr.rel (!%p49_p5) target bundleno = 34 (0x22), region = 247 }
 0xea6   :  { %8772 = vsyncpa [#allocation3], 1 }
 0xea7   :  { %8774 = vsyncpa [#allocation3 + $0x1], 1 }
 0xea8   :  { %8775 = vsyncpa [#allocation6], 1 }
 0xea9   :  { %8776 = vsyncpa [#allocation9], 1 }
 0xeaa   :  { %8777 = vsyncpa [#allocation12], 1 }
 0xeab   :  { %8778 = vsyncpa [#allocation15], 1 }
 0xeac   :  { %8779 = vsyncpa [#allocation18], 1 }
 0xead   :  { %8780 = vsyncpa [#allocation21], 1 }
 0xeae   :  { %8781 = vsyncpa [#allocation4], 1 }
 0xeaf   :  { %8783 = vsyncpa [#allocation4 + $0x1], 1 }
 0xeb0   :  { %8784 = vsyncpa [#allocation24], 1 }
 0xeb1   :  { %8786 = vsyncpa [#allocation24 + $0x1], 1 }

</bundles_post_ra>
